<compile_context>
chip_gen: v5e
topology: v5e:2x2
jax: 0.10.0
libtpu: 0.0.40
codegen_flags: <defaults>
</compile_context>

<pallas_src>
import functools
import numpy as np

import jax
import jax.numpy as jnp
from jax import lax
from jax.experimental import pallas as pl
from jax.experimental.pallas import tpu as pltpu


# ----------------------------------------------------------------------------
# Fused forward + backtrace kernel.
# Grid: (batch_blocks [parallel], time_chunks [arbitrary/sequential]).
# State (best_scores, scores_upto_t) lives in resident (L, BB) output blocks.
# Backpointers live in a (T_pad, L, BB) VMEM scratch (never written to HBM).
# ----------------------------------------------------------------------------
def _viterbi_kernel(start_label, end_label,
                    sc_ref, len_ref,                 # (CT, L, L, BB) f32, (1, BB) i32
                    dec_ref, best_ref, fwd_ref,      # (T_pad, BB) i32, (L, BB) f32, (L, BB) f32
                    bp_sc, ptr_sc):                  # (T_pad, L, BB) i32, (1, BB) i32
    c = pl.program_id(1)
    n_chunks = pl.num_programs(1)
    CT = sc_ref.shape[0]
    L, BB = best_ref.shape
    T_pad = dec_ref.shape[0]

    lab2 = lax.broadcasted_iota(jnp.int32, (L, BB), 0)           # label index (sublanes)
    prev_iota = lax.broadcasted_iota(jnp.int32, (L, L, BB), 0)   # previous-label index
    lens = len_ref[...]                                          # (1, BB) per-batch lengths
    neg = jnp.float32(-1e30)

    # Seeding with (0 at start_label, -1e30 elsewhere) makes the t == 0 update a plain
    # instance of the general recursion (reproduces the reference init exactly because
    # exp(-1e30 - m) underflows to 0 in f32 for realistic emission magnitudes).
    @pl.when(c == 0)
    def _init():
        init = jnp.where(lab2 == start_label, jnp.float32(0.0), neg)
        best_ref[...] = init
        fwd_ref[...] = init

    # ---- forward recursion over the CT time steps of this chunk ----
    def step(i, carry):
        t = c * CT + i
        active = lens > t                             # (1, BB) per-batch mask (also kills
                                                      # the ragged / padded tail steps)
        s = sc_ref[i]                                 # (L_prev, L_cur, BB)
        best = best_ref[...]
        fwd = fwd_ref[...]

        # Viterbi: max / first-argmax over the previous-label (leading, VALU) axis.
        cand = s + best[:, None, :]                   # (L_prev, L_cur, BB)
        new_best = jnp.max(cand, axis=0)              # (L, BB)
        new_bp = jnp.min(jnp.where(cand == new_best[None], prev_iota, jnp.int32(L)),
                         axis=0)                      # first maximal prev index

        # Forward algorithm: numerically stable log-sum-exp over previous labels.
        # TODO(synk): on v7x the single EUP slot may bind here; a bf16 exp path
        #             (v6e/v7x only) would halve EUP pressure if tolerance allows.
        c2 = s + fwd[:, None, :]
        m = jnp.max(c2, axis=0)
        new_fwd = m + jnp.log(jnp.sum(jnp.exp(c2 - m[None]), axis=0))

        bp_sc[t] = jnp.where(active, new_bp, jnp.int32(end_label))
        best_ref[...] = jnp.where(active, new_best, best)
        fwd_ref[...] = jnp.where(active, new_fwd, fwd)
        return carry

    lax.fori_loop(0, CT, step, None, unroll=(True if CT <= 8 else 8))

    # ---- fused backtrace at the last chunk: backpointers stay on-chip ----
    @pl.when(c == n_chunks - 1)
    def _backtrace():
        ptr_sc[...] = jnp.full((1, BB), end_label, jnp.int32)

        def bt(i, carry):
            t = (T_pad - 1) - i
            ptr = ptr_sc[...]                                     # (1, BB)
            bp_t = bp_sc[t]                                       # (L, BB)
            d = jnp.sum(jnp.where(lab2 == ptr, bp_t, 0),
                        axis=0, keepdims=True).astype(jnp.int32)  # one-hot gather
            dec_ref[pl.ds(t, 1), :] = d                           # write row of resident out
            ptr_sc[...] = d
            return carry

        lax.fori_loop(0, T_pad, bt, None, unroll=(True if T_pad <= 32 else 8))


def _round_up(x, m):
    return (x + m - 1) // m * m


# ----------------------------------------------------------------------------
# Wrapper reproducing ViterbiDecoderForward.forward semantics
# ----------------------------------------------------------------------------
def viterbi_decode(emission, transition, lengths, n_labels, start_label, end_label,
                   time_chunk=16):
    B, T, L, _ = emission.shape
    assert L == n_labels
    max_len = int(max(lengths))                 # lengths are host-side python ints
    CT = max(1, min(int(time_chunk), max_len))
    n_chunks = pl.cdiv(max_len, CT)
    T_pad = n_chunks * CT
    # TODO(synk): bucket max_len / T_pad (round up to a few CT multiples) for
    #             serving-style workloads so the pallas_call shape doesn't recompile.

    # Fuse "scores = emission + transition" into the single batch-last relayout copy:
    # (B, T, L, L) -> (T, L_prev, L_cur, B).  No extra time pad is materialized.
    # TODO(synk): have the emission producer emit scores directly in (T, L, L, B)
    #             layout so even this one HBM copy disappears.
    scores = jnp.transpose(
        emission[:, :max_len].astype(jnp.float32)
        + transition.astype(jnp.float32)[None, None],
        (1, 2, 3, 0))

    lens_arr = jnp.asarray(list(lengths), jnp.int32).reshape(1, B)

    # Split batch across the two v7x TensorCores only when each block stays lane-dense.
    n_bblocks = 2 if (B % 256 == 0) else 1
    BB = B // n_bblocks

    # Explicit VMEM budget (default scoped limits are 16/32/32 MiB on v5e/v6e/v7x).
    lane = _round_up(BB, 128)
    l_sub = _round_up(L, 8)
    em_blk = CT * L * l_sub * lane * 4
    state_blk = l_sub * lane * 4
    dec_blk = _round_up(T_pad, 8) * lane * 4
    lens_blk = 8 * lane * 4
    bp_bytes = T_pad * l_sub * lane * 4
    footprint = 2 * (em_blk + lens_blk + dec_blk + 2 * state_blk) + bp_bytes + lens_blk
    vmem_limit = int(min(128 * 1024 * 1024, max(32 * 1024 * 1024, footprint + (4 << 20))))
    # TODO(synk): on v7x (64 MiB physical VMEM) pack bp_sc to int8 or stream it to HBM
    #             in time chunks once T_pad * L * B approaches the budget.

    kernel = functools.partial(_viterbi_kernel, int(start_label), int(end_label))
    grid_spec = pltpu.PrefetchScalarGridSpec(
        num_scalar_prefetch=0,
        grid=(n_bblocks, n_chunks),
        in_specs=[
            pl.BlockSpec((CT, L, L, BB), lambda p, c: (c, 0, 0, p)),   # scores chunk
            pl.BlockSpec((1, BB), lambda p, c: (0, p)),                # per-batch lengths
        ],
        out_specs=[
            pl.BlockSpec((T_pad, BB), lambda p, c: (0, p)),            # decoded (resident)
            pl.BlockSpec((L, BB), lambda p, c: (0, p)),                # best_scores (state)
            pl.BlockSpec((L, BB), lambda p, c: (0, p)),                # scores_upto_t (state)
        ],
        scratch_shapes=[
            pltpu.VMEM((T_pad, L, BB), jnp.int32),                     # backpointers (VMEM only)
            pltpu.VMEM((1, BB), jnp.int32),                            # backtrace pointer
        ],
    )
    dec, best, fwd = pl.pallas_call(
        kernel,
        grid_spec=grid_spec,
        out_shape=(
            jax.ShapeDtypeStruct((T_pad, B), jnp.int32),
            jax.ShapeDtypeStruct((L, B), jnp.float32),
            jax.ShapeDtypeStruct((L, B), jnp.float32),
        ),
        compiler_params=pltpu.CompilerParams(
            dimension_semantics=("parallel", "arbitrary"),
            vmem_limit_bytes=vmem_limit),
    )(scores, lens_arr)

    # PyTorch post-processing: drop leading start_label column, append end_label.
    decoded = jnp.concatenate(
        [dec[1:max_len], jnp.full((1, B), end_label, jnp.int32)], axis=0).T
    score = -(fwd[end_label] - best[end_label])
    return decoded, score


# ----------------------------------------------------------------------------
# Pure numpy reference (mirrors the PyTorch code) for verification
# ----------------------------------------------------------------------------
def numpy_ref(emission, transition, lengths, n_labels, start_label, end_label):
    scores = emission + transition[None, None]
    B = scores.shape[0]
    max_len = max(lengths)
    scores_upto_t = np.zeros((B, n_labels), np.float32)
    best_scores = np.zeros((B, n_labels), np.float32)
    backpointers = np.full((B, max_len, n_labels), end_label, np.int64)
    for t in range(max_len):
        bt = sum(l > t for l in lengths)
        if t == 0:
            best_scores[:bt] = scores[:bt, t, start_label]
            backpointers[:bt, t, :] = start_label
            scores_upto_t[:bt] = scores[:bt, t, start_label, :]
        else:
            cand = scores[:bt, t] + best_scores[:bt, :, None]
            best_scores[:bt] = cand.max(axis=1)
            backpointers[:bt, t, :] = cand.argmax(axis=1)
            c2 = scores[:bt, t] + scores_upto_t[:bt, :, None]
            m = c2.max(axis=1)
            scores_upto_t[:bt] = m + np.log(np.exp(c2 - m[:, None, :]).sum(axis=1))
    decoded = np.zeros((B, max_len), np.int64)
    pointer = np.full((B, 1), end_label, np.int64)
    for t in reversed(range(max_len)):
        decoded[:, t] = np.take_along_axis(backpointers[:, t, :], pointer, axis=1)[:, 0]
        pointer = decoded[:, t:t + 1]
    assert np.all(decoded[:, 0] == start_label)
    decoded = np.concatenate([decoded[:, 1:], np.full((B, 1), end_label, np.int64)], axis=1)
    final = -(scores_upto_t[:, end_label] - best_scores[:, end_label])
    return decoded, final


if __name__ == "__main__":
    B, T, L = 2, 8, 10
    start_label, end_label = L - 2, L - 1
    lengths = [8, 5]                          # works sorted or unsorted (per-batch mask)

    key = jax.random.PRNGKey(0)
    k1, k2 = jax.random.split(key)
    emission = jax.random.normal(k1, (B, T, L, L), dtype=jnp.float32)
    transition = jax.random.normal(k2, (L, L), dtype=jnp.float32)

    d_ref, s_ref = numpy_ref(np.asarray(emission), np.asarray(transition),
                             lengths, L, start_label, end_label)

    # exercise single-chunk, multi-chunk, and ragged-last-chunk (partial block) paths
    for ct in (16, 5, 3):
        decoded, score = viterbi_decode(emission, transition, lengths, L,
                                        start_label, end_label, time_chunk=ct)
        decoded = jax.block_until_ready(decoded)
        score = jax.block_until_ready(score)
        np.testing.assert_array_equal(np.asarray(decoded), d_ref.astype(np.int32))
        np.testing.assert_allclose(np.asarray(score), s_ref, rtol=1e-4, atol=1e-4)

    print("KERNEL_OK")
</pallas_src>

<mosaic_0001>
module attributes {stable_mosaic.version = 11 : i64} {
  func.func @_viterbi_kernel(%arg0: i32, %arg1: i32, %arg2: memref<8x10x10x2xf32, #tpu.memory_space<vmem>>, %arg3: memref<1x2xi32, #tpu.memory_space<vmem>>, %arg4: memref<8x2xi32, #tpu.memory_space<vmem>>, %arg5: memref<10x2xf32, #tpu.memory_space<vmem>>, %arg6: memref<10x2xf32, #tpu.memory_space<vmem>>, %arg7: memref<8x10x2xi32, #tpu.memory_space<vmem>>, %arg8: memref<1x2xi32, #tpu.memory_space<vmem>>) attributes {dimension_semantics = [#tpu.dimension_semantics<parallel>, #tpu.dimension_semantics<arbitrary>], iteration_bounds = array<i64: 1, 1>, scalar_prefetch = 0 : i64, scratch_operands = 2 : i64, tpu.core_type = #tpu.core_type<tc>, window_params = [{transform_indices = @transform_0, window_bounds = array<i64: 8, 10, 10, 2>}, {transform_indices = @transform_1, window_bounds = array<i64: 1, 2>}, {transform_indices = @transform_2, window_bounds = array<i64: 8, 2>}, {transform_indices = @transform_3, window_bounds = array<i64: 10, 2>}, {transform_indices = @transform_4, window_bounds = array<i64: 10, 2>}]} {
    %0 = tpu.iota {dimensions = array<i32: 0>} : vector<10x2xi32>
    %1 = tpu.iota {dimensions = array<i32: 0>} : vector<10x10x2xi32>
    %c0 = arith.constant 0 : index
    %c0_0 = arith.constant 0 : index
    %2 = vector.load %arg3[%c0, %c0_0] : memref<1x2xi32, #tpu.memory_space<vmem>>, vector<1x2xi32>
    %c0_i32 = arith.constant 0 : i32
    %3 = arith.cmpi eq, %arg1, %c0_i32 : i32
    %4 = arith.extui %3 : i1 to i32
    %cst = arith.constant -1.000000e+30 : f32
    %c0_i32_1 = arith.constant 0 : i32
    %5 = arith.cmpi ne, %4, %c0_i32_1 : i32
    scf.if %5 {
      %c8_i32_163 = arith.constant 8 : i32
      %377 = vector.broadcast %c8_i32_163 : i32 to vector<10x2xi32>
      %378 = arith.cmpi eq, %0, %377 : vector<10x2xi32>
      %cst_164 = arith.constant 0.000000e+00 : f32
      %379 = vector.broadcast %cst_164 : f32 to vector<10x2xf32>
      %380 = vector.broadcast %cst : f32 to vector<10x2xf32>
      %381 = arith.select %378, %379, %380 : vector<10x2xi1>, vector<10x2xf32>
      %c0_165 = arith.constant 0 : index
      %c0_166 = arith.constant 0 : index
      %382 = vector.load %arg5[%c0_165, %c0_166] : memref<10x2xf32, #tpu.memory_space<vmem>>, vector<10x2xf32>
      tpu.vector_store %arg5[%c0_165, %c0_166], %381 {strides = array<i32>} : memref<10x2xf32, #tpu.memory_space<vmem>>, vector<10x2xf32>,
      %c0_167 = arith.constant 0 : index
      %c0_168 = arith.constant 0 : index
      %383 = vector.load %arg6[%c0_167, %c0_168] : memref<10x2xf32, #tpu.memory_space<vmem>>, vector<10x2xf32>
      tpu.vector_store %arg6[%c0_167, %c0_168], %381 {strides = array<i32>} : memref<10x2xf32, #tpu.memory_space<vmem>>, vector<10x2xf32>,
    } else {
    }
    %c0_i32_2 = arith.constant 0 : i32
    %c8_i32 = arith.constant 8 : i32
    %6 = arith.muli %arg1, %c8_i32 : i32
    %7 = arith.addi %6, %c0_i32_2 : i32
    %8 = vector.broadcast %7 : i32 to vector<1x2xi32>
    %9 = arith.cmpi sgt, %2, %8 : vector<1x2xi32>
    %10 = arith.index_cast %c0_i32_2 : i32 to index
    %c0_3 = arith.constant 0 : index
    %c0_4 = arith.constant 0 : index
    %c0_5 = arith.constant 0 : index
    %11 = vector.load %arg2[%10, %c0_3, %c0_4, %c0_5] : memref<8x10x10x2xf32, #tpu.memory_space<vmem>>, vector<1x10x10x2xf32>
    %12 = vector.shape_cast %11 : vector<1x10x10x2xf32> to vector<10x10x2xf32>
    %c0_6 = arith.constant 0 : index
    %c0_7 = arith.constant 0 : index
    %13 = vector.load %arg5[%c0_6, %c0_7] : memref<10x2xf32, #tpu.memory_space<vmem>>, vector<10x2xf32>
    %c0_8 = arith.constant 0 : index
    %c0_9 = arith.constant 0 : index
    %14 = vector.load %arg6[%c0_8, %c0_9] : memref<10x2xf32, #tpu.memory_space<vmem>>, vector<10x2xf32>
    %15 = vector.shape_cast %13 : vector<10x2xf32> to vector<10x1x2xf32>
    %16 = vector.broadcast %15 : vector<10x1x2xf32> to vector<10x10x2xf32>
    %17 = arith.addf %12, %16 : vector<10x10x2xf32>
    %cst_10 = arith.constant dense<0xFF800000> : vector<10x2xf32>
    %18 = vector.multi_reduction <maximumf>, %17, %cst_10 [0] : vector<10x10x2xf32> to vector<10x2xf32>
    %19 = vector.shape_cast %18 : vector<10x2xf32> to vector<1x10x2xf32>
    %20 = vector.broadcast %19 : vector<1x10x2xf32> to vector<10x10x2xf32>
    %21 = arith.cmpf oeq, %17, %20 : vector<10x10x2xf32>
    %c10_i32 = arith.constant 10 : i32
    %22 = vector.broadcast %c10_i32 : i32 to vector<10x10x2xi32>
    %23 = arith.select %21, %1, %22 : vector<10x10x2xi1>, vector<10x10x2xi32>
    %cst_11 = arith.constant dense<2147483647> : vector<10x2xi32>
    %24 = vector.multi_reduction <minsi>, %23, %cst_11 [0] : vector<10x10x2xi32> to vector<10x2xi32>
    %25 = vector.shape_cast %14 : vector<10x2xf32> to vector<10x1x2xf32>
    %26 = vector.broadcast %25 : vector<10x1x2xf32> to vector<10x10x2xf32>
    %27 = arith.addf %12, %26 : vector<10x10x2xf32>
    %cst_12 = arith.constant dense<0xFF800000> : vector<10x2xf32>
    %28 = vector.multi_reduction <maximumf>, %27, %cst_12 [0] : vector<10x10x2xf32> to vector<10x2xf32>
    %29 = vector.shape_cast %28 : vector<10x2xf32> to vector<1x10x2xf32>
    %30 = vector.broadcast %29 : vector<1x10x2xf32> to vector<10x10x2xf32>
    %31 = arith.subf %27, %30 : vector<10x10x2xf32>
    %32 = math.exp %31 : vector<10x10x2xf32>
    %cst_13 = arith.constant dense<0.000000e+00> : vector<10x2xf32>
    %33 = vector.multi_reduction <add>, %32, %cst_13 [0] : vector<10x10x2xf32> to vector<10x2xf32>
    %34 = math.log %33 : vector<10x2xf32>
    %35 = arith.addf %28, %34 : vector<10x2xf32>
    %c9_i32 = arith.constant 9 : i32
    %36 = vector.shape_cast %9 : vector<1x2xi1> to vector<1x2xi1>
    %37 = vector.broadcast %36 : vector<1x2xi1> to vector<10x2xi1>
    %38 = vector.broadcast %c9_i32 : i32 to vector<10x2xi32>
    %39 = arith.select %37, %24, %38 : vector<10x2xi1>, vector<10x2xi32>
    %40 = arith.index_cast %7 : i32 to index
    %c0_14 = arith.constant 0 : index
    %c0_15 = arith.constant 0 : index
    %41 = vector.load %arg7[%40, %c0_14, %c0_15] : memref<8x10x2xi32, #tpu.memory_space<vmem>>, vector<1x10x2xi32>
    %42 = vector.shape_cast %41 : vector<1x10x2xi32> to vector<10x2xi32>
    %43 = vector.shape_cast %39 : vector<10x2xi32> to vector<1x10x2xi32>
    tpu.vector_store %arg7[%40, %c0_14, %c0_15], %43 {strides = array<i32>} : memref<8x10x2xi32, #tpu.memory_space<vmem>>, vector<1x10x2xi32>,
    %44 = vector.shape_cast %9 : vector<1x2xi1> to vector<1x2xi1>
    %45 = vector.broadcast %44 : vector<1x2xi1> to vector<10x2xi1>
    %46 = arith.select %45, %18, %13 : vector<10x2xi1>, vector<10x2xf32>
    %c0_16 = arith.constant 0 : index
    %c0_17 = arith.constant 0 : index
    %47 = vector.load %arg5[%c0_16, %c0_17] : memref<10x2xf32, #tpu.memory_space<vmem>>, vector<10x2xf32>
    tpu.vector_store %arg5[%c0_16, %c0_17], %46 {strides = array<i32>} : memref<10x2xf32, #tpu.memory_space<vmem>>, vector<10x2xf32>,
    %48 = vector.shape_cast %9 : vector<1x2xi1> to vector<1x2xi1>
    %49 = vector.broadcast %48 : vector<1x2xi1> to vector<10x2xi1>
    %50 = arith.select %49, %35, %14 : vector<10x2xi1>, vector<10x2xf32>
    %c0_18 = arith.constant 0 : index
    %c0_19 = arith.constant 0 : index
    %51 = vector.load %arg6[%c0_18, %c0_19] : memref<10x2xf32, #tpu.memory_space<vmem>>, vector<10x2xf32>
    tpu.vector_store %arg6[%c0_18, %c0_19], %50 {strides = array<i32>} : memref<10x2xf32, #tpu.memory_space<vmem>>, vector<10x2xf32>,
    %c1_i32 = arith.constant 1 : i32
    %c8_i32_20 = arith.constant 8 : i32
    %52 = arith.muli %arg1, %c8_i32_20 : i32
    %53 = arith.addi %52, %c1_i32 : i32
    %54 = vector.broadcast %53 : i32 to vector<1x2xi32>
    %55 = arith.cmpi sgt, %2, %54 : vector<1x2xi32>
    %56 = arith.index_cast %c1_i32 : i32 to index
    %c0_21 = arith.constant 0 : index
    %c0_22 = arith.constant 0 : index
    %c0_23 = arith.constant 0 : index
    %57 = vector.load %arg2[%56, %c0_21, %c0_22, %c0_23] : memref<8x10x10x2xf32, #tpu.memory_space<vmem>>, vector<1x10x10x2xf32>
    %58 = vector.shape_cast %57 : vector<1x10x10x2xf32> to vector<10x10x2xf32>
    %c0_24 = arith.constant 0 : index
    %c0_25 = arith.constant 0 : index
    %59 = vector.load %arg5[%c0_24, %c0_25] : memref<10x2xf32, #tpu.memory_space<vmem>>, vector<10x2xf32>
    %c0_26 = arith.constant 0 : index
    %c0_27 = arith.constant 0 : index
    %60 = vector.load %arg6[%c0_26, %c0_27] : memref<10x2xf32, #tpu.memory_space<vmem>>, vector<10x2xf32>
    %61 = vector.shape_cast %59 : vector<10x2xf32> to vector<10x1x2xf32>
    %62 = vector.broadcast %61 : vector<10x1x2xf32> to vector<10x10x2xf32>
    %63 = arith.addf %58, %62 : vector<10x10x2xf32>
    %cst_28 = arith.constant dense<0xFF800000> : vector<10x2xf32>
    %64 = vector.multi_reduction <maximumf>, %63, %cst_28 [0] : vector<10x10x2xf32> to vector<10x2xf32>
    %65 = vector.shape_cast %64 : vector<10x2xf32> to vector<1x10x2xf32>
    %66 = vector.broadcast %65 : vector<1x10x2xf32> to vector<10x10x2xf32>
    %67 = arith.cmpf oeq, %63, %66 : vector<10x10x2xf32>
    %c10_i32_29 = arith.constant 10 : i32
    %68 = vector.broadcast %c10_i32_29 : i32 to vector<10x10x2xi32>
    %69 = arith.select %67, %1, %68 : vector<10x10x2xi1>, vector<10x10x2xi32>
    %cst_30 = arith.constant dense<2147483647> : vector<10x2xi32>
    %70 = vector.multi_reduction <minsi>, %69, %cst_30 [0] : vector<10x10x2xi32> to vector<10x2xi32>
    %71 = vector.shape_cast %60 : vector<10x2xf32> to vector<10x1x2xf32>
    %72 = vector.broadcast %71 : vector<10x1x2xf32> to vector<10x10x2xf32>
    %73 = arith.addf %58, %72 : vector<10x10x2xf32>
    %cst_31 = arith.constant dense<0xFF800000> : vector<10x2xf32>
    %74 = vector.multi_reduction <maximumf>, %73, %cst_31 [0] : vector<10x10x2xf32> to vector<10x2xf32>
    %75 = vector.shape_cast %74 : vector<10x2xf32> to vector<1x10x2xf32>
    %76 = vector.broadcast %75 : vector<1x10x2xf32> to vector<10x10x2xf32>
    %77 = arith.subf %73, %76 : vector<10x10x2xf32>
    %78 = math.exp %77 : vector<10x10x2xf32>
    %cst_32 = arith.constant dense<0.000000e+00> : vector<10x2xf32>
    %79 = vector.multi_reduction <add>, %78, %cst_32 [0] : vector<10x10x2xf32> to vector<10x2xf32>
    %80 = math.log %79 : vector<10x2xf32>
    %81 = arith.addf %74, %80 : vector<10x2xf32>
    %c9_i32_33 = arith.constant 9 : i32
    %82 = vector.shape_cast %55 : vector<1x2xi1> to vector<1x2xi1>
    %83 = vector.broadcast %82 : vector<1x2xi1> to vector<10x2xi1>
    %84 = vector.broadcast %c9_i32_33 : i32 to vector<10x2xi32>
    %85 = arith.select %83, %70, %84 : vector<10x2xi1>, vector<10x2xi32>
    %86 = arith.index_cast %53 : i32 to index
    %c0_34 = arith.constant 0 : index
    %c0_35 = arith.constant 0 : index
    %87 = vector.load %arg7[%86, %c0_34, %c0_35] : memref<8x10x2xi32, #tpu.memory_space<vmem>>, vector<1x10x2xi32>
    %88 = vector.shape_cast %87 : vector<1x10x2xi32> to vector<10x2xi32>
    %89 = vector.shape_cast %85 : vector<10x2xi32> to vector<1x10x2xi32>
    tpu.vector_store %arg7[%86, %c0_34, %c0_35], %89 {strides = array<i32>} : memref<8x10x2xi32, #tpu.memory_space<vmem>>, vector<1x10x2xi32>,
    %90 = vector.shape_cast %55 : vector<1x2xi1> to vector<1x2xi1>
    %91 = vector.broadcast %90 : vector<1x2xi1> to vector<10x2xi1>
    %92 = arith.select %91, %64, %59 : vector<10x2xi1>, vector<10x2xf32>
    %c0_36 = arith.constant 0 : index
    %c0_37 = arith.constant 0 : index
    %93 = vector.load %arg5[%c0_36, %c0_37] : memref<10x2xf32, #tpu.memory_space<vmem>>, vector<10x2xf32>
    tpu.vector_store %arg5[%c0_36, %c0_37], %92 {strides = array<i32>} : memref<10x2xf32, #tpu.memory_space<vmem>>, vector<10x2xf32>,
    %94 = vector.shape_cast %55 : vector<1x2xi1> to vector<1x2xi1>
    %95 = vector.broadcast %94 : vector<1x2xi1> to vector<10x2xi1>
    %96 = arith.select %95, %81, %60 : vector<10x2xi1>, vector<10x2xf32>
    %c0_38 = arith.constant 0 : index
    %c0_39 = arith.constant 0 : index
    %97 = vector.load %arg6[%c0_38, %c0_39] : memref<10x2xf32, #tpu.memory_space<vmem>>, vector<10x2xf32>
    tpu.vector_store %arg6[%c0_38, %c0_39], %96 {strides = array<i32>} : memref<10x2xf32, #tpu.memory_space<vmem>>, vector<10x2xf32>,
    %c2_i32 = arith.constant 2 : i32
    %c8_i32_40 = arith.constant 8 : i32
    %98 = arith.muli %arg1, %c8_i32_40 : i32
    %99 = arith.addi %98, %c2_i32 : i32
    %100 = vector.broadcast %99 : i32 to vector<1x2xi32>
    %101 = arith.cmpi sgt, %2, %100 : vector<1x2xi32>
    %102 = arith.index_cast %c2_i32 : i32 to index
    %c0_41 = arith.constant 0 : index
    %c0_42 = arith.constant 0 : index
    %c0_43 = arith.constant 0 : index
    %103 = vector.load %arg2[%102, %c0_41, %c0_42, %c0_43] : memref<8x10x10x2xf32, #tpu.memory_space<vmem>>, vector<1x10x10x2xf32>
    %104 = vector.shape_cast %103 : vector<1x10x10x2xf32> to vector<10x10x2xf32>
    %c0_44 = arith.constant 0 : index
    %c0_45 = arith.constant 0 : index
    %105 = vector.load %arg5[%c0_44, %c0_45] : memref<10x2xf32, #tpu.memory_space<vmem>>, vector<10x2xf32>
    %c0_46 = arith.constant 0 : index
    %c0_47 = arith.constant 0 : index
    %106 = vector.load %arg6[%c0_46, %c0_47] : memref<10x2xf32, #tpu.memory_space<vmem>>, vector<10x2xf32>
    %107 = vector.shape_cast %105 : vector<10x2xf32> to vector<10x1x2xf32>
    %108 = vector.broadcast %107 : vector<10x1x2xf32> to vector<10x10x2xf32>
    %109 = arith.addf %104, %108 : vector<10x10x2xf32>
    %cst_48 = arith.constant dense<0xFF800000> : vector<10x2xf32>
    %110 = vector.multi_reduction <maximumf>, %109, %cst_48 [0] : vector<10x10x2xf32> to vector<10x2xf32>
    %111 = vector.shape_cast %110 : vector<10x2xf32> to vector<1x10x2xf32>
    %112 = vector.broadcast %111 : vector<1x10x2xf32> to vector<10x10x2xf32>
    %113 = arith.cmpf oeq, %109, %112 : vector<10x10x2xf32>
    %c10_i32_49 = arith.constant 10 : i32
    %114 = vector.broadcast %c10_i32_49 : i32 to vector<10x10x2xi32>
    %115 = arith.select %113, %1, %114 : vector<10x10x2xi1>, vector<10x10x2xi32>
    %cst_50 = arith.constant dense<2147483647> : vector<10x2xi32>
    %116 = vector.multi_reduction <minsi>, %115, %cst_50 [0] : vector<10x10x2xi32> to vector<10x2xi32>
    %117 = vector.shape_cast %106 : vector<10x2xf32> to vector<10x1x2xf32>
    %118 = vector.broadcast %117 : vector<10x1x2xf32> to vector<10x10x2xf32>
    %119 = arith.addf %104, %118 : vector<10x10x2xf32>
    %cst_51 = arith.constant dense<0xFF800000> : vector<10x2xf32>
    %120 = vector.multi_reduction <maximumf>, %119, %cst_51 [0] : vector<10x10x2xf32> to vector<10x2xf32>
    %121 = vector.shape_cast %120 : vector<10x2xf32> to vector<1x10x2xf32>
    %122 = vector.broadcast %121 : vector<1x10x2xf32> to vector<10x10x2xf32>
    %123 = arith.subf %119, %122 : vector<10x10x2xf32>
    %124 = math.exp %123 : vector<10x10x2xf32>
    %cst_52 = arith.constant dense<0.000000e+00> : vector<10x2xf32>
    %125 = vector.multi_reduction <add>, %124, %cst_52 [0] : vector<10x10x2xf32> to vector<10x2xf32>
    %126 = math.log %125 : vector<10x2xf32>
    %127 = arith.addf %120, %126 : vector<10x2xf32>
    %c9_i32_53 = arith.constant 9 : i32
    %128 = vector.shape_cast %101 : vector<1x2xi1> to vector<1x2xi1>
    %129 = vector.broadcast %128 : vector<1x2xi1> to vector<10x2xi1>
    %130 = vector.broadcast %c9_i32_53 : i32 to vector<10x2xi32>
    %131 = arith.select %129, %116, %130 : vector<10x2xi1>, vector<10x2xi32>
    %132 = arith.index_cast %99 : i32 to index
    %c0_54 = arith.constant 0 : index
    %c0_55 = arith.constant 0 : index
    %133 = vector.load %arg7[%132, %c0_54, %c0_55] : memref<8x10x2xi32, #tpu.memory_space<vmem>>, vector<1x10x2xi32>
    %134 = vector.shape_cast %133 : vector<1x10x2xi32> to vector<10x2xi32>
    %135 = vector.shape_cast %131 : vector<10x2xi32> to vector<1x10x2xi32>
    tpu.vector_store %arg7[%132, %c0_54, %c0_55], %135 {strides = array<i32>} : memref<8x10x2xi32, #tpu.memory_space<vmem>>, vector<1x10x2xi32>,
    %136 = vector.shape_cast %101 : vector<1x2xi1> to vector<1x2xi1>
    %137 = vector.broadcast %136 : vector<1x2xi1> to vector<10x2xi1>
    %138 = arith.select %137, %110, %105 : vector<10x2xi1>, vector<10x2xf32>
    %c0_56 = arith.constant 0 : index
    %c0_57 = arith.constant 0 : index
    %139 = vector.load %arg5[%c0_56, %c0_57] : memref<10x2xf32, #tpu.memory_space<vmem>>, vector<10x2xf32>
    tpu.vector_store %arg5[%c0_56, %c0_57], %138 {strides = array<i32>} : memref<10x2xf32, #tpu.memory_space<vmem>>, vector<10x2xf32>,
    %140 = vector.shape_cast %101 : vector<1x2xi1> to vector<1x2xi1>
    %141 = vector.broadcast %140 : vector<1x2xi1> to vector<10x2xi1>
    %142 = arith.select %141, %127, %106 : vector<10x2xi1>, vector<10x2xf32>
    %c0_58 = arith.constant 0 : index
    %c0_59 = arith.constant 0 : index
    %143 = vector.load %arg6[%c0_58, %c0_59] : memref<10x2xf32, #tpu.memory_space<vmem>>, vector<10x2xf32>
    tpu.vector_store %arg6[%c0_58, %c0_59], %142 {strides = array<i32>} : memref<10x2xf32, #tpu.memory_space<vmem>>, vector<10x2xf32>,
    %c3_i32 = arith.constant 3 : i32
    %c8_i32_60 = arith.constant 8 : i32
    %144 = arith.muli %arg1, %c8_i32_60 : i32
    %145 = arith.addi %144, %c3_i32 : i32
    %146 = vector.broadcast %145 : i32 to vector<1x2xi32>
    %147 = arith.cmpi sgt, %2, %146 : vector<1x2xi32>
    %148 = arith.index_cast %c3_i32 : i32 to index
    %c0_61 = arith.constant 0 : index
    %c0_62 = arith.constant 0 : index
    %c0_63 = arith.constant 0 : index
    %149 = vector.load %arg2[%148, %c0_61, %c0_62, %c0_63] : memref<8x10x10x2xf32, #tpu.memory_space<vmem>>, vector<1x10x10x2xf32>
    %150 = vector.shape_cast %149 : vector<1x10x10x2xf32> to vector<10x10x2xf32>
    %c0_64 = arith.constant 0 : index
    %c0_65 = arith.constant 0 : index
    %151 = vector.load %arg5[%c0_64, %c0_65] : memref<10x2xf32, #tpu.memory_space<vmem>>, vector<10x2xf32>
    %c0_66 = arith.constant 0 : index
    %c0_67 = arith.constant 0 : index
    %152 = vector.load %arg6[%c0_66, %c0_67] : memref<10x2xf32, #tpu.memory_space<vmem>>, vector<10x2xf32>
    %153 = vector.shape_cast %151 : vector<10x2xf32> to vector<10x1x2xf32>
    %154 = vector.broadcast %153 : vector<10x1x2xf32> to vector<10x10x2xf32>
    %155 = arith.addf %150, %154 : vector<10x10x2xf32>
    %cst_68 = arith.constant dense<0xFF800000> : vector<10x2xf32>
    %156 = vector.multi_reduction <maximumf>, %155, %cst_68 [0] : vector<10x10x2xf32> to vector<10x2xf32>
    %157 = vector.shape_cast %156 : vector<10x2xf32> to vector<1x10x2xf32>
    %158 = vector.broadcast %157 : vector<1x10x2xf32> to vector<10x10x2xf32>
    %159 = arith.cmpf oeq, %155, %158 : vector<10x10x2xf32>
    %c10_i32_69 = arith.constant 10 : i32
    %160 = vector.broadcast %c10_i32_69 : i32 to vector<10x10x2xi32>
    %161 = arith.select %159, %1, %160 : vector<10x10x2xi1>, vector<10x10x2xi32>
    %cst_70 = arith.constant dense<2147483647> : vector<10x2xi32>
    %162 = vector.multi_reduction <minsi>, %161, %cst_70 [0] : vector<10x10x2xi32> to vector<10x2xi32>
    %163 = vector.shape_cast %152 : vector<10x2xf32> to vector<10x1x2xf32>
    %164 = vector.broadcast %163 : vector<10x1x2xf32> to vector<10x10x2xf32>
    %165 = arith.addf %150, %164 : vector<10x10x2xf32>
    %cst_71 = arith.constant dense<0xFF800000> : vector<10x2xf32>
    %166 = vector.multi_reduction <maximumf>, %165, %cst_71 [0] : vector<10x10x2xf32> to vector<10x2xf32>
    %167 = vector.shape_cast %166 : vector<10x2xf32> to vector<1x10x2xf32>
    %168 = vector.broadcast %167 : vector<1x10x2xf32> to vector<10x10x2xf32>
    %169 = arith.subf %165, %168 : vector<10x10x2xf32>
    %170 = math.exp %169 : vector<10x10x2xf32>
    %cst_72 = arith.constant dense<0.000000e+00> : vector<10x2xf32>
    %171 = vector.multi_reduction <add>, %170, %cst_72 [0] : vector<10x10x2xf32> to vector<10x2xf32>
    %172 = math.log %171 : vector<10x2xf32>
    %173 = arith.addf %166, %172 : vector<10x2xf32>
    %c9_i32_73 = arith.constant 9 : i32
    %174 = vector.shape_cast %147 : vector<1x2xi1> to vector<1x2xi1>
    %175 = vector.broadcast %174 : vector<1x2xi1> to vector<10x2xi1>
    %176 = vector.broadcast %c9_i32_73 : i32 to vector<10x2xi32>
    %177 = arith.select %175, %162, %176 : vector<10x2xi1>, vector<10x2xi32>
    %178 = arith.index_cast %145 : i32 to index
    %c0_74 = arith.constant 0 : index
    %c0_75 = arith.constant 0 : index
    %179 = vector.load %arg7[%178, %c0_74, %c0_75] : memref<8x10x2xi32, #tpu.memory_space<vmem>>, vector<1x10x2xi32>
    %180 = vector.shape_cast %179 : vector<1x10x2xi32> to vector<10x2xi32>
    %181 = vector.shape_cast %177 : vector<10x2xi32> to vector<1x10x2xi32>
    tpu.vector_store %arg7[%178, %c0_74, %c0_75], %181 {strides = array<i32>} : memref<8x10x2xi32, #tpu.memory_space<vmem>>, vector<1x10x2xi32>,
    %182 = vector.shape_cast %147 : vector<1x2xi1> to vector<1x2xi1>
    %183 = vector.broadcast %182 : vector<1x2xi1> to vector<10x2xi1>
    %184 = arith.select %183, %156, %151 : vector<10x2xi1>, vector<10x2xf32>
    %c0_76 = arith.constant 0 : index
    %c0_77 = arith.constant 0 : index
    %185 = vector.load %arg5[%c0_76, %c0_77] : memref<10x2xf32, #tpu.memory_space<vmem>>, vector<10x2xf32>
    tpu.vector_store %arg5[%c0_76, %c0_77], %184 {strides = array<i32>} : memref<10x2xf32, #tpu.memory_space<vmem>>, vector<10x2xf32>,
    %186 = vector.shape_cast %147 : vector<1x2xi1> to vector<1x2xi1>
    %187 = vector.broadcast %186 : vector<1x2xi1> to vector<10x2xi1>
    %188 = arith.select %187, %173, %152 : vector<10x2xi1>, vector<10x2xf32>
    %c0_78 = arith.constant 0 : index
    %c0_79 = arith.constant 0 : index
    %189 = vector.load %arg6[%c0_78, %c0_79] : memref<10x2xf32, #tpu.memory_space<vmem>>, vector<10x2xf32>
    tpu.vector_store %arg6[%c0_78, %c0_79], %188 {strides = array<i32>} : memref<10x2xf32, #tpu.memory_space<vmem>>, vector<10x2xf32>,
    %c4_i32 = arith.constant 4 : i32
    %c8_i32_80 = arith.constant 8 : i32
    %190 = arith.muli %arg1, %c8_i32_80 : i32
    %191 = arith.addi %190, %c4_i32 : i32
    %192 = vector.broadcast %191 : i32 to vector<1x2xi32>
    %193 = arith.cmpi sgt, %2, %192 : vector<1x2xi32>
    %194 = arith.index_cast %c4_i32 : i32 to index
    %c0_81 = arith.constant 0 : index
    %c0_82 = arith.constant 0 : index
    %c0_83 = arith.constant 0 : index
    %195 = vector.load %arg2[%194, %c0_81, %c0_82, %c0_83] : memref<8x10x10x2xf32, #tpu.memory_space<vmem>>, vector<1x10x10x2xf32>
    %196 = vector.shape_cast %195 : vector<1x10x10x2xf32> to vector<10x10x2xf32>
    %c0_84 = arith.constant 0 : index
    %c0_85 = arith.constant 0 : index
    %197 = vector.load %arg5[%c0_84, %c0_85] : memref<10x2xf32, #tpu.memory_space<vmem>>, vector<10x2xf32>
    %c0_86 = arith.constant 0 : index
    %c0_87 = arith.constant 0 : index
    %198 = vector.load %arg6[%c0_86, %c0_87] : memref<10x2xf32, #tpu.memory_space<vmem>>, vector<10x2xf32>
    %199 = vector.shape_cast %197 : vector<10x2xf32> to vector<10x1x2xf32>
    %200 = vector.broadcast %199 : vector<10x1x2xf32> to vector<10x10x2xf32>
    %201 = arith.addf %196, %200 : vector<10x10x2xf32>
    %cst_88 = arith.constant dense<0xFF800000> : vector<10x2xf32>
    %202 = vector.multi_reduction <maximumf>, %201, %cst_88 [0] : vector<10x10x2xf32> to vector<10x2xf32>
    %203 = vector.shape_cast %202 : vector<10x2xf32> to vector<1x10x2xf32>
    %204 = vector.broadcast %203 : vector<1x10x2xf32> to vector<10x10x2xf32>
    %205 = arith.cmpf oeq, %201, %204 : vector<10x10x2xf32>
    %c10_i32_89 = arith.constant 10 : i32
    %206 = vector.broadcast %c10_i32_89 : i32 to vector<10x10x2xi32>
    %207 = arith.select %205, %1, %206 : vector<10x10x2xi1>, vector<10x10x2xi32>
    %cst_90 = arith.constant dense<2147483647> : vector<10x2xi32>
    %208 = vector.multi_reduction <minsi>, %207, %cst_90 [0] : vector<10x10x2xi32> to vector<10x2xi32>
    %209 = vector.shape_cast %198 : vector<10x2xf32> to vector<10x1x2xf32>
    %210 = vector.broadcast %209 : vector<10x1x2xf32> to vector<10x10x2xf32>
    %211 = arith.addf %196, %210 : vector<10x10x2xf32>
    %cst_91 = arith.constant dense<0xFF800000> : vector<10x2xf32>
    %212 = vector.multi_reduction <maximumf>, %211, %cst_91 [0] : vector<10x10x2xf32> to vector<10x2xf32>
    %213 = vector.shape_cast %212 : vector<10x2xf32> to vector<1x10x2xf32>
    %214 = vector.broadcast %213 : vector<1x10x2xf32> to vector<10x10x2xf32>
    %215 = arith.subf %211, %214 : vector<10x10x2xf32>
    %216 = math.exp %215 : vector<10x10x2xf32>
    %cst_92 = arith.constant dense<0.000000e+00> : vector<10x2xf32>
    %217 = vector.multi_reduction <add>, %216, %cst_92 [0] : vector<10x10x2xf32> to vector<10x2xf32>
    %218 = math.log %217 : vector<10x2xf32>
    %219 = arith.addf %212, %218 : vector<10x2xf32>
    %c9_i32_93 = arith.constant 9 : i32
    %220 = vector.shape_cast %193 : vector<1x2xi1> to vector<1x2xi1>
    %221 = vector.broadcast %220 : vector<1x2xi1> to vector<10x2xi1>
    %222 = vector.broadcast %c9_i32_93 : i32 to vector<10x2xi32>
    %223 = arith.select %221, %208, %222 : vector<10x2xi1>, vector<10x2xi32>
    %224 = arith.index_cast %191 : i32 to index
    %c0_94 = arith.constant 0 : index
    %c0_95 = arith.constant 0 : index
    %225 = vector.load %arg7[%224, %c0_94, %c0_95] : memref<8x10x2xi32, #tpu.memory_space<vmem>>, vector<1x10x2xi32>
    %226 = vector.shape_cast %225 : vector<1x10x2xi32> to vector<10x2xi32>
    %227 = vector.shape_cast %223 : vector<10x2xi32> to vector<1x10x2xi32>
    tpu.vector_store %arg7[%224, %c0_94, %c0_95], %227 {strides = array<i32>} : memref<8x10x2xi32, #tpu.memory_space<vmem>>, vector<1x10x2xi32>,
    %228 = vector.shape_cast %193 : vector<1x2xi1> to vector<1x2xi1>
    %229 = vector.broadcast %228 : vector<1x2xi1> to vector<10x2xi1>
    %230 = arith.select %229, %202, %197 : vector<10x2xi1>, vector<10x2xf32>
    %c0_96 = arith.constant 0 : index
    %c0_97 = arith.constant 0 : index
    %231 = vector.load %arg5[%c0_96, %c0_97] : memref<10x2xf32, #tpu.memory_space<vmem>>, vector<10x2xf32>
    tpu.vector_store %arg5[%c0_96, %c0_97], %230 {strides = array<i32>} : memref<10x2xf32, #tpu.memory_space<vmem>>, vector<10x2xf32>,
    %232 = vector.shape_cast %193 : vector<1x2xi1> to vector<1x2xi1>
    %233 = vector.broadcast %232 : vector<1x2xi1> to vector<10x2xi1>
    %234 = arith.select %233, %219, %198 : vector<10x2xi1>, vector<10x2xf32>
    %c0_98 = arith.constant 0 : index
    %c0_99 = arith.constant 0 : index
    %235 = vector.load %arg6[%c0_98, %c0_99] : memref<10x2xf32, #tpu.memory_space<vmem>>, vector<10x2xf32>
    tpu.vector_store %arg6[%c0_98, %c0_99], %234 {strides = array<i32>} : memref<10x2xf32, #tpu.memory_space<vmem>>, vector<10x2xf32>,
    %c5_i32 = arith.constant 5 : i32
    %c8_i32_100 = arith.constant 8 : i32
    %236 = arith.muli %arg1, %c8_i32_100 : i32
    %237 = arith.addi %236, %c5_i32 : i32
    %238 = vector.broadcast %237 : i32 to vector<1x2xi32>
    %239 = arith.cmpi sgt, %2, %238 : vector<1x2xi32>
    %240 = arith.index_cast %c5_i32 : i32 to index
    %c0_101 = arith.constant 0 : index
    %c0_102 = arith.constant 0 : index
    %c0_103 = arith.constant 0 : index
    %241 = vector.load %arg2[%240, %c0_101, %c0_102, %c0_103] : memref<8x10x10x2xf32, #tpu.memory_space<vmem>>, vector<1x10x10x2xf32>
    %242 = vector.shape_cast %241 : vector<1x10x10x2xf32> to vector<10x10x2xf32>
    %c0_104 = arith.constant 0 : index
    %c0_105 = arith.constant 0 : index
    %243 = vector.load %arg5[%c0_104, %c0_105] : memref<10x2xf32, #tpu.memory_space<vmem>>, vector<10x2xf32>
    %c0_106 = arith.constant 0 : index
    %c0_107 = arith.constant 0 : index
    %244 = vector.load %arg6[%c0_106, %c0_107] : memref<10x2xf32, #tpu.memory_space<vmem>>, vector<10x2xf32>
    %245 = vector.shape_cast %243 : vector<10x2xf32> to vector<10x1x2xf32>
    %246 = vector.broadcast %245 : vector<10x1x2xf32> to vector<10x10x2xf32>
    %247 = arith.addf %242, %246 : vector<10x10x2xf32>
    %cst_108 = arith.constant dense<0xFF800000> : vector<10x2xf32>
    %248 = vector.multi_reduction <maximumf>, %247, %cst_108 [0] : vector<10x10x2xf32> to vector<10x2xf32>
    %249 = vector.shape_cast %248 : vector<10x2xf32> to vector<1x10x2xf32>
    %250 = vector.broadcast %249 : vector<1x10x2xf32> to vector<10x10x2xf32>
    %251 = arith.cmpf oeq, %247, %250 : vector<10x10x2xf32>
    %c10_i32_109 = arith.constant 10 : i32
    %252 = vector.broadcast %c10_i32_109 : i32 to vector<10x10x2xi32>
    %253 = arith.select %251, %1, %252 : vector<10x10x2xi1>, vector<10x10x2xi32>
    %cst_110 = arith.constant dense<2147483647> : vector<10x2xi32>
    %254 = vector.multi_reduction <minsi>, %253, %cst_110 [0] : vector<10x10x2xi32> to vector<10x2xi32>
    %255 = vector.shape_cast %244 : vector<10x2xf32> to vector<10x1x2xf32>
    %256 = vector.broadcast %255 : vector<10x1x2xf32> to vector<10x10x2xf32>
    %257 = arith.addf %242, %256 : vector<10x10x2xf32>
    %cst_111 = arith.constant dense<0xFF800000> : vector<10x2xf32>
    %258 = vector.multi_reduction <maximumf>, %257, %cst_111 [0] : vector<10x10x2xf32> to vector<10x2xf32>
    %259 = vector.shape_cast %258 : vector<10x2xf32> to vector<1x10x2xf32>
    %260 = vector.broadcast %259 : vector<1x10x2xf32> to vector<10x10x2xf32>
    %261 = arith.subf %257, %260 : vector<10x10x2xf32>
    %262 = math.exp %261 : vector<10x10x2xf32>
    %cst_112 = arith.constant dense<0.000000e+00> : vector<10x2xf32>
    %263 = vector.multi_reduction <add>, %262, %cst_112 [0] : vector<10x10x2xf32> to vector<10x2xf32>
    %264 = math.log %263 : vector<10x2xf32>
    %265 = arith.addf %258, %264 : vector<10x2xf32>
    %c9_i32_113 = arith.constant 9 : i32
    %266 = vector.shape_cast %239 : vector<1x2xi1> to vector<1x2xi1>
    %267 = vector.broadcast %266 : vector<1x2xi1> to vector<10x2xi1>
    %268 = vector.broadcast %c9_i32_113 : i32 to vector<10x2xi32>
    %269 = arith.select %267, %254, %268 : vector<10x2xi1>, vector<10x2xi32>
    %270 = arith.index_cast %237 : i32 to index
    %c0_114 = arith.constant 0 : index
    %c0_115 = arith.constant 0 : index
    %271 = vector.load %arg7[%270, %c0_114, %c0_115] : memref<8x10x2xi32, #tpu.memory_space<vmem>>, vector<1x10x2xi32>
    %272 = vector.shape_cast %271 : vector<1x10x2xi32> to vector<10x2xi32>
    %273 = vector.shape_cast %269 : vector<10x2xi32> to vector<1x10x2xi32>
    tpu.vector_store %arg7[%270, %c0_114, %c0_115], %273 {strides = array<i32>} : memref<8x10x2xi32, #tpu.memory_space<vmem>>, vector<1x10x2xi32>,
    %274 = vector.shape_cast %239 : vector<1x2xi1> to vector<1x2xi1>
    %275 = vector.broadcast %274 : vector<1x2xi1> to vector<10x2xi1>
    %276 = arith.select %275, %248, %243 : vector<10x2xi1>, vector<10x2xf32>
    %c0_116 = arith.constant 0 : index
    %c0_117 = arith.constant 0 : index
    %277 = vector.load %arg5[%c0_116, %c0_117] : memref<10x2xf32, #tpu.memory_space<vmem>>, vector<10x2xf32>
    tpu.vector_store %arg5[%c0_116, %c0_117], %276 {strides = array<i32>} : memref<10x2xf32, #tpu.memory_space<vmem>>, vector<10x2xf32>,
    %278 = vector.shape_cast %239 : vector<1x2xi1> to vector<1x2xi1>
    %279 = vector.broadcast %278 : vector<1x2xi1> to vector<10x2xi1>
    %280 = arith.select %279, %265, %244 : vector<10x2xi1>, vector<10x2xf32>
    %c0_118 = arith.constant 0 : index
    %c0_119 = arith.constant 0 : index
    %281 = vector.load %arg6[%c0_118, %c0_119] : memref<10x2xf32, #tpu.memory_space<vmem>>, vector<10x2xf32>
    tpu.vector_store %arg6[%c0_118, %c0_119], %280 {strides = array<i32>} : memref<10x2xf32, #tpu.memory_space<vmem>>, vector<10x2xf32>,
    %c6_i32 = arith.constant 6 : i32
    %c8_i32_120 = arith.constant 8 : i32
    %282 = arith.muli %arg1, %c8_i32_120 : i32
    %283 = arith.addi %282, %c6_i32 : i32
    %284 = vector.broadcast %283 : i32 to vector<1x2xi32>
    %285 = arith.cmpi sgt, %2, %284 : vector<1x2xi32>
    %286 = arith.index_cast %c6_i32 : i32 to index
    %c0_121 = arith.constant 0 : index
    %c0_122 = arith.constant 0 : index
    %c0_123 = arith.constant 0 : index
    %287 = vector.load %arg2[%286, %c0_121, %c0_122, %c0_123] : memref<8x10x10x2xf32, #tpu.memory_space<vmem>>, vector<1x10x10x2xf32>
    %288 = vector.shape_cast %287 : vector<1x10x10x2xf32> to vector<10x10x2xf32>
    %c0_124 = arith.constant 0 : index
    %c0_125 = arith.constant 0 : index
    %289 = vector.load %arg5[%c0_124, %c0_125] : memref<10x2xf32, #tpu.memory_space<vmem>>, vector<10x2xf32>
    %c0_126 = arith.constant 0 : index
    %c0_127 = arith.constant 0 : index
    %290 = vector.load %arg6[%c0_126, %c0_127] : memref<10x2xf32, #tpu.memory_space<vmem>>, vector<10x2xf32>
    %291 = vector.shape_cast %289 : vector<10x2xf32> to vector<10x1x2xf32>
    %292 = vector.broadcast %291 : vector<10x1x2xf32> to vector<10x10x2xf32>
    %293 = arith.addf %288, %292 : vector<10x10x2xf32>
    %cst_128 = arith.constant dense<0xFF800000> : vector<10x2xf32>
    %294 = vector.multi_reduction <maximumf>, %293, %cst_128 [0] : vector<10x10x2xf32> to vector<10x2xf32>
    %295 = vector.shape_cast %294 : vector<10x2xf32> to vector<1x10x2xf32>
    %296 = vector.broadcast %295 : vector<1x10x2xf32> to vector<10x10x2xf32>
    %297 = arith.cmpf oeq, %293, %296 : vector<10x10x2xf32>
    %c10_i32_129 = arith.constant 10 : i32
    %298 = vector.broadcast %c10_i32_129 : i32 to vector<10x10x2xi32>
    %299 = arith.select %297, %1, %298 : vector<10x10x2xi1>, vector<10x10x2xi32>
    %cst_130 = arith.constant dense<2147483647> : vector<10x2xi32>
    %300 = vector.multi_reduction <minsi>, %299, %cst_130 [0] : vector<10x10x2xi32> to vector<10x2xi32>
    %301 = vector.shape_cast %290 : vector<10x2xf32> to vector<10x1x2xf32>
    %302 = vector.broadcast %301 : vector<10x1x2xf32> to vector<10x10x2xf32>
    %303 = arith.addf %288, %302 : vector<10x10x2xf32>
    %cst_131 = arith.constant dense<0xFF800000> : vector<10x2xf32>
    %304 = vector.multi_reduction <maximumf>, %303, %cst_131 [0] : vector<10x10x2xf32> to vector<10x2xf32>
    %305 = vector.shape_cast %304 : vector<10x2xf32> to vector<1x10x2xf32>
    %306 = vector.broadcast %305 : vector<1x10x2xf32> to vector<10x10x2xf32>
    %307 = arith.subf %303, %306 : vector<10x10x2xf32>
    %308 = math.exp %307 : vector<10x10x2xf32>
    %cst_132 = arith.constant dense<0.000000e+00> : vector<10x2xf32>
    %309 = vector.multi_reduction <add>, %308, %cst_132 [0] : vector<10x10x2xf32> to vector<10x2xf32>
    %310 = math.log %309 : vector<10x2xf32>
    %311 = arith.addf %304, %310 : vector<10x2xf32>
    %c9_i32_133 = arith.constant 9 : i32
    %312 = vector.shape_cast %285 : vector<1x2xi1> to vector<1x2xi1>
    %313 = vector.broadcast %312 : vector<1x2xi1> to vector<10x2xi1>
    %314 = vector.broadcast %c9_i32_133 : i32 to vector<10x2xi32>
    %315 = arith.select %313, %300, %314 : vector<10x2xi1>, vector<10x2xi32>
    %316 = arith.index_cast %283 : i32 to index
    %c0_134 = arith.constant 0 : index
    %c0_135 = arith.constant 0 : index
    %317 = vector.load %arg7[%316, %c0_134, %c0_135] : memref<8x10x2xi32, #tpu.memory_space<vmem>>, vector<1x10x2xi32>
    %318 = vector.shape_cast %317 : vector<1x10x2xi32> to vector<10x2xi32>
    %319 = vector.shape_cast %315 : vector<10x2xi32> to vector<1x10x2xi32>
    tpu.vector_store %arg7[%316, %c0_134, %c0_135], %319 {strides = array<i32>} : memref<8x10x2xi32, #tpu.memory_space<vmem>>, vector<1x10x2xi32>,
    %320 = vector.shape_cast %285 : vector<1x2xi1> to vector<1x2xi1>
    %321 = vector.broadcast %320 : vector<1x2xi1> to vector<10x2xi1>
    %322 = arith.select %321, %294, %289 : vector<10x2xi1>, vector<10x2xf32>
    %c0_136 = arith.constant 0 : index
    %c0_137 = arith.constant 0 : index
    %323 = vector.load %arg5[%c0_136, %c0_137] : memref<10x2xf32, #tpu.memory_space<vmem>>, vector<10x2xf32>
    tpu.vector_store %arg5[%c0_136, %c0_137], %322 {strides = array<i32>} : memref<10x2xf32, #tpu.memory_space<vmem>>, vector<10x2xf32>,
    %324 = vector.shape_cast %285 : vector<1x2xi1> to vector<1x2xi1>
    %325 = vector.broadcast %324 : vector<1x2xi1> to vector<10x2xi1>
    %326 = arith.select %325, %311, %290 : vector<10x2xi1>, vector<10x2xf32>
    %c0_138 = arith.constant 0 : index
    %c0_139 = arith.constant 0 : index
    %327 = vector.load %arg6[%c0_138, %c0_139] : memref<10x2xf32, #tpu.memory_space<vmem>>, vector<10x2xf32>
    tpu.vector_store %arg6[%c0_138, %c0_139], %326 {strides = array<i32>} : memref<10x2xf32, #tpu.memory_space<vmem>>, vector<10x2xf32>,
    %c7_i32 = arith.constant 7 : i32
    %c8_i32_140 = arith.constant 8 : i32
    %328 = arith.muli %arg1, %c8_i32_140 : i32
    %329 = arith.addi %328, %c7_i32 : i32
    %330 = vector.broadcast %329 : i32 to vector<1x2xi32>
    %331 = arith.cmpi sgt, %2, %330 : vector<1x2xi32>
    %332 = arith.index_cast %c7_i32 : i32 to index
    %c0_141 = arith.constant 0 : index
    %c0_142 = arith.constant 0 : index
    %c0_143 = arith.constant 0 : index
    %333 = vector.load %arg2[%332, %c0_141, %c0_142, %c0_143] : memref<8x10x10x2xf32, #tpu.memory_space<vmem>>, vector<1x10x10x2xf32>
    %334 = vector.shape_cast %333 : vector<1x10x10x2xf32> to vector<10x10x2xf32>
    %c0_144 = arith.constant 0 : index
    %c0_145 = arith.constant 0 : index
    %335 = vector.load %arg5[%c0_144, %c0_145] : memref<10x2xf32, #tpu.memory_space<vmem>>, vector<10x2xf32>
    %c0_146 = arith.constant 0 : index
    %c0_147 = arith.constant 0 : index
    %336 = vector.load %arg6[%c0_146, %c0_147] : memref<10x2xf32, #tpu.memory_space<vmem>>, vector<10x2xf32>
    %337 = vector.shape_cast %335 : vector<10x2xf32> to vector<10x1x2xf32>
    %338 = vector.broadcast %337 : vector<10x1x2xf32> to vector<10x10x2xf32>
    %339 = arith.addf %334, %338 : vector<10x10x2xf32>
    %cst_148 = arith.constant dense<0xFF800000> : vector<10x2xf32>
    %340 = vector.multi_reduction <maximumf>, %339, %cst_148 [0] : vector<10x10x2xf32> to vector<10x2xf32>
    %341 = vector.shape_cast %340 : vector<10x2xf32> to vector<1x10x2xf32>
    %342 = vector.broadcast %341 : vector<1x10x2xf32> to vector<10x10x2xf32>
    %343 = arith.cmpf oeq, %339, %342 : vector<10x10x2xf32>
    %c10_i32_149 = arith.constant 10 : i32
    %344 = vector.broadcast %c10_i32_149 : i32 to vector<10x10x2xi32>
    %345 = arith.select %343, %1, %344 : vector<10x10x2xi1>, vector<10x10x2xi32>
    %cst_150 = arith.constant dense<2147483647> : vector<10x2xi32>
    %346 = vector.multi_reduction <minsi>, %345, %cst_150 [0] : vector<10x10x2xi32> to vector<10x2xi32>
    %347 = vector.shape_cast %336 : vector<10x2xf32> to vector<10x1x2xf32>
    %348 = vector.broadcast %347 : vector<10x1x2xf32> to vector<10x10x2xf32>
    %349 = arith.addf %334, %348 : vector<10x10x2xf32>
    %cst_151 = arith.constant dense<0xFF800000> : vector<10x2xf32>
    %350 = vector.multi_reduction <maximumf>, %349, %cst_151 [0] : vector<10x10x2xf32> to vector<10x2xf32>
    %351 = vector.shape_cast %350 : vector<10x2xf32> to vector<1x10x2xf32>
    %352 = vector.broadcast %351 : vector<1x10x2xf32> to vector<10x10x2xf32>
    %353 = arith.subf %349, %352 : vector<10x10x2xf32>
    %354 = math.exp %353 : vector<10x10x2xf32>
    %cst_152 = arith.constant dense<0.000000e+00> : vector<10x2xf32>
    %355 = vector.multi_reduction <add>, %354, %cst_152 [0] : vector<10x10x2xf32> to vector<10x2xf32>
    %356 = math.log %355 : vector<10x2xf32>
    %357 = arith.addf %350, %356 : vector<10x2xf32>
    %c9_i32_153 = arith.constant 9 : i32
    %358 = vector.shape_cast %331 : vector<1x2xi1> to vector<1x2xi1>
    %359 = vector.broadcast %358 : vector<1x2xi1> to vector<10x2xi1>
    %360 = vector.broadcast %c9_i32_153 : i32 to vector<10x2xi32>
    %361 = arith.select %359, %346, %360 : vector<10x2xi1>, vector<10x2xi32>
    %362 = arith.index_cast %329 : i32 to index
    %c0_154 = arith.constant 0 : index
    %c0_155 = arith.constant 0 : index
    %363 = vector.load %arg7[%362, %c0_154, %c0_155] : memref<8x10x2xi32, #tpu.memory_space<vmem>>, vector<1x10x2xi32>
    %364 = vector.shape_cast %363 : vector<1x10x2xi32> to vector<10x2xi32>
    %365 = vector.shape_cast %361 : vector<10x2xi32> to vector<1x10x2xi32>
    tpu.vector_store %arg7[%362, %c0_154, %c0_155], %365 {strides = array<i32>} : memref<8x10x2xi32, #tpu.memory_space<vmem>>, vector<1x10x2xi32>,
    %366 = vector.shape_cast %331 : vector<1x2xi1> to vector<1x2xi1>
    %367 = vector.broadcast %366 : vector<1x2xi1> to vector<10x2xi1>
    %368 = arith.select %367, %340, %335 : vector<10x2xi1>, vector<10x2xf32>
    %c0_156 = arith.constant 0 : index
    %c0_157 = arith.constant 0 : index
    %369 = vector.load %arg5[%c0_156, %c0_157] : memref<10x2xf32, #tpu.memory_space<vmem>>, vector<10x2xf32>
    tpu.vector_store %arg5[%c0_156, %c0_157], %368 {strides = array<i32>} : memref<10x2xf32, #tpu.memory_space<vmem>>, vector<10x2xf32>,
    %370 = vector.shape_cast %331 : vector<1x2xi1> to vector<1x2xi1>
    %371 = vector.broadcast %370 : vector<1x2xi1> to vector<10x2xi1>
    %372 = arith.select %371, %357, %336 : vector<10x2xi1>, vector<10x2xf32>
    %c0_158 = arith.constant 0 : index
    %c0_159 = arith.constant 0 : index
    %373 = vector.load %arg6[%c0_158, %c0_159] : memref<10x2xf32, #tpu.memory_space<vmem>>, vector<10x2xf32>
    tpu.vector_store %arg6[%c0_158, %c0_159], %372 {strides = array<i32>} : memref<10x2xf32, #tpu.memory_space<vmem>>, vector<10x2xf32>,
    %c8_i32_160 = arith.constant 8 : i32
    %c0_i32_161 = arith.constant 0 : i32
    %374 = arith.cmpi eq, %arg1, %c0_i32_161 : i32
    %375 = arith.extui %374 : i1 to i32
    %c0_i32_162 = arith.constant 0 : i32
    %376 = arith.cmpi ne, %375, %c0_i32_162 : i32
    scf.if %376 {
      %c9_i32_163 = arith.constant 9 : i32
      %377 = vector.broadcast %c9_i32_163 : i32 to vector<1x2xi32>
      %c0_164 = arith.constant 0 : index
      %c0_165 = arith.constant 0 : index
      %378 = vector.load %arg8[%c0_164, %c0_165] : memref<1x2xi32, #tpu.memory_space<vmem>>, vector<1x2xi32>
      tpu.vector_store %arg8[%c0_164, %c0_165], %377 {strides = array<i32>} : memref<1x2xi32, #tpu.memory_space<vmem>>, vector<1x2xi32>,
      %c0_i32_166 = arith.constant 0 : i32
      %c7_i32_167 = arith.constant 7 : i32
      %379 = arith.subi %c7_i32_167, %c0_i32_166 : i32
      %c0_168 = arith.constant 0 : index
      %c0_169 = arith.constant 0 : index
      %380 = vector.load %arg8[%c0_168, %c0_169] : memref<1x2xi32, #tpu.memory_space<vmem>>, vector<1x2xi32>
      %381 = arith.index_cast %379 : i32 to index
      %c0_170 = arith.constant 0 : index
      %c0_171 = arith.constant 0 : index
      %382 = vector.load %arg7[%381, %c0_170, %c0_171] : memref<8x10x2xi32, #tpu.memory_space<vmem>>, vector<1x10x2xi32>
      %383 = vector.shape_cast %382 : vector<1x10x2xi32> to vector<10x2xi32>
      %384 = vector.broadcast %380 : vector<1x2xi32> to vector<10x2xi32>
      %385 = arith.cmpi eq, %0, %384 : vector<10x2xi32>
      %c0_i32_172 = arith.constant 0 : i32
      %386 = vector.broadcast %c0_i32_172 : i32 to vector<10x2xi32>
      %387 = arith.select %385, %383, %386 : vector<10x2xi1>, vector<10x2xi32>
      %cst_173 = arith.constant dense<0> : vector<2xi32>
      %388 = vector.multi_reduction <add>, %387, %cst_173 [0] : vector<10x2xi32> to vector<2xi32>
      %389 = vector.shape_cast %388 : vector<2xi32> to vector<1x2xi32>
      %390 = arith.index_cast %379 : i32 to index
      %c0_174 = arith.constant 0 : index
      %391 = vector.load %arg4[%390, %c0_174] : memref<8x2xi32, #tpu.memory_space<vmem>>, vector<1x2xi32>
      tpu.vector_store %arg4[%390, %c0_174], %389 {strides = array<i32>} : memref<8x2xi32, #tpu.memory_space<vmem>>, vector<1x2xi32>,
      %c0_175 = arith.constant 0 : index
      %c0_176 = arith.constant 0 : index
      %392 = vector.load %arg8[%c0_175, %c0_176] : memref<1x2xi32, #tpu.memory_space<vmem>>, vector<1x2xi32>
      tpu.vector_store %arg8[%c0_175, %c0_176], %389 {strides = array<i32>} : memref<1x2xi32, #tpu.memory_space<vmem>>, vector<1x2xi32>,
      %c1_i32_177 = arith.constant 1 : i32
      %c7_i32_178 = arith.constant 7 : i32
      %393 = arith.subi %c7_i32_178, %c1_i32_177 : i32
      %c0_179 = arith.constant 0 : index
      %c0_180 = arith.constant 0 : index
      %394 = vector.load %arg8[%c0_179, %c0_180] : memref<1x2xi32, #tpu.memory_space<vmem>>, vector<1x2xi32>
      %395 = arith.index_cast %393 : i32 to index
      %c0_181 = arith.constant 0 : index
      %c0_182 = arith.constant 0 : index
      %396 = vector.load %arg7[%395, %c0_181, %c0_182] : memref<8x10x2xi32, #tpu.memory_space<vmem>>, vector<1x10x2xi32>
      %397 = vector.shape_cast %396 : vector<1x10x2xi32> to vector<10x2xi32>
      %398 = vector.broadcast %394 : vector<1x2xi32> to vector<10x2xi32>
      %399 = arith.cmpi eq, %0, %398 : vector<10x2xi32>
      %c0_i32_183 = arith.constant 0 : i32
      %400 = vector.broadcast %c0_i32_183 : i32 to vector<10x2xi32>
      %401 = arith.select %399, %397, %400 : vector<10x2xi1>, vector<10x2xi32>
      %cst_184 = arith.constant dense<0> : vector<2xi32>
      %402 = vector.multi_reduction <add>, %401, %cst_184 [0] : vector<10x2xi32> to vector<2xi32>
      %403 = vector.shape_cast %402 : vector<2xi32> to vector<1x2xi32>
      %404 = arith.index_cast %393 : i32 to index
      %c0_185 = arith.constant 0 : index
      %405 = vector.load %arg4[%404, %c0_185] : memref<8x2xi32, #tpu.memory_space<vmem>>, vector<1x2xi32>
      tpu.vector_store %arg4[%404, %c0_185], %403 {strides = array<i32>} : memref<8x2xi32, #tpu.memory_space<vmem>>, vector<1x2xi32>,
      %c0_186 = arith.constant 0 : index
      %c0_187 = arith.constant 0 : index
      %406 = vector.load %arg8[%c0_186, %c0_187] : memref<1x2xi32, #tpu.memory_space<vmem>>, vector<1x2xi32>
      tpu.vector_store %arg8[%c0_186, %c0_187], %403 {strides = array<i32>} : memref<1x2xi32, #tpu.memory_space<vmem>>, vector<1x2xi32>,
      %c2_i32_188 = arith.constant 2 : i32
      %c7_i32_189 = arith.constant 7 : i32
      %407 = arith.subi %c7_i32_189, %c2_i32_188 : i32
      %c0_190 = arith.constant 0 : index
      %c0_191 = arith.constant 0 : index
      %408 = vector.load %arg8[%c0_190, %c0_191] : memref<1x2xi32, #tpu.memory_space<vmem>>, vector<1x2xi32>
      %409 = arith.index_cast %407 : i32 to index
      %c0_192 = arith.constant 0 : index
      %c0_193 = arith.constant 0 : index
      %410 = vector.load %arg7[%409, %c0_192, %c0_193] : memref<8x10x2xi32, #tpu.memory_space<vmem>>, vector<1x10x2xi32>
      %411 = vector.shape_cast %410 : vector<1x10x2xi32> to vector<10x2xi32>
      %412 = vector.broadcast %408 : vector<1x2xi32> to vector<10x2xi32>
      %413 = arith.cmpi eq, %0, %412 : vector<10x2xi32>
      %c0_i32_194 = arith.constant 0 : i32
      %414 = vector.broadcast %c0_i32_194 : i32 to vector<10x2xi32>
      %415 = arith.select %413, %411, %414 : vector<10x2xi1>, vector<10x2xi32>
      %cst_195 = arith.constant dense<0> : vector<2xi32>
      %416 = vector.multi_reduction <add>, %415, %cst_195 [0] : vector<10x2xi32> to vector<2xi32>
      %417 = vector.shape_cast %416 : vector<2xi32> to vector<1x2xi32>
      %418 = arith.index_cast %407 : i32 to index
      %c0_196 = arith.constant 0 : index
      %419 = vector.load %arg4[%418, %c0_196] : memref<8x2xi32, #tpu.memory_space<vmem>>, vector<1x2xi32>
      tpu.vector_store %arg4[%418, %c0_196], %417 {strides = array<i32>} : memref<8x2xi32, #tpu.memory_space<vmem>>, vector<1x2xi32>,
      %c0_197 = arith.constant 0 : index
      %c0_198 = arith.constant 0 : index
      %420 = vector.load %arg8[%c0_197, %c0_198] : memref<1x2xi32, #tpu.memory_space<vmem>>, vector<1x2xi32>
      tpu.vector_store %arg8[%c0_197, %c0_198], %417 {strides = array<i32>} : memref<1x2xi32, #tpu.memory_space<vmem>>, vector<1x2xi32>,
      %c3_i32_199 = arith.constant 3 : i32
      %c7_i32_200 = arith.constant 7 : i32
      %421 = arith.subi %c7_i32_200, %c3_i32_199 : i32
      %c0_201 = arith.constant 0 : index
      %c0_202 = arith.constant 0 : index
      %422 = vector.load %arg8[%c0_201, %c0_202] : memref<1x2xi32, #tpu.memory_space<vmem>>, vector<1x2xi32>
      %423 = arith.index_cast %421 : i32 to index
      %c0_203 = arith.constant 0 : index
      %c0_204 = arith.constant 0 : index
      %424 = vector.load %arg7[%423, %c0_203, %c0_204] : memref<8x10x2xi32, #tpu.memory_space<vmem>>, vector<1x10x2xi32>
      %425 = vector.shape_cast %424 : vector<1x10x2xi32> to vector<10x2xi32>
      %426 = vector.broadcast %422 : vector<1x2xi32> to vector<10x2xi32>
      %427 = arith.cmpi eq, %0, %426 : vector<10x2xi32>
      %c0_i32_205 = arith.constant 0 : i32
      %428 = vector.broadcast %c0_i32_205 : i32 to vector<10x2xi32>
      %429 = arith.select %427, %425, %428 : vector<10x2xi1>, vector<10x2xi32>
      %cst_206 = arith.constant dense<0> : vector<2xi32>
      %430 = vector.multi_reduction <add>, %429, %cst_206 [0] : vector<10x2xi32> to vector<2xi32>
      %431 = vector.shape_cast %430 : vector<2xi32> to vector<1x2xi32>
      %432 = arith.index_cast %421 : i32 to index
      %c0_207 = arith.constant 0 : index
      %433 = vector.load %arg4[%432, %c0_207] : memref<8x2xi32, #tpu.memory_space<vmem>>, vector<1x2xi32>
      tpu.vector_store %arg4[%432, %c0_207], %431 {strides = array<i32>} : memref<8x2xi32, #tpu.memory_space<vmem>>, vector<1x2xi32>,
      %c0_208 = arith.constant 0 : index
      %c0_209 = arith.constant 0 : index
      %434 = vector.load %arg8[%c0_208, %c0_209] : memref<1x2xi32, #tpu.memory_space<vmem>>, vector<1x2xi32>
      tpu.vector_store %arg8[%c0_208, %c0_209], %431 {strides = array<i32>} : memref<1x2xi32, #tpu.memory_space<vmem>>, vector<1x2xi32>,
      %c4_i32_210 = arith.constant 4 : i32
      %c7_i32_211 = arith.constant 7 : i32
      %435 = arith.subi %c7_i32_211, %c4_i32_210 : i32
      %c0_212 = arith.constant 0 : index
      %c0_213 = arith.constant 0 : index
      %436 = vector.load %arg8[%c0_212, %c0_213] : memref<1x2xi32, #tpu.memory_space<vmem>>, vector<1x2xi32>
      %437 = arith.index_cast %435 : i32 to index
      %c0_214 = arith.constant 0 : index
      %c0_215 = arith.constant 0 : index
      %438 = vector.load %arg7[%437, %c0_214, %c0_215] : memref<8x10x2xi32, #tpu.memory_space<vmem>>, vector<1x10x2xi32>
      %439 = vector.shape_cast %438 : vector<1x10x2xi32> to vector<10x2xi32>
      %440 = vector.broadcast %436 : vector<1x2xi32> to vector<10x2xi32>
      %441 = arith.cmpi eq, %0, %440 : vector<10x2xi32>
      %c0_i32_216 = arith.constant 0 : i32
      %442 = vector.broadcast %c0_i32_216 : i32 to vector<10x2xi32>
      %443 = arith.select %441, %439, %442 : vector<10x2xi1>, vector<10x2xi32>
      %cst_217 = arith.constant dense<0> : vector<2xi32>
      %444 = vector.multi_reduction <add>, %443, %cst_217 [0] : vector<10x2xi32> to vector<2xi32>
      %445 = vector.shape_cast %444 : vector<2xi32> to vector<1x2xi32>
      %446 = arith.index_cast %435 : i32 to index
      %c0_218 = arith.constant 0 : index
      %447 = vector.load %arg4[%446, %c0_218] : memref<8x2xi32, #tpu.memory_space<vmem>>, vector<1x2xi32>
      tpu.vector_store %arg4[%446, %c0_218], %445 {strides = array<i32>} : memref<8x2xi32, #tpu.memory_space<vmem>>, vector<1x2xi32>,
      %c0_219 = arith.constant 0 : index
      %c0_220 = arith.constant 0 : index
      %448 = vector.load %arg8[%c0_219, %c0_220] : memref<1x2xi32, #tpu.memory_space<vmem>>, vector<1x2xi32>
      tpu.vector_store %arg8[%c0_219, %c0_220], %445 {strides = array<i32>} : memref<1x2xi32, #tpu.memory_space<vmem>>, vector<1x2xi32>,
      %c5_i32_221 = arith.constant 5 : i32
      %c7_i32_222 = arith.constant 7 : i32
      %449 = arith.subi %c7_i32_222, %c5_i32_221 : i32
      %c0_223 = arith.constant 0 : index
      %c0_224 = arith.constant 0 : index
      %450 = vector.load %arg8[%c0_223, %c0_224] : memref<1x2xi32, #tpu.memory_space<vmem>>, vector<1x2xi32>
      %451 = arith.index_cast %449 : i32 to index
      %c0_225 = arith.constant 0 : index
      %c0_226 = arith.constant 0 : index
      %452 = vector.load %arg7[%451, %c0_225, %c0_226] : memref<8x10x2xi32, #tpu.memory_space<vmem>>, vector<1x10x2xi32>
      %453 = vector.shape_cast %452 : vector<1x10x2xi32> to vector<10x2xi32>
      %454 = vector.broadcast %450 : vector<1x2xi32> to vector<10x2xi32>
      %455 = arith.cmpi eq, %0, %454 : vector<10x2xi32>
      %c0_i32_227 = arith.constant 0 : i32
      %456 = vector.broadcast %c0_i32_227 : i32 to vector<10x2xi32>
      %457 = arith.select %455, %453, %456 : vector<10x2xi1>, vector<10x2xi32>
      %cst_228 = arith.constant dense<0> : vector<2xi32>
      %458 = vector.multi_reduction <add>, %457, %cst_228 [0] : vector<10x2xi32> to vector<2xi32>
      %459 = vector.shape_cast %458 : vector<2xi32> to vector<1x2xi32>
      %460 = arith.index_cast %449 : i32 to index
      %c0_229 = arith.constant 0 : index
      %461 = vector.load %arg4[%460, %c0_229] : memref<8x2xi32, #tpu.memory_space<vmem>>, vector<1x2xi32>
      tpu.vector_store %arg4[%460, %c0_229], %459 {strides = array<i32>} : memref<8x2xi32, #tpu.memory_space<vmem>>, vector<1x2xi32>,
      %c0_230 = arith.constant 0 : index
      %c0_231 = arith.constant 0 : index
      %462 = vector.load %arg8[%c0_230, %c0_231] : memref<1x2xi32, #tpu.memory_space<vmem>>, vector<1x2xi32>
      tpu.vector_store %arg8[%c0_230, %c0_231], %459 {strides = array<i32>} : memref<1x2xi32, #tpu.memory_space<vmem>>, vector<1x2xi32>,
      %c6_i32_232 = arith.constant 6 : i32
      %c7_i32_233 = arith.constant 7 : i32
      %463 = arith.subi %c7_i32_233, %c6_i32_232 : i32
      %c0_234 = arith.constant 0 : index
      %c0_235 = arith.constant 0 : index
      %464 = vector.load %arg8[%c0_234, %c0_235] : memref<1x2xi32, #tpu.memory_space<vmem>>, vector<1x2xi32>
      %465 = arith.index_cast %463 : i32 to index
      %c0_236 = arith.constant 0 : index
      %c0_237 = arith.constant 0 : index
      %466 = vector.load %arg7[%465, %c0_236, %c0_237] : memref<8x10x2xi32, #tpu.memory_space<vmem>>, vector<1x10x2xi32>
      %467 = vector.shape_cast %466 : vector<1x10x2xi32> to vector<10x2xi32>
      %468 = vector.broadcast %464 : vector<1x2xi32> to vector<10x2xi32>
      %469 = arith.cmpi eq, %0, %468 : vector<10x2xi32>
      %c0_i32_238 = arith.constant 0 : i32
      %470 = vector.broadcast %c0_i32_238 : i32 to vector<10x2xi32>
      %471 = arith.select %469, %467, %470 : vector<10x2xi1>, vector<10x2xi32>
      %cst_239 = arith.constant dense<0> : vector<2xi32>
      %472 = vector.multi_reduction <add>, %471, %cst_239 [0] : vector<10x2xi32> to vector<2xi32>
      %473 = vector.shape_cast %472 : vector<2xi32> to vector<1x2xi32>
      %474 = arith.index_cast %463 : i32 to index
      %c0_240 = arith.constant 0 : index
      %475 = vector.load %arg4[%474, %c0_240] : memref<8x2xi32, #tpu.memory_space<vmem>>, vector<1x2xi32>
      tpu.vector_store %arg4[%474, %c0_240], %473 {strides = array<i32>} : memref<8x2xi32, #tpu.memory_space<vmem>>, vector<1x2xi32>,
      %c0_241 = arith.constant 0 : index
      %c0_242 = arith.constant 0 : index
      %476 = vector.load %arg8[%c0_241, %c0_242] : memref<1x2xi32, #tpu.memory_space<vmem>>, vector<1x2xi32>
      tpu.vector_store %arg8[%c0_241, %c0_242], %473 {strides = array<i32>} : memref<1x2xi32, #tpu.memory_space<vmem>>, vector<1x2xi32>,
      %c7_i32_243 = arith.constant 7 : i32
      %c7_i32_244 = arith.constant 7 : i32
      %477 = arith.subi %c7_i32_244, %c7_i32_243 : i32
      %c0_245 = arith.constant 0 : index
      %c0_246 = arith.constant 0 : index
      %478 = vector.load %arg8[%c0_245, %c0_246] : memref<1x2xi32, #tpu.memory_space<vmem>>, vector<1x2xi32>
      %479 = arith.index_cast %477 : i32 to index
      %c0_247 = arith.constant 0 : index
      %c0_248 = arith.constant 0 : index
      %480 = vector.load %arg7[%479, %c0_247, %c0_248] : memref<8x10x2xi32, #tpu.memory_space<vmem>>, vector<1x10x2xi32>
      %481 = vector.shape_cast %480 : vector<1x10x2xi32> to vector<10x2xi32>
      %482 = vector.broadcast %478 : vector<1x2xi32> to vector<10x2xi32>
      %483 = arith.cmpi eq, %0, %482 : vector<10x2xi32>
      %c0_i32_249 = arith.constant 0 : i32
      %484 = vector.broadcast %c0_i32_249 : i32 to vector<10x2xi32>
      %485 = arith.select %483, %481, %484 : vector<10x2xi1>, vector<10x2xi32>
      %cst_250 = arith.constant dense<0> : vector<2xi32>
      %486 = vector.multi_reduction <add>, %485, %cst_250 [0] : vector<10x2xi32> to vector<2xi32>
      %487 = vector.shape_cast %486 : vector<2xi32> to vector<1x2xi32>
      %488 = arith.index_cast %477 : i32 to index
      %c0_251 = arith.constant 0 : index
      %489 = vector.load %arg4[%488, %c0_251] : memref<8x2xi32, #tpu.memory_space<vmem>>, vector<1x2xi32>
      tpu.vector_store %arg4[%488, %c0_251], %487 {strides = array<i32>} : memref<8x2xi32, #tpu.memory_space<vmem>>, vector<1x2xi32>,
      %c0_252 = arith.constant 0 : index
      %c0_253 = arith.constant 0 : index
      %490 = vector.load %arg8[%c0_252, %c0_253] : memref<1x2xi32, #tpu.memory_space<vmem>>, vector<1x2xi32>
      tpu.vector_store %arg8[%c0_252, %c0_253], %487 {strides = array<i32>} : memref<1x2xi32, #tpu.memory_space<vmem>>, vector<1x2xi32>,
      %c8_i32_254 = arith.constant 8 : i32
    } else {
    }
    return
  }
  func.func @transform_0(%arg0: i32, %arg1: i32) -> (i32, i32, i32, i32) {
    %c0_i32 = arith.constant 0 : i32
    %c0_i32_0 = arith.constant 0 : i32
    %c0_i32_1 = arith.constant 0 : i32
    return %arg1, %c0_i32, %c0_i32_0, %arg0 : i32, i32, i32, i32
  }
  func.func @transform_1(%arg0: i32, %arg1: i32) -> (i32, i32) {
    %c0_i32 = arith.constant 0 : i32
    %c0_i32_0 = arith.constant 0 : i32
    return %c0_i32, %arg0 : i32, i32
  }
  func.func @transform_2(%arg0: i32, %arg1: i32) -> (i32, i32) {
    %c0_i32 = arith.constant 0 : i32
    %c0_i32_0 = arith.constant 0 : i32
    return %c0_i32, %arg0 : i32, i32
  }
  func.func @transform_3(%arg0: i32, %arg1: i32) -> (i32, i32) {
    %c0_i32 = arith.constant 0 : i32
    %c0_i32_0 = arith.constant 0 : i32
    return %c0_i32, %arg0 : i32, i32
  }
  func.func @transform_4(%arg0: i32, %arg1: i32) -> (i32, i32) {
    %c0_i32 = arith.constant 0 : i32
    %c0_i32_0 = arith.constant 0 : i32
    return %c0_i32, %arg0 : i32, i32
  }
}

</mosaic_0001>

<bundles_post_ra>
// kernel: tpu_custom_call.1
= control target key start
LH: loop header
LB: loop body
LE: loop exit
PB: predicated region body
PF: predicated region fallthrough
CT: control target
= control target key end

     0   :  { %vm9068_vm0 = vcmask 15360   ;;  %v14_v0 = vlaneseq  ;;  %v4230_v1 = vmov -1e+30   ;;  %vm9044_vm2 = vcmask 9216   ;;  %s8934_s4 = inlined_call_operand.vmem [shape: f32[10,2], index: 4, kind: output, shape index: {2}]   ;;  %s8935_s3 = inlined_call_operand.vmem [shape: f32[10,2], index: 3, kind: output, shape index: {1}]   ;;  %s8936_s1 = inlined_call_operand.vmem [shape: s32[1,2], index: 1, kind: input, shape index: {}]   ;;  %s8937_s0 = inlined_call_operand.vmem [shape: f32[8,10,10,2], index: 0, kind: input, shape index: {}]   ;;  %s8938_s2 = inlined_call_operand.vmem [shape: s32[8,2], index: 2, kind: output, shape index: {0}]  }
   0x1   :  { %30 = vst.msk [vmem:[%s8934_s4] sm:$0xff] %vm9068_vm0, %v4230_v1  ;;  %v4266_v2 = vld [vmem:[%s8936_s1] sm:$0x1]  ;;  %v8939_v5 = vmov 0   ;;  %v4303_v14 = vld [vmem:[%s8937_s0 + $0x8] sm:$0x3] }
   0x2   :  { %9088 = vst [vmem:[#allocation4_spill] sm:$0xff] %v4266_v2  ;;  %v4272_v3 = vshrl.u32 %v14_v0, 7  ;;  %vm34_vm1 = vcmp.gt.s32.totalorder %v4266_v2, 0  ;;  %v4308_v15 = vld [vmem:[%s8937_s0 + $0x10] sm:$0xff]  ;;  %v4313_v16 = vld [vmem:[%s8937_s0 + $0x18] sm:$0x3] }
   0x3   :  { %27 = vst.msk [vmem:[%s8935_s3] sm:$0xff] %vm9068_vm0, %v4230_v1  ;;  %v4280_v6 = vsel %vm34_vm1, 1, %v8939_v5  ;;  %v4318_v17 = vld [vmem:[%s8937_s0 + $0x20] sm:$0xff]  ;;  %v4332_v23 = vld [vmem:[%s8937_s0 + $0x28] sm:$0x3]  ;;  %v4337_v24 = vld [vmem:[%s8937_s0 + $0x30] sm:$0xff] }
   0x4   :  { %9089 = vst [vmem:[#allocation5_spill] sm:$0xff] %v4272_v3  ;;  %v4276_v4 = vadd.s32 8, %v4272_v3  ;;  %v4327_v22 = vld [vmem:[%s8937_s0] sm:$0xff]  ;;  %v4342_v29 = vld [vmem:[%s8937_s0 + $0x38] sm:$0x3]  ;;  %v4360_v36 = vld [vmem:[%s8937_s0 + $0x50] sm:$0xff] }
   0x5   :  { %v4350_v34 = vld [vmem:[%s8937_s0 + $0x40] sm:$0xff]  ;;  %v4355_v35 = vld [vmem:[%s8937_s0 + $0x48] sm:$0x3]  ;;  %v4382_v42 = vld [vmem:[%s8937_s0 + $0x58] sm:$0x3]  ;;  %vm456_vm5 = vcmp.gt.s32.totalorder %v4266_v2, 1 }
   0x6   :  { %9090 = vst [vmem:[#allocation6_spill] sm:$0xff] %v4276_v4  ;;  %vm23_vm3 = vcmp.eq.s32.totalorder %v4276_v4, 8  ;;  %v4387_v43 = vld [vmem:[%s8937_s0 + $0x68] sm:$0x3]  ;;  %v4406_v50 = vld [vmem:[%s8937_s0 + $0x60] sm:$0xff]  ;;  %v4411_v51 = vld [vmem:[%s8937_s0 + $0x70] sm:$0xff] }
   0x7   :  { %v25_v7 = vsel %vm23_vm3, 0.0, %v4230_v1  ;;  %9096 = vst [vmem:[#allocation12_spill] sm:$0xff] %v4387_v43  ;;  %v4416_v52 = vld [vmem:[%s8937_s0 + $0x78] sm:$0x3]  ;;  %v4427_v55 = vld [vmem:[%s8937_s0 + $0x80] sm:$0xff]  ;;  %v4437_v57 = vld [vmem:[%s8937_s0 + $0x90] sm:$0xff] }
   0x8   :  { %29 = vst.msk [vmem:[%s8935_s3 + $0x8] sm:$0x3] %vm9044_vm2, %v25_v7  ;;  %v4432_v56 = vld [vmem:[%s8937_s0 + $0x88] sm:$0x3]  ;;  %v4510_v4 = vld [vmem:[%s8934_s4] sm:$0xff] }
   0x9   :  { %31 = vst.msk [vmem:[%s8934_s4 + $0x8] sm:$0x3] %vm9044_vm2, %v25_v7  ;;  %v4463_v7 = vld [vmem:[%s8937_s0 + $0x98] sm:$0x3] }
   0xa   :  { %v4293_v8 = vld [vmem:[%s8935_s3] sm:$0xff]  ;;  %9101 = vst [vmem:[#allocation17_spill] sm:$0xff] %v4416_v52 }
   0xb   :  { %v61_v10 = vrot.slane %v4293_v8, 1  ;;  %v62_v11 = vrot.slane %v4293_v8, 2  ;;  %v63_v12 = vrot.slane %v4293_v8, 3  ;;  %v64_v13 = vrot.slane %v4293_v8, 4  ;;  %9104 = vst [vmem:[#allocation20_spill] sm:$0xff] %v4432_v56 }
   0xc   :  { %v65_v18 = vrot.slane %v4293_v8, 5  ;;  %v66_v19 = vrot.slane %v4293_v8, 6  ;;  %v67_v20 = vrot.slane %v4293_v8, 7  ;;  %v69_v21 = vperm.slane %v4293_v8, 0  ;;  %9112 = vst [vmem:[#allocation28_spill] sm:$0xff] %v4463_v7 }
   0xd   :  { %v70_v25 = vperm.slane %v61_v10, 0  ;;  %v71_v26 = vperm.slane %v62_v11, 0  ;;  %v72_v27 = vperm.slane %v63_v12, 0  ;;  %v73_v28 = vperm.slane %v64_v13, 0 }
   0xe   :  { %v74_v30 = vperm.slane %v65_v18, 0  ;;  %v75_v31 = vperm.slane %v66_v19, 0  ;;  %v76_v32 = vperm.slane %v67_v20, 0  ;;  %v4345_v33 = vadd.f32 %v69_v21, %v4327_v22 }
   0xf   :  { %v4363_v37 = vadd.f32 %v69_v21, %v4303_v14  ;;  %v4366_v38 = vadd.f32 %v70_v25, %v4308_v15  ;;  %v4369_v39 = vadd.f32 %v70_v25, %v4313_v16  ;;  %v4372_v40 = vadd.f32 %v71_v26, %v4318_v17  ;;  %v4377_v41 = vld [vmem:[%s8935_s3 + $0x8] sm:$0x3] }
  0x10   :  { %9091 = vst [vmem:[#allocation7_spill] sm:$0xff] %v4345_v33  ;;  %v4390_v44 = vadd.f32 %v71_v26, %v4332_v23  ;;  %v4393_v45 = vadd.f32 %v72_v27, %v4337_v24  ;;  %v4396_v46 = vadd.f32 %v72_v27, %v4342_v29  ;;  %v4399_v47 = vadd.f32 %v73_v28, %v4350_v34 }
  0x11   :  { %9092 = vst [vmem:[#allocation8_spill] sm:$0xff] %v4363_v37  ;;  %v68_v48 = vrot.slane %v4377_v41, 1  ;;  %v77_v49 = vperm.slane %v4377_v41, 0  ;;  %v4419_v53 = vadd.f32 %v73_v28, %v4355_v35  ;;  %v4422_v54 = vadd.f32 %v74_v30, %v4360_v36 }
  0x12   :  { %9093 = vst [vmem:[#allocation9_spill] sm:$0xff] %v4366_v38  ;;  %v4440_v58 = vadd.f32 %v74_v30, %v4382_v42  ;;  %v4443_v59 = vadd.f32 %v75_v31, %v4406_v50  ;;  %v4446_v60 = vadd.f32 %v75_v31, %v4387_v43  ;;  %v4449_v61 = vadd.f32 %v76_v32, %v4411_v51 }
  0x13   :  { %9094 = vst [vmem:[#allocation10_spill] sm:$0xff] %v4369_v39  ;;  %v78_v62 = vperm.slane %v68_v48, 0  ;;  %v4452_v63 = vadd.f32 %v76_v32, %v4416_v52  ;;  %v4455_v0 = vadd.f32 %v77_v49, %v4427_v55  ;;  %v4458_v1 = vadd.f32 %v77_v49, %v4432_v56 }
  0x14   :  { %9095 = vst [vmem:[#allocation11_spill] sm:$0xff] %v4372_v40  ;;  %v110_v10 = vsel %vm9068_vm0, %v4345_v33, -inf  ;;  %v111_v11 = vsel %vm9068_vm0, %v4366_v38, -inf  ;;  %v112_v12 = vsel %vm9068_vm0, %v4372_v40, -inf  ;;  %v114_v13 = vsel %vm9068_vm0, %v4393_v45, -inf }
  0x15   :  { %9097 = vst [vmem:[#allocation13_spill] sm:$0xff] %v4390_v44  ;;  %v4474_v18 = vadd.f32 %v78_v62, %v4437_v57  ;;  %v4477_v19 = vadd.f32 %v78_v62, %v4463_v7  ;;  %v113_v20 = vmax.f32 %v110_v10, %v112_v12  ;;  %v115_v21 = vmax.f32 %v111_v11, %v114_v13 }
  0x16   :  { %9098 = vst [vmem:[#allocation14_spill] sm:$0xff] %v4393_v45  ;;  %v116_v25 = vsel %vm9068_vm0, %v4399_v47, -inf  ;;  %v118_v26 = vsel %vm9068_vm0, %v4422_v54, -inf  ;;  %v120_v27 = vsel %vm9068_vm0, %v4443_v59, -inf  ;;  %v122_v28 = vsel %vm9068_vm0, %v4449_v61, -inf }
  0x17   :  { %9099 = vst [vmem:[#allocation15_spill] sm:$0xff] %v4396_v46  ;;  %v117_v30 = vmax.f32 %v113_v20, %v116_v25  ;;  %v119_v31 = vmax.f32 %v115_v21, %v118_v26  ;;  %v124_v32 = vsel %vm9068_vm0, %v4455_v0, -inf  ;;  %v126_v48 = vsel %vm9068_vm0, %v4474_v18, -inf }
  0x18   :  { %9100 = vst [vmem:[#allocation16_spill] sm:$0xff] %v4399_v47  ;;  %v130_v49 = vsel %vm9044_vm2, %v4363_v37, -inf  ;;  %v131_v62 = vsel %vm9044_vm2, %v4369_v39, -inf  ;;  %v132_v10 = vsel %vm9044_vm2, %v4390_v44, -inf  ;;  %v134_v11 = vsel %vm9044_vm2, %v4396_v46, -inf  ;;  %v3600_v39 = vld [vmem:[%s8937_s0 + $0x120] sm:$0xff] }
  0x19   :  { %9102 = vst [vmem:[#allocation18_spill] sm:$0xff] %v4419_v53  ;;  %v121_v12 = vmax.f32 %v117_v30, %v120_v27  ;;  %v123_v13 = vmax.f32 %v119_v31, %v122_v28  ;;  %v133_v20 = vmax.f32 %v130_v49, %v132_v10  ;;  %v135_v21 = vmax.f32 %v131_v62, %v134_v11  ;;  %v3601_v37 = vld [vmem:[%s8937_s0 + $0x128] sm:$0x3]  ;;  %v3592_v47 = vld [vmem:[%s8937_s0 + $0xe0] sm:$0xff] }
  0x1a   :  { %9103 = vst [vmem:[#allocation19_spill] sm:$0xff] %v4422_v54  ;;  %v136_v25 = vsel %vm9044_vm2, %v4419_v53, -inf  ;;  %v138_v26 = vsel %vm9044_vm2, %v4440_v58, -inf  ;;  %v140_v5 = vsel %vm9044_vm2, %v4446_v60, -inf  ;;  %v142_v9 = vsel %vm9044_vm2, %v4452_v63, -inf }
  0x1b   :  { %9105 = vst [vmem:[#allocation21_spill] sm:$0xff] %v4440_v58  ;;  %v125_v27 = vmax.f32 %v121_v12, %v124_v32  ;;  %v127_v28 = vmax.f32 %v123_v13, %v126_v48  ;;  %v137_v30 = vmax.f32 %v133_v20, %v136_v25  ;;  %v139_v31 = vmax.f32 %v135_v21, %v138_v26  ;;  %v4526_v32 = vld [vmem:[%s8934_s4 + $0x8] sm:$0x3]  ;;  %v3591_v54 = vld [vmem:[%s8937_s0 + $0xd8] sm:$0x3] }
  0x1c   :  { %9106 = vst [vmem:[#allocation22_spill] sm:$0xff] %v4443_v59  ;;  %v144_v49 = vsel %vm9044_vm2, %v4458_v1, -inf  ;;  %v146_v62 = vsel %vm9044_vm2, %v4477_v19, -inf  ;;  %v9115_v10 = vperm.slane %v4280_v6, 0  ;;  %v9116_v11 = vmov 0 }
  0x1d   :  { %9107 = vst [vmem:[#allocation23_spill] sm:$0xff] %v4446_v60  ;;  %v4528_v48 = vmax.f32 %v125_v27, %v127_v28  ;;  %v141_v12 = vmax.f32 %v137_v30, %v140_v5  ;;  %v143_v13 = vmax.f32 %v139_v31, %v142_v9  ;;  %v247_v20 = vrot.slane %v4510_v4, 1  ;;  %v3590_v60 = vld [vmem:[%s8937_s0 + $0xd0] sm:$0xff] }
  0x1e   :  { %9108 = vst [vmem:[#allocation24_spill] sm:$0xff] %v4449_v61  ;;  %vm4518_vm4 = vcmp.eq.s32.totalorder %v9115_v10, 1  ;;  %v9121_v21 = vmov 0   ;;  %v248_v6 = vrot.slane %v4510_v4, 2  ;;  %v249_v26 = vrot.slane %v4510_v4, 3 }
  0x1f   :  { %9109 = vst [vmem:[#allocation25_spill] sm:$0xff] %v4452_v63  ;;  %v9117_v11 = vsel %vm4518_vm4, 4294967295, %v9116_v11  ;;  %v4532_v25 = vsel %vm456_vm5, 1, %v9121_v21  ;;  %v250_v10 = vrot.slane %v4510_v4, 4  ;;  %v145_v3 = vmax.f32 %v141_v12, %v144_v49  ;;  %v3588_v63 = vld [vmem:[%s8937_s0 + $0xc0] sm:$0xff] }
  0x20   :  { %9110 = vst [vmem:[#allocation26_spill] sm:$0xff] %v4455_v0  ;;  %v446_v27 = vsel %vm4518_vm4, %v4528_v48, %v4293_v8  ;;  %v251_v5 = vrot.slane %v4510_v4, 5  ;;  %v252_v9 = vrot.slane %v4510_v4, 6  ;;  %v253_v28 = vrot.slane %v4510_v4, 7 }
  0x21   :  { %9111 = vst [vmem:[#allocation27_spill] sm:$0xff] %v4458_v1  ;;  %v254_v30 = vrot.slane %v4526_v32, 1  ;;  %v4553_v8 = vperm.slane %v247_v20, 0  ;;  %v4555_v12 = vperm.slane %v248_v6, 0  ;;  %v4559_v1 = vperm.slane %v250_v10, 0 }
  0x22   :  { %9113 = vst [vmem:[#allocation29_spill] sm:$0xff] %v4474_v18  ;;  %v4569_v49 = vperm.slane %v253_v28, 0  ;;  %v8947_v20 = vperm.slane %v4526_v32, 0  ;;  %v3585_v28 = vld [vmem:[%s8937_s0 + $0xa8] sm:$0x3] }
  0x23   :  { %9114 = vst [vmem:[#allocation30_spill] sm:$0xff] %v4477_v19  ;;  %v147_v19 = vmax.f32 %v143_v13, %v146_v62  ;;  %v8948_v62 = vperm.slane %v4510_v4, 0  ;;  %v4557_v13 = vperm.slane %v249_v26, 0  ;;  %v4576_v6 = vperm.slane %v254_v30, 0 }
  0x24   :  { %9118 = vst [vmem:[#allocation31_spill] sm:$0xff] %v9117_v11  ;;  %v4589_v10 = vadd.f32 %v4555_v12, %v4318_v17  ;;  %v3584_v17 = vld [vmem:[%s8937_s0 + $0xa0] sm:$0xff]  ;;  %v3594_v11 = vld [vmem:[%s8937_s0 + $0xf0] sm:$0xff] }
  0x25   :  { %9119 = vst [vmem:[#allocation32_spill] sm:$0xff] %v4526_v32  ;;  %v4549_v31 = vmax.f32 %v145_v3, %v147_v19  ;;  %v4567_v19 = vperm.slane %v252_v9, 0  ;;  %v4581_v26 = vadd.f32 %v8948_v62, %v4327_v22  ;;  %v4597_v9 = vadd.f32 %v4559_v1, %v4350_v34  ;;  %v3587_v62 = vld [vmem:[%s8937_s0 + $0xb8] sm:$0x3] }
  0x26   :  { %9120 = vst [vmem:[#allocation33_spill] sm:$0xff] %v4528_v48  ;;  %v4617_v34 = vadd.f32 %v8947_v20, %v4427_v55  ;;  %v4644_v30 = vsel %vm9068_vm0, %v4589_v10, -inf  ;;  %v3602_v48 = vld [vmem:[%s8937_s0 + $0x130] sm:$0xff]  ;;  %v3595_v32 = vld [vmem:[%s8937_s0 + $0xf8] sm:$0x3] }
  0x27   :  { %448 = vst.msk [vmem:[%s8935_s3] sm:$0xff] %vm9068_vm0, %v446_v27  ;;  %v4561_v27 = vperm.slane %v251_v5, 0  ;;  %v447_v3 = vsel %vm4518_vm4, %v4549_v31, %v4377_v41  ;;  %v4585_v41 = vadd.f32 %v4553_v8, %v4308_v15  ;;  %v4593_v5 = vadd.f32 %v4557_v13, %v4337_v24 }
  0x28   :  { %9122 = vst [vmem:[#allocation34_spill] sm:$0xff] %v4549_v31  ;;  %v4605_v15 = vadd.f32 %v4567_v19, %v4406_v50  ;;  %v4612_v24 = vadd.f32 %v4569_v49, %v4411_v51  ;;  %v4625_v50 = vsel %vm9068_vm0, %v4581_v26, -inf  ;;  %v3586_v51 = vld [vmem:[%s8937_s0 + $0xb0] sm:$0xff]  ;;  %v4652_v20 = vsel %vm9068_vm0, %v4597_v9, -inf  ;;  %v3589_v31 = vld [vmem:[%s8937_s0 + $0xc8] sm:$0x3] }
  0x29   :  { %9123 = vst [vmem:[#allocation35_spill] sm:$0xff] %v4567_v19  ;;  %v4601_v22 = vadd.f32 %v4561_v27, %v4360_v36  ;;  %v4621_v36 = vadd.f32 %v4576_v6, %v4437_v57  ;;  %v4640_v57 = vsel %vm9068_vm0, %v4585_v41, -inf }
  0x2a   :  { %9124 = vst [vmem:[#allocation36_spill] sm:$0xff] %v4569_v49 }
  0x2b   :  { %449 = vst.msk [vmem:[%s8935_s3 + $0x8] sm:$0x3] %vm9044_vm2, %v447_v3  ;;  %v4648_v3 = vsel %vm9068_vm0, %v4593_v5, -inf }
  0x2c   :  { %9125 = vst [vmem:[#allocation37_spill] sm:$0xff] %v4576_v6 }
  0x2d   :  { %9126 = vst [vmem:[#allocation38_spill] sm:$0xff] %v4593_v5 }
  0x2e   :  { %9127 = vst [vmem:[#allocation39_spill] sm:$0xff] %v4597_v9  ;;  %v4636_v55 = vld [vmem:[%s8935_s3] sm:$0xff]  ;;  %v3598_v9 = vld [vmem:[%s8937_s0 + $0x110] sm:$0xff] }
  0x2f   :  { %v484_v58 = vrot.slane %v4636_v55, 1  ;;  %v485_v53 = vrot.slane %v4636_v55, 2  ;;  %v486_v46 = vrot.slane %v4636_v55, 3  ;;  %v487_v44 = vrot.slane %v4636_v55, 4 }
  0x30   :  { %v488_v18 = vrot.slane %v4636_v55, 5  ;;  %v489_v0 = vrot.slane %v4636_v55, 6  ;;  %v490_v61 = vrot.slane %v4636_v55, 7  ;;  %v492_v59 = vperm.slane %v4636_v55, 0 }
  0x31   :  { %v493_v45 = vperm.slane %v484_v58, 0  ;;  %v494_v40 = vperm.slane %v485_v53, 0  ;;  %v495_v38 = vperm.slane %v486_v46, 0  ;;  %v496_v33 = vperm.slane %v487_v44, 0  ;;  %v3593_v53 = vld [vmem:[%s8937_s0 + $0xe8] sm:$0x3] }
  0x32   :  { %v4692_v21 = vld [vmem:[%s8935_s3 + $0x8] sm:$0x3]  ;;  %v497_v2 = vperm.slane %v488_v18, 0  ;;  %v498_v6 = vperm.slane %v489_v0, 0  ;;  %v499_v7 = vperm.slane %v490_v61, 0  ;;  %v4697_v58 = vadd.f32 %v3584_v17, %v492_v59  ;;  %v3596_v0 = vld [vmem:[%s8937_s0 + $0x100] sm:$0xff] }
  0x33   :  { %v491_v44 = vrot.slane %v4692_v21, 1  ;;  %v500_v46 = vperm.slane %v4692_v21, 0  ;;  %v4707_v56 = vadd.f32 %v3585_v28, %v492_v59  ;;  %v4709_v49 = vadd.f32 %v3586_v51, %v493_v45  ;;  %v3603_v61 = vld [vmem:[%s8937_s0 + $0x138] sm:$0x3]  ;;  %v3597_v18 = vld [vmem:[%s8937_s0 + $0x108] sm:$0x3] }
  0x34   :  { %v4720_v17 = vadd.f32 %v3587_v62, %v493_v45  ;;  %v4722_v52 = vadd.f32 %v3588_v63, %v494_v40  ;;  %v4724_v59 = vadd.f32 %v3589_v31, %v494_v40  ;;  %v4726_v28 = vadd.f32 %v3590_v60, %v495_v38  ;;  %v3599_v45 = vld [vmem:[%s8937_s0 + $0x118] sm:$0x3] }
  0x35   :  { %9128 = vst [vmem:[#allocation40_spill] sm:$0xff] %v4707_v56  ;;  %v501_v51 = vperm.slane %v491_v44, 0  ;;  %v4728_v19 = vadd.f32 %v3600_v39, %v500_v46  ;;  %v4730_v43 = vadd.f32 %v3601_v37, %v500_v46  ;;  %v4738_v62 = vadd.f32 %v3591_v54, %v495_v38 }
  0x36   :  { %v4740_v63 = vadd.f32 %v3592_v47, %v496_v33  ;;  %v4742_v40 = vadd.f32 %v3593_v53, %v496_v33  ;;  %v4744_v60 = vadd.f32 %v3594_v11, %v497_v2  ;;  %v4746_v39 = vadd.f32 %v3595_v32, %v497_v2 }
  0x37   :  { %9129 = vst [vmem:[#allocation41_spill] sm:$0xff] %v4728_v19  ;;  %v4748_v37 = vadd.f32 %v3602_v48, %v501_v51  ;;  %v4750_v31 = vadd.f32 %v3603_v61, %v501_v51  ;;  %v4752_v44 = vadd.f32 %v3596_v0, %v498_v6  ;;  %v4754_v46 = vadd.f32 %v3597_v18, %v498_v6 }
  0x38   :  { %v4756_v5 = vadd.f32 %v3598_v9, %v499_v7  ;;  %v4758_v38 = vadd.f32 %v3599_v45, %v499_v7  ;;  %v532_v33 = vsel %vm9068_vm0, %v4697_v58, -inf  ;;  %v533_v47 = vsel %vm9068_vm0, %v4709_v49, -inf }
  0x39   :  { %9130 = vst [vmem:[#allocation42_spill] sm:$0xff] %v4748_v37  ;;  %v534_v2 = vsel %vm9068_vm0, %v4722_v52, -inf  ;;  %v536_v54 = vsel %vm9068_vm0, %v4726_v28, -inf  ;;  %v538_v11 = vsel %vm9068_vm0, %v4740_v63, -inf  ;;  %v540_v32 = vsel %vm9068_vm0, %v4744_v60, -inf }
  0x3a   :  { %9131 = vst [vmem:[#allocation43_spill] sm:$0xff] %v4750_v31  ;;  %v9133_v7 = vperm.slane %v4532_v25, 0  ;;  %v9134_v48 = vmov 0  ;;  %v535_v6 = vmax.f32 %v532_v33, %v534_v2  ;;  %v537_v9 = vmax.f32 %v533_v47, %v536_v54 }
  0x3b   :  { %9132 = vst [vmem:[#allocation44_spill] sm:$0xff] %v4756_v5  ;;  %v542_v53 = vsel %vm9068_vm0, %v4752_v44, -inf  ;;  %v544_v61 = vsel %vm9068_vm0, %v4756_v5, -inf  ;;  %v546_v0 = vsel %vm9068_vm0, %v4728_v19, -inf  ;;  %v548_v18 = vsel %vm9068_vm0, %v4748_v37, -inf }
  0x3c   :  { %vm4774_vm6 = vcmp.eq.s32.totalorder %v9133_v7, 1  ;;  %v551_v25 = vsel %vm9044_vm2, %v4707_v56, -inf  ;;  %v552_v51 = vsel %vm9044_vm2, %v4720_v17, -inf  ;;  %v539_v45 = vmax.f32 %v535_v6, %v538_v11 }
  0x3d   :  { %v9135_v48 = vsel %vm4774_vm6, 4294967295, %v9134_v48  ;;  %v541_v33 = vmax.f32 %v537_v9, %v540_v32  ;;  %v553_v47 = vsel %vm9044_vm2, %v4724_v59, -inf  ;;  %v555_v2 = vsel %vm9044_vm2, %v4738_v62, -inf }
  0x3e   :  { %9136 = vst [vmem:[#allocation45_spill] sm:$0xff] %v9135_v48  ;;  %v554_v54 = vmax.f32 %v551_v25, %v553_v47  ;;  %v556_v7 = vmax.f32 %v552_v51, %v555_v2  ;;  %v557_v19 = vsel %vm9044_vm2, %v4742_v40, -inf  ;;  %v559_v37 = vsel %vm9044_vm2, %v4746_v39, -inf }
  0x3f   :  { %v543_v56 = vmax.f32 %v539_v45, %v542_v53  ;;  %v545_v5 = vmax.f32 %v541_v33, %v544_v61  ;;  %v561_v11 = vsel %vm9044_vm2, %v4754_v46, -inf  ;;  %v563_v32 = vsel %vm9044_vm2, %v4758_v38, -inf }
  0x40   :  { %v558_v6 = vmax.f32 %v554_v54, %v557_v19  ;;  %v560_v9 = vmax.f32 %v556_v7, %v559_v37  ;;  %v565_v25 = vsel %vm9044_vm2, %v4730_v43, -inf  ;;  %v567_v51 = vsel %vm9044_vm2, %v4750_v31, -inf }
  0x41   :  { %v547_v47 = vmax.f32 %v543_v56, %v546_v0  ;;  %v549_v2 = vmax.f32 %v545_v5, %v548_v18  ;;  %v298_v53 = vmax.f32 %v4625_v50, %v4644_v30  ;;  %v300_v61 = vmax.f32 %v4640_v57, %v4648_v3 }
  0x42   :  { %v562_v45 = vmax.f32 %v558_v6, %v561_v11  ;;  %v564_v33 = vmax.f32 %v560_v9, %v563_v32  ;;  %v303_v19 = vsel %vm9068_vm0, %v4601_v22, -inf  ;;  %v305_v37 = vsel %vm9068_vm0, %v4605_v15, -inf }
  0x43   :  { %v4814_v54 = vmax.f32 %v547_v47, %v549_v2  ;;  %v302_v7 = vmax.f32 %v298_v53, %v4652_v20  ;;  %v304_v56 = vmax.f32 %v300_v61, %v303_v19  ;;  %v307_v5 = vsel %vm9068_vm0, %v4612_v24, -inf }
  0x44   :  { %v566_v50 = vmax.f32 %v562_v45, %v565_v25  ;;  %v568_v30 = vmax.f32 %v564_v33, %v567_v51  ;;  %v309_v57 = vsel %vm9068_vm0, %v4617_v34, -inf  ;;  %v311_v3 = vsel %vm9068_vm0, %v4621_v36, -inf }
  0x45   :  { %v867_v0 = vsel %vm4774_vm6, %v4814_v54, %v4636_v55  ;;  %v306_v18 = vmax.f32 %v302_v7, %v305_v37  ;;  %v308_v11 = vmax.f32 %v304_v56, %v307_v5  ;;  %v9137_v32 = vperm.slane %v4510_v4, 0  ;;  %v9140_v56 = vld [vmem:[#allocation12_spill] sm:$0xff]  ;;  %v9141_v5 = vld [vmem:[#allocation35_spill] sm:$0xff] }
  0x46   :  { %v4827_v20 = vmax.f32 %v566_v50, %v568_v30  ;;  %869 = vst.msk [vmem:[%s8935_s3] sm:$0xff] %vm9068_vm0, %v867_v0  ;;  %v4840_v9 = vadd.f32 %v4555_v12, %v4332_v23  ;;  %v4848_v47 = vadd.f32 %v4553_v8, %v4313_v16  ;;  %v4852_v2 = vadd.f32 %v4557_v13, %v4342_v29  ;;  %v9142_v30 = vld [vmem:[#allocation17_spill] sm:$0xff] }
  0x47   :  { %v4836_v6 = vadd.f32 %v9137_v32, %v4303_v14  ;;  %v310_v25 = vmax.f32 %v306_v18, %v309_v57  ;;  %v312_v55 = vmax.f32 %v308_v11, %v311_v3  ;;  %v4862_v23 = vadd.f32 %v4559_v1, %v4355_v35  ;;  %v9138_v1 = vld [vmem:[#allocation38_spill] sm:$0xff]  ;;  %v9143_v57 = vld [vmem:[#allocation36_spill] sm:$0xff] }
  0x48   :  { %v868_v51 = vsel %vm4774_vm6, %v4827_v20, %v4692_v21  ;;  %v4866_v21 = vadd.f32 %v4561_v27, %v4382_v42  ;;  %v316_v29 = vsel %vm9044_vm2, %v4840_v9, -inf  ;;  %v9139_v42 = vld [vmem:[#allocation39_spill] sm:$0xff]  ;;  %v315_v53 = vsel %vm9044_vm2, %v4848_v47, -inf  ;;  %v9144_v18 = vld [vmem:[#allocation20_spill] sm:$0xff] }
  0x49   :  { %870 = vst.msk [vmem:[%s8935_s3 + $0x8] sm:$0x3] %vm9044_vm2, %v868_v51  ;;  %v4858_v14 = vmax.f32 %v310_v25, %v312_v55  ;;  %v314_v16 = vsel %vm9044_vm2, %v4836_v6, -inf  ;;  %v318_v61 = vsel %vm9044_vm2, %v4852_v2, -inf  ;;  %v4894_v50 = vadd.f32 %v9141_v5, %v9140_v56  ;;  %v9145_v11 = vld [vmem:[#allocation32_spill] sm:$0xff] }
  0x4a   :  { %v317_v7 = vmax.f32 %v314_v16, %v316_v29  ;;  %v4898_v3 = vadd.f32 %v9143_v57, %v9142_v30  ;;  %v319_v25 = vmax.f32 %v315_v53, %v318_v61 }
  0x4b   :  { %v333_v8 = vsub.f32 %v4581_v26, %v4858_v14  ;;  %v335_v12 = vsub.f32 %v4585_v41, %v4858_v14  ;;  %v337_v35 = vsub.f32 %v4589_v10, %v4858_v14  ;;  %v339_v13 = vsub.f32 %v9138_v1, %v4858_v14 }
  0x4c   :  { %v341_v27 = vsub.f32 %v9139_v42, %v4858_v14  ;;  %v343_v26 = vsub.f32 %v4601_v22, %v4858_v14  ;;  %v320_v10 = vsel %vm9044_vm2, %v4862_v23, -inf  ;;  %v345_v33 = vsub.f32 %v4605_v15, %v4858_v14 }
  0x4d   :  { %v353_v45 = vmul.f32 1.442695, %v333_v8  ;;  %v357_v41 = vmul.f32 1.442695, %v335_v12  ;;  %v361_v19 = vmul.f32 1.442695, %v337_v35  ;;  %v347_v55 = vsub.f32 %v4612_v24, %v4858_v14 }
  0x4e   :  { %v365_v37 = vmul.f32 1.442695, %v339_v13  ;;  %v322_v22 = vsel %vm9044_vm2, %v4866_v21, -inf  ;;  %v369_v0 = vmul.f32 1.442695, %v341_v27  ;;  %v9146_v15 = vperm.slane %v9145_v11, 0 }
  0x4f   :  { %3735 = vpow2.f32 %v353_v45  ;;  %v373_v51 = vmul.f32 1.442695, %v343_v26  ;;  %v321_v16 = vmax.f32 %v317_v7, %v320_v10  ;;  %v377_v29 = vmul.f32 1.442695, %v345_v33  ;;  %v9147_v8 = vld [vmem:[#allocation28_spill] sm:$0xff]  ;;  %v9148_v12 = vld [vmem:[#allocation37_spill] sm:$0xff] }
  0x50   :  { %3737 = vpow2.f32 %v357_v41  ;;  %v4905_v32 = vadd.f32 %v9146_v15, %v9144_v18  ;;  %v4911_v35 = vadd.f32 %v9148_v12, %v9147_v8  ;;  %v323_v1 = vmax.f32 %v319_v25, %v322_v22 }
  0x51   :  { %3739 = vpow2.f32 %v361_v19  ;;  %v349_v13 = vsub.f32 %v4617_v34, %v4858_v14  ;;  %v324_v42 = vsel %vm9044_vm2, %v4894_v50, -inf  ;;  %v326_v27 = vsel %vm9044_vm2, %v4898_v3, -inf }
  0x52   :  { %3741 = vpow2.f32 %v365_v37  ;;  %v325_v24 = vmax.f32 %v321_v16, %v324_v42  ;;  %v327_v53 = vmax.f32 %v323_v1, %v326_v27  ;;  %v328_v61 = vsel %vm9044_vm2, %v4905_v32, -inf }
  0x53   :  { %3743 = vpow2.f32 %v369_v0  ;;  %v351_v45 = vsub.f32 %v4621_v36, %v4858_v14  ;;  %v381_v41 = vmul.f32 1.442695, %v347_v55  ;;  %v330_v19 = vsel %vm9044_vm2, %v4911_v35, -inf  ;;  %v4933_v55 = vld [vmem:[%s8935_s3 + $0x8] sm:$0x3] }
  0x54   :  { %3745 = vpow2.f32 %v373_v51  ;;  %v329_v33 = vmax.f32 %v325_v24, %v328_v61  ;;  %v385_v7 = vmul.f32 1.442695, %v349_v13  ;;  %v331_v57 = vmax.f32 %v327_v53, %v330_v19 }
  0x55   :  { %v3736_v26 = vpop.eup %3735  ;;  %3747 = vpow2.f32 %v377_v29  ;;  %v389_v0 = vmul.f32 1.442695, %v351_v45  ;;  %v912_v24 = vrot.slane %v4933_v55, 1 }
  0x56   :  { %v3738_v10 = vpop.eup %3737  ;;  %v393_v34 = vsel %vm9068_vm0, %v3736_v26, 0.0  ;;  %3749 = vpow2.f32 %v381_v41  ;;  %v4928_v15 = vmax.f32 %v329_v33, %v331_v57 }
  0x57   :  { %v3740_v37 = vpop.eup %3739  ;;  %v394_v56 = vsel %vm9068_vm0, %v3738_v10, 0.0  ;;  %3751 = vpow2.f32 %v385_v7  ;;  %v922_v57 = vperm.slane %v912_v24, 0 }
  0x58   :  { %v3742_v5 = vpop.eup %3741  ;;  %v395_v30 = vadd.f32 %v394_v56, %v393_v34  ;;  %v396_v22 = vsel %vm9068_vm0, %v3740_v37, 0.0  ;;  %v334_v8 = vsub.f32 %v4836_v6, %v4928_v15  ;;  %v336_v12 = vsub.f32 %v4848_v47, %v4928_v15 }
  0x59   :  { %v3744_v36 = vpop.eup %3743  ;;  %v398_v51 = vsel %vm9068_vm0, %v3742_v5, 0.0  ;;  %v338_v1 = vsub.f32 %v4840_v9, %v4928_v15  ;;  %v340_v42 = vsub.f32 %v4852_v2, %v4928_v15  ;;  %v342_v27 = vsub.f32 %v4862_v23, %v4928_v15 }
  0x5a   :  { %v397_v18 = vadd.f32 %v396_v22, %v395_v30  ;;  %v3746_v25 = vpop.eup %3745  ;;  %v400_v13 = vsel %vm9068_vm0, %v3744_v36, 0.0  ;;  %3753 = vpow2.f32 %v389_v0  ;;  %v344_v6 = vsub.f32 %v4866_v21, %v4928_v15  ;;  %v3622_v0 = vld [vmem:[%s8937_s0 + $0x1d0] sm:$0xff] }
  0x5b   :  { %v3748_v16 = vpop.eup %3747  ;;  %v402_v47 = vsel %vm9068_vm0, %v3746_v25, 0.0  ;;  %v346_v9 = vsub.f32 %v4894_v50, %v4928_v15  ;;  %v355_v26 = vmul.f32 1.442695, %v334_v8  ;;  %v348_v23 = vsub.f32 %v4898_v3, %v4928_v15 }
  0x5c   :  { %v399_v29 = vadd.f32 %v398_v51, %v397_v18  ;;  %v404_v61 = vsel %vm9068_vm0, %v3748_v16, 0.0  ;;  %v3750_v45 = vpop.eup %3749  ;;  %v359_v41 = vmul.f32 1.442695, %v336_v12  ;;  %v363_v10 = vmul.f32 1.442695, %v338_v1 }
  0x5d   :  { %v3752_v34 = vpop.eup %3751  ;;  %v350_v33 = vsub.f32 %v4905_v32, %v4928_v15  ;;  %3755 = vpow2.f32 %v355_v26  ;;  %v367_v21 = vmul.f32 1.442695, %v340_v42  ;;  %v371_v19 = vmul.f32 1.442695, %v342_v27  ;;  %v3620_v32 = vld [vmem:[%s8937_s0 + $0x1c0] sm:$0xff] }
  0x5e   :  { %v401_v53 = vadd.f32 %v400_v13, %v399_v29  ;;  %v921_v37 = vperm.slane %v4933_v55, 0  ;;  %3757 = vpow2.f32 %v359_v41  ;;  %v375_v50 = vmul.f32 1.442695, %v344_v6  ;;  %v3621_v26 = vld [vmem:[%s8937_s0 + $0x1c8] sm:$0x3] }
  0x5f   :  { %v406_v56 = vsel %vm9068_vm0, %v3750_v45, 0.0  ;;  %v352_v5 = vsub.f32 %v4911_v35, %v4928_v15  ;;  %3759 = vpow2.f32 %v363_v10  ;;  %v379_v3 = vmul.f32 1.442695, %v346_v9 }
  0x60   :  { %v403_v2 = vadd.f32 %v402_v47, %v401_v53  ;;  %v3754_v30 = vpop.eup %3753  ;;  %3761 = vpow2.f32 %v367_v21  ;;  %v383_v36 = vmul.f32 1.442695, %v348_v23  ;;  %v408_v18 = vsel %vm9068_vm0, %v3752_v34, 0.0  ;;  %v4979_v53 = vld [vmem:[%s8935_s3] sm:$0xff]  ;;  %v3623_v23 = vld [vmem:[%s8937_s0 + $0x1d8] sm:$0x3] }
  0x61   :  { %3763 = vpow2.f32 %v371_v19  ;;  %v387_v25 = vmul.f32 1.442695, %v350_v33  ;;  %v4969_v16 = vadd.f32 %v3620_v32, %v921_v37  ;;  %v410_v29 = vsel %vm9068_vm0, %v3754_v30, 0.0  ;;  %v3604_v32 = vld [vmem:[%s8937_s0 + $0x140] sm:$0xff] }
  0x62   :  { %v405_v7 = vadd.f32 %v404_v61, %v403_v2  ;;  %3765 = vpow2.f32 %v375_v50  ;;  %v391_v8 = vmul.f32 1.442695, %v352_v5  ;;  %v4972_v1 = vadd.f32 %v3622_v0, %v922_v57 }
  0x63   :  { %v3756_v51 = vpop.eup %3755  ;;  %9149 = vst [vmem:[#allocation38_spill] sm:$0xff] %v4969_v16  ;;  %3767 = vpow2.f32 %v379_v3  ;;  %v905_v61 = vrot.slane %v4979_v53, 1  ;;  %v4991_v41 = vsel %vm9068_vm0, %v4969_v16, -inf  ;;  %v906_v19 = vrot.slane %v4979_v53, 2 }
  0x64   :  { %v407_v22 = vadd.f32 %v406_v56, %v405_v7  ;;  %v3758_v12 = vpop.eup %3757  ;;  %9150 = vst [vmem:[#allocation39_spill] sm:$0xff] %v4972_v1  ;;  %3769 = vpow2.f32 %v383_v36  ;;  %v412_v42 = vsel %vm9044_vm2, %v3756_v51, 0.0  ;;  %v4995_v10 = vsel %vm9068_vm0, %v4972_v1, -inf  ;;  %v9155_v1 = vld [vmem:[#allocation4_spill] sm:$0xff] }
  0x65   :  { %v3760_v27 = vpop.eup %3759  ;;  %3771 = vpow2.f32 %v387_v25  ;;  %v413_v24 = vsel %vm9044_vm2, %v3758_v12, 0.0  ;;  %v907_v7 = vrot.slane %v4979_v53, 3  ;;  %v913_v50 = vperm.slane %v4979_v53, 0  ;;  %v3607_v12 = vld [vmem:[%s8937_s0 + $0x158] sm:$0x3] }
  0x66   :  { %v409_v35 = vadd.f32 %v408_v18, %v407_v22  ;;  %v3762_v6 = vpop.eup %3761  ;;  %v414_v47 = vadd.f32 %v413_v24, %v412_v42  ;;  %v415_v45 = vsel %vm9044_vm2, %v3760_v27, 0.0  ;;  %v914_v56 = vperm.slane %v905_v61, 0  ;;  %v3606_v22 = vld [vmem:[%s8937_s0 + $0x150] sm:$0xff] }
  0x67   :  { %v3764_v9 = vpop.eup %3763  ;;  %v417_v33 = vsel %vm9044_vm2, %v3762_v6, 0.0  ;;  %v908_v36 = vrot.slane %v4979_v53, 4  ;;  %v909_v0 = vrot.slane %v4979_v53, 5  ;;  %v5010_v25 = vadd.f32 %v3621_v26, %v921_v37  ;;  %v3608_v37 = vld [vmem:[%s8937_s0 + $0x160] sm:$0xff]  ;;  %v3610_v26 = vld [vmem:[%s8937_s0 + $0x170] sm:$0xff] }
  0x68   :  { %v411_v13 = vadd.f32 %v410_v29, %v409_v35  ;;  %v3766_v2 = vpop.eup %3765  ;;  %v416_v34 = vadd.f32 %v415_v45, %v414_v47  ;;  %v419_v30 = vsel %vm9044_vm2, %v3764_v9, 0.0  ;;  %v5012_v35 = vadd.f32 %v3623_v23, %v922_v57  ;;  %v3609_v9 = vld [vmem:[%s8937_s0 + $0x168] sm:$0x3] }
  0x69   :  { %v3768_v21 = vpop.eup %3767  ;;  %9151 = vst [vmem:[#allocation12_spill] sm:$0xff] %v5010_v25  ;;  %v421_v51 = vsel %vm9044_vm2, %v3766_v2, 0.0  ;;  %v910_v57 = vrot.slane %v4979_v53, 6  ;;  %v911_v24 = vrot.slane %v4979_v53, 7  ;;  %v5035_v45 = vadd.f32 %v3604_v32, %v913_v50 }
  0x6a   :  { %3773 = vlog2.f32 %v411_v13  ;;  %v3770_v5 = vpop.eup %3769  ;;  %v418_v3 = vadd.f32 %v417_v33, %v416_v34  ;;  %9152 = vst [vmem:[#allocation35_spill] sm:$0xff] %v5012_v35  ;;  %v423_v29 = vsel %vm9044_vm2, %v3768_v21, 0.0  ;;  %v5037_v2 = vadd.f32 %v3606_v22, %v914_v56  ;;  %v3611_v33 = vld [vmem:[%s8937_s0 + $0x178] sm:$0x3]  ;;  %v3612_v21 = vld [vmem:[%s8937_s0 + $0x180] sm:$0xff]  ;;  %v3614_v22 = vld [vmem:[%s8937_s0 + $0x190] sm:$0xff] }
  0x6b   :  { %3775 = vpow2.f32 %v391_v8  ;;  %v3772_v18 = vpop.eup %3771  ;;  %v3605_v8 = vld [vmem:[%s8937_s0 + $0x148] sm:$0x3]  ;;  %v425_v27 = vsel %vm9044_vm2, %v3770_v5, 0.0  ;;  %vm877_vm7 = vcmp.gt.s32.totalorder %v9155_v1, 2 }
  0x6c   :  { %v420_v42 = vadd.f32 %v419_v30, %v418_v3  ;;  %v427_v61 = vsel %vm9044_vm2, %v3772_v18, 0.0  ;;  %v3613_v5 = vld [vmem:[%s8937_s0 + $0x188] sm:$0x3]  ;;  %v5049_v3 = vadd.f32 %v3605_v8, %v913_v50  ;;  %v5051_v30 = vadd.f32 %v3607_v12, %v914_v56  ;;  %v3615_v18 = vld [vmem:[%s8937_s0 + $0x198] sm:$0x3]  ;;  %v3616_v50 = vld [vmem:[%s8937_s0 + $0x1a0] sm:$0xff] }
  0x6d   :  { %v918_v56 = vperm.slane %v909_v0, 0  ;;  %v919_v8 = vperm.slane %v910_v57, 0  ;;  %v920_v12 = vperm.slane %v911_v24, 0 }
  0x6e   :  { %v422_v23 = vadd.f32 %v421_v51, %v420_v42  ;;  %9153 = vst [vmem:[#allocation17_spill] sm:$0xff] %v5049_v3  ;;  %v915_v51 = vperm.slane %v906_v19, 0  ;;  %v917_v42 = vperm.slane %v908_v36, 0  ;;  %v3619_v36 = vld [vmem:[%s8937_s0 + $0x1b8] sm:$0x3] }
  0x6f   :  { %9154 = vst [vmem:[#allocation36_spill] sm:$0xff] %v5051_v30  ;;  %v5102_v31 = vadd.f32 %v3619_v36, %v920_v12 }
  0x70   :  { %v3774_v13 = vpop.eup %3773  ;;  %v5088_v57 = vadd.f32 %v3612_v21, %v917_v42  ;;  %v5090_v24 = vadd.f32 %v3613_v5, %v917_v42 }
  0x71   :  { %v3776_v6 = vpop.eup %3775  ;;  %v432_v47 = vmul.f32 0.6931472, %v3774_v13  ;;  %v916_v13 = vperm.slane %v907_v7, 0  ;;  %v3618_v7 = vld [vmem:[%s8937_s0 + $0x1b0] sm:$0xff]  ;;  %9166 = vst [vmem:[#allocation49_spill] sm:$0xff] %v5102_v31 }
  0x72   :  { %v429_v34 = vsel %vm9044_vm2, %v3776_v6, 0.0  ;;  %v424_v6 = vadd.f32 %v423_v29, %v422_v23  ;;  %v5076_v29 = vadd.f32 %v3608_v37, %v915_v51  ;;  %v5078_v23 = vadd.f32 %v3609_v9, %v915_v51  ;;  %9159 = vst [vmem:[#allocation28_spill] sm:$0xff] %v5088_v57 }
  0x73   :  { %v435_v32 = vadd.f32 %v432_v47, %v4858_v14  ;;  %v3617_v14 = vld [vmem:[%s8937_s0 + $0x1a8] sm:$0x3]  ;;  %v5080_v16 = vadd.f32 %v3610_v26, %v916_v13  ;;  %v5086_v0 = vadd.f32 %v3611_v33, %v916_v13  ;;  %9160 = vst [vmem:[#allocation37_spill] sm:$0xff] %v5090_v24  ;;  %v5094_v37 = vadd.f32 %v3615_v18, %v918_v56  ;;  %v3662_v47 = vld [vmem:[%s8937_s0 + $0x310] sm:$0xff] }
  0x74   :  { %9157 = vst [vmem:[#allocation20_spill] sm:$0xff] %v5078_v23  ;;  %v5096_v9 = vadd.f32 %v3616_v50, %v919_v8  ;;  %v5098_v26 = vadd.f32 %v3617_v14, %v919_v8  ;;  %v5100_v48 = vadd.f32 %v3618_v7, %v920_v12  ;;  %v954_v33 = vsel %vm9068_vm0, %v5037_v2, -inf }
  0x75   :  { %v450_v19 = vsel %vm4518_vm4, %v435_v32, %v4510_v4  ;;  %v426_v4 = vadd.f32 %v425_v27, %v424_v6  ;;  %9158 = vst [vmem:[#allocation32_spill] sm:$0xff] %v5086_v0  ;;  %v5092_v32 = vadd.f32 %v3614_v22, %v918_v56  ;;  %v953_v27 = vsel %vm9068_vm0, %v5035_v45, -inf }
  0x76   :  { %452 = vst.msk [vmem:[%s8934_s4] sm:$0xff] %vm9068_vm0, %v450_v19  ;;  %v955_v21 = vsel %vm9068_vm0, %v5076_v29, -inf  ;;  %v957_v5 = vsel %vm9068_vm0, %v5080_v16, -inf  ;;  %v959_v22 = vsel %vm9068_vm0, %v5088_v57, -inf  ;;  %v963_v6 = vsel %vm9068_vm0, %v5096_v9, -inf }
  0x77   :  { %9161 = vst [vmem:[#allocation4_spill] sm:$0xff] %v5092_v32  ;;  %v428_v51 = vadd.f32 %v427_v61, %v426_v4  ;;  %v956_v18 = vmax.f32 %v953_v27, %v955_v21  ;;  %v958_v13 = vmax.f32 %v954_v33, %v957_v5  ;;  %v961_v42 = vsel %vm9068_vm0, %v5092_v32, -inf }
  0x78   :  { %9162 = vst [vmem:[#allocation31_spill] sm:$0xff] %v5094_v37  ;;  %v965_v50 = vsel %vm9068_vm0, %v5100_v48, -inf  ;;  %v972_v14 = vsel %vm9044_vm2, %v5049_v3, -inf  ;;  %v973_v56 = vsel %vm9044_vm2, %v5051_v30, -inf  ;;  %v974_v12 = vsel %vm9044_vm2, %v5078_v23, -inf }
  0x79   :  { %9163 = vst [vmem:[#allocation46_spill] sm:$0xff] %v5096_v9  ;;  %v430_v61 = vadd.f32 %v429_v34, %v428_v51  ;;  %v960_v8 = vmax.f32 %v956_v18, %v959_v22  ;;  %v962_v34 = vmax.f32 %v958_v13, %v961_v42  ;;  %v975_v19 = vmax.f32 %v972_v14, %v974_v12  ;;  %v3637_v9 = vld [vmem:[%s8937_s0 + $0x248] sm:$0x3] }
  0x7a   :  { %9164 = vst [vmem:[#allocation47_spill] sm:$0xff] %v5098_v26  ;;  %v976_v7 = vsel %vm9044_vm2, %v5086_v0, -inf  ;;  %v978_v36 = vsel %vm9044_vm2, %v5090_v24, -inf  ;;  %v980_v4 = vsel %vm9044_vm2, %v5094_v37, -inf  ;;  %v982_v21 = vsel %vm9044_vm2, %v5098_v26, -inf }
  0x7b   :  { %9165 = vst [vmem:[#allocation48_spill] sm:$0xff] %v5100_v48  ;;  %3777 = vlog2.f32 %v430_v61  ;;  %v964_v51 = vmax.f32 %v960_v8, %v963_v6  ;;  %v966_v27 = vmax.f32 %v962_v34, %v965_v50  ;;  %v977_v33 = vmax.f32 %v973_v56, %v976_v7  ;;  %v3636_v48 = vld [vmem:[%s8937_s0 + $0x240] sm:$0xff] }
  0x7c   :  { %v986_v5 = vsel %vm9044_vm2, %v5010_v25, -inf  ;;  %v979_v22 = vmax.f32 %v975_v19, %v978_v36  ;;  %v984_v61 = vsel %vm9044_vm2, %v5102_v31, -inf  ;;  %v9167_v18 = vmov 0  }
  0x7d   :  { %v1279_v13 = vsel %vm877_vm7, 1, %v9167_v18  ;;  %v968_v42 = vmax.f32 %v964_v51, %v4991_v41  ;;  %v970_v6 = vmax.f32 %v966_v27, %v4995_v10  ;;  %v981_v50 = vmax.f32 %v977_v33, %v980_v4  ;;  %v3625_v27 = vld [vmem:[%s8937_s0 + $0x1e8] sm:$0x3]  ;;  %v3626_v33 = vld [vmem:[%s8937_s0 + $0x1f0] sm:$0xff] }
  0x7e   :  { %v1280_v14 = vperm.slane %v1279_v13, 0  ;;  %v988_v56 = vsel %vm9044_vm2, %v5012_v35, -inf  ;;  %v983_v8 = vmax.f32 %v979_v22, %v982_v21  ;;  %v9168_v7 = vmov 0  ;;  %v3627_v21 = vld [vmem:[%s8937_s0 + $0x1f8] sm:$0x3] }
  0x7f   :  { %v5145_v12 = vmax.f32 %v968_v42, %v970_v6  ;;  %v985_v19 = vmax.f32 %v981_v50, %v984_v61  ;;  %v3640_v42 = vld [vmem:[%s8937_s0 + $0x260] sm:$0xff]  ;;  %v3629_v6 = vld [vmem:[%s8937_s0 + $0x208] sm:$0x3] }
  0x80   :  { %vm5147_vm8 = vcmp.eq.s32.totalorder %v1280_v14, 1  ;;  %v987_v36 = vmax.f32 %v983_v8, %v986_v5 }
  0x81   :  { %v3778_v34 = vpop.eup %3777  ;;  %v9169_v7 = vsel %vm5147_vm8, 4294967295, %v9168_v7  ;;  %v989_v25 = vmax.f32 %v985_v19, %v988_v56  ;;  %v1288_v41 = vsel %vm5147_vm8, %v5145_v12, %v4979_v53  ;;  %v5180_v53 = vld [vmem:[%s8936_s1] sm:$0x1] }
  0x82   :  { %9170 = vst [vmem:[#allocation50_spill] sm:$0xff] %v9169_v7  ;;  %v434_v1 = vmul.f32 0.6931472, %v3778_v34  ;;  %vm1298_vm9 = vcmp.gt.s32.totalorder %v5180_v53, 3  ;;  %v3641_v34 = vld [vmem:[%s8937_s0 + $0x268] sm:$0x3] }
  0x83   :  { %1290 = vst.msk [vmem:[%s8935_s3] sm:$0xff] %vm9068_vm0, %v1288_v41  ;;  %v5160_v4 = vmax.f32 %v987_v36, %v989_v25  ;;  %v5192_v25 = vsel %vm1298_vm9, 1, %v9167_v18  ;;  %v3628_v19 = vld [vmem:[%s8937_s0 + $0x200] sm:$0xff] }
  0x84   :  { %v436_v10 = vadd.f32 %v434_v1, %v4928_v15  ;;  %v3630_v1 = vld [vmem:[%s8937_s0 + $0x210] sm:$0xff]  ;;  %v3632_v36 = vld [vmem:[%s8937_s0 + $0x220] sm:$0xff] }
  0x85   :  { %9171 = vst [vmem:[#allocation51_spill] sm:$0xff] %v5160_v4  ;;  %v1289_v15 = vsel %vm5147_vm8, %v5160_v4, %v4933_v55 }
  0x86   :  { %v451_v51 = vsel %vm4518_vm4, %v436_v10, %v9145_v11  ;;  %1291 = vst.msk [vmem:[%s8935_s3 + $0x8] sm:$0x3] %vm9044_vm2, %v1289_v15  ;;  %v3624_v11 = vld [vmem:[%s8937_s0 + $0x1e0] sm:$0xff]  ;;  %v3642_v15 = vld [vmem:[%s8937_s0 + $0x270] sm:$0xff] }
  0x87   :  { %453 = vst.msk [vmem:[%s8934_s4 + $0x8] sm:$0x3] %vm9044_vm2, %v451_v51 }
  0x8a   :  { %v5189_v55 = vld [vmem:[%s8935_s3] sm:$0xff] }
  0x8b   :  { %v1326_v5 = vrot.slane %v5189_v55, 1  ;;  %v1327_v22 = vrot.slane %v5189_v55, 2  ;;  %v1328_v61 = vrot.slane %v5189_v55, 3  ;;  %v1329_v13 = vrot.slane %v5189_v55, 4 }
  0x8c   :  { %v1330_v50 = vrot.slane %v5189_v55, 5  ;;  %v1331_v14 = vrot.slane %v5189_v55, 6  ;;  %v1332_v56 = vrot.slane %v5189_v55, 7  ;;  %v1334_v8 = vperm.slane %v5189_v55, 0 }
  0x8d   :  { %v1335_v41 = vperm.slane %v1326_v5, 0  ;;  %v1336_v10 = vperm.slane %v1327_v22, 0  ;;  %v1337_v51 = vperm.slane %v1328_v61, 0  ;;  %v5235_v7 = vld [vmem:[%s8935_s3 + $0x8] sm:$0x3]  ;;  %v1338_v35 = vperm.slane %v1329_v13, 0 }
  0x8e   :  { %v1339_v31 = vperm.slane %v1330_v50, 0  ;;  %v1340_v26 = vperm.slane %v1331_v14, 0  ;;  %v1333_v24 = vrot.slane %v5235_v7, 1  ;;  %v1342_v5 = vperm.slane %v5235_v7, 0  ;;  %v3631_v22 = vld [vmem:[%s8937_s0 + $0x218] sm:$0x3] }
  0x8f   :  { %v3634_v61 = vld [vmem:[%s8937_s0 + $0x230] sm:$0xff]  ;;  %v1341_v0 = vperm.slane %v1332_v56, 0  ;;  %v5246_v23 = vadd.f32 %v3624_v11, %v1334_v8  ;;  %v3643_v13 = vld [vmem:[%s8937_s0 + $0x278] sm:$0x3]  ;;  %v3633_v50 = vld [vmem:[%s8937_s0 + $0x228] sm:$0x3]  ;;  %v5257_v37 = vadd.f32 %v3625_v27, %v1334_v8  ;;  %v5259_v30 = vadd.f32 %v3626_v33, %v1335_v41 }
  0x90   :  { %v3635_v14 = vld [vmem:[%s8937_s0 + $0x238] sm:$0x3]  ;;  %v5261_v3 = vadd.f32 %v3627_v21, %v1335_v41  ;;  %v5263_v11 = vadd.f32 %v3628_v19, %v1336_v10  ;;  %v1343_v56 = vperm.slane %v1333_v24, 0  ;;  %v5265_v4 = vadd.f32 %v3640_v42, %v1342_v5  ;;  %v3638_v27 = vld [vmem:[%s8937_s0 + $0x250] sm:$0xff] }
  0x91   :  { %9172 = vst [vmem:[#allocation52_spill] sm:$0xff] %v5257_v37  ;;  %v5276_v33 = vadd.f32 %v3629_v6, %v1336_v10  ;;  %v5278_v21 = vadd.f32 %v3630_v1, %v1337_v51  ;;  %v5280_v8 = vadd.f32 %v3641_v34, %v1342_v5  ;;  %v3639_v24 = vld [vmem:[%s8937_s0 + $0x258] sm:$0x3]  ;;  %v5285_v42 = vadd.f32 %v3631_v22, %v1337_v51 }
  0x92   :  { %9173 = vst [vmem:[#allocation53_spill] sm:$0xff] %v5261_v3  ;;  %v5287_v19 = vadd.f32 %v3632_v36, %v1338_v35  ;;  %v5289_v41 = vadd.f32 %v3634_v61, %v1339_v31  ;;  %v5291_v32 = vadd.f32 %v3642_v15, %v1343_v56  ;;  %v5293_v57 = vadd.f32 %v3643_v13, %v1343_v56 }
  0x93   :  { %9174 = vst [vmem:[#allocation54_spill] sm:$0xff] %v5265_v4  ;;  %v5295_v6 = vadd.f32 %v3633_v50, %v1338_v35  ;;  %v5297_v1 = vadd.f32 %v3635_v14, %v1339_v31  ;;  %v1388_v34 = vsel %vm9068_vm0, %v5265_v4, -inf  ;;  %v5301_v10 = vadd.f32 %v3636_v48, %v1340_v26 }
  0x94   :  { %9175 = vst [vmem:[#allocation55_spill] sm:$0xff] %v5276_v33  ;;  %v5303_v5 = vadd.f32 %v3637_v9, %v1340_v26  ;;  %v5305_v51 = vadd.f32 %v3638_v27, %v1341_v0  ;;  %v1390_v36 = vsel %vm9068_vm0, %v5291_v32, -inf  ;;  %v5309_v15 = vadd.f32 %v3639_v24, %v1341_v0 }
  0x95   :  { %9176 = vst [vmem:[#allocation56_spill] sm:$0xff] %v5280_v8  ;;  %v1374_v35 = vsel %vm9068_vm0, %v5246_v23, -inf  ;;  %v1375_v31 = vsel %vm9068_vm0, %v5259_v30, -inf  ;;  %v1376_v22 = vsel %vm9068_vm0, %v5263_v11, -inf  ;;  %v1378_v48 = vsel %vm9068_vm0, %v5278_v21, -inf }
  0x96   :  { %9177 = vst [vmem:[#allocation57_spill] sm:$0xff] %v5285_v42  ;;  %v1380_v9 = vsel %vm9068_vm0, %v5287_v19, -inf  ;;  %v1382_v26 = vsel %vm9068_vm0, %v5289_v41, -inf  ;;  %v1377_v0 = vmax.f32 %v1374_v35, %v1376_v22  ;;  %v1379_v61 = vmax.f32 %v1375_v31, %v1378_v48 }
  0x97   :  { %9178 = vst [vmem:[#allocation58_spill] sm:$0xff] %v5289_v41  ;;  %v1384_v13 = vsel %vm9068_vm0, %v5301_v10, -inf  ;;  %v1386_v50 = vsel %vm9068_vm0, %v5305_v51, -inf  ;;  %v1393_v14 = vsel %vm9044_vm2, %v5257_v37, -inf  ;;  %v1394_v56 = vsel %vm9044_vm2, %v5261_v3, -inf }
  0x98   :  { %9179 = vst [vmem:[#allocation59_spill] sm:$0xff] %v5291_v32  ;;  %v1395_v27 = vsel %vm9044_vm2, %v5276_v33, -inf  ;;  %v1397_v24 = vsel %vm9044_vm2, %v5285_v42, -inf  ;;  %v1381_v35 = vmax.f32 %v1377_v0, %v1380_v9  ;;  %v1383_v31 = vmax.f32 %v1379_v61, %v1382_v26 }
  0x99   :  { %9180 = vst [vmem:[#allocation60_spill] sm:$0xff] %v5293_v57  ;;  %v1396_v22 = vmax.f32 %v1393_v14, %v1395_v27  ;;  %v1398_v48 = vmax.f32 %v1394_v56, %v1397_v24  ;;  %v1399_v32 = vsel %vm9044_vm2, %v5295_v6, -inf  ;;  %v1401_v4 = vsel %vm9044_vm2, %v5297_v1, -inf  ;;  %v9191_v14 = vld [vmem:[#allocation33_spill] sm:$0xff]  ;;  %v9192_v56 = vld [vmem:[#allocation7_spill] sm:$0xff] }
  0x9a   :  { %9181 = vst [vmem:[#allocation61_spill] sm:$0xff] %v5295_v6  ;;  %v1403_v37 = vsel %vm9044_vm2, %v5303_v5, -inf  ;;  %v1405_v3 = vsel %vm9044_vm2, %v5309_v15, -inf  ;;  %v1385_v33 = vmax.f32 %v1381_v35, %v1384_v13  ;;  %v1407_v9 = vsel %vm9044_vm2, %v5280_v8, -inf  ;;  %v9194_v24 = vld [vmem:[#allocation11_spill] sm:$0xff]  ;;  %v9195_v35 = vld [vmem:[#allocation14_spill] sm:$0xff] }
  0x9b   :  { %9182 = vst [vmem:[#allocation62_spill] sm:$0xff] %v5297_v1  ;;  %v1402_v42 = vmax.f32 %v1398_v48, %v1401_v4  ;;  %v1409_v26 = vsel %vm9044_vm2, %v5293_v57, -inf  ;;  %v9187_v0 = vperm.slane %v5192_v25, 0  ;;  %v9188_v61 = vmov 0  ;;  %v9193_v4 = vld [vmem:[#allocation9_spill] sm:$0xff]  ;;  %v9196_v25 = vld [vmem:[#allocation16_spill] sm:$0xff] }
  0x9c   :  { %9183 = vst [vmem:[#allocation63_spill] sm:$0xff] %v5301_v10  ;;  %v1400_v10 = vmax.f32 %v1396_v22, %v1399_v32  ;;  %vm149_vm11 = vcmp.eq.f32.partialorder %v9192_v56, %v9191_v14  ;;  %v1389_v27 = vmax.f32 %v1385_v33, %v1388_v34  ;;  %vm151_vm12 = vcmp.eq.f32.partialorder %v9193_v4, %v9191_v14  ;;  %v9197_v33 = vld [vmem:[#allocation19_spill] sm:$0xff] }
  0x9d   :  { %9184 = vst [vmem:[#allocation64_spill] sm:$0xff] %v5303_v5  ;;  %vm5349_vm10 = vcmp.eq.s32.totalorder %v9187_v0, 1  ;;  %v1406_v32 = vmax.f32 %v1402_v42, %v1405_v3  ;;  %vm153_vm13 = vcmp.eq.f32.partialorder %v9194_v24, %v9191_v14  ;;  %vm155_vm14 = vcmp.eq.f32.partialorder %v9195_v35, %v9191_v14  ;;  %v9198_v3 = vld [vmem:[#allocation22_spill] sm:$0xff] }
  0x9e   :  { %9185 = vst [vmem:[#allocation65_spill] sm:$0xff] %v5305_v51  ;;  %v1387_v51 = vmax.f32 %v1383_v31, %v1386_v50  ;;  %v9189_v61 = vsel %vm5349_vm10, 4294967295, %v9188_v61  ;;  %v1404_v50 = vmax.f32 %v1400_v10, %v1403_v37  ;;  %vm157_vm15 = vcmp.eq.f32.partialorder %v9196_v25, %v9191_v14  ;;  %v9199_v37 = vld [vmem:[#allocation24_spill] sm:$0xff]  ;;  %v9200_v42 = vld [vmem:[#allocation26_spill] sm:$0xff] }
  0x9f   :  { %9186 = vst [vmem:[#allocation66_spill] sm:$0xff] %v5309_v15  ;;  %v1410_v48 = vmax.f32 %v1406_v32, %v1409_v26  ;;  %vm159_vm1 = vcmp.eq.f32.partialorder %v9197_v33, %v9191_v14  ;;  %vm161_vm3 = vcmp.eq.f32.partialorder %v9198_v3, %v9191_v14  ;;  %vm163_vm5 = vcmp.eq.f32.partialorder %v9199_v37, %v9191_v14 }
  0xa0   :  { %9190 = vst [vmem:[#allocation67_spill] sm:$0xff] %v9189_v61  ;;  %v1391_v13 = vmax.f32 %v1387_v51, %v1390_v36  ;;  %v1408_v22 = vmax.f32 %v1404_v50, %v1407_v9  ;;  %vm165_vm7 = vcmp.eq.f32.partialorder %v9200_v42, %v9191_v14  ;;  %v9202_v51 = vld [vmem:[#allocation29_spill] sm:$0xff]  ;;  %v9045_v36 = vmov 10  }
  0xa1   :  { %vm167_vm9 = vcmp.eq.f32.partialorder %v9202_v51, %v9191_v14  ;;  %v169_v9 = vsel %vm149_vm11, 0, %v9045_v36  ;;  %v171_v26 = vsel %vm151_vm12, 1, %v9045_v36  ;;  %v175_v0 = vsel %vm155_vm14, 3, %v9045_v36 }
  0xa2   :  { %v5363_v31 = vmax.f32 %v1389_v27, %v1391_v13  ;;  %v5373_v34 = vmax.f32 %v1408_v22, %v1410_v48  ;;  %v177_v56 = vsel %vm157_vm15, 4, %v9045_v36  ;;  %v179_v13 = vsel %vm159_vm1, 5, %v9045_v36 }
  0xa3   :  { %v181_v50 = vsel %vm161_vm3, 6, %v9045_v36  ;;  %v183_v32 = vsel %vm163_vm5, 7, %v9045_v36  ;;  %v185_v4 = vsel %vm165_vm7, 8, %v9045_v36  ;;  %v187_v24 = vsel %vm167_vm9, 9, %v9045_v36 }
  0xa4   :  { %9201 = vst [vmem:[#allocation33_spill] sm:$0xff] %v5373_v34  ;;  %v1709_v10 = vsel %vm5349_vm10, %v5363_v31, %v5189_v55  ;;  %v173_v55 = vsel %vm153_vm13, 2, %v9045_v36  ;;  %v1710_v27 = vsel %vm5349_vm10, %v5373_v34, %v5235_v7  ;;  %v189_v7 = vsel %vm9068_vm0, %v169_v9, 2147483647 }
  0xa5   :  { %1711 = vst.msk [vmem:[%s8935_s3] sm:$0xff] %vm9068_vm0, %v1709_v10  ;;  %v190_v35 = vsel %vm9068_vm0, %v171_v26, 2147483647  ;;  %v191_v25 = vsel %vm9068_vm0, %v173_v55, 2147483647 }
  0xa6   :  { %1712 = vst.msk [vmem:[%s8935_s3 + $0x8] sm:$0x3] %vm9044_vm2, %v1710_v27  ;;  %v194_v22 = vsel %vm9068_vm0, %v175_v0, 2147483647  ;;  %vm192_vm11 = vcmp.lt.s32.totalorder %v189_v7, %v191_v25  ;;  %v197_v48 = vsel %vm9068_vm0, %v177_v56, 2147483647 }
  0xa7   :  { %vm195_vm12 = vcmp.lt.s32.totalorder %v190_v35, %v194_v22  ;;  %v200_v33 = vsel %vm9068_vm0, %v179_v13, 2147483647  ;;  %v193_v3 = vsel %vm192_vm11, %v189_v7, %v191_v25  ;;  %v203_v14 = vsel %vm9068_vm0, %v181_v50, 2147483647  ;;  %v9203_v56 = vld [vmem:[#allocation34_spill] sm:$0xff]  ;;  %v9204_v27 = vld [vmem:[#allocation8_spill] sm:$0xff] }
  0xa8   :  { %v196_v37 = vsel %vm195_vm12, %v190_v35, %v194_v22  ;;  %v206_v42 = vsel %vm9068_vm0, %v183_v32, 2147483647  ;;  %vm198_vm13 = vcmp.lt.s32.totalorder %v193_v3, %v197_v48  ;;  %v209_v9 = vsel %vm9068_vm0, %v185_v4, 2147483647  ;;  %v9205_v13 = vld [vmem:[#allocation10_spill] sm:$0xff]  ;;  %v9206_v50 = vld [vmem:[#allocation13_spill] sm:$0xff] }
  0xa9   :  { %vm201_vm14 = vcmp.lt.s32.totalorder %v196_v37, %v200_v33  ;;  %v199_v10 = vsel %vm198_vm13, %v193_v3, %v197_v48  ;;  %v212_v26 = vsel %vm9068_vm0, %v187_v24, 2147483647  ;;  %vm150_vm3 = vcmp.eq.f32.partialorder %v9204_v27, %v9203_v56  ;;  %v9207_v7 = vld [vmem:[#allocation15_spill] sm:$0xff]  ;;  %v9208_v35 = vld [vmem:[#allocation18_spill] sm:$0xff]  ;;  %v9209_v25 = vld [vmem:[#allocation21_spill] sm:$0xff] }
  0xaa   :  { %v202_v51 = vsel %vm201_vm14, %v196_v37, %v200_v33  ;;  %vm204_vm15 = vcmp.lt.s32.totalorder %v199_v10, %v203_v14  ;;  %vm152_vm9 = vcmp.eq.f32.partialorder %v9205_v13, %v9203_v56  ;;  %vm154_vm11 = vcmp.eq.f32.partialorder %v9206_v50, %v9203_v56  ;;  %v9210_v22 = vld [vmem:[#allocation23_spill] sm:$0xff]  ;;  %v9211_v48 = vld [vmem:[#allocation25_spill] sm:$0xff]  ;;  %v9213_v37 = vld [vmem:[#allocation30_spill] sm:$0xff] }
  0xab   :  { %vm207_vm1 = vcmp.lt.s32.totalorder %v202_v51, %v206_v42  ;;  %v205_v55 = vsel %vm204_vm15, %v199_v10, %v203_v14  ;;  %vm156_vm12 = vcmp.eq.f32.partialorder %v9207_v7, %v9203_v56  ;;  %vm158_vm13 = vcmp.eq.f32.partialorder %v9208_v35, %v9203_v56  ;;  %v9212_v3 = vld [vmem:[#allocation27_spill] sm:$0xff] }
  0xac   :  { %v208_v0 = vsel %vm207_vm1, %v202_v51, %v206_v42  ;;  %vm210_vm5 = vcmp.lt.s32.totalorder %v205_v55, %v209_v9  ;;  %vm160_vm15 = vcmp.eq.f32.partialorder %v9209_v25, %v9203_v56  ;;  %vm162_vm1 = vcmp.eq.f32.partialorder %v9210_v22, %v9203_v56 }
  0xad   :  { %vm213_vm7 = vcmp.lt.s32.totalorder %v208_v0, %v212_v26  ;;  %v5440_v32 = vld [vmem:[%s8935_s3 + $0x8] sm:$0x3]  ;;  %v211_v4 = vsel %vm210_vm5, %v205_v55, %v209_v9  ;;  %vm164_vm2 = vcmp.eq.f32.partialorder %v9211_v48, %v9203_v56  ;;  %vm166_vm5 = vcmp.eq.f32.partialorder %v9212_v3, %v9203_v56  ;;  %v5488_v48 = vld [vmem:[%s8935_s3] sm:$0xff] }
  0xae   :  { %v214_v24 = vsel %vm213_vm7, %v208_v0, %v212_v26  ;;  %vm168_vm7 = vcmp.eq.f32.partialorder %v9213_v37, %v9203_v56  ;;  %v170_v14 = vsel %vm150_vm3, 0, %v9045_v36  ;;  %v172_v10 = vsel %vm152_vm9, 1, %v9045_v36 }
  0xaf   :  { %vm215_vm14 = vcmp.lt.s32.totalorder %v211_v4, %v214_v24  ;;  %v174_v51 = vsel %vm154_vm11, 2, %v9045_v36  ;;  %v176_v9 = vsel %vm156_vm12, 3, %v9045_v36  ;;  %v178_v55 = vsel %vm158_vm13, 4, %v9045_v36 }
  0xb0   :  { %v216_v33 = vsel %vm215_vm14, %v211_v4, %v214_v24  ;;  %v180_v0 = vsel %vm160_vm15, 5, %v9045_v36  ;;  %v182_v27 = vsel %vm162_vm1, 6, %v9045_v36  ;;  %v184_v13 = vsel %vm164_vm2, 7, %v9045_v36 }
  0xb1   :  { %v440_v26 = vsel %vm4518_vm4, %v216_v33, 9  ;;  %v186_v4 = vsel %vm166_vm5, 8, %v9045_v36  ;;  %v188_v56 = vsel %vm168_vm7, 9, %v9045_v36  ;;  %vm9214_vm3 = vcmask 9216   ;;  %v3654_v36 = vld [vmem:[%s8937_s0 + $0x2d0] sm:$0xff] }
  0xb2   :  { %444 = vst.msk [vmem:[#allocation2] sm:$0xff] %vm9068_vm0, %v440_v26  ;;  %v217_v50 = vsel %vm9214_vm3, %v170_v14, 2147483647  ;;  %vm9215_vm9 = vmmov %vm9214_vm3 }
  0xb3   :  { %v218_v24 = vsel %vm9215_vm9, %v172_v10, 2147483647  ;;  %vm9216_vm11 = vmmov %vm9214_vm3 }
  0xb4   :  { %v219_v7 = vsel %vm9216_vm11, %v174_v51, 2147483647  ;;  %vm9217_vm12 = vmmov %vm9214_vm3 }
  0xb5   :  { %v222_v35 = vsel %vm9217_vm12, %v176_v9, 2147483647  ;;  %vm220_vm13 = vcmp.lt.s32.totalorder %v217_v50, %v219_v7  ;;  %vm9218_vm15 = vmmov %vm9214_vm3 }
  0xb6   :  { %vm223_vm14 = vcmp.lt.s32.totalorder %v218_v24, %v222_v35  ;;  %v225_v25 = vsel %vm9218_vm15, %v178_v55, 2147483647  ;;  %vm9219_vm1 = vmmov %vm9214_vm3  ;;  %v221_v33 = vsel %vm220_vm13, %v217_v50, %v219_v7  ;;  %v1748_v50 = vrot.slane %v5488_v48, 2 }
  0xb7   :  { %v228_v22 = vsel %vm9219_vm1, %v180_v0, 2147483647  ;;  %v224_v3 = vsel %vm223_vm14, %v218_v24, %v222_v35  ;;  %vm9220_vm2 = vmmov %vm9219_vm1  ;;  %vm226_vm7 = vcmp.lt.s32.totalorder %v221_v33, %v225_v25  ;;  %v1747_v0 = vrot.slane %v5488_v48, 1 }
  0xb8   :  { %v231_v37 = vsel %vm9220_vm2, %v182_v27, 2147483647  ;;  %vm9221_vm5 = vmmov %vm9219_vm1  ;;  %vm229_vm3 = vcmp.lt.s32.totalorder %v224_v3, %v228_v22  ;;  %v227_v9 = vsel %vm226_vm7, %v221_v33, %v225_v25  ;;  %v1749_v27 = vrot.slane %v5488_v48, 3  ;;  %v3644_v33 = vld [vmem:[%s8937_s0 + $0x280] sm:$0xff] }
  0xb9   :  { %v234_v14 = vsel %vm9221_vm5, %v184_v13, 2147483647  ;;  %vm9222_vm9 = vmmov %vm9219_vm1  ;;  %v230_v26 = vsel %vm229_vm3, %v224_v3, %v228_v22  ;;  %vm232_vm12 = vcmp.lt.s32.totalorder %v227_v9, %v231_v37  ;;  %v1750_v7 = vrot.slane %v5488_v48, 4  ;;  %v3646_v3 = vld [vmem:[%s8937_s0 + $0x290] sm:$0xff] }
  0xba   :  { %v237_v51 = vsel %vm9222_vm9, %v186_v4, 2147483647  ;;  %vm9223_vm11 = vmmov %vm9219_vm1  ;;  %vm235_vm15 = vcmp.lt.s32.totalorder %v230_v26, %v234_v14  ;;  %v233_v24 = vsel %vm232_vm12, %v227_v9, %v231_v37  ;;  %v1751_v35 = vrot.slane %v5488_v48, 5  ;;  %v3648_v9 = vld [vmem:[%s8937_s0 + $0x2a0] sm:$0xff] }
  0xbb   :  { %v240_v55 = vsel %vm9223_vm11, %v188_v56, 2147483647  ;;  %v236_v13 = vsel %vm235_vm15, %v230_v26, %v234_v14  ;;  %vm238_vm13 = vcmp.lt.s32.totalorder %v233_v24, %v237_v51  ;;  %v1752_v4 = vrot.slane %v5488_v48, 6 }
  0xbc   :  { %vm241_vm14 = vcmp.lt.s32.totalorder %v236_v13, %v240_v55  ;;  %v1753_v56 = vrot.slane %v5488_v48, 7  ;;  %v239_v25 = vsel %vm238_vm13, %v233_v24, %v237_v51  ;;  %v5509_v14 = vperm.slane %v1747_v0, 0  ;;  %v3650_v51 = vld [vmem:[%s8937_s0 + $0x2b0] sm:$0xff]  ;;  %v3652_v0 = vld [vmem:[%s8937_s0 + $0x2c0] sm:$0xff] }
  0xbd   :  { %v242_v22 = vsel %vm241_vm14, %v236_v13, %v240_v55  ;;  %v5517_v26 = vperm.slane %v1748_v50, 0  ;;  %v5519_v55 = vperm.slane %v1749_v27, 0  ;;  %v5521_v24 = vperm.slane %v1750_v7, 0  ;;  %v3660_v50 = vld [vmem:[%s8937_s0 + $0x300] sm:$0xff] }
  0xbe   :  { %vm243_vm1 = vcmp.lt.s32.totalorder %v239_v25, %v242_v22  ;;  %v5529_v10 = vperm.slane %v1751_v35, 0  ;;  %v5531_v37 = vperm.slane %v1752_v4, 0  ;;  %v5533_v42 = vperm.slane %v1753_v56, 0  ;;  %v3656_v35 = vld [vmem:[%s8937_s0 + $0x2e0] sm:$0xff]  ;;  %v3658_v4 = vld [vmem:[%s8937_s0 + $0x2f0] sm:$0xff] }
  0xbf   :  { %v244_v13 = vsel %vm243_vm1, %v239_v25, %v242_v22  ;;  %v9224_v27 = vrot.slane %v5440_v32, 1  ;;  %v9225_v56 = vperm.slane %v5488_v48, 0  ;;  %v5555_v61 = vadd.f32 %v3646_v3, %v5509_v14 }
  0xc0   :  { %v441_v25 = vsel %vm4518_vm4, %v244_v13, 9  ;;  %vm9228_vm4 = vmmov %vm9220_vm2  ;;  %v5562_v13 = vadd.f32 %v3648_v9, %v5517_v26  ;;  %v5568_v57 = vadd.f32 %v3652_v0, %v5521_v24  ;;  %v9233_v3 = vperm.slane %v5440_v32, 0 }
  0xc1   :  { %v5540_v7 = vperm.slane %v9224_v27, 0  ;;  %v5552_v22 = vadd.f32 %v3644_v33, %v9225_v56  ;;  %9227 = vst [vmem:[#allocation9_spill] sm:$0xff] %v5555_v61  ;;  %v5565_v27 = vadd.f32 %v3650_v51, %v5519_v55  ;;  %v5571_v33 = vadd.f32 %v3654_v36, %v5529_v10 }
  0xc2   :  { %445 = vst.msk [vmem:[#allocation2 + $0x8] sm:$0x3] %vm9228_vm4, %v441_v25  ;;  %v5575_v56 = vadd.f32 %v3660_v50, %v9233_v3  ;;  %v5578_v8 = vadd.f32 %v3656_v35, %v5531_v37  ;;  %v5581_v25 = vadd.f32 %v3658_v4, %v5533_v42  ;;  %v1796_v36 = vsel %vm9068_vm0, %v5555_v61, -inf }
  0xc3   :  { %9226 = vst [vmem:[#allocation7_spill] sm:$0xff] %v5552_v22  ;;  %v5584_v9 = vadd.f32 %v3662_v47, %v5540_v7  ;;  %v1795_v51 = vsel %vm9068_vm0, %v5552_v22, -inf  ;;  %v1797_v0 = vsel %vm9068_vm0, %v5562_v13, -inf  ;;  %v1799_v35 = vsel %vm9068_vm0, %v5565_v27, -inf }
  0xc4   :  { %9229 = vst [vmem:[#allocation11_spill] sm:$0xff] %v5562_v13  ;;  %v1798_v50 = vmax.f32 %v1795_v51, %v1797_v0  ;;  %v1801_v4 = vsel %vm9068_vm0, %v5568_v57, -inf  ;;  %v1803_v47 = vsel %vm9068_vm0, %v5571_v33, -inf  ;;  %v1800_v3 = vmax.f32 %v1796_v36, %v1799_v35  ;;  %v5606_v51 = vld [vmem:[%s8934_s4] sm:$0xff] }
  0xc5   :  { %9230 = vst [vmem:[#allocation14_spill] sm:$0xff] %v5565_v27  ;;  %v1805_v22 = vsel %vm9068_vm0, %v5578_v8, -inf  ;;  %vm1719_vm2 = vcmp.gt.s32.totalorder %v5180_v53, 4  ;;  %v1807_v13 = vsel %vm9068_vm0, %v5581_v25, -inf  ;;  %v1809_v0 = vsel %vm9068_vm0, %v5575_v56, -inf }
  0xc6   :  { %9231 = vst [vmem:[#allocation16_spill] sm:$0xff] %v5568_v57  ;;  %v1802_v61 = vmax.f32 %v1798_v50, %v1801_v4  ;;  %v1804_v57 = vmax.f32 %v1800_v3, %v1803_v47  ;;  %v1811_v36 = vsel %vm9068_vm0, %v5584_v9, -inf  ;;  %v2121_v53 = vsel %vm1719_vm2, 1, %v9167_v18 }
  0xc7   :  { %9232 = vst [vmem:[#allocation19_spill] sm:$0xff] %v5571_v33  ;;  %v668_v50 = vrot.slane %v5606_v51, 1  ;;  %vm570_vm5 = vcmp.eq.f32.partialorder %v4697_v58, %v4814_v54  ;;  %vm572_vm7 = vcmp.eq.f32.partialorder %v4709_v49, %v4814_v54  ;;  %vm574_vm9 = vcmp.eq.f32.partialorder %v4722_v52, %v4814_v54  ;;  %v9241_v58 = vld [vmem:[#allocation44_spill] sm:$0xff]  ;;  %v9243_v52 = vld [vmem:[#allocation42_spill] sm:$0xff] }
  0xc8   :  { %9234 = vst [vmem:[#allocation22_spill] sm:$0xff] %v5575_v56  ;;  %v1806_v35 = vmax.f32 %v1802_v61, %v1805_v22  ;;  %vm576_vm11 = vcmp.eq.f32.partialorder %v4726_v28, %v4814_v54  ;;  %vm578_vm12 = vcmp.eq.f32.partialorder %v4740_v63, %v4814_v54  ;;  %vm580_vm15 = vcmp.eq.f32.partialorder %v4744_v60, %v4814_v54 }
  0xc9   :  { %9235 = vst [vmem:[#allocation24_spill] sm:$0xff] %v5578_v8  ;;  %v1808_v8 = vmax.f32 %v1804_v57, %v1807_v13  ;;  %v3661_v57 = vld [vmem:[%s8937_s0 + $0x308] sm:$0x3]  ;;  %vm582_vm13 = vcmp.eq.f32.partialorder %v4752_v44, %v4814_v54  ;;  %vm584_vm14 = vcmp.eq.f32.partialorder %v9241_v58, %v4814_v54  ;;  %vm588_vm4 = vcmp.eq.f32.partialorder %v9243_v52, %v4814_v54 }
  0xca   :  { %9236 = vst [vmem:[#allocation26_spill] sm:$0xff] %v5581_v25  ;;  %v1810_v4 = vmax.f32 %v1806_v35, %v1809_v0  ;;  %v2122_v25 = vperm.slane %v2121_v53, 0  ;;  %v9244_v28 = vmov 10  }
  0xcb   :  { %9237 = vst [vmem:[#allocation29_spill] sm:$0xff] %v5584_v9  ;;  %v1812_v15 = vmax.f32 %v1808_v8, %v1811_v36  ;;  %v9242_v8 = vld [vmem:[#allocation41_spill] sm:$0xff]  ;;  %v590_v13 = vsel %vm570_vm5, 0, %v9244_v28  ;;  %v592_v63 = vsel %vm572_vm7, 1, %v9244_v28  ;;  %v594_v44 = vsel %vm574_vm9, 2, %v9244_v28 }
  0xcc   :  { %vm5624_vm3 = vcmp.eq.s32.totalorder %v2122_v25, 1  ;;  %vm586_vm1 = vcmp.eq.f32.partialorder %v9242_v8, %v4814_v54  ;;  %v596_v47 = vsel %vm576_vm11, 3, %v9244_v28  ;;  %v598_v54 = vsel %vm578_vm12, 4, %v9244_v28 }
  0xcd   :  { %v5634_v49 = vmax.f32 %v1810_v4, %v1812_v15  ;;  %v9245_v15 = vperm.slane %v5440_v32, 0  ;;  %v600_v3 = vsel %vm580_vm15, 5, %v9244_v28  ;;  %v602_v0 = vsel %vm582_vm13, 6, %v9244_v28 }
  0xce   :  { %v604_v36 = vsel %vm584_vm14, 7, %v9244_v28  ;;  %v606_v35 = vsel %vm586_vm1, 8, %v9244_v28  ;;  %v608_v53 = vsel %vm588_vm4, 9, %v9244_v28  ;;  %v610_v4 = vsel %vm9068_vm0, %v590_v13, 2147483647 }
  0xcf   :  { %9240 = vst [vmem:[#allocation34_spill] sm:$0xff] %v5634_v49  ;;  %v5650_v25 = vadd.f32 %v3661_v57, %v9245_v15  ;;  %v2130_v60 = vsel %vm5624_vm3, %v5634_v49, %v5488_v48  ;;  %v611_v57 = vsel %vm9068_vm0, %v592_v63, 2147483647  ;;  %v612_v58 = vsel %vm9068_vm0, %v594_v44, 2147483647  ;;  %v9246_v15 = vld [vmem:[#allocation40_spill] sm:$0xff] }
  0xd0   :  { %2132 = vst.msk [vmem:[%s8935_s3] sm:$0xff] %vm9068_vm0, %v2130_v60  ;;  %v615_v8 = vsel %vm9068_vm0, %v596_v47, 2147483647  ;;  %v618_v52 = vsel %vm9068_vm0, %v598_v54, 2147483647  ;;  %vm571_vm2 = vcmp.eq.f32.partialorder %v9246_v15, %v4827_v20  ;;  %vm613_vm5 = vcmp.lt.s32.totalorder %v610_v4, %v612_v58 }
  0xd1   :  { %vm616_vm7 = vcmp.lt.s32.totalorder %v611_v57, %v615_v8  ;;  %v621_v60 = vsel %vm9068_vm0, %v600_v3, 2147483647  ;;  %v624_v61 = vsel %vm9068_vm0, %v602_v0, 2147483647  ;;  %v614_v27 = vsel %vm613_vm5, %v610_v4, %v612_v58 }
  0xd2   :  { %v617_v33 = vsel %vm616_vm7, %v611_v57, %v615_v8  ;;  %v627_v13 = vsel %vm9068_vm0, %v604_v36, 2147483647  ;;  %v630_v63 = vsel %vm9068_vm0, %v606_v35, 2147483647  ;;  %vm619_vm9 = vcmp.lt.s32.totalorder %v614_v27, %v618_v52 }
  0xd3   :  { %vm622_vm11 = vcmp.lt.s32.totalorder %v617_v33, %v621_v60  ;;  %v633_v44 = vsel %vm9068_vm0, %v608_v53, 2147483647  ;;  %vm573_vm12 = vcmp.eq.f32.partialorder %v4720_v17, %v4827_v20  ;;  %v620_v47 = vsel %vm619_vm9, %v614_v27, %v618_v52  ;;  %v9247_v27 = vld [vmem:[#allocation43_spill] sm:$0xff]  ;;  %v3645_v53 = vld [vmem:[%s8937_s0 + $0x288] sm:$0x3] }
  0xd4   :  { %v623_v54 = vsel %vm622_vm11, %v617_v33, %v621_v60  ;;  %vm625_vm14 = vcmp.lt.s32.totalorder %v620_v47, %v624_v61  ;;  %vm579_vm4 = vcmp.eq.f32.partialorder %v4742_v40, %v4827_v20  ;;  %vm581_vm5 = vcmp.eq.f32.partialorder %v4746_v39, %v4827_v20 }
  0xd5   :  { %vm628_vm1 = vcmp.lt.s32.totalorder %v623_v54, %v627_v13  ;;  %v626_v3 = vsel %vm625_vm14, %v620_v47, %v624_v61  ;;  %vm583_vm7 = vcmp.eq.f32.partialorder %v4754_v46, %v4827_v20  ;;  %vm585_vm9 = vcmp.eq.f32.partialorder %v4758_v38, %v4827_v20 }
  0xd6   :  { %v629_v0 = vsel %vm628_vm1, %v623_v54, %v627_v13  ;;  %vm631_vm11 = vcmp.lt.s32.totalorder %v626_v3, %v630_v63  ;;  %vm587_vm13 = vcmp.eq.f32.partialorder %v4730_v43, %v4827_v20  ;;  %vm589_vm15 = vcmp.eq.f32.partialorder %v9247_v27, %v4827_v20 }
  0xd7   :  { %vm634_vm0 = vcmp.lt.s32.totalorder %v629_v0, %v633_v44  ;;  %v632_v33 = vsel %vm631_vm11, %v626_v3, %v630_v63  ;;  %v591_v61 = vsel %vm571_vm2, 0, %v9244_v28  ;;  %v593_v35 = vsel %vm573_vm12, 1, %v9244_v28 }
  0xd8   :  { %v635_v36 = vsel %vm634_vm0, %v629_v0, %v633_v44  ;;  %vm9248_vm1 = vcmp.eq.f32.partialorder %v4724_v59, %v4827_v20  ;;  %vm9249_vm0 = vcmp.eq.f32.partialorder %v4738_v62, %v4827_v20  ;;  %v599_v17 = vsel %vm579_vm4, 4, %v9244_v28 }
  0xd9   :  { %vm636_vm14 = vcmp.lt.s32.totalorder %v632_v33, %v635_v36  ;;  %v595_v4 = vsel %vm9248_vm1, 2, %v9244_v28  ;;  %v597_v57 = vsel %vm9249_vm0, 3, %v9244_v28  ;;  %v601_v8 = vsel %vm581_vm5, 5, %v9244_v28 }
  0xda   :  { %v637_v58 = vsel %vm636_vm14, %v632_v33, %v635_v36  ;;  %v603_v59 = vsel %vm583_vm7, 6, %v9244_v28  ;;  %v605_v62 = vsel %vm585_vm9, 7, %v9244_v28  ;;  %v607_v15 = vsel %vm587_vm13, 8, %v9244_v28 }
  0xdb   :  { %v861_v40 = vsel %vm4774_vm6, %v637_v58, 9  ;;  %v609_v39 = vsel %vm589_vm15, 9, %v9244_v28  ;;  %vm9251_vm2 = vcmask 9216   ;;  %v9252_v60 = vperm.slane %v5488_v48, 0  ;;  %v5758_v48 = vld [vmem:[%s8934_s4 + $0x8] sm:$0x3] }
  0xdc   :  { %v638_v46 = vsel %vm9251_vm2, %v591_v61, 2147483647  ;;  %vm9253_vm12 = vcmask 15360   ;;  %vm9254_vm4 = vmmov %vm9251_vm2  ;;  %v672_v43 = vrot.slane %v5606_v51, 5 }
  0xdd   :  { %v5746_v13 = vadd.f32 %v3645_v53, %v9252_v60  ;;  %865 = vst.msk [vmem:[#allocation2 + $0x10] sm:$0xff] %vm9253_vm12, %v861_v40  ;;  %v639_v38 = vsel %vm9254_vm4, %v593_v35, 2147483647  ;;  %vm9255_vm5 = vmmov %vm9251_vm2  ;;  %v673_v35 = vrot.slane %v5606_v51, 6  ;;  %v674_v53 = vrot.slane %v5606_v51, 7 }
  0xde   :  { %v640_v63 = vsel %vm9255_vm5, %v595_v4, 2147483647  ;;  %vm9256_vm7 = vmmov %vm9251_vm2 }
  0xdf   :  { %vm641_vm13 = vcmp.lt.s32.totalorder %v638_v46, %v640_v63  ;;  %v643_v44 = vsel %vm9256_vm7, %v597_v57, 2147483647  ;;  %vm9257_vm9 = vmmov %vm9251_vm2  ;;  %v675_v57 = vrot.slane %v5758_v48, 1 }
  0xe0   :  { %v646_v20 = vsel %vm9257_vm9, %v599_v17, 2147483647  ;;  %vm9258_vm15 = vmmov %vm9251_vm2  ;;  %v642_v54 = vsel %vm641_vm13, %v638_v46, %v640_v63  ;;  %vm644_vm11 = vcmp.lt.s32.totalorder %v639_v38, %v643_v44  ;;  %v676_v17 = vperm.slane %v5606_v51, 0 }
  0xe1   :  { %v649_v47 = vsel %vm9258_vm15, %v601_v8, 2147483647  ;;  %vm9259_vm14 = vmmov %vm9251_vm2  ;;  %v645_v27 = vsel %vm644_vm11, %v639_v38, %v643_v44  ;;  %vm647_vm0 = vcmp.lt.s32.totalorder %v642_v54, %v646_v20  ;;  %v677_v8 = vperm.slane %v668_v50, 0  ;;  %v3647_v38 = vld [vmem:[%s8937_s0 + $0x298] sm:$0x3] }
  0xe2   :  { %v652_v3 = vsel %vm9259_vm14, %v603_v59, 2147483647  ;;  %vm9260_vm1 = vmmov %vm9251_vm2  ;;  %v648_v61 = vsel %vm647_vm0, %v642_v54, %v646_v20  ;;  %vm650_vm4 = vcmp.lt.s32.totalorder %v645_v27, %v649_v47  ;;  %v9263_v59 = vrot.slane %v5606_v51, 2  ;;  %v3649_v20 = vld [vmem:[%s8937_s0 + $0x2a8] sm:$0x3] }
  0xe3   :  { %v655_v0 = vsel %vm9260_vm1, %v605_v62, 2147483647  ;;  %vm9261_vm2 = vmmov %vm9260_vm1  ;;  %v651_v4 = vsel %vm650_vm4, %v645_v27, %v649_v47  ;;  %vm653_vm5 = vcmp.lt.s32.totalorder %v648_v61, %v652_v3  ;;  %v9265_v46 = vrot.slane %v5606_v51, 4  ;;  %v4088_v27 = vld [vmem:[%s8937_s0 + $0xa0] sm:$0xff] }
  0xe4   :  { %v658_v33 = vsel %vm9261_vm2, %v607_v15, 2147483647  ;;  %vm9262_vm12 = vmmov %vm9260_vm1  ;;  %v654_v58 = vsel %vm653_vm5, %v648_v61, %v652_v3  ;;  %vm656_vm13 = vcmp.lt.s32.totalorder %v651_v4, %v655_v0  ;;  %v678_v62 = vperm.slane %v9263_v59, 0  ;;  %v4092_v59 = vld [vmem:[%s8937_s0 + $0xe0] sm:$0xff] }
  0xe5   :  { %v661_v36 = vsel %vm9262_vm12, %v609_v39, 2147483647  ;;  %v657_v40 = vsel %vm656_vm13, %v651_v4, %v655_v0  ;;  %vm659_vm7 = vcmp.lt.s32.totalorder %v654_v58, %v658_v33  ;;  %v9264_v15 = vrot.slane %v5606_v51, 3  ;;  %vm9266_vm11 = vmmov %vm9260_vm1 }
  0xe6   :  { %v5776_v60 = vperm.slane %v9265_v46, 0  ;;  %v660_v63 = vsel %vm659_vm7, %v654_v58, %v658_v33  ;;  %vm662_vm9 = vcmp.lt.s32.totalorder %v657_v40, %v661_v36  ;;  %v5781_v44 = vperm.slane %v672_v43, 0  ;;  %v4089_v33 = vld [vmem:[%s8937_s0 + $0xb0] sm:$0xff] }
  0xe7   :  { %v679_v39 = vperm.slane %v9264_v15, 0  ;;  %v5783_v50 = vperm.slane %v673_v35, 0  ;;  %v663_v47 = vsel %vm662_vm9, %v657_v40, %v661_v36  ;;  %v5788_v54 = vperm.slane %v674_v53, 0  ;;  %v4090_v36 = vld [vmem:[%s8937_s0 + $0xc0] sm:$0xff]  ;;  %v3651_v15 = vld [vmem:[%s8937_s0 + $0x2b8] sm:$0x3] }
  0xe8   :  { %v9074_v3 = vperm.slane %v5758_v48, 0  ;;  %v5791_v0 = vperm.slane %v675_v57, 0  ;;  %vm664_vm15 = vcmp.lt.s32.totalorder %v660_v63, %v663_v47  ;;  %v5796_v43 = vadd.f32 %v4088_v27, %v676_v17  ;;  %v4091_v57 = vld [vmem:[%s8937_s0 + $0xd0] sm:$0xff]  ;;  %v4094_v27 = vld [vmem:[%s8937_s0 + $0x100] sm:$0xff] }
  0xe9   :  { %v5801_v61 = vadd.f32 %v4089_v33, %v677_v8  ;;  %v5806_v35 = vadd.f32 %v4090_v36, %v678_v62  ;;  %v5809_v53 = vadd.f32 %v3647_v38, %v5509_v14  ;;  %v665_v4 = vsel %vm664_vm15, %v660_v63, %v663_v47  ;;  %v3653_v14 = vld [vmem:[%s8937_s0 + $0x2c8] sm:$0x3]  ;;  %v4093_v63 = vld [vmem:[%s8937_s0 + $0xf0] sm:$0xff]  ;;  %vm9278_vm15 = vmmov %vm9266_vm11 }
  0xea   :  { %v5814_v58 = vadd.f32 %v4091_v57, %v679_v39  ;;  %v5820_v40 = vadd.f32 %v4092_v59, %v5776_v60  ;;  %v5829_v46 = vadd.f32 %v3649_v20, %v5517_v26  ;;  %v862_v38 = vsel %vm4774_vm6, %v665_v4, 9  ;;  %v4095_v26 = vld [vmem:[%s8937_s0 + $0x110] sm:$0xff]  ;;  %v4096_v59 = vld [vmem:[%s8937_s0 + $0x120] sm:$0xff] }
  0xeb   :  { %v5837_v47 = vadd.f32 %v4093_v63, %v5781_v44  ;;  %v5843_v33 = vadd.f32 %v4094_v27, %v5783_v50  ;;  %866 = vst.msk [vmem:[#allocation2 + $0x18] sm:$0x3] %vm9266_vm11, %v862_v38  ;;  %v5850_v20 = vadd.f32 %v4095_v26, %v5788_v54  ;;  %vm9267_vm14 = vcmask 15360   ;;  %v4097_v63 = vld [vmem:[%s8937_s0 + $0x130] sm:$0xff] }
  0xec   :  { %v716_v36 = vsel %vm9267_vm14, %v5796_v43, -inf  ;;  %vm9268_vm1 = vmmov %vm9267_vm14  ;;  %v5863_v38 = vadd.f32 %v4096_v59, %v9074_v3  ;;  %v5869_v27 = vadd.f32 %v4097_v63, %v5791_v0  ;;  %v5874_v56 = vadd.f32 %v3651_v15, %v5519_v55  ;;  %v4099_v55 = vld [vmem:[%s8937_s0 + $0xb8] sm:$0x3] }
  0xed   :  { %v717_v4 = vsel %vm9268_vm1, %v5801_v61, -inf  ;;  %vm9269_vm0 = vmmov %vm9268_vm1  ;;  %v5877_v18 = vadd.f32 %v3653_v14, %v5521_v24  ;;  %v5891_v24 = vadd.f32 %v4099_v55, %v677_v8  ;;  %v4101_v63 = vld [vmem:[%s8937_s0 + $0xd8] sm:$0x3]  ;;  %v4102_v55 = vld [vmem:[%s8937_s0 + $0xe8] sm:$0x3] }
  0xee   :  { %v718_v57 = vsel %vm9269_vm0, %v5806_v35, -inf  ;;  %vm9270_vm2 = vmmov %vm9269_vm0  ;;  %9271 = vst [vmem:[#allocation8_spill] sm:$0xff] %v5874_v56  ;;  %v5906_v8 = vadd.f32 %v4101_v63, %v679_v39 }
  0xef   :  { %v719_v26 = vmax.f32 %v716_v36, %v718_v57  ;;  %v720_v9 = vsel %vm9270_vm2, %v5814_v58, -inf  ;;  %vm9272_vm12 = vmmov %vm9269_vm0  ;;  %v4098_v36 = vld [vmem:[%s8937_s0 + $0xa8] sm:$0x3] }
  0xf0   :  { %v721_v49 = vmax.f32 %v717_v4, %v720_v9  ;;  %v722_v59 = vsel %vm9272_vm12, %v5820_v40, -inf  ;;  %vm9273_vm4 = vmmov %vm9269_vm0  ;;  %v5886_v57 = vadd.f32 %v4098_v36, %v676_v17  ;;  %v3655_v9 = vld [vmem:[%s8937_s0 + $0x2d8] sm:$0x3]  ;;  %v4100_v4 = vld [vmem:[%s8937_s0 + $0xc8] sm:$0x3] }
  0xf1   :  { %v723_v3 = vmax.f32 %v719_v26, %v722_v59  ;;  %v724_v5 = vsel %vm9273_vm4, %v5837_v47, -inf  ;;  %vm9274_vm5 = vmmov %vm9269_vm0  ;;  %v5901_v17 = vadd.f32 %v4100_v4, %v678_v62  ;;  %v3657_v26 = vld [vmem:[%s8937_s0 + $0x2e8] sm:$0x3]  ;;  %v3659_v36 = vld [vmem:[%s8937_s0 + $0x2f8] sm:$0x3] }
  0xf2   :  { %v725_v15 = vmax.f32 %v721_v49, %v724_v5  ;;  %v726_v14 = vsel %vm9274_vm5, %v5843_v33, -inf  ;;  %vm9275_vm13 = vmmov %vm9269_vm0  ;;  %v735_v63 = vsel %vm9278_vm15, %v5886_v57, -inf  ;;  %v5944_v6 = vadd.f32 %v3657_v26, %v5531_v37  ;;  %v4104_v37 = vld [vmem:[%s8937_s0 + $0x108] sm:$0x3] }
  0xf3   :  { %v727_v5 = vmax.f32 %v723_v3, %v726_v14  ;;  %v728_v49 = vsel %vm9275_vm13, %v5850_v20, -inf  ;;  %vm9276_vm7 = vmmov %vm9269_vm0  ;;  %v5924_v3 = vadd.f32 %v4102_v55, %v5776_v60  ;;  %v4103_v14 = vld [vmem:[%s8937_s0 + $0xf8] sm:$0x3]  ;;  %v5941_v55 = vadd.f32 %v3655_v9, %v5529_v10 }
  0xf4   :  { %v730_v59 = vsel %vm9276_vm7, %v5863_v38, -inf  ;;  %vm9277_vm9 = vmmov %vm9269_vm0  ;;  %v729_v39 = vmax.f32 %v725_v15, %v728_v49  ;;  %v5930_v4 = vadd.f32 %v4103_v14, %v5781_v44  ;;  %v736_v15 = vsel %vm9266_vm11, %v5891_v24, -inf }
  0xf5   :  { %v732_v62 = vsel %vm9277_vm9, %v5869_v27, -inf  ;;  %v731_v1 = vmax.f32 %v727_v5, %v730_v59  ;;  %vm9279_vm14 = vmmov %vm9266_vm11  ;;  %v5947_v34 = vadd.f32 %v3659_v36, %v5533_v42  ;;  %v5965_v42 = vadd.f32 %v4104_v37, %v5783_v50 }
  0xf6   :  { %v737_v49 = vsel %vm9279_vm14, %v5901_v17, -inf  ;;  %vm9280_vm1 = vmmov %vm9266_vm11  ;;  %v733_v44 = vmax.f32 %v729_v39, %v732_v62  ;;  %v4105_v62 = vld [vmem:[%s8937_s0 + $0x118] sm:$0x3]  ;;  %v9285_v39 = vperm.slane %v5758_v48, 0 }
  0xf7   :  { %v739_v60 = vsel %vm9280_vm1, %v5906_v8, -inf  ;;  %v738_v14 = vmax.f32 %v735_v63, %v737_v49  ;;  %vm9281_vm0 = vmmov %vm9280_vm1  ;;  %v5973_v36 = vadd.f32 %v4105_v62, %v5788_v54 }
  0xf8   :  { %v5951_v5 = vsel %vm9281_vm0, %v5746_v13, -inf  ;;  %vm9282_vm2 = vmmov %vm9281_vm0  ;;  %v740_v41 = vmax.f32 %v736_v15, %v739_v60  ;;  %v5959_v9 = vmax.f32 %v731_v1, %v733_v44  ;;  %v4106_v1 = vld [vmem:[%s8937_s0 + $0x128] sm:$0x3] }
  0xf9   :  { %v5955_v59 = vsel %vm9282_vm2, %v5809_v53, -inf  ;;  %vm9283_vm12 = vmmov %vm9281_vm0  ;;  %v5980_v63 = vadd.f32 %v4106_v1, %v9285_v39 }
  0xfa   :  { %v1816_v10 = vsel %vm9283_vm12, %v5829_v46, -inf  ;;  %vm9284_vm4 = vmmov %vm9281_vm0  ;;  %v754_v49 = vsub.f32 %v5796_v43, %v5959_v9  ;;  %v756_v60 = vsub.f32 %v5801_v61, %v5959_v9  ;;  %v758_v54 = vsub.f32 %v5806_v35, %v5959_v9  ;;  %v4107_v61 = vld [vmem:[%s8937_s0 + $0x138] sm:$0x3] }
  0xfb   :  { %v741_v26 = vsel %vm9284_vm4, %v5924_v3, -inf  ;;  %vm9286_vm5 = vmmov %vm9281_vm0  ;;  %v760_v44 = vsub.f32 %v5814_v58, %v5959_v9  ;;  %v1817_v37 = vmax.f32 %v5951_v5, %v1816_v10  ;;  %v6001_v35 = vadd.f32 %v4107_v61, %v5791_v0 }
  0xfc   :  { %v742_v50 = vmax.f32 %v738_v14, %v741_v26  ;;  %v743_v15 = vsel %vm9286_vm5, %v5930_v4, -inf  ;;  %vm9287_vm13 = vmmov %vm9281_vm0  ;;  %v762_v26 = vsub.f32 %v5820_v40, %v5959_v9  ;;  %v774_v1 = vmul.f32 1.442695, %v754_v49 }
  0xfd   :  { %v1818_v14 = vsel %vm9287_vm13, %v5874_v56, -inf  ;;  %v744_v62 = vmax.f32 %v740_v41, %v743_v15  ;;  %v778_v43 = vmul.f32 1.442695, %v756_v60  ;;  %vm9288_vm7 = vmmov %vm9281_vm0  ;;  %v764_v5 = vsub.f32 %v5837_v47, %v5959_v9  ;;  %v3663_v15 = vld [vmem:[%s8937_s0 + $0x318] sm:$0x3] }
  0xfe   :  { %v745_v58 = vsel %vm9288_vm7, %v5965_v42, -inf  ;;  %v782_v10 = vmul.f32 1.442695, %v758_v54  ;;  %v786_v39 = vmul.f32 1.442695, %v760_v44  ;;  %v766_v41 = vsub.f32 %v5843_v33, %v5959_v9  ;;  %vm9289_vm9 = vmmov %vm9281_vm0 }
  0xff   :  { %v746_v56 = vmax.f32 %v742_v50, %v745_v58  ;;  %3779 = vpow2.f32 %v774_v1  ;;  %v747_v40 = vsel %vm9289_vm9, %v5973_v36, -inf  ;;  %vm9290_vm15 = vmmov %vm9281_vm0  ;;  %v768_v47 = vsub.f32 %v5850_v20, %v5959_v9 }
 0x100   :  { %v749_v0 = vsel %vm9290_vm15, %v5980_v63, -inf  ;;  %3781 = vpow2.f32 %v778_v43  ;;  %v790_v49 = vmul.f32 1.442695, %v762_v26  ;;  %v748_v50 = vmax.f32 %v744_v62, %v747_v40  ;;  %vm9291_vm11 = vmmov %vm9281_vm0 }
 0x101   :  { %v770_v33 = vsub.f32 %v5863_v38, %v5959_v9  ;;  %3783 = vpow2.f32 %v782_v10  ;;  %v750_v60 = vmax.f32 %v746_v56, %v749_v0  ;;  %v751_v54 = vsel %vm9291_vm11, %v6001_v35, -inf  ;;  %vm9292_vm14 = vmmov %vm9281_vm0 }
 0x102   :  { %v772_v44 = vsub.f32 %v5869_v27, %v5959_v9  ;;  %3785 = vpow2.f32 %v786_v39  ;;  %v794_v1 = vmul.f32 1.442695, %v764_v5  ;;  %v752_v61 = vmax.f32 %v748_v50, %v751_v54  ;;  %vm9293_vm1 = vmmov %vm9281_vm0 }
 0x103   :  { %v6025_v58 = vadd.f32 %v3663_v15, %v5540_v7  ;;  %v6029_v20 = vsel %vm9292_vm14, %v5650_v25, -inf  ;;  %v1820_v38 = vsel %vm9293_vm1, %v5877_v18, -inf  ;;  %v798_v56 = vmul.f32 1.442695, %v766_v41  ;;  %vm9294_vm2 = vmmov %vm9281_vm0 }
 0x104   :  { %v1819_v26 = vmax.f32 %v5955_v59, %v1818_v14  ;;  %3787 = vpow2.f32 %v790_v49  ;;  %v802_v62 = vmul.f32 1.442695, %v768_v47  ;;  %v6034_v43 = vmax.f32 %v750_v60, %v752_v61  ;;  %vm9295_vm12 = vmmov %vm9281_vm0 }
 0x105   :  { %v3780_v27 = vpop.eup %3779  ;;  %v1822_v5 = vsel %vm9281_vm0, %v5941_v55, -inf  ;;  %v6040_v7 = vsel %vm9294_vm2, %v5944_v6, -inf  ;;  %v6044_v10 = vsel %vm9295_vm12, %v5947_v34, -inf  ;;  %v806_v39 = vmul.f32 1.442695, %v770_v33  ;;  %vm9302_vm11 = vmmov %vm9281_vm0 }
 0x106   :  { %v3782_v41 = vpop.eup %3781  ;;  %v1821_v40 = vmax.f32 %v1817_v37, %v1820_v38  ;;  %3789 = vpow2.f32 %v794_v1  ;;  %v810_v59 = vmul.f32 1.442695, %v772_v44  ;;  %vm9296_vm4 = vcmask 15360   ;;  %vm9306_vm12 = vmmov %vm9281_vm0 }
 0x107   :  { %v814_v14 = vsel %vm9296_vm4, %v3780_v27, 0.0  ;;  %v3784_v0 = vpop.eup %3783  ;;  %3791 = vpow2.f32 %v798_v56  ;;  %vm9297_vm5 = vmmov %vm9296_vm4  ;;  %v755_v47 = vsub.f32 %v5886_v57, %v6034_v43  ;;  %v757_v49 = vsub.f32 %v5891_v24, %v6034_v43 }
 0x108   :  { %v815_v15 = vsel %vm9297_vm5, %v3782_v41, 0.0  ;;  %v3786_v50 = vpop.eup %3785  ;;  %3793 = vpow2.f32 %v802_v62  ;;  %v759_v37 = vsub.f32 %v5901_v17, %v6034_v43  ;;  %v761_v33 = vsub.f32 %v5906_v8, %v6034_v43  ;;  %vm9298_vm13 = vmmov %vm9296_vm4 }
 0x109   :  { %v816_v60 = vadd.f32 %v815_v15, %v814_v14  ;;  %v1823_v54 = vmax.f32 %v1819_v26, %v1822_v5  ;;  %3795 = vpow2.f32 %v806_v39  ;;  %v817_v44 = vsel %vm9298_vm13, %v3784_v0, 0.0  ;;  %vm9299_vm7 = vmmov %vm9296_vm4 }
 0x10a   :  { %v763_v1 = vsub.f32 %v5924_v3, %v6034_v43  ;;  %v3788_v57 = vpop.eup %3787  ;;  %v1825_v61 = vmax.f32 %v1821_v40, %v6040_v7  ;;  %3797 = vpow2.f32 %v810_v59  ;;  %v765_v38 = vsub.f32 %v5930_v4, %v6034_v43  ;;  %vm9300_vm9 = vmmov %vm9296_vm4 }
 0x10b   :  { %v818_v24 = vadd.f32 %v817_v44, %v816_v60  ;;  %v819_v17 = vsel %vm9299_vm7, %v3786_v50, 0.0  ;;  %v767_v8 = vsub.f32 %v5965_v42, %v6034_v43  ;;  %v776_v56 = vmul.f32 1.442695, %v755_v47  ;;  %vm9301_vm15 = vmmov %vm9296_vm4 }
 0x10c   :  { %v780_v26 = vmul.f32 1.442695, %v757_v49  ;;  %v3790_v62 = vpop.eup %3789  ;;  %v769_v3 = vsub.f32 %v5973_v36, %v6034_v43  ;;  %v784_v5 = vmul.f32 1.442695, %v759_v37  ;;  %v788_v39 = vmul.f32 1.442695, %v761_v33  ;;  %vm9303_vm14 = vmmov %vm9296_vm4 }
 0x10d   :  { %v820_v27 = vadd.f32 %v819_v17, %v818_v24  ;;  %v3792_v7 = vpop.eup %3791  ;;  %v821_v41 = vsel %vm9300_vm9, %v3788_v57, 0.0  ;;  %v771_v4 = vsub.f32 %v5980_v63, %v6034_v43  ;;  %3799 = vpow2.f32 %v776_v56  ;;  %vm9304_vm1 = vmmov %vm9296_vm4 }
 0x10e   :  { %v792_v40 = vmul.f32 1.442695, %v763_v1  ;;  %v3794_v59 = vpop.eup %3793  ;;  %v773_v42 = vsub.f32 %v6001_v35, %v6034_v43  ;;  %3801 = vpow2.f32 %v780_v26  ;;  %v796_v0 = vmul.f32 1.442695, %v765_v38  ;;  %vm9305_vm2 = vmmov %vm9304_vm1 }
 0x10f   :  { %v822_v14 = vadd.f32 %v821_v41, %v820_v27  ;;  %v3796_v15 = vpop.eup %3795  ;;  %v1827_v36 = vmax.f32 %v1823_v54, %v6044_v10  ;;  %v823_v47 = vsel %vm9301_vm15, %v3790_v62, 0.0  ;;  %3803 = vpow2.f32 %v784_v5  ;;  %vm9307_vm4 = vmmov %vm9304_vm1 }
 0x110   :  { %v800_v49 = vmul.f32 1.442695, %v767_v8  ;;  %v3798_v50 = vpop.eup %3797  ;;  %v1830_v63 = vsel %vm9302_vm11, %v6025_v58, -inf  ;;  %3805 = vpow2.f32 %v788_v39  ;;  %v804_v37 = vmul.f32 1.442695, %v769_v3  ;;  %vm9308_vm5 = vmmov %vm9281_vm0 }
 0x111   :  { %v824_v60 = vadd.f32 %v823_v47, %v822_v14  ;;  %v825_v33 = vsel %vm9303_vm14, %v3792_v7, 0.0  ;;  %3807 = vpow2.f32 %v792_v40  ;;  %v808_v35 = vmul.f32 1.442695, %v771_v4  ;;  %vm9309_vm13 = vmmov %vm9281_vm0 }
 0x112   :  { %3809 = vpow2.f32 %v796_v0  ;;  %v812_v1 = vmul.f32 1.442695, %v773_v42  ;;  %v1829_v10 = vmax.f32 %v1825_v61, %v6029_v20  ;;  %v1831_v54 = vmax.f32 %v1827_v36, %v1830_v63  ;;  %vm9310_vm7 = vmmov %vm9281_vm0 }
 0x113   :  { %v826_v44 = vadd.f32 %v825_v33, %v824_v60  ;;  %v3800_v57 = vpop.eup %3799  ;;  %v827_v24 = vsel %vm9304_vm1, %v3794_v59, 0.0  ;;  %3811 = vpow2.f32 %v800_v49  ;;  %v829_v26 = vsel %vm9305_vm2, %v3796_v15, 0.0  ;;  %vm9311_vm9 = vmmov %vm9281_vm0 }
 0x114   :  { %v3802_v38 = vpop.eup %3801  ;;  %3813 = vpow2.f32 %v804_v37  ;;  %v833_v8 = vsel %vm9281_vm0, %v3800_v57, 0.0  ;;  %v6082_v61 = vmax.f32 %v1829_v10, %v1831_v54  ;;  %v831_v39 = vsel %vm9307_vm4, %v3798_v50, 0.0  ;;  %vm9312_vm15 = vmmov %vm9281_vm0  ;;  %v9319_v10 = vld [vmem:[#allocation48_spill] sm:$0xff] }
 0x115   :  { %v828_v17 = vadd.f32 %v827_v24, %v826_v44  ;;  %v3804_v56 = vpop.eup %3803  ;;  %3815 = vpow2.f32 %v808_v35  ;;  %v834_v62 = vsel %vm9306_vm12, %v3802_v38, 0.0  ;;  %vm9313_vm11 = vmmov %vm9281_vm0  ;;  %vm991_vm14 = vcmp.eq.f32.partialorder %v5035_v45, %v5145_v12  ;;  %v9316_v35 = vld [vmem:[#allocation28_spill] sm:$0xff] }
 0x116   :  { %v3806_v27 = vpop.eup %3805  ;;  %3817 = vpow2.f32 %v812_v1  ;;  %v835_v5 = vadd.f32 %v834_v62, %v833_v8  ;;  %v836_v7 = vsel %vm9308_vm5, %v3804_v56, 0.0  ;;  %v2131_v63 = vsel %vm5624_vm3, %v6082_v61, %v5440_v32  ;;  %vm9314_vm2 = vmmov %vm9281_vm0  ;;  %v9317_v44 = vld [vmem:[#allocation4_spill] sm:$0xff]  ;;  %v9318_v1 = vld [vmem:[#allocation46_spill] sm:$0xff] }
 0x117   :  { %v830_v3 = vadd.f32 %v829_v26, %v828_v17  ;;  %v3808_v20 = vpop.eup %3807  ;;  %v838_v14 = vsel %vm9309_vm13, %v3806_v27, 0.0  ;;  %vm993_vm1 = vcmp.eq.f32.partialorder %v5037_v2, %v5145_v12  ;;  %2133 = vst.msk [vmem:[%s8935_s3 + $0x8] sm:$0x3] %vm9314_vm2, %v2131_v63  ;;  %vm995_vm12 = vcmp.eq.f32.partialorder %v5076_v29, %v5145_v12  ;;  %vm9315_vm5 = vmmov %vm9281_vm0  ;;  %v9320_v29 = vld [vmem:[#allocation38_spill] sm:$0xff]  ;;  %v3680_v45 = vld [vmem:[%s8937_s0 + $0x3a0] sm:$0xff] }
 0x118   :  { %v3810_v41 = vpop.eup %3809  ;;  %v837_v40 = vadd.f32 %v836_v7, %v835_v5  ;;  %v840_v42 = vsel %vm9310_vm7, %v3808_v20, 0.0  ;;  %vm997_vm4 = vcmp.eq.f32.partialorder %v5080_v16, %v5145_v12  ;;  %vm999_vm13 = vcmp.eq.f32.partialorder %v9316_v35, %v5145_v12  ;;  %v9321_v16 = vld [vmem:[#allocation39_spill] sm:$0xff]  ;;  %v3681_v2 = vld [vmem:[%s8937_s0 + $0x3a8] sm:$0x3] }
 0x119   :  { %v832_v4 = vadd.f32 %v831_v39, %v830_v3  ;;  %v3812_v59 = vpop.eup %3811  ;;  %v842_v36 = vsel %vm9311_vm9, %v3810_v41, 0.0  ;;  %vm1001_vm7 = vcmp.eq.f32.partialorder %v9317_v44, %v5145_v12  ;;  %vm1003_vm9 = vcmp.eq.f32.partialorder %v9318_v1, %v5145_v12 }
 0x11a   :  { %v3814_v0 = vpop.eup %3813  ;;  %v839_v15 = vadd.f32 %v838_v14, %v837_v40  ;;  %v844_v47 = vsel %vm9312_vm15, %v3812_v59, 0.0  ;;  %vm1005_vm15 = vcmp.eq.f32.partialorder %v9319_v10, %v5145_v12  ;;  %v1011_v54 = vsel %vm991_vm14, 0, %v9244_v28 }
 0x11b   :  { %3819 = vlog2.f32 %v832_v4  ;;  %v3816_v49 = vpop.eup %3815  ;;  %v846_v50 = vsel %vm9313_vm11, %v3814_v0, 0.0  ;;  %vm1007_vm11 = vcmp.eq.f32.partialorder %v9320_v29, %v5145_v12  ;;  %v1013_v24 = vsel %vm993_vm1, 1, %v9244_v28 }
 0x11c   :  { %v3818_v60 = vpop.eup %3817  ;;  %v841_v37 = vadd.f32 %v840_v42, %v839_v15  ;;  %v848_v33 = vsel %vm9281_vm0, %v3816_v49, 0.0  ;;  %vm1009_vm0 = vcmp.eq.f32.partialorder %v9321_v16, %v5145_v12  ;;  %v1015_v38 = vsel %vm995_vm12, 2, %v9244_v28  ;;  %v3682_v49 = vld [vmem:[%s8937_s0 + $0x3b0] sm:$0xff] }
 0x11d   :  { %v850_v32 = vsel %vm9315_vm5, %v3818_v60, 0.0  ;;  %v1017_v17 = vsel %vm997_vm4, 3, %v9244_v28  ;;  %v1019_v26 = vsel %vm999_vm13, 4, %v9244_v28  ;;  %v1021_v62 = vsel %vm1001_vm7, 5, %v9244_v28 }
 0x11e   :  { %v843_v57 = vadd.f32 %v842_v36, %v841_v37  ;;  %v1023_v27 = vsel %vm1003_vm9, 6, %v9244_v28  ;;  %v1025_v12 = vsel %vm1005_vm15, 7, %v9244_v28  ;;  %v1027_v5 = vsel %vm1007_vm11, 8, %v9244_v28  ;;  %v6150_v59 = vld [vmem:[%s8935_s3 + $0x8] sm:$0x3] }
 0x11f   :  { %v1029_v20 = vsel %vm1009_vm0, 9, %v9244_v28  ;;  %vm9322_vm14 = vcmask 15360   ;;  %v2175_v15 = vrot.slane %v6150_v59, 1  ;;  %v2184_v36 = vperm.slane %v6150_v59, 0 }
 0x120   :  { %v845_v56 = vadd.f32 %v844_v47, %v843_v57  ;;  %v1031_v7 = vsel %vm9322_vm14, %v1011_v54, 2147483647  ;;  %vm9323_vm1 = vmmov %vm9322_vm14 }
 0x121   :  { %v3820_v8 = vpop.eup %3819  ;;  %v1032_v41 = vsel %vm9323_vm1, %v1013_v24, 2147483647  ;;  %vm9324_vm2 = vmmov %vm9323_vm1  ;;  %v2185_v37 = vperm.slane %v2175_v15, 0 }
 0x122   :  { %v853_v3 = vmul.f32 0.6931472, %v3820_v8  ;;  %v847_v39 = vadd.f32 %v846_v50, %v845_v56  ;;  %v1033_v4 = vsel %vm9324_vm2, %v1015_v38, 2147483647  ;;  %vm9325_vm4 = vmmov %vm9323_vm1  ;;  %v3683_v50 = vld [vmem:[%s8937_s0 + $0x3b8] sm:$0x3] }
 0x123   :  { %vm1034_vm12 = vcmp.lt.s32.totalorder %v1031_v7, %v1033_v4  ;;  %v1036_v14 = vsel %vm9325_vm4, %v1017_v17, 2147483647  ;;  %vm9326_vm5 = vmmov %vm9323_vm1  ;;  %v6176_v10 = vadd.f32 %v3682_v49, %v2185_v37  ;;  %v6178_v29 = vadd.f32 %v3683_v50, %v2185_v37 }
 0x124   :  { %v856_v40 = vadd.f32 %v853_v3, %v5959_v9  ;;  %v1039_v42 = vsel %vm9326_vm5, %v1019_v26, 2147483647  ;;  %v849_v0 = vadd.f32 %v848_v33, %v847_v39  ;;  %v1035_v47 = vsel %vm1034_vm12, %v1031_v7, %v1033_v4  ;;  %vm9327_vm9 = vmmov %vm9323_vm1  ;;  %v9337_v26 = vld [vmem:[#allocation51_spill] sm:$0xff]  ;;  %v9345_v4 = vld [vmem:[#allocation49_spill] sm:$0xff] }
 0x125   :  { %vm1037_vm13 = vcmp.lt.s32.totalorder %v1032_v41, %v1036_v14  ;;  %vm1040_vm7 = vcmp.lt.s32.totalorder %v1035_v47, %v1039_v42  ;;  %v1042_v63 = vsel %vm9327_vm9, %v1021_v62, 2147483647  ;;  %vm9328_vm15 = vmmov %vm9323_vm1  ;;  %v6172_v33 = vadd.f32 %v3681_v2, %v2184_v36  ;;  %v9338_v62 = vld [vmem:[#allocation17_spill] sm:$0xff]  ;;  %v9340_v2 = vld [vmem:[#allocation20_spill] sm:$0xff] }
 0x126   :  { %v871_v9 = vsel %vm4774_vm6, %v856_v40, %v5606_v51  ;;  %v851_v60 = vadd.f32 %v850_v32, %v849_v0  ;;  %v6170_v51 = vadd.f32 %v3680_v45, %v2184_v36  ;;  %v1038_v35 = vsel %vm1037_vm13, %v1032_v41, %v1036_v14  ;;  %vm9329_vm11 = vmmov %vm9323_vm1  ;;  %v9339_v45 = vld [vmem:[#allocation36_spill] sm:$0xff]  ;;  %v9344_v41 = vld [vmem:[#allocation47_spill] sm:$0xff] }
 0x127   :  { %873 = vst.msk [vmem:[%s8934_s4] sm:$0xff] %vm9328_vm15, %v871_v9  ;;  %v1041_v44 = vsel %vm1040_vm7, %v1035_v47, %v1039_v42  ;;  %v1045_v1 = vsel %vm9329_vm11, %v1023_v27, 2147483647  ;;  %vm9330_vm0 = vmmov %vm9323_vm1  ;;  %vm9332_vm1 = vcmask 9216   ;;  %vm1043_vm2 = vcmp.lt.s32.totalorder %v1038_v35, %v1042_v63  ;;  %v9346_v40 = vld [vmem:[#allocation12_spill] sm:$0xff]  ;;  %v9347_v42 = vld [vmem:[#allocation35_spill] sm:$0xff] }
 0x128   :  { %v1048_v57 = vsel %vm9330_vm0, %v1025_v12, 2147483647  ;;  %3821 = vlog2.f32 %v851_v60  ;;  %vm9331_vm14 = vmmov %vm9330_vm0  ;;  %v6186_v32 = vsel %vm9332_vm1, %v6172_v33, -inf  ;;  %vm1046_vm12 = vcmp.lt.s32.totalorder %v1041_v44, %v1045_v1  ;;  %v9341_v12 = vld [vmem:[#allocation32_spill] sm:$0xff] }
 0x129   :  { %v6182_v16 = vsel %vm9331_vm14, %v6170_v51, -inf  ;;  %vm9333_vm4 = vmmov %vm9330_vm0  ;;  %v1044_v17 = vsel %vm1043_vm2, %v1038_v35, %v1042_v63  ;;  %v1047_v8 = vsel %vm1046_vm12, %v1041_v44, %v1045_v1  ;;  %vm992_vm11 = vcmp.eq.f32.partialorder %v9338_v62, %v9337_v26 }
 0x12a   :  { %v1051_v54 = vsel %vm9333_vm4, %v1027_v5, 2147483647  ;;  %vm9334_vm5 = vmmov %vm9330_vm0  ;;  %vm1049_vm7 = vcmp.lt.s32.totalorder %v1044_v17, %v1048_v57  ;;  %vm996_vm14 = vcmp.eq.f32.partialorder %v9340_v2, %v9337_v26  ;;  %vm998_vm2 = vcmp.eq.f32.partialorder %v9341_v12, %v9337_v26  ;;  %v9342_v5 = vld [vmem:[#allocation37_spill] sm:$0xff] }
 0x12b   :  { %v6191_v24 = vsel %vm9334_vm5, %v6176_v10, -inf  ;;  %vm9335_vm13 = vmmov %vm9332_vm1  ;;  %vm1052_vm9 = vcmp.lt.s32.totalorder %v1047_v8, %v1051_v54  ;;  %v1050_v27 = vsel %vm1049_vm7, %v1044_v17, %v1048_v57  ;;  %vm1000_vm12 = vcmp.eq.f32.partialorder %v9342_v5, %v9337_v26 }
 0x12c   :  { %v6195_v38 = vsel %vm9335_vm13, %v6178_v29, -inf  ;;  %vm9336_vm15 = vmmov %vm9330_vm0  ;;  %v1053_v3 = vsel %vm1052_vm9, %v1047_v8, %v1051_v54  ;;  %vm994_vm0 = vcmp.eq.f32.partialorder %v9339_v45, %v9337_v26  ;;  %vm1004_vm5 = vcmp.eq.f32.partialorder %v9344_v41, %v9337_v26  ;;  %v9361_v41 = vld [vmem:[#allocation63_spill] sm:$0xff] }
 0x12d   :  { %v1054_v56 = vsel %vm9336_vm15, %v1029_v20, 2147483647  ;;  %v9343_v20 = vld [vmem:[#allocation31_spill] sm:$0xff]  ;;  %vm1006_vm13 = vcmp.eq.f32.partialorder %v9345_v4, %v9337_v26  ;;  %vm1008_vm7 = vcmp.eq.f32.partialorder %v9346_v40, %v9337_v26  ;;  %vm1010_vm15 = vcmp.eq.f32.partialorder %v9347_v42, %v9337_v26  ;;  %v9362_v4 = vld [vmem:[#allocation65_spill] sm:$0xff] }
 0x12e   :  { %vm1055_vm1 = vcmp.lt.s32.totalorder %v1050_v27, %v1054_v56  ;;  %vm1002_vm4 = vcmp.eq.f32.partialorder %v9343_v20, %v9337_v26  ;;  %v3822_v39 = vpop.eup %3821  ;;  %v1012_v0 = vsel %vm992_vm11, 0, %v9244_v28  ;;  %v1014_v36 = vsel %vm994_vm0, 1, %v9244_v28  ;;  %v9364_v42 = vld [vmem:[#allocation59_spill] sm:$0xff] }
 0x12f   :  { %v1056_v7 = vsel %vm1055_vm1, %v1050_v27, %v1054_v56  ;;  %v855_v14 = vmul.f32 0.6931472, %v3822_v39  ;;  %v1016_v47 = vsel %vm996_vm14, 2, %v9244_v28  ;;  %v1018_v9 = vsel %vm998_vm2, 3, %v9244_v28  ;;  %v9360_v39 = vld [vmem:[#allocation58_spill] sm:$0xff] }
 0x130   :  { %vm1057_vm9 = vcmp.lt.s32.totalorder %v1053_v3, %v1056_v7  ;;  %v1020_v60 = vsel %vm1000_vm12, 4, %v9244_v28  ;;  %v1022_v37 = vsel %vm1002_vm4, 5, %v9244_v28  ;;  %vm9349_vm11 = vcmask 15360  }
 0x131   :  { %v1058_v15 = vsel %vm1057_vm9, %v1053_v3, %v1056_v7  ;;  %v857_v49 = vadd.f32 %v855_v14, %v6034_v43  ;;  %v1024_v43 = vsel %vm1004_vm5, 6, %v9244_v28  ;;  %v1026_v35 = vsel %vm1006_vm13, 7, %v9244_v28  ;;  %v9363_v14 = vld [vmem:[#allocation54_spill] sm:$0xff] }
 0x132   :  { %v1282_v63 = vsel %vm5147_vm8, %v1058_v15, 9  ;;  %v1028_v44 = vsel %vm1008_vm7, 8, %v9244_v28  ;;  %v1030_v1 = vsel %vm1010_vm15, 9, %v9244_v28  ;;  %vm9350_vm0 = vcmask 9216  }
 0x133   :  { %1286 = vst.msk [vmem:[#allocation2 + $0x20] sm:$0xff] %vm9349_vm11, %v1282_v63  ;;  %v872_v57 = vsel %vm4774_vm6, %v857_v49, %v5758_v48  ;;  %v1059_v54 = vsel %vm9350_vm0, %v1012_v0, 2147483647  ;;  %vm9351_vm14 = vmmov %vm9350_vm0  ;;  %vm1412_vm13 = vcmp.eq.f32.partialorder %v5246_v23, %v5363_v31  ;;  %v1079_v45 = vsel %vm9350_vm0, %v1028_v44, 2147483647  ;;  %v9370_v44 = vld [vmem:[#allocation33_spill] sm:$0xff] }
 0x134   :  { %v1060_v17 = vsel %vm9351_vm14, %v1014_v36, 2147483647  ;;  %vm9352_vm1 = vmmov %vm9350_vm0  ;;  %v1432_v15 = vsel %vm1412_vm13, 0, %v9244_v28  ;;  %vm9365_vm13 = vcmask 15360  }
 0x135   :  { %v1061_v8 = vsel %vm9352_vm1, %v1016_v47, 2147483647  ;;  %vm9353_vm2 = vmmov %vm9350_vm0 }
 0x136   :  { %874 = vst.msk [vmem:[%s8934_s4 + $0x8] sm:$0x3] %vm9353_vm2, %v872_v57  ;;  %vm1062_vm12 = vcmp.lt.s32.totalorder %v1059_v54, %v1061_v8  ;;  %vm9354_vm4 = vmmov %vm9350_vm0  ;;  %vm1414_vm2 = vcmp.eq.f32.partialorder %v5259_v30, %v5363_v31 }
 0x137   :  { %v1064_v56 = vsel %vm9354_vm4, %v1018_v9, 2147483647  ;;  %vm9355_vm5 = vmmov %vm9350_vm0  ;;  %v1063_v52 = vsel %vm1062_vm12, %v1059_v54, %v1061_v8  ;;  %vm1416_vm4 = vcmp.eq.f32.partialorder %v5263_v11, %v5363_v31  ;;  %v1434_v36 = vsel %vm1414_vm2, 1, %v9244_v28 }
 0x138   :  { %v1067_v26 = vsel %vm9355_vm5, %v1020_v60, 2147483647  ;;  %vm1065_vm6 = vcmp.lt.s32.totalorder %v1060_v17, %v1064_v56  ;;  %vm9356_vm7 = vmmov %vm9350_vm0  ;;  %vm1418_vm5 = vcmp.eq.f32.partialorder %v5278_v21, %v5363_v31  ;;  %v1436_v47 = vsel %vm1416_vm4, 2, %v9244_v28 }
 0x139   :  { %v1070_v48 = vsel %vm9356_vm7, %v1022_v37, 2147483647  ;;  %vm9357_vm9 = vmmov %vm9350_vm0  ;;  %v1066_v27 = vsel %vm1065_vm6, %v1060_v17, %v1064_v56  ;;  %vm1068_vm15 = vcmp.lt.s32.totalorder %v1063_v52, %v1067_v26  ;;  %vm1420_vm7 = vcmp.eq.f32.partialorder %v5287_v19, %v5363_v31 }
 0x13a   :  { %v1073_v62 = vsel %vm9357_vm9, %v1024_v43, 2147483647  ;;  %vm9358_vm11 = vmmov %vm9350_vm0  ;;  %v1069_v2 = vsel %vm1068_vm15, %v1063_v52, %v1067_v26  ;;  %vm1071_vm14 = vcmp.lt.s32.totalorder %v1066_v27, %v1070_v48  ;;  %vm1422_vm9 = vcmp.eq.f32.partialorder %v9360_v39, %v5363_v31  ;;  %v9382_v39 = vld [vmem:[#allocation62_spill] sm:$0xff] }
 0x13b   :  { %v1076_v3 = vsel %vm9358_vm11, %v1026_v35, 2147483647  ;;  %vm9359_vm1 = vmmov %vm9350_vm0  ;;  %v1072_v5 = vsel %vm1071_vm14, %v1066_v27, %v1070_v48  ;;  %vm1074_vm12 = vcmp.lt.s32.totalorder %v1069_v2, %v1073_v62  ;;  %vm1424_vm11 = vcmp.eq.f32.partialorder %v9361_v41, %v5363_v31  ;;  %v9377_v48 = vld [vmem:[#allocation53_spill] sm:$0xff]  ;;  %v9384_v41 = vld [vmem:[#allocation66_spill] sm:$0xff] }
 0x13c   :  { %v1082_v12 = vsel %vm9359_vm1, %v1030_v1, 2147483647  ;;  %v1075_v20 = vsel %vm1074_vm12, %v1069_v2, %v1073_v62  ;;  %vm1077_vm6 = vcmp.lt.s32.totalorder %v1072_v5, %v1076_v3  ;;  %vm1426_vm0 = vcmp.eq.f32.partialorder %v9362_v4, %v5363_v31  ;;  %vm9366_vm2 = vmmov %vm9365_vm13  ;;  %v9371_v1 = vld [vmem:[#allocation52_spill] sm:$0xff]  ;;  %v9380_v2 = vld [vmem:[#allocation57_spill] sm:$0xff] }
 0x13d   :  { %v1078_v7 = vsel %vm1077_vm6, %v1072_v5, %v1076_v3  ;;  %vm1080_vm15 = vcmp.lt.s32.totalorder %v1075_v20, %v1079_v45  ;;  %vm1428_vm1 = vcmp.eq.f32.partialorder %v9363_v14, %v5363_v31  ;;  %vm1430_vm12 = vcmp.eq.f32.partialorder %v9364_v42, %v5363_v31  ;;  %v9385_v4 = vld [vmem:[#allocation56_spill] sm:$0xff] }
 0x13e   :  { %v1081_v40 = vsel %vm1080_vm15, %v1075_v20, %v1079_v45  ;;  %vm1083_vm14 = vcmp.lt.s32.totalorder %v1078_v7, %v1082_v12  ;;  %v1438_v9 = vsel %vm1418_vm5, 3, %v9244_v28  ;;  %v1440_v23 = vsel %vm1420_vm7, 4, %v9244_v28  ;;  %vm9368_vm5 = vmmov %vm9366_vm2  ;;  %v9379_v45 = vld [vmem:[#allocation55_spill] sm:$0xff]  ;;  %v9386_v42 = vld [vmem:[#allocation60_spill] sm:$0xff] }
 0x13f   :  { %v1084_v0 = vsel %vm1083_vm14, %v1078_v7, %v1082_v12  ;;  %v1442_v30 = vsel %vm1422_vm9, 5, %v9244_v28  ;;  %v1444_v11 = vsel %vm1424_vm11, 6, %v9244_v28  ;;  %v1446_v63 = vsel %vm1426_vm0, 7, %v9244_v28  ;;  %vm9369_vm7 = vmmov %vm9366_vm2  ;;  %v9381_v12 = vld [vmem:[#allocation61_spill] sm:$0xff]  ;;  %v9383_v7 = vld [vmem:[#allocation64_spill] sm:$0xff] }
 0x140   :  { %vm1085_vm6 = vcmp.lt.s32.totalorder %v1081_v40, %v1084_v0  ;;  %v1448_v60 = vsel %vm1428_vm1, 8, %v9244_v28  ;;  %v1450_v37 = vsel %vm1430_vm12, 9, %v9244_v28  ;;  %v1452_v19 = vsel %vm9365_vm13, %v1432_v15, 2147483647  ;;  %vm9372_vm0 = vmmov %vm9366_vm2 }
 0x141   :  { %v1086_v49 = vsel %vm1085_vm6, %v1081_v40, %v1084_v0  ;;  %v1453_v43 = vsel %vm9366_vm2, %v1434_v36, 2147483647  ;;  %vm9367_vm4 = vcmask 9216   ;;  %v1454_v31 = vsel %vm9368_vm5, %v1436_v47, 2147483647  ;;  %vm9373_vm14 = vmmov %vm9372_vm0 }
 0x142   :  { %v1283_v21 = vsel %vm5147_vm8, %v1086_v49, 9  ;;  %v1457_v35 = vsel %vm9369_vm7, %v1438_v9, 2147483647  ;;  %vm1413_vm9 = vcmp.eq.f32.partialorder %v9371_v1, %v9370_v44  ;;  %vm1455_vm15 = vcmp.lt.s32.totalorder %v1452_v19, %v1454_v31  ;;  %vm9374_vm1 = vmmov %vm9372_vm0 }
 0x143   :  { %1287 = vst.msk [vmem:[#allocation2 + $0x28] sm:$0x3] %vm9367_vm4, %v1283_v21  ;;  %vm1458_vm11 = vcmp.lt.s32.totalorder %v1453_v43, %v1457_v35  ;;  %v1460_v57 = vsel %vm9372_vm0, %v1440_v23, 2147483647  ;;  %v1463_v54 = vsel %vm9373_vm14, %v1442_v30, 2147483647  ;;  %v1456_v17 = vsel %vm1455_vm15, %v1452_v19, %v1454_v31  ;;  %vm9375_vm12 = vmmov %vm9372_vm0 }
 0x144   :  { %v1459_v8 = vsel %vm1458_vm11, %v1453_v43, %v1457_v35  ;;  %v1466_v56 = vsel %vm9374_vm1, %v1444_v11, 2147483647  ;;  %v1469_v26 = vsel %vm9375_vm12, %v1446_v63, 2147483647  ;;  %vm1461_vm6 = vcmp.lt.s32.totalorder %v1456_v17, %v1460_v57  ;;  %vm9376_vm2 = vmmov %vm9372_vm0  ;;  %v6390_v19 = vld [vmem:[%s8935_s3] sm:$0xff] }
 0x145   :  { %vm1464_vm13 = vcmp.lt.s32.totalorder %v1459_v8, %v1463_v54  ;;  %v1472_v52 = vsel %vm9376_vm2, %v1448_v60, 2147483647  ;;  %vm1415_vm4 = vcmp.eq.f32.partialorder %v9377_v48, %v9370_v44  ;;  %v1462_v62 = vsel %vm1461_vm6, %v1456_v17, %v1460_v57  ;;  %vm9378_vm5 = vmmov %vm9372_vm0 }
 0x146   :  { %v1465_v27 = vsel %vm1464_vm13, %v1459_v8, %v1463_v54  ;;  %v1475_v3 = vsel %vm9378_vm5, %v1450_v37, 2147483647  ;;  %vm1417_vm7 = vcmp.eq.f32.partialorder %v9379_v45, %v9370_v44  ;;  %vm1467_vm15 = vcmp.lt.s32.totalorder %v1462_v62, %v1466_v56 }
 0x147   :  { %vm1470_vm11 = vcmp.lt.s32.totalorder %v1465_v27, %v1469_v26  ;;  %vm1419_vm0 = vcmp.eq.f32.partialorder %v9380_v2, %v9370_v44  ;;  %vm1421_vm14 = vcmp.eq.f32.partialorder %v9381_v12, %v9370_v44  ;;  %v1468_v5 = vsel %vm1467_vm15, %v1462_v62, %v1466_v56 }
 0x148   :  { %v1471_v20 = vsel %vm1470_vm11, %v1465_v27, %v1469_v26  ;;  %vm1423_vm1 = vcmp.eq.f32.partialorder %v9382_v39, %v9370_v44  ;;  %vm1425_vm12 = vcmp.eq.f32.partialorder %v9383_v7, %v9370_v44  ;;  %vm1473_vm6 = vcmp.lt.s32.totalorder %v1468_v5, %v1472_v52 }
 0x149   :  { %vm1476_vm13 = vcmp.lt.s32.totalorder %v1471_v20, %v1475_v3  ;;  %vm1427_vm2 = vcmp.eq.f32.partialorder %v9384_v41, %v9370_v44  ;;  %vm1429_vm5 = vcmp.eq.f32.partialorder %v9385_v4, %v9370_v44  ;;  %v1474_v40 = vsel %vm1473_vm6, %v1468_v5, %v1472_v52  ;;  %v3664_v5 = vld [vmem:[%s8937_s0 + $0x320] sm:$0xff]  ;;  %v3666_v41 = vld [vmem:[%s8937_s0 + $0x330] sm:$0xff] }
 0x14a   :  { %v1477_v14 = vsel %vm1476_vm13, %v1471_v20, %v1475_v3  ;;  %vm1431_vm15 = vcmp.eq.f32.partialorder %v9386_v42, %v9370_v44  ;;  %v1433_v0 = vsel %vm1413_vm9, 0, %v9244_v28  ;;  %v1435_v15 = vsel %vm1415_vm4, 1, %v9244_v28  ;;  %v3668_v4 = vld [vmem:[%s8937_s0 + $0x340] sm:$0xff] }
 0x14b   :  { %vm1478_vm11 = vcmp.lt.s32.totalorder %v1474_v40, %v1477_v14  ;;  %v1437_v36 = vsel %vm1417_vm7, 2, %v9244_v28  ;;  %v1439_v47 = vsel %vm1419_vm0, 3, %v9244_v28  ;;  %v1441_v23 = vsel %vm1421_vm14, 4, %v9244_v28 }
 0x14c   :  { %v1479_v9 = vsel %vm1478_vm11, %v1474_v40, %v1477_v14  ;;  %v1443_v30 = vsel %vm1423_vm1, 5, %v9244_v28  ;;  %v1445_v49 = vsel %vm1425_vm12, 6, %v9244_v28  ;;  %v1447_v60 = vsel %vm1427_vm2, 7, %v9244_v28  ;;  %v3670_v40 = vld [vmem:[%s8937_s0 + $0x350] sm:$0xff] }
 0x14d   :  { %v1703_v63 = vsel %vm5349_vm10, %v1479_v9, 9  ;;  %v1449_v21 = vsel %vm1429_vm5, 8, %v9244_v28  ;;  %vm9388_vm9 = vcmask 9216   ;;  %vm9389_vm4 = vcmask 15360   ;;  %v3674_v9 = vld [vmem:[%s8937_s0 + $0x370] sm:$0xff] }
 0x14e   :  { %v1480_v37 = vsel %vm9388_vm9, %v1433_v0, 2147483647  ;;  %1707 = vst.msk [vmem:[#allocation2 + $0x30] sm:$0xff] %vm9389_vm4, %v1703_v63  ;;  %v1451_v43 = vsel %vm1431_vm15, 9, %v9244_v28  ;;  %vm9390_vm7 = vmmov %vm9388_vm9  ;;  %v2168_v62 = vrot.slane %v6390_v19, 1  ;;  %v2169_v27 = vrot.slane %v6390_v19, 2 }
 0x14f   :  { %v1481_v31 = vsel %vm9390_vm7, %v1435_v15, 2147483647  ;;  %vm9391_vm0 = vmmov %vm9390_vm7  ;;  %v2170_v45 = vrot.slane %v6390_v19, 3  ;;  %v2171_v2 = vrot.slane %v6390_v19, 4  ;;  %v2172_v20 = vrot.slane %v6390_v19, 5 }
 0x150   :  { %v1482_v35 = vsel %vm9391_vm0, %v1437_v36, 2147483647  ;;  %vm9392_vm1 = vmmov %vm9391_vm0  ;;  %v2173_v39 = vrot.slane %v6390_v19, 6  ;;  %v2174_v14 = vrot.slane %v6390_v19, 7  ;;  %v2176_v42 = vperm.slane %v6390_v19, 0 }
 0x151   :  { %vm1483_vm14 = vcmp.lt.s32.totalorder %v1480_v37, %v1482_v35  ;;  %v1485_v1 = vsel %vm9392_vm1, %v1439_v47, 2147483647  ;;  %vm9393_vm12 = vmmov %vm9391_vm0  ;;  %v3665_v15 = vld [vmem:[%s8937_s0 + $0x328] sm:$0x3]  ;;  %v3667_v36 = vld [vmem:[%s8937_s0 + $0x338] sm:$0x3] }
 0x152   :  { %v1488_v57 = vsel %vm9393_vm12, %v1441_v23, 2147483647  ;;  %vm9394_vm6 = vmmov %vm9391_vm0  ;;  %v1484_v17 = vsel %vm1483_vm14, %v1480_v37, %v1482_v35  ;;  %vm1486_vm13 = vcmp.lt.s32.totalorder %v1481_v31, %v1485_v1  ;;  %v3672_v47 = vld [vmem:[%s8937_s0 + $0x360] sm:$0xff]  ;;  %v2177_v23 = vperm.slane %v2168_v62, 0  ;;  %v3669_v63 = vld [vmem:[%s8937_s0 + $0x348] sm:$0x3] }
 0x153   :  { %v1491_v54 = vsel %vm9394_vm6, %v1443_v30, 2147483647  ;;  %vm9395_vm2 = vmmov %vm9391_vm0  ;;  %v1487_v26 = vsel %vm1486_vm13, %v1481_v31, %v1485_v1  ;;  %vm1489_vm11 = vcmp.lt.s32.totalorder %v1484_v17, %v1488_v57  ;;  %v2178_v30 = vperm.slane %v2169_v27, 0  ;;  %v6447_v31 = vld [vmem:[%s8936_s1] sm:$0x1] }
 0x154   :  { %v1494_v8 = vsel %vm9395_vm2, %v1445_v49, 2147483647  ;;  %vm9396_vm5 = vmmov %vm9391_vm0  ;;  %v1490_v48 = vsel %vm1489_vm11, %v1484_v17, %v1488_v57  ;;  %vm1492_vm4 = vcmp.lt.s32.totalorder %v1487_v26, %v1491_v54  ;;  %v2180_v37 = vperm.slane %v2171_v2, 0  ;;  %v3671_v35 = vld [vmem:[%s8937_s0 + $0x358] sm:$0x3] }
 0x155   :  { %v1497_v56 = vsel %vm9396_vm5, %v1447_v60, 2147483647  ;;  %vm9397_vm15 = vmmov %vm9391_vm0  ;;  %v1493_v3 = vsel %vm1492_vm4, %v1487_v26, %v1491_v54  ;;  %vm1495_vm7 = vcmp.lt.s32.totalorder %v1490_v48, %v1494_v8  ;;  %v3676_v60 = vld [vmem:[%s8937_s0 + $0x380] sm:$0xff]  ;;  %vm2140_vm6 = vcmp.gt.s32.totalorder %v6447_v31, 5  ;;  %v3673_v1 = vld [vmem:[%s8937_s0 + $0x368] sm:$0x3] }
 0x156   :  { %v1500_v44 = vsel %vm9397_vm15, %v1449_v21, 2147483647  ;;  %vm9398_vm9 = vmmov %vm9391_vm0  ;;  %v1496_v12 = vsel %vm1495_vm7, %v1490_v48, %v1494_v8  ;;  %vm1498_vm0 = vcmp.lt.s32.totalorder %v1493_v3, %v1497_v56  ;;  %v2179_v21 = vperm.slane %v2170_v45, 0  ;;  %v3677_v26 = vld [vmem:[%s8937_s0 + $0x388] sm:$0x3] }
 0x157   :  { %v1503_v52 = vsel %vm9398_vm9, %v1451_v43, 2147483647  ;;  %v1499_v7 = vsel %vm1498_vm0, %v1493_v3, %v1497_v56  ;;  %vm1501_vm14 = vcmp.lt.s32.totalorder %v1496_v12, %v1500_v44  ;;  %v2181_v43 = vperm.slane %v2172_v20, 0  ;;  %v3675_v56 = vld [vmem:[%s8937_s0 + $0x378] sm:$0x3]  ;;  %vm9399_vm13 = vmmov %vm9395_vm2 }
 0x158   :  { %v1502_v0 = vsel %vm1501_vm14, %v1496_v12, %v1500_v44  ;;  %vm1504_vm1 = vcmp.lt.s32.totalorder %v1499_v7, %v1503_v52  ;;  %v2182_v57 = vperm.slane %v2173_v39, 0  ;;  %v2183_v54 = vperm.slane %v2174_v14, 0  ;;  %v3678_v44 = vld [vmem:[%s8937_s0 + $0x390] sm:$0xff]  ;;  %v3679_v3 = vld [vmem:[%s8937_s0 + $0x398] sm:$0x3] }
 0x159   :  { %v1505_v49 = vsel %vm1504_vm1, %v1499_v7, %v1503_v52  ;;  %v6456_v17 = vadd.f32 %v3664_v5, %v2176_v42  ;;  %v6467_v52 = vadd.f32 %v3665_v15, %v2176_v42  ;;  %v6469_v48 = vadd.f32 %v3666_v41, %v2177_v23  ;;  %vm9410_vm1 = vmmov %vm9399_vm13 }
 0x15a   :  { %vm1506_vm12 = vcmp.lt.s32.totalorder %v1502_v0, %v1505_v49  ;;  %v6471_v62 = vadd.f32 %v3667_v36, %v2177_v23  ;;  %v6478_v45 = vadd.f32 %v3668_v4, %v2178_v30  ;;  %v6480_v2 = vadd.f32 %v3669_v63, %v2178_v30 }
 0x15b   :  { %v1507_v8 = vsel %vm1506_vm12, %v1502_v0, %v1505_v49  ;;  %v6482_v12 = vadd.f32 %v3670_v40, %v2179_v21  ;;  %v6485_v5 = vadd.f32 %v3671_v35, %v2179_v21  ;;  %v6487_v20 = vadd.f32 %v3672_v47, %v2180_v37  ;;  %v9403_v47 = vld [vmem:[#allocation34_spill] sm:$0xff]  ;;  %vm9411_vm12 = vmmov %vm9410_vm1 }
 0x15c   :  { %v1704_v27 = vsel %vm5349_vm10, %v1507_v8, 9  ;;  %v6489_v39 = vadd.f32 %v3673_v1, %v2180_v37  ;;  %v6491_v7 = vadd.f32 %v3674_v9, %v2181_v43  ;;  %v6493_v41 = vadd.f32 %v3675_v56, %v2181_v43  ;;  %v9404_v9 = vld [vmem:[#allocation7_spill] sm:$0xff] }
 0x15d   :  { %1708 = vst.msk [vmem:[#allocation2 + $0x38] sm:$0x3] %vm9399_vm13, %v1704_v27  ;;  %v6495_v14 = vadd.f32 %v3676_v60, %v2182_v57  ;;  %v6497_v4 = vadd.f32 %v3677_v26, %v2182_v57  ;;  %v6499_v42 = vadd.f32 %v3678_v44, %v2183_v54  ;;  %v6501_v40 = vadd.f32 %v3679_v3, %v2183_v54  ;;  %vm9412_vm13 = vmmov %vm9410_vm1 }
 0x15e   :  { %vm9400_vm2 = vcmask 15360   ;;  %vm1833_vm15 = vcmp.eq.f32.partialorder %v9404_v9, %v9403_v47  ;;  %v2235_v43 = vsel %vm9410_vm1, %v6467_v52, -inf  ;;  %v2236_v1 = vsel %vm9411_vm12, %v6471_v62, -inf }
 0x15f   :  { %v2216_v0 = vsel %vm9400_vm2, %v6456_v17, -inf  ;;  %vm9401_vm5 = vmmov %vm9400_vm2  ;;  %v2237_v57 = vsel %vm9412_vm13, %v6480_v2, -inf }
 0x160   :  { %v2217_v15 = vsel %vm9401_vm5, %v6469_v48, -inf  ;;  %vm9402_vm11 = vmmov %vm9400_vm2  ;;  %v2238_v56 = vmax.f32 %v2235_v43, %v2237_v57 }
 0x161   :  { %v2218_v36 = vsel %vm9402_vm11, %v6478_v45, -inf  ;;  %vm9405_vm9 = vmmov %vm9400_vm2 }
 0x162   :  { %v2219_v23 = vmax.f32 %v2216_v0, %v2218_v36  ;;  %v2220_v30 = vsel %vm9405_vm9, %v6482_v12, -inf  ;;  %vm9406_vm4 = vmmov %vm9400_vm2 }
 0x163   :  { %v2222_v49 = vsel %vm9406_vm4, %v6487_v20, -inf  ;;  %vm9407_vm7 = vmmov %vm9400_vm2  ;;  %v2221_v60 = vmax.f32 %v2217_v15, %v2220_v30 }
 0x164   :  { %v2224_v63 = vsel %vm9407_vm7, %v6491_v7, -inf  ;;  %vm9408_vm0 = vmmov %vm9400_vm2  ;;  %v2223_v35 = vmax.f32 %v2219_v23, %v2222_v49  ;;  %v9418_v49 = vmov 0  }
 0x165   :  { %v2226_v21 = vsel %vm9408_vm0, %v6495_v14, -inf  ;;  %vm9409_vm14 = vmmov %vm9408_vm0  ;;  %v2225_v8 = vmax.f32 %v2221_v60, %v2224_v63  ;;  %v2542_v63 = vsel %vm2140_vm6, 1, %v9418_v49 }
 0x166   :  { %v2228_v37 = vsel %vm9409_vm14, %v6499_v42, -inf  ;;  %vm9413_vm2 = vmmov %vm9410_vm1  ;;  %v2227_v27 = vmax.f32 %v2223_v35, %v2226_v21  ;;  %v2543_v43 = vperm.slane %v2542_v63, 0  ;;  %v9419_v21 = vld [vmem:[#allocation9_spill] sm:$0xff]  ;;  %v9420_v35 = vld [vmem:[#allocation11_spill] sm:$0xff] }
 0x167   :  { %v2239_v54 = vsel %vm9413_vm2, %v6485_v5, -inf  ;;  %vm9414_vm5 = vmmov %vm9410_vm1  ;;  %v2229_v36 = vmax.f32 %v2225_v8, %v2228_v37  ;;  %vm1835_vm7 = vcmp.eq.f32.partialorder %v9419_v21, %v9403_v47  ;;  %vm1837_vm0 = vcmp.eq.f32.partialorder %v9420_v35, %v9403_v47  ;;  %v9421_v37 = vld [vmem:[#allocation14_spill] sm:$0xff] }
 0x168   :  { %v2240_v26 = vmax.f32 %v2236_v1, %v2239_v54  ;;  %v2241_v44 = vsel %vm9414_vm5, %v6489_v39, -inf  ;;  %vm9415_vm11 = vmmov %vm9410_vm1  ;;  %v2231_v60 = vmax.f32 %v2227_v27, %v6182_v16  ;;  %vm1839_vm14 = vcmp.eq.f32.partialorder %v9421_v37, %v9403_v47  ;;  %v9424_v16 = vld [vmem:[#allocation16_spill] sm:$0xff] }
 0x169   :  { %v2243_v3 = vsel %vm9415_vm11, %v6493_v41, -inf  ;;  %vm9416_vm9 = vmmov %vm9410_vm1  ;;  %v2242_v23 = vmax.f32 %v2238_v56, %v2241_v44  ;;  %v2233_v1 = vmax.f32 %v2229_v36, %v6191_v24  ;;  %vm1841_vm6 = vcmp.eq.f32.partialorder %v9424_v16, %v9403_v47  ;;  %v9425_v56 = vld [vmem:[#allocation19_spill] sm:$0xff] }
 0x16a   :  { %v2245_v0 = vsel %vm9416_vm9, %v6497_v4, -inf  ;;  %vm9417_vm4 = vmmov %vm9410_vm1  ;;  %v2244_v30 = vmax.f32 %v2240_v26, %v2243_v3  ;;  %vm6548_vm1 = vcmp.eq.s32.totalorder %v2543_v43, 1  ;;  %vm1843_vm12 = vcmp.eq.f32.partialorder %v9425_v56, %v9403_v47  ;;  %v9426_v26 = vld [vmem:[#allocation24_spill] sm:$0xff]  ;;  %v9427_v3 = vld [vmem:[#allocation26_spill] sm:$0xff] }
 0x16b   :  { %v2247_v15 = vsel %vm9417_vm4, %v6501_v40, -inf  ;;  %v2246_v57 = vmax.f32 %v2242_v23, %v2245_v0  ;;  %vm1845_vm13 = vcmp.eq.f32.partialorder %v9426_v26, %v9403_v47  ;;  %v6558_v44 = vmax.f32 %v2231_v60, %v2233_v1  ;;  %v9428_v0 = vld [vmem:[#allocation22_spill] sm:$0xff] }
 0x16c   :  { %v2248_v54 = vmax.f32 %v2244_v30, %v2247_v15  ;;  %vm1847_vm2 = vcmp.eq.f32.partialorder %v9427_v3, %v9403_v47  ;;  %vm1849_vm5 = vcmp.eq.f32.partialorder %v9428_v0, %v9403_v47  ;;  %v9429_v15 = vld [vmem:[#allocation29_spill] sm:$0xff]  ;;  %v1853_v36 = vsel %vm1833_vm15, 0, %v9244_v28 }
 0x16d   :  { %v2250_v24 = vmax.f32 %v2246_v57, %v6186_v32  ;;  %vm1851_vm11 = vcmp.eq.f32.partialorder %v9429_v15, %v9403_v47  ;;  %v1855_v32 = vsel %vm1835_vm7, 1, %v9244_v28  ;;  %v2551_v23 = vsel %vm6548_vm1, %v6558_v44, %v6390_v19 }
 0x16e   :  { %v2252_v27 = vmax.f32 %v2248_v54, %v6195_v38  ;;  %v1857_v30 = vsel %vm1837_vm0, 2, %v9244_v28  ;;  %v1859_v9 = vsel %vm1839_vm14, 3, %v9244_v28  ;;  %vm9430_vm15 = vcmask 15360  }
 0x16f   :  { %2553 = vst.msk [vmem:[%s8935_s3] sm:$0xff] %vm9430_vm15, %v2551_v23  ;;  %v1861_v19 = vsel %vm1841_vm6, 4, %v9244_v28  ;;  %v1863_v63 = vsel %vm1843_vm12, 5, %v9244_v28  ;;  %v1865_v60 = vsel %vm1845_vm13, 6, %v9244_v28  ;;  %v1867_v43 = vsel %vm1847_vm2, 7, %v9244_v28  ;;  %vm9431_vm9 = vmmov %vm9430_vm15 }
 0x170   :  { %v6576_v38 = vmax.f32 %v2250_v24, %v2252_v27  ;;  %v1869_v35 = vsel %vm1849_vm5, 8, %v9244_v28  ;;  %v1871_v1 = vsel %vm1851_vm11, 9, %v9244_v28  ;;  %v1873_v57 = vsel %vm9431_vm9, %v1853_v36, 2147483647  ;;  %vm9432_vm7 = vmmov %vm9431_vm9 }
 0x171   :  { %v1874_v47 = vsel %vm9432_vm7, %v1855_v32, 2147483647  ;;  %vm9433_vm0 = vmmov %vm9432_vm7  ;;  %vm1834_vm14 = vcmp.eq.f32.partialorder %v5746_v13, %v6082_v61  ;;  %vm1836_vm15 = vcmp.eq.f32.partialorder %v5809_v53, %v6082_v61  ;;  %v9441_v32 = vld [vmem:[#allocation8_spill] sm:$0xff] }
 0x172   :  { %v2552_v21 = vsel %vm6548_vm1, %v6576_v38, %v6150_v59  ;;  %v1875_v54 = vsel %vm9433_vm0, %v1857_v30, 2147483647  ;;  %vm9434_vm12 = vmmov %vm9433_vm0 }
 0x173   :  { %2554 = vst.msk [vmem:[%s8935_s3 + $0x8] sm:$0x3] %vm9417_vm4, %v2552_v21  ;;  %vm1876_vm6 = vcmp.lt.s32.totalorder %v1873_v57, %v1875_v54  ;;  %v1878_v59 = vsel %vm9434_vm12, %v1859_v9, 2147483647  ;;  %vm9435_vm13 = vmmov %vm9433_vm0 }
 0x174   :  { %v1881_v37 = vsel %vm9435_vm13, %v1861_v19, 2147483647  ;;  %vm9436_vm2 = vmmov %vm9433_vm0  ;;  %v1877_v56 = vsel %vm1876_vm6, %v1873_v57, %v1875_v54  ;;  %vm1879_vm5 = vcmp.lt.s32.totalorder %v1874_v47, %v1878_v59  ;;  %vm1838_vm13 = vcmp.eq.f32.partialorder %v5829_v46, %v6082_v61 }
 0x175   :  { %v1884_v16 = vsel %vm9436_vm2, %v1863_v63, 2147483647  ;;  %vm9437_vm11 = vmmov %vm9433_vm0  ;;  %v1880_v24 = vsel %vm1879_vm5, %v1874_v47, %v1878_v59  ;;  %vm1882_vm9 = vcmp.lt.s32.totalorder %v1877_v56, %v1881_v37  ;;  %vm1842_vm5 = vcmp.eq.f32.partialorder %v5877_v18, %v6082_v61 }
 0x176   :  { %v1887_v26 = vsel %vm9437_vm11, %v1865_v60, 2147483647  ;;  %vm9438_vm4 = vmmov %vm9433_vm0  ;;  %v1883_v0 = vsel %vm1882_vm9, %v1877_v56, %v1881_v37  ;;  %vm1846_vm9 = vcmp.eq.f32.partialorder %v5944_v6, %v6082_v61  ;;  %v1854_v19 = vsel %vm1834_vm14, 0, %v9244_v28 }
 0x177   :  { %v1890_v27 = vsel %vm9438_vm4, %v1867_v43, 2147483647  ;;  %vm9439_vm7 = vmmov %vm9433_vm0  ;;  %vm1885_vm0 = vcmp.lt.s32.totalorder %v1880_v24, %v1884_v16  ;;  %vm1888_vm6 = vcmp.lt.s32.totalorder %v1883_v0, %v1887_v26  ;;  %vm1844_vm4 = vcmp.eq.f32.partialorder %v5941_v55, %v6082_v61 }
 0x178   :  { %v1893_v3 = vsel %vm9439_vm7, %v1869_v35, 2147483647  ;;  %vm9440_vm12 = vmmov %vm9436_vm2  ;;  %v1886_v36 = vsel %vm1885_vm0, %v1880_v24, %v1884_v16  ;;  %v1889_v23 = vsel %vm1888_vm6, %v1883_v0, %v1887_v26  ;;  %vm1848_vm0 = vcmp.eq.f32.partialorder %v5947_v34, %v6082_v61 }
 0x179   :  { %v1896_v15 = vsel %vm9440_vm12, %v1871_v1, 2147483647  ;;  %vm1891_vm11 = vcmp.lt.s32.totalorder %v1886_v36, %v1890_v27  ;;  %vm1894_vm7 = vcmp.lt.s32.totalorder %v1889_v23, %v1893_v3  ;;  %vm1850_vm12 = vcmp.eq.f32.partialorder %v5650_v25, %v6082_v61 }
 0x17a   :  { %v1892_v30 = vsel %vm1891_vm11, %v1886_v36, %v1890_v27  ;;  %v1895_v9 = vsel %vm1894_vm7, %v1889_v23, %v1893_v3  ;;  %vm1852_vm6 = vcmp.eq.f32.partialorder %v6025_v58, %v6082_v61  ;;  %v1856_v60 = vsel %vm1836_vm15, 1, %v9244_v28 }
 0x17b   :  { %vm1897_vm2 = vcmp.lt.s32.totalorder %v1892_v30, %v1896_v15  ;;  %v1858_v34 = vsel %vm1838_vm13, 2, %v9244_v28  ;;  %vm9442_vm11 = vcmp.eq.f32.partialorder %v9441_v32, %v6082_v61  ;;  %v1862_v13 = vsel %vm1842_vm5, 4, %v9244_v28 }
 0x17c   :  { %v1898_v63 = vsel %vm1897_vm2, %v1892_v30, %v1896_v15  ;;  %v1860_v25 = vsel %vm9442_vm11, 3, %v9244_v28  ;;  %v1864_v53 = vsel %vm1844_vm4, 5, %v9244_v28  ;;  %v1866_v46 = vsel %vm1846_vm9, 6, %v9244_v28 }
 0x17d   :  { %vm1899_vm7 = vcmp.lt.s32.totalorder %v1895_v9, %v1898_v63  ;;  %v1868_v43 = vsel %vm1848_vm0, 7, %v9244_v28  ;;  %v1870_v21 = vsel %vm1850_vm12, 8, %v9244_v28  ;;  %vm9443_vm14 = vcmask 9216  }
 0x17e   :  { %v1900_v58 = vsel %vm1899_vm7, %v1895_v9, %v1898_v63  ;;  %v1901_v35 = vsel %vm9443_vm14, %v1854_v19, 2147483647  ;;  %v1872_v1 = vsel %vm1852_vm6, 9, %v9244_v28  ;;  %vm9444_vm15 = vmmov %vm9443_vm14  ;;  %vm9446_vm2 = vcmask 15360  }
 0x17f   :  { %v2124_v18 = vsel %vm5624_vm3, %v1900_v58, 9  ;;  %v1902_v55 = vsel %vm9444_vm15, %v1856_v60, 2147483647  ;;  %vm9445_vm13 = vmmov %vm9443_vm14  ;;  %vm2254_vm0 = vcmp.eq.f32.partialorder %v6456_v17, %v6558_v44  ;;  %vm2256_vm15 = vcmp.eq.f32.partialorder %v6469_v48, %v6558_v44 }
 0x180   :  { %v1903_v57 = vsel %vm9445_vm13, %v1858_v34, 2147483647  ;;  %2128 = vst.msk [vmem:[#allocation2 + $0x40] sm:$0xff] %vm9446_vm2, %v2124_v18  ;;  %vm9447_vm4 = vmmov %vm9445_vm13  ;;  %v2274_v32 = vsel %vm2254_vm0, 0, %v9244_v28  ;;  %vm9455_vm0 = vcmask 15360  }
 0x181   :  { %vm1904_vm5 = vcmp.lt.s32.totalorder %v1901_v35, %v1903_v57  ;;  %v1906_v6 = vsel %vm9447_vm4, %v1860_v25, 2147483647  ;;  %vm9448_vm9 = vmmov %vm9447_vm4 }
 0x182   :  { %v1909_v61 = vsel %vm9448_vm9, %v1862_v13, 2147483647  ;;  %v1905_v47 = vsel %vm1904_vm5, %v1901_v35, %v1903_v57  ;;  %vm1907_vm12 = vcmp.lt.s32.totalorder %v1902_v55, %v1906_v6  ;;  %vm9449_vm11 = vmmov %vm9447_vm4  ;;  %vm2258_vm9 = vcmp.eq.f32.partialorder %v6478_v45, %v6558_v44 }
 0x183   :  { %v1912_v54 = vsel %vm9449_vm11, %v1864_v53, 2147483647  ;;  %vm9450_vm7 = vmmov %vm9447_vm4  ;;  %v1908_v37 = vsel %vm1907_vm12, %v1902_v55, %v1906_v6  ;;  %vm1910_vm6 = vcmp.lt.s32.totalorder %v1905_v47, %v1909_v61  ;;  %vm2272_vm12 = vcmp.eq.f32.partialorder %v6176_v10, %v6558_v44 }
 0x184   :  { %v1915_v59 = vsel %vm9450_vm7, %v1866_v46, 2147483647  ;;  %vm9451_vm14 = vmmov %vm9447_vm4  ;;  %v1911_v56 = vsel %vm1910_vm6, %v1905_v47, %v1909_v61  ;;  %vm1913_vm13 = vcmp.lt.s32.totalorder %v1908_v37, %v1912_v54  ;;  %vm2262_vm7 = vcmp.eq.f32.partialorder %v6487_v20, %v6558_v44 }
 0x185   :  { %v1918_v16 = vsel %vm9451_vm14, %v1868_v43, 2147483647  ;;  %vm9452_vm2 = vmmov %vm9447_vm4  ;;  %v1914_v27 = vsel %vm1913_vm13, %v1908_v37, %v1912_v54  ;;  %vm1916_vm5 = vcmp.lt.s32.totalorder %v1911_v56, %v1915_v59  ;;  %vm2264_vm6 = vcmp.eq.f32.partialorder %v6491_v7, %v6558_v44 }
 0x186   :  { %v1921_v26 = vsel %vm9452_vm2, %v1870_v21, 2147483647  ;;  %vm9453_vm4 = vmmov %vm9452_vm2  ;;  %v1917_v3 = vsel %vm1916_vm5, %v1911_v56, %v1915_v59  ;;  %vm1919_vm11 = vcmp.lt.s32.totalorder %v1914_v27, %v1918_v16  ;;  %vm2266_vm13 = vcmp.eq.f32.partialorder %v6495_v14, %v6558_v44 }
 0x187   :  { %v1924_v24 = vsel %vm9453_vm4, %v1872_v1, 2147483647  ;;  %v1920_v0 = vsel %vm1919_vm11, %v1914_v27, %v1918_v16  ;;  %vm1922_vm14 = vcmp.lt.s32.totalorder %v1917_v3, %v1921_v26  ;;  %vm2268_vm2 = vcmp.eq.f32.partialorder %v6499_v42, %v6558_v44 }
 0x188   :  { %v1923_v15 = vsel %vm1922_vm14, %v1917_v3, %v1921_v26  ;;  %vm1925_vm4 = vcmp.lt.s32.totalorder %v1920_v0, %v1924_v24  ;;  %vm2270_vm5 = vcmp.eq.f32.partialorder %v6170_v51, %v6558_v44  ;;  %v2276_v14 = vsel %vm2256_vm15, 1, %v9244_v28  ;;  %vm9456_vm15 = vmmov %vm9455_vm0  ;;  %v6821_v26 = vld [vmem:[%s8935_s3] sm:$0xff] }
 0x189   :  { %v1926_v36 = vsel %vm1925_vm4, %v1920_v0, %v1924_v24  ;;  %v2278_v42 = vsel %vm2258_vm9, 2, %v9244_v28  ;;  %vm9454_vm14 = vcmp.eq.f32.partialorder %v6482_v12, %v6558_v44  ;;  %v2282_v10 = vsel %vm2262_vm7, 4, %v9244_v28  ;;  %vm9458_vm7 = vmmov %vm9455_vm0 }
 0x18a   :  { %vm1927_vm11 = vcmp.lt.s32.totalorder %v1923_v15, %v1926_v36  ;;  %v2280_v51 = vsel %vm9454_vm14, 3, %v9244_v28  ;;  %v2284_v17 = vsel %vm2264_vm6, 5, %v9244_v28  ;;  %v2286_v45 = vsel %vm2266_vm13, 6, %v9244_v28  ;;  %vm9459_vm6 = vmmov %vm9455_vm0 }
 0x18b   :  { %v1928_v48 = vsel %vm1927_vm11, %v1923_v15, %v1926_v36  ;;  %v2288_v23 = vsel %vm2268_vm2, 7, %v9244_v28  ;;  %v2290_v30 = vsel %vm2270_vm5, 8, %v9244_v28  ;;  %v2292_v9 = vsel %vm2272_vm12, 9, %v9244_v28  ;;  %vm9460_vm11 = vmmov %vm9455_vm0 }
 0x18c   :  { %v2125_v12 = vsel %vm5624_vm3, %v1928_v48, 9  ;;  %v2294_v20 = vsel %vm9455_vm0, %v2274_v32, 2147483647  ;;  %v2295_v19 = vsel %vm9456_vm15, %v2276_v14, 2147483647  ;;  %vm9457_vm9 = vcmask 9216   ;;  %vm9461_vm12 = vmmov %vm9455_vm0 }
 0x18d   :  { %2129 = vst.msk [vmem:[#allocation2 + $0x48] sm:$0x3] %vm9457_vm9, %v2125_v12  ;;  %v2296_v7 = vsel %vm9458_vm7, %v2278_v42, 2147483647  ;;  %v2299_v44 = vsel %vm9459_vm6, %v2280_v51, 2147483647  ;;  %vm2255_vm13 = vcmp.eq.f32.partialorder %v6467_v52, %v6576_v38  ;;  %vm9462_vm14 = vmmov %vm9455_vm0  ;;  %vm2259_vm6 = vcmp.eq.f32.partialorder %v6480_v2, %v6576_v38 }
 0x18e   :  { %vm2297_vm4 = vcmp.lt.s32.totalorder %v2294_v20, %v2296_v7  ;;  %vm2300_vm5 = vcmp.lt.s32.totalorder %v2295_v19, %v2299_v44  ;;  %v2302_v63 = vsel %vm9460_vm11, %v2282_v10, 2147483647  ;;  %v2305_v60 = vsel %vm9461_vm12, %v2284_v17, 2147483647  ;;  %vm9463_vm7 = vmmov %vm9455_vm0  ;;  %v6830_v32 = vld [vmem:[%s8935_s3 + $0x8] sm:$0x3] }
 0x18f   :  { %v2298_v34 = vsel %vm2297_vm4, %v2294_v20, %v2296_v7  ;;  %v2301_v25 = vsel %vm2300_vm5, %v2295_v19, %v2299_v44  ;;  %v2308_v13 = vsel %vm9462_vm14, %v2286_v45, 2147483647  ;;  %v2311_v53 = vsel %vm9455_vm0, %v2288_v23, 2147483647  ;;  %vm9464_vm2 = vmmov %vm9455_vm0  ;;  %v3684_v45 = vld [vmem:[%s8937_s0 + $0x3c0] sm:$0xff] }
 0x190   :  { %vm2303_vm15 = vcmp.lt.s32.totalorder %v2298_v34, %v2302_v63  ;;  %vm2306_vm9 = vcmp.lt.s32.totalorder %v2301_v25, %v2305_v60  ;;  %v2314_v46 = vsel %vm9463_vm7, %v2290_v30, 2147483647  ;;  %v2317_v21 = vsel %vm9464_vm2, %v2292_v9, 2147483647  ;;  %v3685_v12 = vld [vmem:[%s8937_s0 + $0x3c8] sm:$0x3] }
 0x191   :  { %v2304_v58 = vsel %vm2303_vm15, %v2298_v34, %v2302_v63  ;;  %v2307_v43 = vsel %vm2306_vm9, %v2301_v25, %v2305_v60  ;;  %vm2263_vm12 = vcmp.eq.f32.partialorder %v6489_v39, %v6576_v38  ;;  %vm2265_vm14 = vcmp.eq.f32.partialorder %v6493_v41, %v6576_v38  ;;  %v3686_v9 = vld [vmem:[%s8937_s0 + $0x3d0] sm:$0xff]  ;;  %v3687_v20 = vld [vmem:[%s8937_s0 + $0x3d8] sm:$0x3]  ;;  %v3688_v19 = vld [vmem:[%s8937_s0 + $0x3e0] sm:$0xff] }
 0x192   :  { %vm2309_vm4 = vcmp.lt.s32.totalorder %v2304_v58, %v2308_v13  ;;  %vm2312_vm5 = vcmp.lt.s32.totalorder %v2307_v43, %v2311_v53  ;;  %vm2267_vm0 = vcmp.eq.f32.partialorder %v6497_v4, %v6576_v38  ;;  %vm2269_vm15 = vcmp.eq.f32.partialorder %v6501_v40, %v6576_v38  ;;  %v3689_v34 = vld [vmem:[%s8937_s0 + $0x3e8] sm:$0x3]  ;;  %v3690_v25 = vld [vmem:[%s8937_s0 + $0x3f0] sm:$0xff] }
 0x193   :  { %v2310_v35 = vsel %vm2309_vm4, %v2304_v58, %v2308_v13  ;;  %v2313_v18 = vsel %vm2312_vm5, %v2307_v43, %v2311_v53  ;;  %vm2271_vm7 = vcmp.eq.f32.partialorder %v6172_v33, %v6576_v38  ;;  %vm2273_vm11 = vcmp.eq.f32.partialorder %v6178_v29, %v6576_v38  ;;  %v3691_v13 = vld [vmem:[%s8937_s0 + $0x3f8] sm:$0x3]  ;;  %v3692_v58 = vld [vmem:[%s8937_s0 + $0x400] sm:$0xff]  ;;  %v3693_v43 = vld [vmem:[%s8937_s0 + $0x408] sm:$0x3] }
 0x194   :  { %vm2315_vm2 = vcmp.lt.s32.totalorder %v2310_v35, %v2314_v46  ;;  %vm2318_vm9 = vcmp.lt.s32.totalorder %v2313_v18, %v2317_v21  ;;  %v2275_v57 = vsel %vm2255_vm13, 0, %v9244_v28  ;;  %vm9465_vm4 = vcmp.eq.f32.partialorder %v6471_v62, %v6576_v38 }
 0x195   :  { %v2316_v1 = vsel %vm2315_vm2, %v2310_v35, %v2314_v46  ;;  %v2319_v55 = vsel %vm2318_vm9, %v2313_v18, %v2317_v21  ;;  %v2277_v6 = vsel %vm9465_vm4, 1, %v9244_v28  ;;  %v2279_v33 = vsel %vm2259_vm6, 2, %v9244_v28 }
 0x196   :  { %vm2320_vm5 = vcmp.lt.s32.totalorder %v2316_v1, %v2319_v55  ;;  %vm9466_vm2 = vcmp.eq.f32.partialorder %v6485_v5, %v6576_v38  ;;  %v2283_v52 = vsel %vm2263_vm12, 4, %v9244_v28  ;;  %v2285_v62 = vsel %vm2265_vm14, 5, %v9244_v28 }
 0x197   :  { %v2281_v61 = vsel %vm9466_vm2, 3, %v9244_v28  ;;  %v2321_v47 = vsel %vm2320_vm5, %v2316_v1, %v2319_v55  ;;  %v2287_v2 = vsel %vm2267_vm0, 6, %v9244_v28  ;;  %v2289_v5 = vsel %vm2269_vm15, 7, %v9244_v28  ;;  %v3694_v55 = vld [vmem:[%s8937_s0 + $0x410] sm:$0xff] }
 0x198   :  { %v2545_v39 = vsel %vm6548_vm1, %v2321_v47, 9  ;;  %v2291_v54 = vsel %vm2271_vm7, 8, %v9244_v28  ;;  %vm9467_vm13 = vcmask 9216   ;;  %vm9469_vm12 = vcmask 15360   ;;  %v3696_v47 = vld [vmem:[%s8937_s0 + $0x420] sm:$0xff] }
 0x199   :  { %v2322_v59 = vsel %vm9467_vm13, %v2275_v57, 2147483647  ;;  %vm9468_vm6 = vmmov %vm9467_vm13  ;;  %2549 = vst.msk [vmem:[#allocation2 + $0x50] sm:$0xff] %vm9469_vm12, %v2545_v39  ;;  %v2293_v4 = vsel %vm2273_vm11, 9, %v9244_v28  ;;  %v2589_v14 = vrot.slane %v6821_v26, 1  ;;  %v2590_v42 = vrot.slane %v6821_v26, 2 }
 0x19a   :  { %v2323_v41 = vsel %vm9468_vm6, %v2277_v6, 2147483647  ;;  %vm9470_vm14 = vmmov %vm9468_vm6  ;;  %v2591_v51 = vrot.slane %v6821_v26, 3  ;;  %v2592_v10 = vrot.slane %v6821_v26, 4  ;;  %v2593_v23 = vrot.slane %v6821_v26, 5 }
 0x19b   :  { %v2324_v37 = vsel %vm9470_vm14, %v2279_v33, 2147483647  ;;  %vm9471_vm0 = vmmov %vm9468_vm6  ;;  %v2594_v30 = vrot.slane %v6821_v26, 6  ;;  %v2595_v7 = vrot.slane %v6821_v26, 7  ;;  %v2596_v44 = vrot.slane %v6830_v32, 1 }
 0x19c   :  { %v2327_v40 = vsel %vm9471_vm0, %v2281_v61, 2147483647  ;;  %vm2325_vm15 = vcmp.lt.s32.totalorder %v2322_v59, %v2324_v37  ;;  %vm9472_vm4 = vmmov %vm9471_vm0  ;;  %v2597_v53 = vperm.slane %v6821_v26, 0  ;;  %v2598_v46 = vperm.slane %v2589_v14, 0  ;;  %v3695_v57 = vld [vmem:[%s8937_s0 + $0x418] sm:$0x3] }
 0x19d   :  { %vm2328_vm9 = vcmp.lt.s32.totalorder %v2323_v41, %v2327_v40  ;;  %v2330_v16 = vsel %vm9472_vm4, %v2283_v52, 2147483647  ;;  %vm9473_vm7 = vmmov %vm9471_vm0  ;;  %v2326_v24 = vsel %vm2325_vm15, %v2322_v59, %v2324_v37  ;;  %v2599_v21 = vperm.slane %v2590_v42, 0  ;;  %v3699_v59 = vld [vmem:[%s8937_s0 + $0x438] sm:$0x3] }
 0x19e   :  { %v2333_v56 = vsel %vm9473_vm7, %v2285_v62, 2147483647  ;;  %v2329_v27 = vsel %vm2328_vm9, %v2323_v41, %v2327_v40  ;;  %vm9474_vm5 = vmmov %vm9471_vm0  ;;  %vm2331_vm2 = vcmp.lt.s32.totalorder %v2326_v24, %v2330_v16  ;;  %v2600_v35 = vperm.slane %v2591_v51, 0  ;;  %v3697_v62 = vld [vmem:[%s8937_s0 + $0x428] sm:$0x3]  ;;  %v3700_v41 = vld [vmem:[%s8937_s0 + $0x440] sm:$0xff] }
 0x19f   :  { %v2336_v29 = vsel %vm9474_vm5, %v2287_v2, 2147483647  ;;  %vm9475_vm11 = vmmov %vm9471_vm0  ;;  %vm2334_vm13 = vcmp.lt.s32.totalorder %v2329_v27, %v2333_v56  ;;  %v2332_v15 = vsel %vm2331_vm2, %v2326_v24, %v2330_v16  ;;  %v2601_v18 = vperm.slane %v2592_v10, 0  ;;  %v3702_v24 = vld [vmem:[%s8937_s0 + $0x450] sm:$0xff] }
 0x1a0   :  { %v2339_v38 = vsel %vm9475_vm11, %v2289_v5, 2147483647  ;;  %vm9476_vm6 = vmmov %vm9471_vm0  ;;  %v2335_v36 = vsel %vm2334_vm13, %v2329_v27, %v2333_v56  ;;  %vm2337_vm14 = vcmp.lt.s32.totalorder %v2332_v15, %v2336_v29  ;;  %v2602_v6 = vperm.slane %v2593_v23, 0  ;;  %v3701_v56 = vld [vmem:[%s8937_s0 + $0x448] sm:$0x3] }
 0x1a1   :  { %v2342_v3 = vsel %vm9476_vm6, %v2291_v54, 2147483647  ;;  %vm9477_vm12 = vmmov %vm9471_vm0  ;;  %vm2340_vm0 = vcmp.lt.s32.totalorder %v2335_v36, %v2339_v38  ;;  %v2338_v17 = vsel %vm2337_vm14, %v2332_v15, %v2336_v29  ;;  %v2603_v33 = vperm.slane %v2594_v30, 0  ;;  %v3698_v54 = vld [vmem:[%s8937_s0 + $0x430] sm:$0xff]  ;;  %v3703_v27 = vld [vmem:[%s8937_s0 + $0x458] sm:$0x3] }
 0x1a2   :  { %v2345_v0 = vsel %vm9477_vm12, %v2293_v4, 2147483647  ;;  %v2341_v48 = vsel %vm2340_vm0, %v2335_v36, %v2339_v38  ;;  %vm2343_vm15 = vcmp.lt.s32.totalorder %v2338_v17, %v2342_v3  ;;  %v2604_v61 = vperm.slane %v2595_v7, 0  ;;  %vm9478_vm7 = vmmov %vm9474_vm5 }
 0x1a3   :  { %vm2346_vm9 = vcmp.lt.s32.totalorder %v2341_v48, %v2345_v0  ;;  %v2344_v63 = vsel %vm2343_vm15, %v2338_v17, %v2342_v3  ;;  %v2605_v2 = vperm.slane %v6830_v32, 0  ;;  %v2606_v5 = vperm.slane %v2596_v44, 0 }
 0x1a4   :  { %v2347_v60 = vsel %vm2346_vm9, %v2341_v48, %v2345_v0  ;;  %v6886_v39 = vadd.f32 %v3684_v45, %v2597_v53  ;;  %v6898_v4 = vadd.f32 %v3685_v12, %v2597_v53  ;;  %v6900_v37 = vadd.f32 %v3686_v9, %v2598_v46 }
 0x1a5   :  { %vm2348_vm4 = vcmp.lt.s32.totalorder %v2344_v63, %v2347_v60  ;;  %v6902_v40 = vadd.f32 %v3687_v20, %v2598_v46  ;;  %v6904_v16 = vadd.f32 %v3688_v19, %v2599_v21  ;;  %vm2561_vm5 = vcmp.gt.s32.totalorder %v6447_v31, 6 }
 0x1a6   :  { %v2349_v1 = vsel %vm2348_vm4, %v2344_v63, %v2347_v60  ;;  %v6916_v29 = vadd.f32 %v3689_v34, %v2599_v21  ;;  %v6918_v38 = vadd.f32 %v3690_v25, %v2600_v35  ;;  %v6920_v3 = vadd.f32 %v3691_v13, %v2600_v35 }
 0x1a7   :  { %v2546_v52 = vsel %vm6548_vm1, %v2349_v1, 9  ;;  %v6922_v0 = vadd.f32 %v3692_v58, %v2601_v18  ;;  %v6924_v15 = vadd.f32 %v3693_v43, %v2601_v18  ;;  %v6926_v36 = vadd.f32 %v3694_v55, %v2602_v6 }
 0x1a8   :  { %2550 = vst.msk [vmem:[#allocation2 + $0x58] sm:$0x3] %vm9478_vm7, %v2546_v52  ;;  %v6928_v14 = vadd.f32 %v3695_v57, %v2602_v6  ;;  %v6930_v42 = vadd.f32 %v3696_v47, %v2603_v33  ;;  %v6932_v51 = vadd.f32 %v3697_v62, %v2603_v33  ;;  %v6934_v10 = vadd.f32 %v3698_v54, %v2604_v61 }
 0x1a9   :  { %v6936_v17 = vadd.f32 %v3699_v59, %v2604_v61  ;;  %v6938_v48 = vadd.f32 %v3700_v41, %v2605_v2  ;;  %v6940_v45 = vadd.f32 %v3701_v56, %v2605_v2  ;;  %v6942_v23 = vadd.f32 %v3702_v24, %v2606_v5 }
 0x1aa   :  { %v6944_v30 = vadd.f32 %v3703_v27, %v2606_v5  ;;  %vm9479_vm11 = vcmask 15360   ;;  %v2656_v46 = vsel %vm9478_vm7, %v6898_v4, -inf  ;;  %v6987_v5 = vld [vmem:[%s8934_s4] sm:$0xff]  ;;  %v2963_v56 = vsel %vm2561_vm5, 1, %v9418_v49 }
 0x1ab   :  { %v2637_v12 = vsel %vm9479_vm11, %v6886_v39, -inf  ;;  %vm9480_vm2 = vmmov %vm9479_vm11 }
 0x1ac   :  { %v2638_v9 = vsel %vm9480_vm2, %v6900_v37, -inf  ;;  %vm9481_vm13 = vmmov %vm9480_vm2 }
 0x1ad   :  { %v2639_v20 = vsel %vm9481_vm13, %v6904_v16, -inf  ;;  %vm9482_vm6 = vmmov %vm9480_vm2 }
 0x1ae   :  { %v2641_v19 = vsel %vm9482_vm6, %v6918_v38, -inf  ;;  %vm9483_vm12 = vmmov %vm9480_vm2  ;;  %v2640_v44 = vmax.f32 %v2637_v12, %v2639_v20  ;;  %v2964_v12 = vperm.slane %v2963_v56, 0 }
 0x1af   :  { %v2643_v7 = vsel %vm9483_vm12, %v6922_v0, -inf  ;;  %v2642_v63 = vmax.f32 %v2638_v9, %v2641_v19  ;;  %vm9484_vm14 = vmmov %vm9480_vm2  ;;  %v1089_v19 = vrot.slane %v6987_v5, 1 }
 0x1b0   :  { %v2645_v60 = vsel %vm9484_vm14, %v6926_v36, -inf  ;;  %vm9485_vm0 = vmmov %vm9480_vm2  ;;  %v2644_v58 = vmax.f32 %v2640_v44, %v2643_v7 }
 0x1b1   :  { %v2647_v34 = vsel %vm9485_vm0, %v6930_v42, -inf  ;;  %vm9486_vm15 = vmmov %vm9485_vm0  ;;  %v2646_v43 = vmax.f32 %v2642_v63, %v2645_v60  ;;  %v1090_v63 = vrot.slane %v6987_v5, 2  ;;  %v1091_v60 = vrot.slane %v6987_v5, 3 }
 0x1b2   :  { %v2649_v25 = vsel %vm9486_vm15, %v6934_v10, -inf  ;;  %vm9487_vm9 = vmmov %vm9485_vm0  ;;  %v2648_v6 = vmax.f32 %v2644_v58, %v2647_v34 }
 0x1b3   :  { %v2651_v13 = vsel %vm9487_vm9, %v6938_v48, -inf  ;;  %vm9488_vm4 = vmmov %vm9485_vm0  ;;  %v2650_v33 = vmax.f32 %v2646_v43, %v2649_v25  ;;  %v1092_v25 = vrot.slane %v6987_v5, 4 }
 0x1b4   :  { %v2653_v53 = vsel %vm9488_vm4, %v6942_v23, -inf  ;;  %vm9489_vm11 = vmmov %vm9478_vm7  ;;  %v2652_v54 = vmax.f32 %v2648_v6, %v2651_v13  ;;  %vm6995_vm4 = vcmp.eq.s32.totalorder %v2964_v12, 1  ;;  %v1093_v13 = vrot.slane %v6987_v5, 5 }
 0x1b5   :  { %v2657_v21 = vsel %vm9489_vm11, %v6902_v40, -inf  ;;  %vm9490_vm2 = vmmov %vm9478_vm7  ;;  %v2654_v59 = vmax.f32 %v2650_v33, %v2653_v53  ;;  %vm9500_vm11 = vcmask 15360  }
 0x1b6   :  { %v2658_v35 = vsel %vm9490_vm2, %v6916_v29, -inf  ;;  %vm9491_vm13 = vmmov %vm9490_vm2 }
 0x1b7   :  { %v2659_v18 = vmax.f32 %v2656_v46, %v2658_v35  ;;  %v2660_v1 = vsel %vm9491_vm13, %v6920_v3, -inf  ;;  %vm9492_vm6 = vmmov %vm9490_vm2  ;;  %v2655_v9 = vmax.f32 %v2652_v54, %v2654_v59 }
 0x1b8   :  { %v2662_v55 = vsel %vm9492_vm6, %v6924_v15, -inf  ;;  %vm9493_vm12 = vmmov %vm9490_vm2  ;;  %v2661_v61 = vmax.f32 %v2657_v21, %v2660_v1 }
 0x1b9   :  { %v2664_v57 = vsel %vm9493_vm12, %v6928_v14, -inf  ;;  %vm9494_vm14 = vmmov %vm9490_vm2  ;;  %v2663_v47 = vmax.f32 %v2659_v18, %v2662_v55  ;;  %v2972_v34 = vsel %vm6995_vm4, %v2655_v9, %v6821_v26  ;;  %vm2675_vm5 = vcmp.eq.f32.partialorder %v6886_v39, %v2655_v9 }
 0x1ba   :  { %v2666_v52 = vsel %vm9494_vm14, %v6932_v51, -inf  ;;  %vm9495_vm0 = vmmov %vm9490_vm2  ;;  %v2665_v41 = vmax.f32 %v2661_v61, %v2664_v57  ;;  %vm2677_vm7 = vcmp.eq.f32.partialorder %v6900_v37, %v2655_v9  ;;  %2974 = vst.msk [vmem:[%s8935_s3] sm:$0xff] %vm9500_vm11, %v2972_v34  ;;  %vm2679_vm2 = vcmp.eq.f32.partialorder %v6904_v16, %v2655_v9 }
 0x1bb   :  { %v2668_v62 = vsel %vm9495_vm0, %v6936_v17, -inf  ;;  %vm9496_vm15 = vmmov %vm9495_vm0  ;;  %v2667_v24 = vmax.f32 %v2663_v47, %v2666_v52  ;;  %vm2681_vm13 = vcmp.eq.f32.partialorder %v6918_v38, %v2655_v9  ;;  %vm2683_vm6 = vcmp.eq.f32.partialorder %v6922_v0, %v2655_v9 }
 0x1bc   :  { %v2670_v2 = vsel %vm9496_vm15, %v6940_v45, -inf  ;;  %vm9497_vm9 = vmmov %vm9495_vm0  ;;  %v2669_v20 = vmax.f32 %v2665_v41, %v2668_v62  ;;  %vm2685_vm12 = vcmp.eq.f32.partialorder %v6926_v36, %v2655_v9  ;;  %vm2687_vm14 = vcmp.eq.f32.partialorder %v6930_v42, %v2655_v9 }
 0x1bd   :  { %v2672_v27 = vsel %vm9497_vm9, %v6944_v30, -inf  ;;  %v2671_v7 = vmax.f32 %v2667_v24, %v2670_v2  ;;  %v2695_v26 = vsel %vm2675_vm5, 0, %v9244_v28  ;;  %v2697_v39 = vsel %vm2677_vm7, 1, %v9244_v28  ;;  %vm9501_vm7 = vmmov %vm9500_vm11 }
 0x1be   :  { %v2673_v31 = vmax.f32 %v2669_v20, %v2672_v27  ;;  %v2699_v37 = vsel %vm2679_vm2, 2, %v9244_v28  ;;  %v1094_v16 = vrot.slane %v6987_v5, 6  ;;  %vm2689_vm0 = vcmp.eq.f32.partialorder %v6934_v10, %v2655_v9  ;;  %vm9502_vm11 = vmmov %vm9501_vm7 }
 0x1bf   :  { %vm2691_vm15 = vcmp.eq.f32.partialorder %v6938_v48, %v2655_v9  ;;  %v2701_v0 = vsel %vm2681_vm13, 3, %v9244_v28  ;;  %vm2693_vm5 = vcmp.eq.f32.partialorder %v6942_v23, %v2655_v9  ;;  %v2703_v36 = vsel %vm2683_vm6, 4, %v9244_v28  ;;  %vm9503_vm2 = vmmov %vm9501_vm7 }
 0x1c0   :  { %v7014_v53 = vmax.f32 %v2671_v7, %v2673_v31  ;;  %v2705_v42 = vsel %vm2685_vm12, 5, %v9244_v28  ;;  %v2707_v46 = vsel %vm2687_vm14, 6, %v9244_v28  ;;  %v2716_v10 = vsel %vm9502_vm11, %v2697_v39, 2147483647  ;;  %vm9505_vm12 = vmmov %vm9503_vm2 }
 0x1c1   :  { %v2717_v48 = vsel %vm9503_vm2, %v2699_v37, 2147483647  ;;  %v2709_v58 = vsel %vm2689_vm0, 7, %v9244_v28  ;;  %v2711_v43 = vsel %vm2691_vm15, 8, %v9244_v28  ;;  %v2713_v23 = vsel %vm2693_vm5, 9, %v9244_v28  ;;  %vm9507_vm15 = vmmov %vm9503_vm2 }
 0x1c2   :  { %v2973_v38 = vsel %vm6995_vm4, %v7014_v53, %v6830_v32  ;;  %v2715_v32 = vsel %vm9501_vm7, %v2695_v26, 2147483647  ;;  %v2723_v18 = vsel %vm9505_vm12, %v2703_v36, 2147483647  ;;  %vm9506_vm7 = vmmov %vm9503_vm2  ;;  %vm2676_vm11 = vcmp.eq.f32.partialorder %v6898_v4, %v7014_v53 }
 0x1c3   :  { %2975 = vst.msk [vmem:[%s8935_s3 + $0x8] sm:$0x3] %vm9497_vm9, %v2973_v38  ;;  %vm2718_vm13 = vcmp.lt.s32.totalorder %v2715_v32, %v2717_v48  ;;  %vm9504_vm9 = vmmov %vm9503_vm2  ;;  %v2726_v55 = vsel %vm9506_vm7, %v2705_v42, 2147483647  ;;  %v2729_v6 = vsel %vm9503_vm2, %v2707_v46, 2147483647  ;;  %vm2678_vm12 = vcmp.eq.f32.partialorder %v6902_v40, %v7014_v53 }
 0x1c4   :  { %v2720_v21 = vsel %vm9504_vm9, %v2701_v0, 2147483647  ;;  %v2719_v35 = vsel %vm2718_vm13, %v2715_v32, %v2717_v48  ;;  %v2732_v33 = vsel %vm9507_vm15, %v2709_v58, 2147483647  ;;  %vm9508_vm5 = vmmov %vm9503_vm2  ;;  %vm2680_vm7 = vcmp.eq.f32.partialorder %v6916_v29, %v7014_v53 }
 0x1c5   :  { %vm2721_vm6 = vcmp.lt.s32.totalorder %v2716_v10, %v2720_v21  ;;  %vm2724_vm14 = vcmp.lt.s32.totalorder %v2719_v35, %v2723_v18  ;;  %v2735_v52 = vsel %vm9508_vm5, %v2711_v43, 2147483647  ;;  %vm9509_vm13 = vmmov %vm9503_vm2  ;;  %vm2682_vm2 = vcmp.eq.f32.partialorder %v6920_v3, %v7014_v53 }
 0x1c6   :  { %v2722_v1 = vsel %vm2721_vm6, %v2716_v10, %v2720_v21  ;;  %v2725_v57 = vsel %vm2724_vm14, %v2719_v35, %v2723_v18  ;;  %v2738_v47 = vsel %vm9509_vm13, %v2713_v23, 2147483647  ;;  %vm2688_vm5 = vcmp.eq.f32.partialorder %v6932_v51, %v7014_v53  ;;  %v7079_v51 = vld [vmem:[%s8934_s4 + $0x8] sm:$0x3] }
 0x1c7   :  { %vm2727_vm0 = vcmp.lt.s32.totalorder %v2722_v1, %v2726_v55  ;;  %vm2730_vm9 = vcmp.lt.s32.totalorder %v2725_v57, %v2729_v6  ;;  %vm2690_vm13 = vcmp.eq.f32.partialorder %v6936_v17, %v7014_v53  ;;  %v2696_v29 = vsel %vm2676_vm11, 0, %v9244_v28 }
 0x1c8   :  { %v2728_v61 = vsel %vm2727_vm0, %v2722_v1, %v2726_v55  ;;  %v2731_v62 = vsel %vm2730_vm9, %v2725_v57, %v2729_v6  ;;  %vm2684_vm0 = vcmp.eq.f32.partialorder %v6924_v15, %v7014_v53  ;;  %vm2686_vm9 = vcmp.eq.f32.partialorder %v6928_v14, %v7014_v53 }
 0x1c9   :  { %vm2733_vm6 = vcmp.lt.s32.totalorder %v2728_v61, %v2732_v33  ;;  %vm2736_vm14 = vcmp.lt.s32.totalorder %v2731_v62, %v2735_v52  ;;  %v2698_v3 = vsel %vm2678_vm12, 1, %v9244_v28  ;;  %v2700_v14 = vsel %vm2680_vm7, 2, %v9244_v28 }
 0x1ca   :  { %v2734_v2 = vsel %vm2733_vm6, %v2728_v61, %v2732_v33  ;;  %v2737_v54 = vsel %vm2736_vm14, %v2731_v62, %v2735_v52  ;;  %vm2692_vm14 = vcmp.eq.f32.partialorder %v6940_v45, %v7014_v53  ;;  %v2702_v59 = vsel %vm2682_vm2, 3, %v9244_v28  ;;  %v4111_v61 = vld [vmem:[%s8937_s0 + $0x150] sm:$0xff] }
 0x1cb   :  { %vm2739_vm15 = vcmp.lt.s32.totalorder %v2734_v2, %v2738_v47  ;;  %v2704_v4 = vsel %vm2684_vm0, 4, %v9244_v28  ;;  %v2706_v56 = vsel %vm2686_vm9, 5, %v9244_v28  ;;  %v2708_v27 = vsel %vm2688_vm5, 6, %v9244_v28 }
 0x1cc   :  { %v2740_v40 = vsel %vm2739_vm15, %v2734_v2, %v2738_v47  ;;  %vm2694_vm15 = vcmp.eq.f32.partialorder %v6944_v30, %v7014_v53  ;;  %vm9510_vm11 = vcmask 9216   ;;  %vm9512_vm7 = vcmask 15360   ;;  %v4112_v47 = vld [vmem:[%s8937_s0 + $0x160] sm:$0xff]  ;;  %v4113_v2 = vld [vmem:[%s8937_s0 + $0x170] sm:$0xff] }
 0x1cd   :  { %vm2741_vm6 = vcmp.lt.s32.totalorder %v2737_v54, %v2740_v40  ;;  %v2743_v12 = vsel %vm9510_vm11, %v2696_v29, 2147483647  ;;  %vm9511_vm12 = vmmov %vm9510_vm11  ;;  %v2710_v30 = vsel %vm2690_vm13, 7, %v9244_v28  ;;  %v2712_v7 = vsel %vm2692_vm14, 8, %v9244_v28 }
 0x1ce   :  { %v2742_v41 = vsel %vm2741_vm6, %v2737_v54, %v2740_v40  ;;  %v2744_v9 = vsel %vm9511_vm12, %v2698_v3, 2147483647  ;;  %vm9513_vm2 = vmmov %vm9510_vm11  ;;  %v2714_v31 = vsel %vm2694_vm15, 9, %v9244_v28  ;;  %v1095_v37 = vrot.slane %v6987_v5, 7  ;;  %v4114_v40 = vld [vmem:[%s8937_s0 + $0x158] sm:$0x3] }
 0x1cf   :  { %v2966_v24 = vsel %vm6995_vm4, %v2742_v41, 9  ;;  %v2745_v15 = vsel %vm9513_vm2, %v2700_v14, 2147483647  ;;  %vm9514_vm0 = vmmov %vm9513_vm2  ;;  %v1096_v38 = vrot.slane %v7079_v51, 1  ;;  %v1097_v48 = vperm.slane %v6987_v5, 0 }
 0x1d0   :  { %2970 = vst.msk [vmem:[#allocation2 + $0x60] sm:$0xff] %vm9512_vm7, %v2966_v24  ;;  %v2748_v20 = vsel %vm9514_vm0, %v2702_v59, 2147483647  ;;  %vm2746_vm9 = vcmp.lt.s32.totalorder %v2743_v12, %v2745_v15  ;;  %vm9515_vm6 = vmmov %vm9514_vm0  ;;  %v2763_v42 = vsel %vm9514_vm0, %v2712_v7, 2147483647  ;;  %v1098_v58 = vperm.slane %v1089_v19, 0 }
 0x1d1   :  { %vm2749_vm5 = vcmp.lt.s32.totalorder %v2744_v9, %v2748_v20  ;;  %v2747_v34 = vsel %vm2746_vm9, %v2743_v12, %v2745_v15  ;;  %v2751_v39 = vsel %vm9515_vm6, %v2704_v4, 2147483647  ;;  %vm9516_vm11 = vmmov %vm9514_vm0  ;;  %v1099_v43 = vperm.slane %v1090_v63, 0  ;;  %v4115_v3 = vld [vmem:[%s8937_s0 + $0x168] sm:$0x3]  ;;  %v4117_v4 = vld [vmem:[%s8937_s0 + $0x180] sm:$0xff] }
 0x1d2   :  { %v2750_v26 = vsel %vm2749_vm5, %v2744_v9, %v2748_v20  ;;  %v2754_v17 = vsel %vm9516_vm11, %v2706_v56, 2147483647  ;;  %vm2752_vm13 = vcmp.lt.s32.totalorder %v2747_v34, %v2751_v39  ;;  %vm9517_vm7 = vmmov %vm9514_vm0  ;;  %v1100_v21 = vperm.slane %v1091_v60, 0  ;;  %v4109_v60 = vld [vmem:[%s8937_s0 + $0x140] sm:$0xff]  ;;  %v4116_v59 = vld [vmem:[%s8937_s0 + $0x178] sm:$0x3] }
 0x1d3   :  { %vm2755_vm12 = vcmp.lt.s32.totalorder %v2750_v26, %v2754_v17  ;;  %v2753_v0 = vsel %vm2752_vm13, %v2747_v34, %v2751_v39  ;;  %v2757_v45 = vsel %vm9517_vm7, %v2708_v27, 2147483647  ;;  %vm9518_vm14 = vmmov %vm9514_vm0  ;;  %v1101_v18 = vperm.slane %v1092_v25, 0  ;;  %v4110_v25 = vld [vmem:[%s8937_s0 + $0x148] sm:$0x3]  ;;  %v4119_v12 = vld [vmem:[%s8937_s0 + $0x190] sm:$0xff] }
 0x1d4   :  { %v2756_v36 = vsel %vm2755_vm12, %v2750_v26, %v2754_v17  ;;  %v2760_v53 = vsel %vm9518_vm14, %v2710_v30, 2147483647  ;;  %vm2758_vm15 = vcmp.lt.s32.totalorder %v2753_v0, %v2757_v45  ;;  %vm9519_vm9 = vmmov %vm9514_vm0  ;;  %v1102_v1 = vperm.slane %v1093_v13, 0  ;;  %v4118_v24 = vld [vmem:[%s8937_s0 + $0x188] sm:$0x3]  ;;  %v4121_v20 = vld [vmem:[%s8937_s0 + $0x1a0] sm:$0xff] }
 0x1d5   :  { %vm2761_vm2 = vcmp.lt.s32.totalorder %v2756_v36, %v2760_v53  ;;  %v2766_v46 = vsel %vm9519_vm9, %v2714_v31, 2147483647  ;;  %v2759_v32 = vsel %vm2758_vm15, %v2753_v0, %v2757_v45  ;;  %v1103_v19 = vperm.slane %v1094_v16, 0  ;;  %vm9520_vm13 = vmmov %vm9514_vm0  ;;  %v4120_v30 = vld [vmem:[%s8937_s0 + $0x198] sm:$0x3]  ;;  %v4123_v26 = vld [vmem:[%s8937_s0 + $0x1b0] sm:$0xff] }
 0x1d6   :  { %v2762_v10 = vsel %vm2761_vm2, %v2756_v36, %v2760_v53  ;;  %vm2764_vm5 = vcmp.lt.s32.totalorder %v2759_v32, %v2763_v42  ;;  %v1104_v55 = vperm.slane %v1095_v37, 0  ;;  %v1105_v57 = vperm.slane %v7079_v51, 0  ;;  %v4122_v31 = vld [vmem:[%s8937_s0 + $0x1a8] sm:$0x3]  ;;  %v4124_v17 = vld [vmem:[%s8937_s0 + $0x1b8] sm:$0x3] }
 0x1d7   :  { %vm2767_vm6 = vcmp.lt.s32.totalorder %v2762_v10, %v2766_v46  ;;  %v2765_v23 = vsel %vm2764_vm5, %v2759_v32, %v2763_v42  ;;  %v1106_v63 = vperm.slane %v1096_v38, 0  ;;  %v7130_v33 = vadd.f32 %v4109_v60, %v1097_v48  ;;  %v4125_v38 = vld [vmem:[%s8937_s0 + $0x1c0] sm:$0xff]  ;;  %vm9527_vm5 = vmmov %vm9519_vm9 }
 0x1d8   :  { %v2768_v35 = vsel %vm2767_vm6, %v2762_v10, %v2766_v46  ;;  %v7135_v13 = vadd.f32 %v4110_v25, %v1097_v48  ;;  %v7142_v52 = vadd.f32 %v4111_v61, %v1098_v58  ;;  %v7147_v62 = vadd.f32 %v4112_v47, %v1099_v43  ;;  %v4126_v46 = vld [vmem:[%s8937_s0 + $0x1c8] sm:$0x3]  ;;  %v4127_v10 = vld [vmem:[%s8937_s0 + $0x1d0] sm:$0xff]  ;;  %vm9528_vm6 = vmmov %vm9527_vm5 }
 0x1d9   :  { %vm2769_vm11 = vcmp.lt.s32.totalorder %v2765_v23, %v2768_v35  ;;  %v7152_v54 = vadd.f32 %v4113_v2, %v1100_v21  ;;  %v7158_v29 = vadd.f32 %v4114_v40, %v1098_v58  ;;  %v7163_v14 = vadd.f32 %v4115_v3, %v1099_v43 }
 0x1da   :  { %v2770_v6 = vsel %vm2769_vm11, %v2765_v23, %v2768_v35  ;;  %v7168_v41 = vadd.f32 %v4116_v59, %v1100_v21  ;;  %v7173_v56 = vadd.f32 %v4117_v4, %v1101_v18  ;;  %v7178_v27 = vadd.f32 %v4118_v24, %v1101_v18  ;;  %v4128_v21 = vld [vmem:[%s8937_s0 + $0x1d8] sm:$0x3] }
 0x1db   :  { %v2967_v16 = vsel %vm6995_vm4, %v2770_v6, 9  ;;  %v7183_v9 = vadd.f32 %v4119_v12, %v1102_v1  ;;  %v7188_v15 = vadd.f32 %v4120_v30, %v1102_v1  ;;  %v7193_v7 = vadd.f32 %v4121_v20, %v1103_v19 }
 0x1dc   :  { %2971 = vst.msk [vmem:[#allocation2 + $0x68] sm:$0x3] %vm9520_vm13, %v2967_v16  ;;  %v7198_v34 = vadd.f32 %v4122_v31, %v1103_v19  ;;  %v7203_v39 = vadd.f32 %v4123_v26, %v1104_v55  ;;  %v7208_v37 = vadd.f32 %v4124_v17, %v1104_v55  ;;  %v7213_v0 = vadd.f32 %v4125_v38, %v1105_v57 }
 0x1dd   :  { %vm9521_vm12 = vcmask 15360   ;;  %v7226_v32 = vadd.f32 %v4126_v46, %v1105_v57  ;;  %v7231_v48 = vadd.f32 %v4127_v10, %v1106_v63  ;;  %v7236_v23 = vadd.f32 %v4128_v21, %v1106_v63 }
 0x1de   :  { %v1137_v36 = vsel %vm9521_vm12, %v7130_v33, -inf  ;;  %vm9522_vm7 = vmmov %vm9521_vm12  ;;  %v1156_v1 = vsel %vm9519_vm9, %v7135_v13, -inf  ;;  %v1157_v57 = vsel %vm9527_vm5, %v7158_v29, -inf  ;;  %v1158_v6 = vsel %vm9528_vm6, %v7163_v14, -inf }
 0x1df   :  { %v1138_v45 = vsel %vm9522_vm7, %v7142_v52, -inf  ;;  %vm9523_vm14 = vmmov %vm9522_vm7  ;;  %v1159_v25 = vmax.f32 %v1156_v1, %v1158_v6 }
 0x1e0   :  { %v1139_v53 = vsel %vm9523_vm14, %v7147_v62, -inf  ;;  %vm9524_vm15 = vmmov %vm9522_vm7 }
 0x1e1   :  { %v1141_v42 = vsel %vm9524_vm15, %v7152_v54, -inf  ;;  %v1140_v58 = vmax.f32 %v1137_v36, %v1139_v53  ;;  %vm9525_vm2 = vmmov %vm9522_vm7 }
 0x1e2   :  { %v1142_v43 = vmax.f32 %v1138_v45, %v1141_v42  ;;  %v1143_v35 = vsel %vm9525_vm2, %v7173_v56, -inf  ;;  %vm9526_vm0 = vmmov %vm9525_vm2 }
 0x1e3   :  { %v1145_v18 = vsel %vm9526_vm0, %v7183_v9, -inf  ;;  %v1144_v19 = vmax.f32 %v1140_v58, %v1143_v35  ;;  %vm9529_vm11 = vmmov %vm9526_vm0 }
 0x1e4   :  { %v1146_v55 = vmax.f32 %v1142_v43, %v1145_v18  ;;  %v1147_v63 = vsel %vm9529_vm11, %v7193_v7, -inf  ;;  %vm9530_vm13 = vmmov %vm9526_vm0 }
 0x1e5   :  { %v1149_v60 = vsel %vm9530_vm13, %v7203_v39, -inf  ;;  %vm9531_vm12 = vmmov %vm9527_vm5  ;;  %v1148_v61 = vmax.f32 %v1144_v19, %v1147_v63 }
 0x1e6   :  { %v1160_v16 = vsel %vm9531_vm12, %v7168_v41, -inf  ;;  %v1150_v47 = vmax.f32 %v1146_v55, %v1149_v60  ;;  %vm9532_vm7 = vmmov %vm9527_vm5 }
 0x1e7   :  { %v1161_v2 = vmax.f32 %v1157_v57, %v1160_v16  ;;  %v1162_v40 = vsel %vm9532_vm7, %v7178_v27, -inf  ;;  %vm9533_vm14 = vmmov %vm9526_vm0 }
 0x1e8   :  { %v1151_v3 = vsel %vm9533_vm14, %v7213_v0, -inf  ;;  %vm9534_vm15 = vmmov %vm9526_vm0  ;;  %v1163_v4 = vmax.f32 %v1159_v25, %v1162_v40 }
 0x1e9   :  { %v1153_v59 = vsel %vm9534_vm15, %v7231_v48, -inf  ;;  %vm9535_vm2 = vmmov %vm9527_vm5  ;;  %v1152_v12 = vmax.f32 %v1148_v61, %v1151_v3 }
 0x1ea   :  { %v1164_v24 = vsel %vm9535_vm2, %v7188_v15, -inf  ;;  %v1154_v30 = vmax.f32 %v1150_v47, %v1153_v59  ;;  %vm9536_vm0 = vmmov %vm9535_vm2 }
 0x1eb   :  { %v1165_v20 = vmax.f32 %v1161_v2, %v1164_v24  ;;  %v1166_v31 = vsel %vm9536_vm0, %v7198_v34, -inf  ;;  %vm9537_vm9 = vmmov %vm9536_vm0 }
 0x1ec   :  { %v1167_v26 = vmax.f32 %v1163_v4, %v1166_v31  ;;  %v1168_v17 = vsel %vm9537_vm9, %v7208_v37, -inf  ;;  %v7266_v38 = vmax.f32 %v1152_v12, %v1154_v30  ;;  %vm9538_vm5 = vmmov %vm9536_vm0 }
 0x1ed   :  { %v1169_v36 = vmax.f32 %v1165_v20, %v1168_v17  ;;  %v1170_v45 = vsel %vm9538_vm5, %v7226_v32, -inf  ;;  %vm9539_vm6 = vmmov %vm9536_vm0 }
 0x1ee   :  { %v1171_v53 = vmax.f32 %v1167_v26, %v1170_v45  ;;  %v1172_v42 = vsel %vm9539_vm6, %v7236_v23, -inf  ;;  %v1175_v10 = vsub.f32 %v7130_v33, %v7266_v38  ;;  %v1177_v58 = vsub.f32 %v7142_v52, %v7266_v38  ;;  %vm9540_vm13 = vmmov %vm9529_vm11 }
 0x1ef   :  { %v1173_v46 = vmax.f32 %v1169_v36, %v1172_v42  ;;  %v1179_v43 = vsub.f32 %v7147_v62, %v7266_v38  ;;  %v1181_v21 = vsub.f32 %v7152_v54, %v7266_v38  ;;  %v1183_v35 = vsub.f32 %v7173_v56, %v7266_v38  ;;  %vm9541_vm12 = vmmov %vm9529_vm11 }
 0x1f0   :  { %v1185_v18 = vsub.f32 %v7183_v9, %v7266_v38  ;;  %v1187_v1 = vsub.f32 %v7193_v7, %v7266_v38  ;;  %v1195_v33 = vmul.f32 1.442695, %v1175_v10  ;;  %v1199_v55 = vmul.f32 1.442695, %v1177_v58  ;;  %vm9542_vm7 = vmmov %vm9529_vm11 }
 0x1f1   :  { %v7286_v19 = vmax.f32 %v1171_v53, %v1173_v46  ;;  %v1203_v52 = vmul.f32 1.442695, %v1179_v43  ;;  %v1189_v62 = vsub.f32 %v7203_v39, %v7266_v38  ;;  %v1207_v57 = vmul.f32 1.442695, %v1181_v21  ;;  %vm9543_vm14 = vmmov %vm9542_vm7 }
 0x1f2   :  { %v1191_v54 = vsub.f32 %v7213_v0, %v7266_v38  ;;  %3823 = vpow2.f32 %v1195_v33  ;;  %v1211_v56 = vmul.f32 1.442695, %v1183_v35  ;;  %v1193_v9 = vsub.f32 %v7231_v48, %v7266_v38  ;;  %vm9544_vm15 = vmmov %vm9542_vm7 }
 0x1f3   :  { %3825 = vpow2.f32 %v1199_v55  ;;  %v1215_v6 = vmul.f32 1.442695, %v1185_v18  ;;  %v1219_v7 = vmul.f32 1.442695, %v1187_v1  ;;  %v1176_v63 = vsub.f32 %v7135_v13, %v7286_v19  ;;  %vm9545_vm2 = vmmov %vm9542_vm7 }
 0x1f4   :  { %3827 = vpow2.f32 %v1203_v52  ;;  %v1178_v60 = vsub.f32 %v7158_v29, %v7286_v19  ;;  %v1223_v39 = vmul.f32 1.442695, %v1189_v62  ;;  %v1227_v25 = vmul.f32 1.442695, %v1191_v54  ;;  %vm9546_vm0 = vmmov %vm9545_vm2 }
 0x1f5   :  { %3829 = vpow2.f32 %v1207_v57  ;;  %v1180_v0 = vsub.f32 %v7163_v14, %v7286_v19  ;;  %v1231_v16 = vmul.f32 1.442695, %v1193_v9  ;;  %v1182_v48 = vsub.f32 %v7168_v41, %v7286_v19  ;;  %vm9547_vm9 = vmmov %vm9538_vm5 }
 0x1f6   :  { %3831 = vpow2.f32 %v1211_v56  ;;  %v1184_v13 = vsub.f32 %v7178_v27, %v7286_v19  ;;  %v1197_v47 = vmul.f32 1.442695, %v1176_v63  ;;  %v1201_v29 = vmul.f32 1.442695, %v1178_v60  ;;  %vm9548_vm5 = vmmov %vm9546_vm0 }
 0x1f7   :  { %3833 = vpow2.f32 %v1215_v6  ;;  %v1186_v3 = vsub.f32 %v7188_v15, %v7286_v19  ;;  %v1188_v41 = vsub.f32 %v7198_v34, %v7286_v19  ;;  %v1205_v4 = vmul.f32 1.442695, %v1180_v0 }
 0x1f8   :  { %v3824_v61 = vpop.eup %3823  ;;  %3835 = vpow2.f32 %v1219_v7  ;;  %v1190_v12 = vsub.f32 %v7208_v37, %v7286_v19  ;;  %v1209_v30 = vmul.f32 1.442695, %v1182_v48  ;;  %v1192_v15 = vsub.f32 %v7226_v32, %v7286_v19 }
 0x1f9   :  { %v3826_v2 = vpop.eup %3825  ;;  %3837 = vpow2.f32 %v1223_v39  ;;  %v1235_v40 = vsel %vm9529_vm11, %v3824_v61, 0.0  ;;  %v1213_v26 = vmul.f32 1.442695, %v1184_v13  ;;  %v1194_v34 = vsub.f32 %v7236_v23, %v7286_v19  ;;  %v7322_v23 = vld [vmem:[%s8935_s3] sm:$0xff]  ;;  %vm9549_vm11 = vmmov %vm9546_vm0 }
 0x1fa   :  { %v3828_v14 = vpop.eup %3827  ;;  %3839 = vpow2.f32 %v1227_v25  ;;  %v1236_v59 = vsel %vm9540_vm13, %v3826_v2, 0.0  ;;  %v1217_v45 = vmul.f32 1.442695, %v1186_v3  ;;  %v1221_v37 = vmul.f32 1.442695, %v1188_v41  ;;  %vm9550_vm13 = vmmov %vm9539_vm6 }
 0x1fb   :  { %v3830_v24 = vpop.eup %3829  ;;  %3841 = vpow2.f32 %v1231_v16  ;;  %v1237_v27 = vadd.f32 %v1236_v59, %v1235_v40  ;;  %v1238_v31 = vsel %vm9541_vm12, %v3828_v14, 0.0  ;;  %v1225_v58 = vmul.f32 1.442695, %v1190_v12  ;;  %v7335_v16 = vld [vmem:[%s8935_s3 + $0x8] sm:$0x3]  ;;  %vm9551_vm12 = vmmov %vm9539_vm6 }
 0x1fc   :  { %v3832_v20 = vpop.eup %3831  ;;  %3843 = vpow2.f32 %v1197_v47  ;;  %v1240_v42 = vsel %vm9542_vm7, %v3830_v24, 0.0  ;;  %v1229_v21 = vmul.f32 1.442695, %v1192_v15  ;;  %v1233_v1 = vmul.f32 1.442695, %v1194_v34  ;;  %vm9552_vm7 = vmmov %vm9539_vm6 }
 0x1fd   :  { %v3834_v17 = vpop.eup %3833  ;;  %v1239_v36 = vadd.f32 %v1238_v31, %v1237_v27  ;;  %3845 = vpow2.f32 %v1201_v29  ;;  %v1242_v32 = vsel %vm9543_vm14, %v3832_v20, 0.0  ;;  %v3010_v9 = vrot.slane %v7322_v23, 1  ;;  %vm9553_vm14 = vmmov %vm9539_vm6 }
 0x1fe   :  { %v3836_v53 = vpop.eup %3835  ;;  %3847 = vpow2.f32 %v1205_v4  ;;  %v1244_v55 = vsel %vm9544_vm15, %v3834_v17, 0.0  ;;  %v3011_v60 = vrot.slane %v7322_v23, 2  ;;  %v3012_v48 = vrot.slane %v7322_v23, 3  ;;  %v3705_v17 = vld [vmem:[%s8937_s0 + $0x468] sm:$0x3]  ;;  %vm9554_vm15 = vmmov %vm9539_vm6 }
 0x1ff   :  { %v3838_v46 = vpop.eup %3837  ;;  %v1241_v10 = vadd.f32 %v1240_v42, %v1239_v36  ;;  %3849 = vpow2.f32 %v1209_v30  ;;  %v1246_v52 = vsel %vm9545_vm2, %v3836_v53, 0.0  ;;  %v3013_v2 = vrot.slane %v7322_v23, 4  ;;  %v3706_v36 = vld [vmem:[%s8937_s0 + $0x470] sm:$0xff]  ;;  %vm9555_vm2 = vmmov %vm9539_vm6 }
 0x200   :  { %v3840_v43 = vpop.eup %3839  ;;  %3851 = vpow2.f32 %v1213_v26  ;;  %v1248_v62 = vsel %vm9546_vm0, %v3838_v46, 0.0  ;;  %v3014_v29 = vrot.slane %v7322_v23, 5  ;;  %v3015_v41 = vrot.slane %v7322_v23, 6  ;;  %v3704_v26 = vld [vmem:[%s8937_s0 + $0x460] sm:$0xff]  ;;  %v3707_v46 = vld [vmem:[%s8937_s0 + $0x478] sm:$0x3]  ;;  %vm9556_vm0 = vmmov %vm9555_vm2 }
 0x201   :  { %v3842_v35 = vpop.eup %3841  ;;  %v1243_v18 = vadd.f32 %v1242_v32, %v1241_v10  ;;  %3853 = vpow2.f32 %v1217_v45  ;;  %v1250_v7 = vsel %vm9548_vm5, %v3840_v43, 0.0  ;;  %v3016_v12 = vrot.slane %v7322_v23, 7 }
 0x202   :  { %v3844_v33 = vpop.eup %3843  ;;  %3855 = vpow2.f32 %v1221_v37  ;;  %v1252_v13 = vsel %vm9549_vm11, %v3842_v35, 0.0  ;;  %v3017_v30 = vrot.slane %v7335_v16, 1  ;;  %v3018_v34 = vperm.slane %v7322_v23, 0 }
 0x203   :  { %v3846_v57 = vpop.eup %3845  ;;  %v1245_v54 = vadd.f32 %v1244_v55, %v1243_v18  ;;  %3857 = vpow2.f32 %v1225_v58  ;;  %v1254_v56 = vsel %vm9547_vm9, %v3844_v33, 0.0  ;;  %v3019_v45 = vperm.slane %v3010_v9, 0  ;;  %v3708_v18 = vld [vmem:[%s8937_s0 + $0x480] sm:$0xff]  ;;  %v3710_v33 = vld [vmem:[%s8937_s0 + $0x490] sm:$0xff]  ;;  %vm9557_vm9 = vmmov %vm9556_vm0 }
 0x204   :  { %v3848_v6 = vpop.eup %3847  ;;  %3859 = vpow2.f32 %v1229_v21  ;;  %v1255_v63 = vsel %vm9539_vm6, %v3846_v57, 0.0  ;;  %v3020_v10 = vperm.slane %v3011_v60, 0  ;;  %v3021_v58 = vperm.slane %v3012_v48, 0  ;;  %v3720_v60 = vld [vmem:[%s8937_s0 + $0x4e0] sm:$0xff]  ;;  %vm9558_vm6 = vmmov %vm9549_vm11 }
 0x205   :  { %v3850_v39 = vpop.eup %3849  ;;  %v1247_v25 = vadd.f32 %v1246_v52, %v1245_v54  ;;  %3861 = vpow2.f32 %v1233_v1  ;;  %v1256_v0 = vadd.f32 %v1255_v63, %v1254_v56  ;;  %v1257_v47 = vsel %vm9550_vm13, %v3848_v6, 0.0  ;;  %v3709_v1 = vld [vmem:[%s8937_s0 + $0x488] sm:$0x3]  ;;  %v3712_v6 = vld [vmem:[%s8937_s0 + $0x4a0] sm:$0xff]  ;;  %v3714_v63 = vld [vmem:[%s8937_s0 + $0x4b0] sm:$0xff] }
 0x206   :  { %v3852_v61 = vpop.eup %3851  ;;  %v1259_v59 = vsel %vm9551_vm12, %v3850_v39, 0.0  ;;  %v3022_v55 = vperm.slane %v3013_v2, 0  ;;  %v3023_v57 = vperm.slane %v3014_v29, 0  ;;  %v3024_v54 = vperm.slane %v3015_v41, 0  ;;  %v3716_v48 = vld [vmem:[%s8937_s0 + $0x4c0] sm:$0xff]  ;;  %vm9559_vm11 = vmmov %vm9558_vm6 }
 0x207   :  { %v3854_v40 = vpop.eup %3853  ;;  %v1249_v3 = vadd.f32 %v1248_v62, %v1247_v25  ;;  %v1258_v14 = vadd.f32 %v1257_v47, %v1256_v0  ;;  %v1261_v24 = vsel %vm9552_vm7, %v3852_v61, 0.0  ;;  %v3711_v62 = vld [vmem:[%s8937_s0 + $0x498] sm:$0x3]  ;;  %v3025_v56 = vperm.slane %v3016_v12, 0  ;;  %v3717_v61 = vld [vmem:[%s8937_s0 + $0x4c8] sm:$0x3]  ;;  %vm9560_vm13 = vmmov %vm9558_vm6 }
 0x208   :  { %v3856_v4 = vpop.eup %3855  ;;  %v1263_v27 = vsel %vm9553_vm14, %v3854_v40, 0.0  ;;  %v3026_v39 = vperm.slane %v7335_v16, 0  ;;  %v3027_v25 = vperm.slane %v3017_v30, 0  ;;  %v3715_v0 = vld [vmem:[%s8937_s0 + $0x4b8] sm:$0x3]  ;;  %v7401_v47 = vadd.f32 %v3705_v17, %v3018_v34  ;;  %vm9561_vm12 = vmmov %vm9558_vm6 }
 0x209   :  { %v3858_v20 = vpop.eup %3857  ;;  %v1251_v31 = vadd.f32 %v1250_v7, %v1249_v3  ;;  %v1260_v15 = vadd.f32 %v1259_v59, %v1258_v14  ;;  %v1265_v42 = vsel %vm9554_vm15, %v3856_v4, 0.0  ;;  %v3713_v7 = vld [vmem:[%s8937_s0 + $0x4a8] sm:$0x3]  ;;  %v7403_v2 = vadd.f32 %v3706_v36, %v3019_v45  ;;  %v3718_v3 = vld [vmem:[%s8937_s0 + $0x4d0] sm:$0xff]  ;;  %v3719_v14 = vld [vmem:[%s8937_s0 + $0x4d8] sm:$0x3] }
 0x20a   :  { %v3860_v53 = vpop.eup %3859  ;;  %v1267_v37 = vsel %vm9555_vm2, %v3858_v20, 0.0  ;;  %v7405_v29 = vadd.f32 %v3707_v46, %v3019_v45  ;;  %v3721_v59 = vld [vmem:[%s8937_s0 + $0x4e8] sm:$0x3]  ;;  %v7416_v41 = vadd.f32 %v3708_v18, %v3020_v10  ;;  %v7418_v4 = vadd.f32 %v3709_v1, %v3020_v10  ;;  %v3723_v12 = vld [vmem:[%s8937_s0 + $0x4f8] sm:$0x3]  ;;  %vm9562_vm7 = vmmov %vm9558_vm6 }
 0x20b   :  { %v3862_v43 = vpop.eup %3861  ;;  %v1253_v32 = vadd.f32 %v1252_v13, %v1251_v31  ;;  %v1262_v21 = vadd.f32 %v1261_v24, %v1260_v15  ;;  %v1269_v35 = vsel %vm9556_vm0, %v3860_v53, 0.0  ;;  %v7399_v13 = vadd.f32 %v3704_v26, %v3018_v34  ;;  %v4129_v17 = vld [vmem:[%s8936_s1] sm:$0x1]  ;;  %vm9563_vm14 = vmmov %vm9558_vm6 }
 0x20c   :  { %v1271_v52 = vsel %vm9557_vm9, %v3862_v43, 0.0  ;;  %v7420_v24 = vadd.f32 %v3710_v33, %v3021_v58  ;;  %v7428_v30 = vadd.f32 %v3711_v62, %v3021_v58  ;;  %v7430_v20 = vadd.f32 %v3712_v6, %v3022_v55  ;;  %vm9564_vm15 = vmmov %vm9558_vm6 }
 0x20d   :  { %3863 = vlog2.f32 %v1253_v32  ;;  %v1264_v9 = vadd.f32 %v1263_v27, %v1262_v21  ;;  %v3722_v27 = vld [vmem:[%s8937_s0 + $0x4f0] sm:$0xff]  ;;  %v7432_v31 = vadd.f32 %v3713_v7, %v3022_v55  ;;  %v7434_v15 = vadd.f32 %v3714_v63, %v3023_v57  ;;  %vm9565_vm2 = vmmov %vm9558_vm6 }
 0x20e   :  { %vm2982_vm5 = vcmp.gt.s32.totalorder %v4129_v17, 7  ;;  %v7439_v36 = vadd.f32 %v3715_v0, %v3023_v57  ;;  %v7441_v34 = vadd.f32 %v3716_v48, %v3024_v54  ;;  %v7443_v45 = vadd.f32 %v3717_v61, %v3024_v54  ;;  %vm9566_vm0 = vmmov %vm9565_vm2 }
 0x20f   :  { %v1266_v40 = vadd.f32 %v1265_v42, %v1264_v9  ;;  %v7445_v53 = vadd.f32 %v3718_v3, %v3025_v56  ;;  %v7447_v42 = vadd.f32 %v3719_v14, %v3025_v56  ;;  %v7449_v46 = vadd.f32 %v3720_v60, %v3026_v39 }
 0x210   :  { %v7451_v10 = vadd.f32 %v3721_v59, %v3026_v39  ;;  %v7453_v43 = vadd.f32 %v3722_v27, %v3027_v25  ;;  %v7455_v32 = vadd.f32 %v3723_v12, %v3027_v25  ;;  %v3059_v21 = vsel %vm9558_vm6, %v7403_v2, -inf  ;;  %vm9567_vm6 = vmmov %vm9557_vm9 }
 0x211   :  { %v1268_v26 = vadd.f32 %v1267_v37, %v1266_v40  ;;  %v3058_v1 = vsel %vm9559_vm11, %v7399_v13, -inf  ;;  %v3060_v33 = vsel %vm9560_vm13, %v7416_v41, -inf  ;;  %v3062_v55 = vsel %vm9561_vm12, %v7420_v24, -inf  ;;  %vm9568_vm11 = vmmov %vm9567_vm6 }
 0x212   :  { %v3061_v57 = vmax.f32 %v3058_v1, %v3060_v33  ;;  %v3064_v54 = vsel %vm9562_vm7, %v7430_v20, -inf  ;;  %v3066_v9 = vsel %vm9563_vm14, %v7434_v15, -inf  ;;  %v3068_v6 = vsel %vm9564_vm15, %v7441_v34, -inf  ;;  %vm9569_vm13 = vmmov %vm9566_vm0 }
 0x213   :  { %v3864_v37 = vpop.eup %3863  ;;  %v1270_v58 = vadd.f32 %v1269_v35, %v1268_v26  ;;  %v3063_v35 = vmax.f32 %v3059_v21, %v3062_v55  ;;  %v3070_v7 = vsel %vm9565_vm2, %v7445_v53, -inf  ;;  %v3078_v25 = vsel %vm9567_vm6, %v7405_v29, -inf  ;;  %vm9570_vm12 = vmmov %vm9567_vm6 }
 0x214   :  { %v1274_v18 = vmul.f32 0.6931472, %v3864_v37  ;;  %v3065_v63 = vmax.f32 %v3061_v57, %v3064_v54  ;;  %v3079_v0 = vsel %vm9568_vm11, %v7418_v4, -inf  ;;  %vm9571_vm7 = vmmov %vm9566_vm0  ;;  %v3384_v33 = vsel %vm2982_vm5, 1, %v9418_v49 }
 0x215   :  { %v1272_v62 = vadd.f32 %v1271_v52, %v1270_v58  ;;  %v3067_v60 = vmax.f32 %v3063_v35, %v3066_v9  ;;  %v3072_v52 = vsel %vm9566_vm0, %v7449_v46, -inf  ;;  %v3074_v3 = vsel %vm9571_vm7, %v7453_v43, -inf  ;;  %vm9572_vm14 = vmmov %vm9567_vm6 }
 0x216   :  { %v1277_v56 = vadd.f32 %v1274_v18, %v7266_v38  ;;  %v3077_v38 = vsel %vm9557_vm9, %v7401_v47, -inf  ;;  %v3069_v48 = vmax.f32 %v3065_v63, %v3068_v6  ;;  %v3083_v59 = vsel %vm9572_vm14, %v7432_v31, -inf  ;;  %vm9573_vm15 = vmmov %vm9567_vm6 }
 0x217   :  { %3865 = vlog2.f32 %v1272_v62  ;;  %v3071_v61 = vmax.f32 %v3067_v60, %v3070_v7  ;;  %v3080_v40 = vmax.f32 %v3077_v38, %v3079_v0  ;;  %v3085_v27 = vsel %vm9573_vm15, %v7439_v36, -inf  ;;  %vm9574_vm2 = vmmov %vm9567_vm6 }
 0x218   :  { %v1292_v39 = vsel %vm5147_vm8, %v1277_v56, %v6987_v5  ;;  %v3081_v5 = vsel %vm9570_vm12, %v7428_v30, -inf  ;;  %v3073_v12 = vmax.f32 %v3069_v48, %v3072_v52  ;;  %v3087_v58 = vsel %vm9574_vm2, %v7443_v45, -inf  ;;  %vm9575_vm0 = vmmov %vm9574_vm2 }
 0x219   :  { %1294 = vst.msk [vmem:[%s8934_s4] sm:$0xff] %vm9569_vm13, %v1292_v39  ;;  %v3082_v14 = vmax.f32 %v3078_v25, %v3081_v5  ;;  %v3075_v26 = vmax.f32 %v3071_v61, %v3074_v3  ;;  %v3084_v37 = vmax.f32 %v3080_v40, %v3083_v59  ;;  %v3089_v18 = vsel %vm9575_vm0, %v7447_v42, -inf  ;;  %vm9576_vm9 = vmmov %vm9575_vm0 }
 0x21a   :  { %v3091_v1 = vsel %vm9576_vm9, %v7451_v10, -inf  ;;  %v3385_v35 = vperm.slane %v3384_v33, 0  ;;  %vm9087_vm6 = vcmask 8192   ;;  %vm9577_vm11 = vmmov %vm9575_vm0  ;;  %v4233_v63 = vmov 9  }
 0x21b   :  { %v3086_v21 = vmax.f32 %v3082_v14, %v3085_v27  ;;  %v3076_v62 = vmax.f32 %v3073_v12, %v3075_v26  ;;  %v3088_v57 = vmax.f32 %v3084_v37, %v3087_v58  ;;  %v3093_v9 = vsel %vm9577_vm11, %v7455_v32, -inf  ;;  %3405 = vst.msk [vmem:[#allocation3] sm:$0x1] %vm9087_vm6, %v4233_v63 }
 0x21c   :  { %vm7507_vm13 = vcmp.eq.s32.totalorder %v3385_v35, 1  ;;  %vm9580_vm14 = vcmask 15360  }
 0x21d   :  { %v3866_v55 = vpop.eup %3865  ;;  %v3090_v56 = vmax.f32 %v3086_v21, %v3089_v18  ;;  %v3092_v6 = vmax.f32 %v3088_v57, %v3091_v1  ;;  %vm3096_vm5 = vcmp.eq.f32.partialorder %v7399_v13, %v3076_v62  ;;  %v3393_v60 = vsel %vm7507_vm13, %v3076_v62, %v7322_v23 }
 0x21e   :  { %v1276_v54 = vmul.f32 0.6931472, %v3866_v55  ;;  %vm3100_vm7 = vcmp.eq.f32.partialorder %v7416_v41, %v3076_v62  ;;  %3395 = vst.msk [vmem:[%s8935_s3] sm:$0xff] %vm9580_vm14, %v3393_v60  ;;  %vm3102_vm15 = vcmp.eq.f32.partialorder %v7420_v24, %v3076_v62  ;;  %vm3104_vm2 = vcmp.eq.f32.partialorder %v7430_v20, %v3076_v62 }
 0x21f   :  { %v3094_v17 = vmax.f32 %v3090_v56, %v3093_v9  ;;  %vm3106_vm0 = vcmp.eq.f32.partialorder %v7434_v15, %v3076_v62  ;;  %vm3108_vm9 = vcmp.eq.f32.partialorder %v7441_v34, %v3076_v62  ;;  %vm3110_vm11 = vcmp.eq.f32.partialorder %v7445_v53, %v3076_v62 }
 0x220   :  { %v1278_v49 = vadd.f32 %v1276_v54, %v7286_v19  ;;  %vm3112_vm6 = vcmp.eq.f32.partialorder %v7449_v46, %v3076_v62  ;;  %vm3114_vm14 = vcmp.eq.f32.partialorder %v7453_v43, %v3076_v62  ;;  %v3116_v41 = vsel %vm3096_vm5, 0, %v9244_v28 }
 0x221   :  { %v7530_v23 = vmax.f32 %v3092_v6, %v3094_v17  ;;  %v3120_v24 = vsel %vm3100_vm7, 2, %v9244_v28  ;;  %v3122_v20 = vsel %vm3102_vm15, 3, %v9244_v28  ;;  %v3124_v15 = vsel %vm3104_vm2, 4, %v9244_v28 }
 0x222   :  { %v1293_v19 = vsel %vm5147_vm8, %v1278_v49, %v7079_v51  ;;  %vm9581_vm8 = vcmp.eq.f32.partialorder %v7403_v2, %v3076_v62  ;;  %v3126_v13 = vsel %vm3106_vm0, 5, %v9244_v28  ;;  %v3128_v2 = vsel %vm3108_vm9, 6, %v9244_v28  ;;  %v3406_v1 = vld [vmem:[#allocation3] sm:$0x1] }
 0x223   :  { %1295 = vst.msk [vmem:[%s8934_s4 + $0x8] sm:$0x3] %vm9570_vm12, %v1293_v19  ;;  %v3118_v50 = vsel %vm9581_vm8, 1, %v9244_v28  ;;  %v3394_v51 = vsel %vm7507_vm13, %v7530_v23, %v7335_v16  ;;  %v3130_v34 = vsel %vm3110_vm11, 7, %v9244_v28  ;;  %v3132_v53 = vsel %vm3112_vm6, 8, %v9244_v28 }
 0x224   :  { %3396 = vst.msk [vmem:[%s8935_s3 + $0x8] sm:$0x3] %vm9570_vm12, %v3394_v51  ;;  %v3134_v16 = vsel %vm3114_vm14, 9, %v9244_v28  ;;  %vm9582_vm5 = vcmask 15360   ;;  %vm3099_vm9 = vcmp.eq.f32.partialorder %v7405_v29, %v7530_v23  ;;  %vm3115_vm14 = vcmp.eq.f32.partialorder %v7455_v32, %v7530_v23 }
 0x225   :  { %v3136_v46 = vsel %vm9582_vm5, %v3116_v41, 2147483647  ;;  %vm9583_vm7 = vmmov %vm9582_vm5  ;;  %v3119_v21 = vsel %vm3099_vm9, 1, %v9244_v28  ;;  %vm9594_vm9 = vcmp.eq.f32.partialorder %v7439_v36, %v7530_v23  ;;  %v7630_v36 = vld [vmem:[%s8934_s4] sm:$0xff]  ;;  %v3410_v54 = vperm.slane %v3406_v1, 0  ;;  %v9605_v41 = vld [vmem:[#allocation5_spill] sm:$0xff] }
 0x226   :  { %v3137_v43 = vsel %vm9583_vm7, %v3118_v50, 2147483647  ;;  %vm9584_vm2 = vmmov %vm9582_vm5  ;;  %v3127_v29 = vsel %vm9594_vm9, 5, %v9244_v28  ;;  %v1510_v9 = vrot.slane %v7630_v36, 1 }
 0x227   :  { %v3138_v52 = vsel %vm9584_vm2, %v3120_v24, 2147483647  ;;  %vm9585_vm8 = vmmov %vm9584_vm2  ;;  %v1511_v24 = vrot.slane %v7630_v36, 2 }
 0x228   :  { %v3141_v39 = vsel %vm9585_vm8, %v3122_v20, 2147483647  ;;  %vm9586_vm0 = vmmov %vm9584_vm2  ;;  %vm3139_vm11 = vcmp.lt.s32.totalorder %v3136_v46, %v3138_v52  ;;  %v1512_v20 = vrot.slane %v7630_v36, 3 }
 0x229   :  { %v3144_v38 = vsel %vm9586_vm0, %v3124_v15, 2147483647  ;;  %vm3142_vm6 = vcmp.lt.s32.totalorder %v3137_v43, %v3141_v39  ;;  %vm9587_vm12 = vmmov %vm9586_vm0  ;;  %v3140_v0 = vsel %vm3139_vm11, %v3136_v46, %v3138_v52  ;;  %v3159_v3 = vsel %vm9586_vm0, %v3134_v16, 2147483647 }
 0x22a   :  { %v3147_v25 = vsel %vm9587_vm12, %v3126_v13, 2147483647  ;;  %v3143_v48 = vsel %vm3142_vm6, %v3137_v43, %v3141_v39  ;;  %vm9588_vm5 = vmmov %vm9586_vm0  ;;  %vm3145_vm2 = vcmp.lt.s32.totalorder %v3140_v0, %v3144_v38  ;;  %vm3103_vm12 = vcmp.eq.f32.partialorder %v7428_v30, %v7530_v23  ;;  %v7658_v51 = vld [vmem:[%s8934_s4 + $0x8] sm:$0x3] }
 0x22b   :  { %v3150_v61 = vsel %vm9588_vm5, %v3128_v2, 2147483647  ;;  %vm9589_vm7 = vmmov %vm9586_vm0  ;;  %vm3148_vm8 = vcmp.lt.s32.totalorder %v3143_v48, %v3147_v25  ;;  %v3146_v14 = vsel %vm3145_vm2, %v3140_v0, %v3144_v38  ;;  %vm3113_vm2 = vcmp.eq.f32.partialorder %v7451_v10, %v7530_v23 }
 0x22c   :  { %v3153_v40 = vsel %vm9589_vm7, %v3130_v34, 2147483647  ;;  %vm9590_vm15 = vmmov %vm9586_vm0  ;;  %v3149_v59 = vsel %vm3148_vm8, %v3143_v48, %v3147_v25  ;;  %vm3151_vm11 = vcmp.lt.s32.totalorder %v3146_v14, %v3150_v61  ;;  %vm3109_vm7 = vcmp.eq.f32.partialorder %v7443_v45, %v7530_v23 }
 0x22d   :  { %v3156_v5 = vsel %vm9590_vm15, %v3132_v53, 2147483647  ;;  %vm3154_vm6 = vcmp.lt.s32.totalorder %v3149_v59, %v3153_v40  ;;  %v3152_v27 = vsel %vm3151_vm11, %v3146_v14, %v3150_v61  ;;  %vm3111_vm15 = vcmp.eq.f32.partialorder %v7447_v42, %v7530_v23  ;;  %v9608_v61 = vld [vmem:[#allocation6_spill] sm:$0xff] }
 0x22e   :  { %v3155_v12 = vsel %vm3154_vm6, %v3149_v59, %v3153_v40  ;;  %vm3157_vm8 = vcmp.lt.s32.totalorder %v3152_v27, %v3156_v5  ;;  %vm9591_vm5 = vcmp.eq.f32.partialorder %v7401_v47, %v7530_v23  ;;  %vm9592_vm11 = vcmp.eq.f32.partialorder %v7418_v4, %v7530_v23 }
 0x22f   :  { %vm3160_vm0 = vcmp.lt.s32.totalorder %v3155_v12, %v3159_v3  ;;  %v3117_v26 = vsel %vm9591_vm5, 0, %v9244_v28  ;;  %v3158_v37 = vsel %vm3157_vm8, %v3152_v27, %v3156_v5  ;;  %v3121_v18 = vsel %vm9592_vm11, 2, %v9244_v28 }
 0x230   :  { %v3161_v58 = vsel %vm3160_vm0, %v3155_v12, %v3159_v3  ;;  %v3123_v47 = vsel %vm3103_vm12, 3, %v9244_v28  ;;  %vm9593_vm5 = vcmp.eq.f32.partialorder %v7432_v31, %v7530_v23  ;;  %v3129_v4 = vsel %vm3109_vm7, 6, %v9244_v28 }
 0x231   :  { %vm3162_vm6 = vcmp.lt.s32.totalorder %v3158_v37, %v3161_v58  ;;  %v3125_v33 = vsel %vm9593_vm5, 4, %v9244_v28  ;;  %v3131_v30 = vsel %vm3111_vm15, 7, %v9244_v28  ;;  %v3133_v31 = vsel %vm3113_vm2, 8, %v9244_v28 }
 0x232   :  { %v3163_v55 = vsel %vm3162_vm6, %v3158_v37, %v3161_v58  ;;  %v3135_v45 = vsel %vm3115_vm14, 9, %v9244_v28  ;;  %vm9595_vm12 = vcmask 9216   ;;  %vm9597_vm15 = vcmask 15360  }
 0x233   :  { %v3387_v62 = vsel %vm7507_vm13, %v3163_v55, 9  ;;  %v3164_v42 = vsel %vm9595_vm12, %v3117_v26, 2147483647  ;;  %vm9596_vm7 = vmmov %vm9595_vm12  ;;  %v1513_v2 = vrot.slane %v7630_v36, 4  ;;  %v1514_v34 = vrot.slane %v7630_v36, 5 }
 0x234   :  { %v3165_v57 = vsel %vm9596_vm7, %v3119_v21, 2147483647  ;;  %3391 = vst.msk [vmem:[#allocation2 + $0x70] sm:$0xff] %vm9597_vm15, %v3387_v62  ;;  %vm9598_vm2 = vmmov %vm9596_vm7  ;;  %v1515_v16 = vrot.slane %v7630_v36, 6  ;;  %v1516_v46 = vrot.slane %v7630_v36, 7  ;;  %v1517_v38 = vrot.slane %v7658_v51, 1 }
 0x235   :  { %v3166_v10 = vsel %vm9598_vm2, %v3121_v18, 2147483647  ;;  %vm9599_vm8 = vmmov %vm9598_vm2  ;;  %v3187_v23 = vsel %vm9598_vm2, %v3135_v45, 2147483647  ;;  %v1518_v25 = vperm.slane %v7630_v36, 0  ;;  %v1519_v0 = vperm.slane %v1510_v9, 0 }
 0x236   :  { %v3169_v35 = vsel %vm9599_vm8, %v3123_v47, 2147483647  ;;  %vm3167_vm0 = vcmp.lt.s32.totalorder %v3164_v42, %v3166_v10  ;;  %vm9600_vm6 = vmmov %vm9598_vm2  ;;  %vm7651_vm8 = vcmp.eq.s32.totalorder %v9605_v41, %v3410_v54  ;;  %v1520_v5 = vperm.slane %v1511_v24, 0  ;;  %v4130_v18 = vld [vmem:[%s8937_s0 + $0x1e0] sm:$0xff]  ;;  %v4131_v47 = vld [vmem:[%s8937_s0 + $0x1e8] sm:$0x3] }
 0x237   :  { %vm3170_vm11 = vcmp.lt.s32.totalorder %v3165_v57, %v3169_v35  ;;  %v3172_v56 = vsel %vm9600_vm6, %v3125_v33, 2147483647  ;;  %v3168_v6 = vsel %vm3167_vm0, %v3164_v42, %v3166_v10  ;;  %vm9601_vm14 = vmmov %vm9598_vm2  ;;  %v1521_v3 = vperm.slane %v1512_v20, 0  ;;  %v4135_v45 = vld [vmem:[%s8937_s0 + $0x208] sm:$0x3]  ;;  %v4144_v24 = vld [vmem:[%s8937_s0 + $0x250] sm:$0xff] }
 0x238   :  { %v3171_v32 = vsel %vm3170_vm11, %v3165_v57, %v3169_v35  ;;  %v3175_v28 = vsel %vm9601_vm14, %v3127_v29, 2147483647  ;;  %vm9602_vm5 = vmmov %vm9598_vm2  ;;  %vm3173_vm9 = vcmp.lt.s32.totalorder %v3168_v6, %v3172_v56  ;;  %v1522_v27 = vperm.slane %v1513_v2, 0  ;;  %v4132_v29 = vld [vmem:[%s8937_s0 + $0x1f0] sm:$0xff]  ;;  %v4137_v35 = vld [vmem:[%s8937_s0 + $0x218] sm:$0x3] }
 0x239   :  { %v3178_v63 = vsel %vm9602_vm5, %v3129_v4, 2147483647  ;;  %vm3176_vm12 = vcmp.lt.s32.totalorder %v3171_v32, %v3175_v28  ;;  %vm9603_vm7 = vmmov %vm9598_vm2  ;;  %v3174_v60 = vsel %vm3173_vm9, %v3168_v6, %v3172_v56  ;;  %vm7671_vm9 = vcmp.eq.s32.totalorder %v9608_v61, %v3410_v54  ;;  %v4133_v4 = vld [vmem:[%s8937_s0 + $0x1f8] sm:$0x3]  ;;  %v4136_v57 = vld [vmem:[%s8937_s0 + $0x210] sm:$0xff] }
 0x23a   :  { %v3181_v49 = vsel %vm9603_vm7, %v3131_v30, 2147483647  ;;  %vm9604_vm15 = vmmov %vm9598_vm2  ;;  %v3177_v19 = vsel %vm3176_vm12, %v3171_v32, %v3175_v28  ;;  %vm3179_vm0 = vcmp.lt.s32.totalorder %v3174_v60, %v3178_v63  ;;  %vm9611_vm12 = vcmask 15360   ;;  %v4138_v56 = vld [vmem:[%s8937_s0 + $0x220] sm:$0xff]  ;;  %v4139_v6 = vld [vmem:[%s8937_s0 + $0x228] sm:$0x3] }
 0x23b   :  { %v3184_v17 = vsel %vm9604_vm15, %v3133_v31, 2147483647  ;;  %vm3182_vm11 = vcmp.lt.s32.totalorder %v3177_v19, %v3181_v49  ;;  %v3180_v15 = vsel %vm3179_vm0, %v3174_v60, %v3178_v63  ;;  %v3408_v53 = vld [vmem:[#allocation2 + $0x70] sm:$0xff]  ;;  %v1523_v12 = vperm.slane %v1514_v34, 0  ;;  %vm9612_vm7 = vmmov %vm9598_vm2  ;;  %v4134_v31 = vld [vmem:[%s8937_s0 + $0x200] sm:$0xff] }
 0x23c   :  { %v3183_v13 = vsel %vm3182_vm11, %v3177_v19, %v3181_v49  ;;  %vm3185_vm6 = vcmp.lt.s32.totalorder %v3180_v15, %v3184_v17  ;;  %v3413_v39 = vsel %vm7651_vm8, %v3408_v53, 0  ;;  %v1524_v26 = vperm.slane %v1515_v16, 0  ;;  %v4140_v28 = vld [vmem:[%s8937_s0 + $0x230] sm:$0xff]  ;;  %v4141_v49 = vld [vmem:[%s8937_s0 + $0x238] sm:$0x3]  ;;  %v4142_v60 = vld [vmem:[%s8937_s0 + $0x240] sm:$0xff] }
 0x23d   :  { %vm3188_vm14 = vcmp.lt.s32.totalorder %v3183_v13, %v3187_v23  ;;  %v3186_v43 = vsel %vm3185_vm6, %v3180_v15, %v3184_v17  ;;  %v7678_v59 = vsel %vm9611_vm12, %v3413_v39, 0  ;;  %v1525_v37 = vperm.slane %v1516_v46, 0  ;;  %v4145_v15 = vld [vmem:[%s8937_s0 + $0x260] sm:$0xff]  ;;  %v4146_v2 = vld [vmem:[%s8937_s0 + $0x258] sm:$0x3]  ;;  %v4148_v46 = vld [vmem:[%s8937_s0 + $0x270] sm:$0xff] }
 0x23e   :  { %v3189_v52 = vsel %vm3188_vm14, %v3183_v13, %v3187_v23  ;;  %v1526_v58 = vperm.slane %v7658_v51, 0  ;;  %v1527_v21 = vperm.slane %v1517_v38, 0  ;;  %v7685_v1 = vadd.f32 %v4130_v18, %v1518_v25  ;;  %v4143_v23 = vld [vmem:[%s8937_s0 + $0x248] sm:$0x3]  ;;  %vm9613_vm15 = vmmov %vm9611_vm12  ;;  %v4149_v39 = vld [vmem:[%s8937_s0 + $0x278] sm:$0x3] }
 0x23f   :  { %vm3190_vm5 = vcmp.lt.s32.totalorder %v3186_v43, %v3189_v52  ;;  %v7690_v33 = vadd.f32 %v4131_v47, %v1518_v25  ;;  %v7695_v55 = vadd.f32 %v4132_v29, %v1519_v0  ;;  %v7700_v30 = vadd.f32 %v4133_v4, %v1519_v0  ;;  %v4147_v53 = vld [vmem:[%s8937_s0 + $0x268] sm:$0x3]  ;;  %vm9614_vm2 = vmmov %vm9611_vm12 }
 0x240   :  { %v3191_v48 = vsel %vm3190_vm5, %v3186_v43, %v3189_v52  ;;  %v7705_v62 = vadd.f32 %v4134_v31, %v1520_v5  ;;  %v7710_v42 = vadd.f32 %v4135_v45, %v1520_v5  ;;  %v7715_v10 = vadd.f32 %v4136_v57, %v1521_v3  ;;  %vm9615_vm8 = vmmov %vm9614_vm2 }
 0x241   :  { %v3388_v14 = vsel %vm7507_vm13, %v3191_v48, 9  ;;  %v7720_v54 = vadd.f32 %v4137_v35, %v1521_v3  ;;  %v7725_v9 = vadd.f32 %v4138_v56, %v1522_v27  ;;  %v7730_v32 = vadd.f32 %v4139_v6, %v1522_v27  ;;  %vm9616_vm0 = vmmov %vm9614_vm2 }
 0x242   :  { %3392 = vst.msk [vmem:[#allocation2 + $0x78] sm:$0x3] %vm9612_vm7, %v3388_v14  ;;  %v7735_v63 = vadd.f32 %v4140_v28, %v1523_v12  ;;  %v7740_v17 = vadd.f32 %v4141_v49, %v1523_v12  ;;  %v7745_v19 = vadd.f32 %v4142_v60, %v1524_v26  ;;  %v7750_v50 = vadd.f32 %v4143_v23, %v1524_v26  ;;  %vm9617_vm11 = vmmov %vm9616_vm0 }
 0x243   :  { %v7755_v20 = vadd.f32 %v4144_v24, %v1525_v37  ;;  %v7760_v13 = vadd.f32 %v4145_v15, %v1526_v58  ;;  %v7765_v34 = vadd.f32 %v4146_v2, %v1525_v37  ;;  %v7770_v16 = vadd.f32 %v4147_v53, %v1526_v58  ;;  %vm9618_vm6 = vmmov %vm9616_vm0 }
 0x244   :  { %v7775_v43 = vadd.f32 %v4148_v46, %v1527_v21  ;;  %v1559_v52 = vsel %vm9613_vm15, %v7695_v55, -inf  ;;  %v7782_v38 = vadd.f32 %v4149_v39, %v1527_v21  ;;  %v1558_v25 = vsel %vm9614_vm2, %v7685_v1, -inf  ;;  %vm9619_vm14 = vmmov %vm9616_vm0 }
 0x245   :  { %v1560_v0 = vsel %vm9615_vm8, %v7705_v62, -inf  ;;  %v1562_v48 = vsel %vm9616_vm0, %v7715_v10, -inf  ;;  %v1564_v27 = vsel %vm9617_vm11, %v7725_v9, -inf  ;;  %v1566_v12 = vsel %vm9618_vm6, %v7735_v63, -inf  ;;  %vm9620_vm5 = vmmov %vm9616_vm0 }
 0x246   :  { %v1561_v3 = vmax.f32 %v1558_v25, %v1560_v0  ;;  %v1563_v14 = vmax.f32 %v1559_v52, %v1562_v48  ;;  %v1568_v37 = vsel %vm9619_vm14, %v7745_v19, -inf  ;;  %v1570_v58 = vsel %vm9620_vm5, %v7755_v20, -inf  ;;  %vm9621_vm12 = vmmov %vm9616_vm0 }
 0x247   :  { %v1572_v21 = vsel %vm9621_vm12, %v7760_v13, -inf  ;;  %vm9622_vm15 = vmmov %vm9612_vm7  ;;  %v1574_v60 = vsel %vm9616_vm0, %v7775_v43, -inf }
 0x248   :  { %v1565_v47 = vmax.f32 %v1561_v3, %v1564_v27  ;;  %v1567_v29 = vmax.f32 %v1563_v14, %v1566_v12  ;;  %v1578_v4 = vsel %vm9622_vm15, %v7700_v30, -inf  ;;  %vm9624_vm2 = vmmov %vm9612_vm7  ;;  %vm9632_vm15 = vcmask 8192  }
 0x249   :  { %v3409_v5 = vld [vmem:[#allocation2 + $0x78] sm:$0x3]  ;;  %v1579_v45 = vsel %vm9624_vm2, %v7710_v42, -inf  ;;  %vm9625_vm8 = vmmov %vm9624_vm2 }
 0x24a   :  { %v3414_v26 = vsel %vm7671_vm9, %v3409_v5, 0  ;;  %vm9623_vm9 = vmmov %vm9612_vm7  ;;  %v1581_v57 = vsel %vm9625_vm8, %v7720_v54, -inf  ;;  %v1569_v35 = vmax.f32 %v1565_v47, %v1568_v37  ;;  %v1571_v56 = vmax.f32 %v1567_v29, %v1570_v58 }
 0x24b   :  { %v3416_v18 = vsel %vm9612_vm7, %v3414_v26, 0  ;;  %v1577_v40 = vsel %vm9623_vm9, %v7690_v33, -inf  ;;  %v1582_v28 = vmax.f32 %v1578_v4, %v1581_v57  ;;  %vm9626_vm11 = vmmov %vm9624_vm2 }
 0x24c   :  { %v3417_v31 = vadd.s32 %v3416_v18, %v7678_v59  ;;  %v1580_v6 = vmax.f32 %v1577_v40, %v1579_v45  ;;  %v1583_v59 = vsel %vm9626_vm11, %v7730_v32, -inf  ;;  %vm9627_vm6 = vmmov %vm9624_vm2  ;;  %v1573_v24 = vmax.f32 %v1569_v35, %v1572_v21 }
 0x24d   :  { %v1585_v23 = vsel %vm9627_vm6, %v7740_v17, -inf  ;;  %v1575_v15 = vmax.f32 %v1571_v56, %v1574_v60  ;;  %vm9628_vm14 = vmmov %vm9624_vm2 }
 0x24e   :  { %v3418_v49 = vrot.slane %v3417_v31, 4  ;;  %v1584_v2 = vmax.f32 %v1580_v6, %v1583_v59  ;;  %v1586_v53 = vmax.f32 %v1582_v28, %v1585_v23  ;;  %v1587_v52 = vsel %vm9628_vm14, %v7750_v50, -inf  ;;  %vm9629_vm5 = vmmov %vm9624_vm2 }
 0x24f   :  { %v1589_v39 = vsel %vm9629_vm5, %v7765_v34, -inf  ;;  %v7822_v25 = vmax.f32 %v1573_v24, %v1575_v15  ;;  %vm9630_vm12 = vmmov %vm9624_vm2 }
 0x250   :  { %v3419_v46 = vadd.s32 %v3418_v49, %v3417_v31  ;;  %v1588_v0 = vmax.f32 %v1584_v2, %v1587_v52  ;;  %v1590_v48 = vmax.f32 %v1586_v53, %v1589_v39  ;;  %v1591_v3 = vsel %vm9630_vm12, %v7770_v16, -inf  ;;  %vm9631_vm7 = vmmov %vm9624_vm2 }
 0x251   :  { %v1593_v14 = vsel %vm9631_vm7, %v7782_v38, -inf  ;;  %v1596_v26 = vsub.f32 %v7685_v1, %v7822_v25  ;;  %v1598_v18 = vsub.f32 %v7695_v55, %v7822_v25  ;;  %v1600_v31 = vsub.f32 %v7705_v62, %v7822_v25  ;;  %vm9633_vm9 = vmmov %vm9632_vm15 }
 0x252   :  { %v3420_v5 = vrot.slane %v3419_v46, 2  ;;  %v1592_v27 = vmax.f32 %v1588_v0, %v1591_v3  ;;  %v1594_v12 = vmax.f32 %v1590_v48, %v1593_v14  ;;  %v1602_v1 = vsub.f32 %v7715_v10, %v7822_v25  ;;  %vm9634_vm2 = vmmov %vm9616_vm0 }
 0x253   :  { %v1616_v47 = vmul.f32 1.442695, %v1596_v26  ;;  %v1604_v45 = vsub.f32 %v7725_v9, %v7822_v25  ;;  %v1620_v55 = vmul.f32 1.442695, %v1598_v18  ;;  %v1624_v57 = vmul.f32 1.442695, %v1600_v31  ;;  %vm9635_vm8 = vmmov %vm9616_vm0 }
 0x254   :  { %v3421_v37 = vadd.s32 %v3420_v5, %v3419_v46  ;;  %v7830_v58 = vmax.f32 %v1592_v27, %v1594_v12  ;;  %v1608_v10 = vsub.f32 %v7745_v19, %v7822_v25  ;;  %v1628_v9 = vmul.f32 1.442695, %v1602_v1  ;;  %vm9636_vm11 = vmmov %vm9629_vm5 }
 0x255   :  { %3867 = vpow2.f32 %v1616_v47  ;;  %v1610_v35 = vsub.f32 %v7755_v20, %v7822_v25  ;;  %v1632_v56 = vmul.f32 1.442695, %v1604_v45  ;;  %v1612_v6 = vsub.f32 %v7760_v13, %v7822_v25  ;;  %vm9637_vm14 = vmmov %vm9629_vm5 }
 0x256   :  { %v3422_v21 = vrot.slane %v3421_v37, 1  ;;  %v1597_v29 = vsub.f32 %v7690_v33, %v7830_v58  ;;  %v1599_v4 = vsub.f32 %v7700_v30, %v7830_v58  ;;  %v1606_v30 = vsub.f32 %v7735_v63, %v7822_v25  ;;  %vm9638_vm12 = vmmov %vm9616_vm0 }
 0x257   :  { %v1601_v63 = vsub.f32 %v7710_v42, %v7830_v58  ;;  %v1603_v49 = vsub.f32 %v7720_v54, %v7830_v58  ;;  %v1605_v60 = vsub.f32 %v7730_v32, %v7830_v58  ;;  %v1640_v20 = vmul.f32 1.442695, %v1608_v10  ;;  %vm9639_vm7 = vmmov %vm9616_vm0 }
 0x258   :  { %v3423_v40 = vadd.s32 %v3422_v21, %v3421_v37  ;;  %v1618_v33 = vmul.f32 1.442695, %v1597_v29  ;;  %v1622_v62 = vmul.f32 1.442695, %v1599_v4  ;;  %v1636_v19 = vmul.f32 1.442695, %v1606_v30 }
 0x259   :  { %v1607_v59 = vsub.f32 %v7740_v17, %v7830_v58  ;;  %v1614_v13 = vsub.f32 %v7775_v43, %v7822_v25  ;;  %v1644_v23 = vmul.f32 1.442695, %v1610_v35  ;;  %v1609_v42 = vsub.f32 %v7750_v50, %v7830_v58  ;;  %v3428_v37 = vld [vmem:[#allocation2 + $0x60] sm:$0xff]  ;;  %v3429_v21 = vld [vmem:[#allocation2 + $0x68] sm:$0x3] }
 0x25a   :  { %3424 = vst.msk [vmem:[%s8938_s2 + $0x7] sm:$0x1] %vm9632_vm15, %v3423_v40  ;;  %3869 = vpow2.f32 %v1618_v33  ;;  %v1611_v54 = vsub.f32 %v7765_v34, %v7830_v58  ;;  %v1648_v15 = vmul.f32 1.442695, %v1612_v6  ;;  %v1613_v53 = vsub.f32 %v7770_v16, %v7830_v58  ;;  %vm9640_vm15 = vmmov %vm9616_vm0 }
 0x25b   :  { %3425 = vst.msk [vmem:[#allocation3] sm:$0x1] %vm9633_vm9, %v3423_v40  ;;  %3871 = vpow2.f32 %v1620_v55  ;;  %v3868_v28 = vpop.eup %3867  ;;  %v1626_v17 = vmul.f32 1.442695, %v1601_v63  ;;  %v1630_v46 = vmul.f32 1.442695, %v1603_v49  ;;  %v1615_v52 = vsub.f32 %v7782_v38, %v7830_v58  ;;  %vm9641_vm9 = vmmov %vm9636_vm11 }
 0x25c   :  { %3873 = vpow2.f32 %v1622_v62  ;;  %v1656_v32 = vsel %vm9634_vm2, %v3868_v28, 0.0  ;;  %v1634_v39 = vmul.f32 1.442695, %v1605_v60  ;;  %v1638_v48 = vmul.f32 1.442695, %v1607_v59  ;;  %vm9642_vm2 = vmmov %vm9616_vm0 }
 0x25d   :  { %3875 = vpow2.f32 %v1624_v57  ;;  %v1652_v5 = vmul.f32 1.442695, %v1614_v13  ;;  %v1642_v31 = vmul.f32 1.442695, %v1609_v42  ;;  %v1646_v33 = vmul.f32 1.442695, %v1611_v54 }
 0x25e   :  { %3877 = vpow2.f32 %v1628_v9  ;;  %v1650_v28 = vmul.f32 1.442695, %v1613_v53  ;;  %v1654_v60 = vmul.f32 1.442695, %v1615_v52 }
 0x25f   :  { %3879 = vpow2.f32 %v1632_v56 }
 0x260   :  { %v3870_v24 = vpop.eup %3869  ;;  %3881 = vpow2.f32 %v1636_v19 }
 0x261   :  { %v3872_v2 = vpop.eup %3871  ;;  %3883 = vpow2.f32 %v1640_v20  ;;  %v1675_v27 = vsel %vm9636_vm11, %v3870_v24, 0.0  ;;  %vm9645_vm11 = vmmov %vm9642_vm2 }
 0x262   :  { %v3874_v43 = vpop.eup %3873  ;;  %v1657_v50 = vsel %vm9635_vm8, %v3872_v2, 0.0  ;;  %v3728_v0 = vld [vmem:[#allocation3] ss:$0 sm:$0xff]  ;;  %3885 = vpow2.f32 %v1644_v23  ;;  %vm9643_vm8 = vmmov %vm9616_vm0 }
 0x263   :  { %v3876_v34 = vpop.eup %3875  ;;  %v1658_v3 = vadd.f32 %v1657_v50, %v1656_v32  ;;  %3887 = vpow2.f32 %v1648_v15  ;;  %vm3431_vm6 = vcmp.eq.s32.totalorder %v9605_v41, %v3728_v0  ;;  %v1676_v26 = vsel %vm9637_vm14, %v3874_v43, 0.0  ;;  %vm9647_vm14 = vmmov %vm9642_vm2 }
 0x264   :  { %v3878_v14 = vpop.eup %3877  ;;  %v1659_v16 = vsel %vm9616_vm0, %v3876_v34, 0.0  ;;  %3889 = vpow2.f32 %v1626_v17  ;;  %vm3432_vm5 = vcmp.eq.s32.totalorder %v9608_v61, %v3728_v0  ;;  %v3433_v47 = vsel %vm3431_vm6, %v3428_v37, 0  ;;  %vm9644_vm0 = vmmov %vm9641_vm9 }
 0x265   :  { %v3880_v12 = vpop.eup %3879  ;;  %v1660_v38 = vadd.f32 %v1659_v16, %v1658_v3  ;;  %v1661_v18 = vsel %vm9638_vm12, %v3878_v14, 0.0  ;;  %3891 = vpow2.f32 %v1630_v46  ;;  %v3434_v29 = vsel %vm3432_vm5, %v3429_v21, 0  ;;  %vm9646_vm6 = vmmov %vm9644_vm0 }
 0x266   :  { %v3882_v4 = vpop.eup %3881  ;;  %3893 = vpow2.f32 %v1634_v39  ;;  %v3435_v1 = vsel %vm9639_vm7, %v3433_v47, 0  ;;  %v1663_v55 = vsel %vm9640_vm15, %v3880_v12, 0.0  ;;  %v3436_v30 = vsel %vm9641_vm9, %v3434_v29, 0  ;;  %vm9648_vm5 = vmmov %vm9644_vm0 }
 0x267   :  { %v1662_v40 = vadd.f32 %v1661_v18, %v1660_v38  ;;  %v3884_v45 = vpop.eup %3883  ;;  %3895 = vpow2.f32 %v1652_v5  ;;  %v1677_v10 = vadd.f32 %v1676_v26, %v1675_v27  ;;  %v3437_v9 = vadd.s32 %v3436_v30, %v3435_v1  ;;  %vm9649_vm12 = vmmov %vm9642_vm2 }
 0x268   :  { %v3886_v62 = vpop.eup %3885  ;;  %3897 = vpow2.f32 %v1638_v48  ;;  %v1665_v56 = vsel %vm9642_vm2, %v3882_v4, 0.0  ;;  %v1667_v20 = vsel %vm9643_vm8, %v3884_v45, 0.0  ;;  %vm9650_vm7 = vmmov %vm9644_vm0  ;;  %vm9653_vm2 = vcmask 8192  }
 0x269   :  { %v1664_v57 = vadd.f32 %v1663_v55, %v1662_v40  ;;  %v3888_v35 = vpop.eup %3887  ;;  %3899 = vpow2.f32 %v1642_v31  ;;  %v3438_v49 = vrot.slane %v3437_v9, 4  ;;  %v1669_v15 = vsel %vm9645_vm11, %v3886_v62, 0.0  ;;  %vm9651_vm15 = vmmov %vm9644_vm0  ;;  %v3448_v62 = vld [vmem:[#allocation2 + $0x50] sm:$0xff] }
 0x26a   :  { %v3890_v6 = vpop.eup %3889  ;;  %3901 = vpow2.f32 %v1646_v33  ;;  %v1671_v43 = vsel %vm9647_vm14, %v3888_v35, 0.0  ;;  %vm9652_vm9 = vmmov %vm9644_vm0 }
 0x26b   :  { %v1666_v63 = vadd.f32 %v1665_v56, %v1664_v57  ;;  %v3892_v19 = vpop.eup %3891  ;;  %v1678_v59 = vsel %vm9644_vm0, %v3890_v6, 0.0  ;;  %v3439_v42 = vadd.s32 %v3438_v49, %v3437_v9  ;;  %3903 = vpow2.f32 %v1650_v28  ;;  %vm9654_vm8 = vmmov %vm9644_vm0  ;;  %v3449_v57 = vld [vmem:[#allocation2 + $0x58] sm:$0x3] }
 0x26c   :  { %v3894_v13 = vpop.eup %3893  ;;  %v1679_v24 = vadd.f32 %v1678_v59, %v1677_v10  ;;  %v1680_v32 = vsel %vm9646_vm6, %v3892_v19, 0.0  ;;  %3905 = vpow2.f32 %v1654_v60  ;;  %vm9655_vm0 = vmmov %vm9653_vm2 }
 0x26d   :  { %v1668_v23 = vadd.f32 %v1667_v20, %v1666_v63  ;;  %v3896_v54 = vpop.eup %3895  ;;  %v3440_v46 = vrot.slane %v3439_v42, 2  ;;  %v1682_v52 = vsel %vm9648_vm5, %v3894_v13, 0.0  ;;  %vm9656_vm11 = vmmov %vm9648_vm5 }
 0x26e   :  { %v3898_v2 = vpop.eup %3897  ;;  %v1681_v17 = vadd.f32 %v1680_v32, %v1679_v24  ;;  %v1673_v48 = vsel %vm9649_vm12, %v3896_v54, 0.0  ;;  %vm9657_vm6 = vmmov %vm9649_vm12 }
 0x26f   :  { %v1670_v53 = vadd.f32 %v1669_v15, %v1668_v23  ;;  %v3900_v39 = vpop.eup %3899  ;;  %v3441_v34 = vadd.s32 %v3440_v46, %v3439_v42  ;;  %v1684_v5 = vsel %vm9650_vm7, %v3898_v2, 0.0  ;;  %vm9658_vm12 = vmmov %vm9657_vm6 }
 0x270   :  { %v1683_v0 = vadd.f32 %v1682_v52, %v1681_v17  ;;  %v3902_v3 = vpop.eup %3901  ;;  %v1686_v12 = vsel %vm9651_vm15, %v3900_v39, 0.0  ;;  %vm9659_vm15 = vmmov %vm9650_vm7  ;;  %v4150_v52 = vld [vmem:[%s8937_s0 + $0x280] sm:$0xff] }
 0x271   :  { %v1672_v50 = vadd.f32 %v1671_v43, %v1670_v53  ;;  %v3442_v27 = vrot.slane %v3441_v34, 1  ;;  %v3904_v38 = vpop.eup %3903  ;;  %v1688_v21 = vsel %vm9652_vm9, %v3902_v3, 0.0  ;;  %v4153_v3 = vld [vmem:[%s8937_s0 + $0x288] sm:$0x3]  ;;  %vm9661_vm9 = vmmov %vm9657_vm6 }
 0x272   :  { %v1685_v16 = vadd.f32 %v1684_v5, %v1683_v0  ;;  %v3906_v18 = vpop.eup %3905  ;;  %v1690_v29 = vsel %vm9654_vm8, %v3904_v38, 0.0 }
 0x273   :  { %v1674_v14 = vadd.f32 %v1673_v48, %v1672_v50  ;;  %v3443_v37 = vadd.s32 %v3442_v27, %v3441_v34  ;;  %v1692_v31 = vsel %vm9656_vm11, %v3906_v18, 0.0  ;;  %v4151_v50 = vld [vmem:[%s8937_s0 + $0x290] sm:$0xff]  ;;  %v4152_v34 = vld [vmem:[%s8937_s0 + $0x2a0] sm:$0xff] }
 0x274   :  { %v1687_v26 = vadd.f32 %v1686_v12, %v1685_v16  ;;  %v4154_v16 = vld [vmem:[%s8937_s0 + $0x298] sm:$0x3]  ;;  %v4155_v12 = vld [vmem:[%s8937_s0 + $0x2a8] sm:$0x3] }
 0x275   :  { %3907 = vlog2.f32 %v1674_v14  ;;  %3444 = vst.msk [vmem:[%s8938_s2 + $0x6] sm:$0x1] %vm9653_vm2, %v3443_v37  ;;  %vm9662_vm2 = vmmov %vm9657_vm6 }
 0x276   :  { %v1689_v47 = vadd.f32 %v1688_v21, %v1687_v26  ;;  %3445 = vst.msk [vmem:[#allocation3] sm:$0x1] %vm9655_vm0, %v3443_v37  ;;  %v4156_v21 = vld [vmem:[%s8937_s0 + $0x2b0] sm:$0xff]  ;;  %vm9663_vm8 = vmmov %vm9662_vm2 }
 0x277   :  { %vm9664_vm11 = vmmov %vm9662_vm2 }
 0x278   :  { %v1691_v4 = vadd.f32 %v1690_v29, %v1689_v47  ;;  %v4157_v47 = vld [vmem:[%s8937_s0 + $0x2b8] sm:$0x3] }
 0x27a   :  { %v1693_v1 = vadd.f32 %v1692_v31, %v1691_v4  ;;  %v4158_v4 = vld [vmem:[%s8937_s0 + $0x2c0] sm:$0xff] }
 0x27b   :  { %v3908_v40 = vpop.eup %3907 }
 0x27c   :  { %v1695_v45 = vmul.f32 0.6931472, %v3908_v40  ;;  %3909 = vlog2.f32 %v1693_v1 }
 0x27d   :  { %v3729_v55 = vld [vmem:[#allocation3] ss:$0 sm:$0xff] }
 0x27e   :  { %v1698_v33 = vadd.f32 %v1695_v45, %v7822_v25  ;;  %vm3451_vm14 = vcmp.eq.s32.totalorder %v9605_v41, %v3729_v55  ;;  %vm3452_vm5 = vcmp.eq.s32.totalorder %v9608_v61, %v3729_v55  ;;  %v4159_v45 = vld [vmem:[%s8937_s0 + $0x2c8] sm:$0x3]  ;;  %v4160_v55 = vld [vmem:[%s8937_s0 + $0x2d0] sm:$0xff] }
 0x27f   :  { %v3453_v10 = vsel %vm3451_vm14, %v3448_v62, 0  ;;  %v3454_v9 = vsel %vm3452_vm5, %v3449_v57, 0  ;;  %v4161_v62 = vld [vmem:[%s8937_s0 + $0x2e0] sm:$0xff]  ;;  %vm9666_vm14 = vmmov %vm9662_vm2 }
 0x280   :  { %v1713_v30 = vsel %vm5349_vm10, %v1698_v33, %v7630_v36  ;;  %v3455_v25 = vsel %vm9658_vm12, %v3453_v10, 0  ;;  %v3456_v56 = vsel %vm9650_vm7, %v3454_v9, 0  ;;  %vm9667_vm5 = vmmov %vm9662_vm2 }
 0x281   :  { %1715 = vst.msk [vmem:[%s8934_s4] sm:$0xff] %vm9657_vm6, %v1713_v30  ;;  %v3457_v36 = vadd.s32 %v3456_v56, %v3455_v25  ;;  %v4162_v56 = vld [vmem:[%s8937_s0 + $0x2d8] sm:$0x3]  ;;  %vm9665_vm6 = vmmov %vm9662_vm2 }
 0x282   :  { %v3910_v35 = vpop.eup %3909  ;;  %vm9668_vm12 = vmmov %vm9650_vm7 }
 0x283   :  { %v1697_v6 = vmul.f32 0.6931472, %v3910_v35  ;;  %v3458_v63 = vrot.slane %v3457_v36, 4 }
 0x285   :  { %v1699_v28 = vadd.f32 %v1697_v6, %v7830_v58  ;;  %v3459_v19 = vadd.s32 %v3458_v63, %v3457_v36  ;;  %v4163_v36 = vld [vmem:[%s8937_s0 + $0x2e8] sm:$0x3] }
 0x287   :  { %v1714_v49 = vsel %vm5349_vm10, %v1699_v28, %v7658_v51  ;;  %v3460_v51 = vrot.slane %v3459_v19, 2  ;;  %vm9660_vm10 = vmmov %vm9655_vm0 }
 0x288   :  { %v7923_v60 = vld [vmem:[%s8934_s4] sm:$0xff]  ;;  %1716 = vst.msk [vmem:[%s8934_s4 + $0x8] sm:$0x3] %vm9659_vm15, %v1714_v49  ;;  %v4164_v49 = vld [vmem:[%s8937_s0 + $0x2f0] sm:$0xff]  ;;  %vm9669_vm15 = vmmov %vm9650_vm7 }
 0x289   :  { %v1931_v20 = vrot.slane %v7923_v60, 1  ;;  %v1932_v58 = vrot.slane %v7923_v60, 2  ;;  %v1933_v59 = vrot.slane %v7923_v60, 3  ;;  %v1934_v11 = vrot.slane %v7923_v60, 4 }
 0x28a   :  { %v1935_v13 = vrot.slane %v7923_v60, 5  ;;  %v1936_v23 = vrot.slane %v7923_v60, 6  ;;  %v1937_v24 = vrot.slane %v7923_v60, 7  ;;  %v1939_v42 = vperm.slane %v7923_v60, 0 }
 0x28b   :  { %v1940_v54 = vperm.slane %v1931_v20, 0  ;;  %v1941_v15 = vperm.slane %v1932_v58, 0  ;;  %v3461_v32 = vadd.s32 %v3460_v51, %v3459_v19  ;;  %v1942_v2 = vperm.slane %v1933_v59, 0  ;;  %v4165_v20 = vld [vmem:[%s8937_s0 + $0x300] sm:$0xff]  ;;  %v4166_v51 = vld [vmem:[%s8937_s0 + $0x2f8] sm:$0x3] }
 0x28c   :  { %v1943_v53 = vperm.slane %v1934_v11, 0  ;;  %v1944_v17 = vperm.slane %v1935_v13, 0  ;;  %v1945_v46 = vperm.slane %v1936_v23, 0  ;;  %v7940_v39 = vadd.f32 %v4150_v52, %v1939_v42  ;;  %v4167_v23 = vld [vmem:[%s8937_s0 + $0x308] sm:$0x3] }
 0x28d   :  { %v3462_v43 = vrot.slane %v3461_v32, 1  ;;  %v7945_v0 = vadd.f32 %v4151_v50, %v1940_v54  ;;  %v7950_v48 = vadd.f32 %v4152_v34, %v1941_v15  ;;  %v1946_v5 = vperm.slane %v1937_v24, 0 }
 0x28e   :  { %v7955_v14 = vadd.f32 %v4153_v3, %v1939_v42  ;;  %v7960_v27 = vadd.f32 %v4154_v16, %v1940_v54  ;;  %v7965_v38 = vadd.f32 %v4155_v12, %v1941_v15  ;;  %v7975_v18 = vadd.f32 %v4156_v21, %v1942_v2  ;;  %v4168_v15 = vld [vmem:[%s8937_s0 + $0x310] sm:$0xff] }
 0x28f   :  { %v7970_v26 = vld [vmem:[%s8934_s4 + $0x8] sm:$0x3]  ;;  %v3463_v37 = vadd.s32 %v3462_v43, %v3461_v32  ;;  %v7980_v29 = vadd.f32 %v4157_v47, %v1942_v2  ;;  %v7985_v31 = vadd.f32 %v4158_v4, %v1943_v53  ;;  %v7992_v33 = vadd.f32 %v4159_v45, %v1943_v53 }
 0x290   :  { %v1938_v40 = vrot.slane %v7970_v26, 1  ;;  %v1947_v1 = vperm.slane %v7970_v26, 0  ;;  %v7997_v30 = vadd.f32 %v4160_v55, %v1944_v17  ;;  %v8006_v57 = vadd.f32 %v4161_v62, %v1945_v46 }
 0x291   :  { %3464 = vst.msk [vmem:[%s8938_s2 + $0x5] sm:$0x1] %vm9660_vm10, %v3463_v37  ;;  %v1979_v10 = vsel %vm9661_vm9, %v7940_v39, -inf  ;;  %v1980_v9 = vsel %vm9662_vm2, %v7945_v0, -inf  ;;  %v1981_v35 = vsel %vm9663_vm8, %v7950_v48, -inf  ;;  %v8018_v6 = vadd.f32 %v4162_v56, %v1944_v17  ;;  %vm9670_vm10 = vmmov %vm9662_vm2 }
 0x292   :  { %3465 = vst.msk [vmem:[#allocation3] sm:$0x1] %vm9655_vm0, %v3463_v37  ;;  %v1948_v25 = vperm.slane %v1938_v40, 0  ;;  %v8023_v28 = vadd.f32 %v4163_v36, %v1945_v46  ;;  %v1982_v63 = vmax.f32 %v1979_v10, %v1981_v35  ;;  %v8028_v19 = vadd.f32 %v4164_v49, %v1946_v5  ;;  %vm9671_vm9 = vmmov %vm9662_vm2  ;;  %v4169_v40 = vld [vmem:[%s8937_s0 + $0x318] sm:$0x3]  ;;  %v3468_v36 = vld [vmem:[#allocation2 + $0x40] sm:$0xff] }
 0x293   :  { %v8033_v58 = vadd.f32 %v4165_v20, %v1947_v1  ;;  %v1983_v59 = vsel %vm9664_vm11, %v7975_v18, -inf  ;;  %v1985_v11 = vsel %vm9665_vm6, %v7985_v31, -inf  ;;  %v8042_v13 = vadd.f32 %v4166_v51, %v1946_v5  ;;  %vm9672_vm2 = vmmov %vm9650_vm7 }
 0x294   :  { %v8047_v24 = vadd.f32 %v4167_v23, %v1947_v1  ;;  %v1984_v42 = vmax.f32 %v1980_v9, %v1983_v59  ;;  %v1986_v54 = vmax.f32 %v1982_v63, %v1985_v11  ;;  %v8052_v32 = vadd.f32 %v4168_v15, %v1948_v25  ;;  %vm9673_vm8 = vmmov %vm9672_vm2  ;;  %v3469_v63 = vld [vmem:[#allocation2 + $0x48] sm:$0x3] }
 0x295   :  { %v1987_v2 = vsel %vm9666_vm14, %v7997_v30, -inf  ;;  %v1989_v53 = vsel %vm9667_vm5, %v8006_v57, -inf  ;;  %v1999_v17 = vsel %vm9668_vm12, %v7960_v27, -inf  ;;  %v1998_v52 = vsel %vm9650_vm7, %v7955_v14, -inf  ;;  %vm9674_vm0 = vmmov %vm9667_vm5 }
 0x296   :  { %v1988_v46 = vmax.f32 %v1984_v42, %v1987_v2  ;;  %v1990_v43 = vmax.f32 %v1986_v54, %v1989_v53  ;;  %v2000_v50 = vsel %vm9669_vm15, %v7965_v38, -inf  ;;  %v1991_v34 = vsel %vm9670_vm10, %v8028_v19, -inf  ;;  %vm9675_vm11 = vmmov %vm9672_vm2 }
 0x297   :  { %v1993_v5 = vsel %vm9671_vm9, %v8033_v58, -inf  ;;  %v2001_v3 = vmax.f32 %v1998_v52, %v2000_v50  ;;  %v2002_v16 = vsel %vm9672_vm2, %v7980_v29, -inf  ;;  %v2004_v47 = vsel %vm9673_vm8, %v7992_v33, -inf  ;;  %vm9676_vm6 = vmmov %vm9672_vm2 }
 0x298   :  { %v1992_v12 = vmax.f32 %v1988_v46, %v1991_v34  ;;  %v1994_v37 = vmax.f32 %v1990_v43, %v1993_v5  ;;  %v2003_v21 = vmax.f32 %v1999_v17, %v2002_v16  ;;  %v8075_v1 = vadd.f32 %v4169_v40, %v1948_v25  ;;  %vm9677_vm14 = vmmov %vm9672_vm2 }
 0x299   :  { %v3730_v4 = vld [vmem:[#allocation3] ss:$0 sm:$0xff]  ;;  %v1995_v45 = vsel %vm9674_vm0, %v8052_v32, -inf  ;;  %v2005_v55 = vmax.f32 %v2001_v3, %v2004_v47  ;;  %v2006_v62 = vsel %vm9675_vm11, %v8018_v6, -inf  ;;  %v2008_v35 = vsel %vm9676_vm6, %v8023_v28, -inf  ;;  %vm9678_vm7 = vmmov %vm9672_vm2 }
 0x29a   :  { %v1996_v10 = vmax.f32 %v1992_v12, %v1995_v45  ;;  %v2007_v9 = vmax.f32 %v2003_v21, %v2006_v62  ;;  %v2010_v56 = vsel %vm9677_vm14, %v8042_v13, -inf  ;;  %vm3471_vm5 = vcmp.eq.s32.totalorder %v9605_v41, %v3730_v4  ;;  %vm9679_vm15 = vmmov %vm9674_vm0 }
 0x29b   :  { %vm3472_vm12 = vcmp.eq.s32.totalorder %v9608_v61, %v3730_v4  ;;  %v2009_v25 = vmax.f32 %v2005_v55, %v2008_v35  ;;  %v2012_v49 = vsel %vm9678_vm7, %v8047_v24, -inf  ;;  %v3473_v20 = vsel %vm3471_vm5, %v3468_v36, 0  ;;  %vm9680_vm10 = vmmov %vm9672_vm2 }
 0x29c   :  { %v3474_v59 = vsel %vm3472_vm12, %v3469_v63, 0  ;;  %v8089_v11 = vmax.f32 %v1994_v37, %v1996_v10  ;;  %v2011_v51 = vmax.f32 %v2007_v9, %v2010_v56  ;;  %v3475_v23 = vsel %vm9679_vm15, %v3473_v20, 0  ;;  %vm9681_vm9 = vmmov %vm9672_vm2 }
 0x29d   :  { %v3476_v42 = vsel %vm9680_vm10, %v3474_v59, 0  ;;  %v2013_v54 = vmax.f32 %v2009_v25, %v2012_v49  ;;  %v2014_v15 = vsel %vm9681_vm9, %v8075_v1, -inf  ;;  %vm9682_vm2 = vcmask 8192   ;;  %vm9683_vm8 = vmmov %vm9674_vm0 }
 0x29e   :  { %v3477_v2 = vadd.s32 %v3476_v42, %v3475_v23  ;;  %v2015_v53 = vmax.f32 %v2011_v51, %v2014_v15  ;;  %v2017_v17 = vsub.f32 %v7940_v39, %v8089_v11  ;;  %v2019_v46 = vsub.f32 %v7945_v0, %v8089_v11  ;;  %vm9684_vm0 = vmmov %vm9682_vm2 }
 0x29f   :  { %v2021_v50 = vsub.f32 %v7950_v48, %v8089_v11  ;;  %v2023_v0 = vsub.f32 %v7975_v18, %v8089_v11  ;;  %v2025_v48 = vsub.f32 %v7985_v31, %v8089_v11  ;;  %v2027_v18 = vsub.f32 %v7997_v30, %v8089_v11  ;;  %vm9685_vm11 = vmmov %vm9683_vm8 }
 0x2a0   :  { %v3478_v43 = vrot.slane %v3477_v2, 4  ;;  %v8099_v52 = vmax.f32 %v2013_v54, %v2015_v53  ;;  %v2037_v34 = vmul.f32 1.442695, %v2017_v17  ;;  %v2041_v5 = vmul.f32 1.442695, %v2019_v46  ;;  %vm9686_vm14 = vmmov %vm9676_vm6 }
 0x2a1   :  { %v2049_v45 = vmul.f32 1.442695, %v2023_v0  ;;  %v2029_v62 = vsub.f32 %v8006_v57, %v8089_v11  ;;  %v2031_v10 = vsub.f32 %v8028_v19, %v8089_v11  ;;  %v2035_v36 = vsub.f32 %v8052_v32, %v8089_v11  ;;  %vm9687_vm5 = vmmov %vm9683_vm8 }
 0x2a2   :  { %v3479_v3 = vadd.s32 %v3478_v43, %v3477_v2  ;;  %v2018_v16 = vsub.f32 %v7955_v14, %v8099_v52  ;;  %v2020_v12 = vsub.f32 %v7960_v27, %v8099_v52  ;;  %v2022_v39 = vsub.f32 %v7965_v38, %v8099_v52  ;;  %vm9688_vm12 = vmmov %vm9676_vm6 }
 0x2a3   :  { %v2024_v21 = vsub.f32 %v7980_v29, %v8099_v52  ;;  %3911 = vpow2.f32 %v2037_v34  ;;  %v2045_v14 = vmul.f32 1.442695, %v2021_v50  ;;  %v2026_v27 = vsub.f32 %v7992_v33, %v8099_v52  ;;  %vm9689_vm7 = vmmov %vm9687_vm5 }
 0x2a4   :  { %v3480_v37 = vrot.slane %v3479_v3, 2  ;;  %v2039_v47 = vmul.f32 1.442695, %v2018_v16  ;;  %v2043_v4 = vmul.f32 1.442695, %v2020_v12  ;;  %3913 = vpow2.f32 %v2041_v5  ;;  %vm9690_vm15 = vmmov %vm9676_vm6 }
 0x2a5   :  { %v2047_v38 = vmul.f32 1.442695, %v2022_v39  ;;  %v2028_v29 = vsub.f32 %v8018_v6, %v8099_v52  ;;  %v2051_v31 = vmul.f32 1.442695, %v2024_v21  ;;  %v2053_v33 = vmul.f32 1.442695, %v2025_v48  ;;  %vm9691_vm10 = vmmov %vm9687_vm5 }
 0x2a6   :  { %v3481_v40 = vadd.s32 %v3480_v37, %v3479_v3  ;;  %3915 = vpow2.f32 %v2039_v47  ;;  %v2030_v30 = vsub.f32 %v8023_v28, %v8099_v52  ;;  %v2055_v35 = vmul.f32 1.442695, %v2026_v27  ;;  %vm9692_vm9 = vmmov %vm9676_vm6 }
 0x2a7   :  { %3917 = vpow2.f32 %v2043_v4  ;;  %v2033_v6 = vsub.f32 %v8033_v58, %v8089_v11  ;;  %v2057_v57 = vmul.f32 1.442695, %v2027_v18  ;;  %v2032_v28 = vsub.f32 %v8042_v13, %v8099_v52 }
 0x2a8   :  { %v3482_v55 = vrot.slane %v3481_v40, 1  ;;  %3919 = vpow2.f32 %v2045_v14  ;;  %v2059_v19 = vmul.f32 1.442695, %v2028_v29  ;;  %v2034_v58 = vsub.f32 %v8047_v24, %v8099_v52 }
 0x2a9   :  { %3921 = vpow2.f32 %v2047_v38  ;;  %v3912_v56 = vpop.eup %3911  ;;  %v2061_v32 = vmul.f32 1.442695, %v2029_v62  ;;  %v2063_v51 = vmul.f32 1.442695, %v2030_v30  ;;  %v2036_v54 = vsub.f32 %v8075_v1, %v8099_v52 }
 0x2aa   :  { %v3483_v9 = vadd.s32 %v3482_v55, %v3481_v40  ;;  %3923 = vpow2.f32 %v2049_v45  ;;  %v3914_v63 = vpop.eup %3913  ;;  %v2077_v25 = vsel %vm9683_vm8, %v3912_v56, 0.0  ;;  %v2065_v15 = vmul.f32 1.442695, %v2031_v10  ;;  %vm9694_vm8 = vmmov %vm9676_vm6  ;;  %v3489_v56 = vld [vmem:[#allocation2 + $0x38] sm:$0x3] }
 0x2ab   :  { %3925 = vpow2.f32 %v2051_v31  ;;  %v2078_v20 = vsel %vm9685_vm11, %v3914_v63, 0.0  ;;  %v2067_v24 = vmul.f32 1.442695, %v2032_v28  ;;  %v2069_v50 = vmul.f32 1.442695, %v2033_v6 }
 0x2ac   :  { %3484 = vst.msk [vmem:[%s8938_s2 + $0x4] sm:$0x1] %vm9682_vm2, %v3483_v9  ;;  %v3916_v49 = vpop.eup %3915  ;;  %3927 = vpow2.f32 %v2053_v33  ;;  %v2079_v23 = vadd.f32 %v2078_v20, %v2077_v25  ;;  %v2071_v16 = vmul.f32 1.442695, %v2034_v58  ;;  %v2073_v0 = vmul.f32 1.442695, %v2035_v36  ;;  %vm9693_vm2 = vmmov %vm9687_vm5 }
 0x2ad   :  { %3485 = vst.msk [vmem:[#allocation3] sm:$0x1] %vm9684_vm0, %v3483_v9  ;;  %v3918_v59 = vpop.eup %3917  ;;  %3929 = vpow2.f32 %v2055_v35  ;;  %v2096_v13 = vsel %vm9676_vm6, %v3916_v49, 0.0  ;;  %v2075_v47 = vmul.f32 1.442695, %v2036_v54  ;;  %vm9695_vm11 = vmmov %vm9693_vm2  ;;  %v3488_v35 = vld [vmem:[#allocation2 + $0x30] sm:$0xff] }
 0x2ae   :  { %v3920_v42 = vpop.eup %3919  ;;  %3931 = vpow2.f32 %v2057_v57  ;;  %v2097_v2 = vsel %vm9686_vm14, %v3918_v59, 0.0  ;;  %vm9696_vm14 = vmmov %vm9694_vm8 }
 0x2af   :  { %v3922_v53 = vpop.eup %3921  ;;  %3933 = vpow2.f32 %v2059_v19  ;;  %v2080_v17 = vsel %vm9687_vm5, %v3920_v42, 0.0  ;;  %v2098_v46 = vadd.f32 %v2097_v2, %v2096_v13  ;;  %vm9697_vm5 = vmmov %vm9693_vm2 }
 0x2b0   :  { %v3924_v43 = vpop.eup %3923  ;;  %3935 = vpow2.f32 %v2061_v32  ;;  %v2081_v34 = vadd.f32 %v2080_v17, %v2079_v23  ;;  %v2099_v5 = vsel %vm9688_vm12, %v3922_v53, 0.0  ;;  %vm9698_vm12 = vmmov %vm9693_vm2 }
 0x2b1   :  { %v3926_v3 = vpop.eup %3925  ;;  %3937 = vpow2.f32 %v2063_v51  ;;  %v2082_v1 = vsel %vm9689_vm7, %v3924_v43, 0.0  ;;  %v2100_v12 = vadd.f32 %v2099_v5, %v2098_v46  ;;  %vm9699_vm7 = vmmov %vm9694_vm8 }
 0x2b2   :  { %v3928_v39 = vpop.eup %3927  ;;  %3939 = vpow2.f32 %v2065_v15  ;;  %v2083_v37 = vadd.f32 %v2082_v1, %v2081_v34  ;;  %v2101_v21 = vsel %vm9690_vm15, %v3926_v3, 0.0  ;;  %vm9700_vm15 = vmmov %vm9699_vm7 }
 0x2b3   :  { %v3930_v48 = vpop.eup %3929  ;;  %3941 = vpow2.f32 %v2067_v24  ;;  %v2084_v4 = vsel %vm9691_vm10, %v3928_v39, 0.0  ;;  %v2102_v14 = vadd.f32 %v2101_v21, %v2100_v12  ;;  %vm9701_vm10 = vmmov %vm9693_vm2 }
 0x2b4   :  { %v3932_v40 = vpop.eup %3931  ;;  %3943 = vpow2.f32 %v2069_v50  ;;  %v2085_v27 = vadd.f32 %v2084_v4, %v2083_v37  ;;  %v2103_v38 = vsel %vm9692_vm9, %v3930_v48, 0.0  ;;  %v3731_v18 = vld [vmem:[#allocation3] ss:$0 sm:$0xff]  ;;  %vm9702_vm9 = vmmov %vm9699_vm7 }
 0x2b5   :  { %v3934_v45 = vpop.eup %3933  ;;  %3945 = vpow2.f32 %v2071_v16  ;;  %v2086_v55 = vsel %vm9693_vm2, %v3932_v40, 0.0  ;;  %v2104_v29 = vadd.f32 %v2103_v38, %v2102_v14  ;;  %vm3491_vm0 = vcmp.eq.s32.totalorder %v9605_v41, %v3731_v18 }
 0x2b6   :  { %v3936_v31 = vpop.eup %3935  ;;  %3947 = vpow2.f32 %v2073_v0  ;;  %v2087_v62 = vadd.f32 %v2086_v55, %v2085_v27  ;;  %v2105_v10 = vsel %vm9694_vm8, %v3934_v45, 0.0  ;;  %vm3492_vm6 = vcmp.eq.s32.totalorder %v9608_v61, %v3731_v18  ;;  %vm9703_vm8 = vmmov %vm9699_vm7  ;;  %v3509_v27 = vld [vmem:[#allocation2 + $0x28] sm:$0x3] }
 0x2b7   :  { %v3938_v33 = vpop.eup %3937  ;;  %3949 = vpow2.f32 %v2075_v47  ;;  %v2088_v9 = vsel %vm9695_vm11, %v3936_v31, 0.0  ;;  %v2106_v30 = vadd.f32 %v2105_v10, %v2104_v29  ;;  %v3493_v63 = vsel %vm3491_vm0, %v3488_v35, 0 }
 0x2b8   :  { %v3940_v6 = vpop.eup %3939  ;;  %v2089_v36 = vadd.f32 %v2088_v9, %v2087_v62  ;;  %v2107_v57 = vsel %vm9696_vm14, %v3938_v33, 0.0  ;;  %v3494_v28 = vsel %vm3492_vm6, %v3489_v56, 0  ;;  %v3495_v58 = vsel %vm9698_vm12, %v3493_v63, 0  ;;  %vm9706_vm6 = vmmov %vm9693_vm2 }
 0x2b9   :  { %v3942_v19 = vpop.eup %3941  ;;  %v2090_v25 = vsel %vm9697_vm5, %v3940_v6, 0.0  ;;  %v2108_v49 = vadd.f32 %v2107_v57, %v2106_v30  ;;  %v3496_v32 = vsel %vm9699_vm7, %v3494_v28, 0  ;;  %vm9704_vm0 = vcmask 8192   ;;  %vm9707_vm14 = vmmov %vm9699_vm7 }
 0x2ba   :  { %v3944_v20 = vpop.eup %3943  ;;  %v2091_v59 = vadd.f32 %v2090_v25, %v2089_v36  ;;  %v2109_v51 = vsel %vm9700_vm15, %v3942_v19, 0.0  ;;  %v3497_v23 = vadd.s32 %v3496_v32, %v3495_v58  ;;  %vm9705_vm11 = vmmov %vm9704_vm0 }
 0x2bb   :  { %v3946_v13 = vpop.eup %3945  ;;  %v2092_v42 = vsel %vm9701_vm10, %v3944_v20, 0.0  ;;  %v2110_v54 = vadd.f32 %v2109_v51, %v2108_v49  ;;  %vm9709_vm15 = vmmov %vm9693_vm2 }
 0x2bc   :  { %v3948_v15 = vpop.eup %3947  ;;  %v2093_v2 = vadd.f32 %v2092_v42, %v2091_v59  ;;  %v2111_v53 = vsel %vm9702_vm9, %v3946_v13, 0.0  ;;  %v3498_v24 = vrot.slane %v3497_v23, 4  ;;  %v4170_v59 = vld [vmem:[%s8937_s0 + $0x320] sm:$0xff]  ;;  %v4171_v13 = vld [vmem:[%s8937_s0 + $0x328] sm:$0x3]  ;;  %vm9710_vm10 = vmmov %vm9693_vm2 }
 0x2bd   :  { %v3950_v17 = vpop.eup %3949  ;;  %v2094_v46 = vsel %vm9693_vm2, %v3948_v15, 0.0  ;;  %v2112_v43 = vadd.f32 %v2111_v53, %v2110_v54  ;;  %v4172_v54 = vld [vmem:[%s8937_s0 + $0x330] sm:$0xff]  ;;  %vm9711_vm9 = vmmov %vm9693_vm2 }
 0x2be   :  { %v2095_v50 = vadd.f32 %v2094_v46, %v2093_v2  ;;  %v2113_v34 = vsel %vm9703_vm8, %v3950_v17, 0.0  ;;  %v3499_v5 = vadd.s32 %v3498_v24, %v3497_v23  ;;  %v4173_v2 = vld [vmem:[%s8937_s0 + $0x338] sm:$0x3]  ;;  %v4174_v24 = vld [vmem:[%s8937_s0 + $0x340] sm:$0xff]  ;;  %v4175_v46 = vld [vmem:[%s8937_s0 + $0x348] sm:$0x3] }
 0x2bf   :  { %v2114_v3 = vadd.f32 %v2113_v34, %v2112_v43  ;;  %vm9712_vm8 = vmmov %vm9693_vm2 }
 0x2c0   :  { %3951 = vlog2.f32 %v2095_v50  ;;  %v3500_v16 = vrot.slane %v3499_v5, 2  ;;  %v4176_v50 = vld [vmem:[%s8937_s0 + $0x350] sm:$0xff] }
 0x2c1   :  { %3953 = vlog2.f32 %v2114_v3 }
 0x2c2   :  { %v3501_v1 = vadd.s32 %v3500_v16, %v3499_v5  ;;  %v4177_v5 = vld [vmem:[%s8937_s0 + $0x358] sm:$0x3] }
 0x2c4   :  { %v3502_v12 = vrot.slane %v3501_v1, 1 }
 0x2c6   :  { %v3952_v39 = vpop.eup %3951  ;;  %v3503_v0 = vadd.s32 %v3502_v12, %v3501_v1  ;;  %v4178_v1 = vld [vmem:[%s8937_s0 + $0x360] sm:$0xff] }
 0x2c7   :  { %v3954_v37 = vpop.eup %3953  ;;  %v2116_v21 = vmul.f32 0.6931472, %v3952_v39  ;;  %v4179_v39 = vld [vmem:[%s8937_s0 + $0x368] sm:$0x3] }
 0x2c8   :  { %v2118_v48 = vmul.f32 0.6931472, %v3954_v37  ;;  %3504 = vst.msk [vmem:[%s8938_s2 + $0x3] sm:$0x1] %vm9704_vm0, %v3503_v0  ;;  %v4180_v37 = vld [vmem:[%s8937_s0 + $0x370] sm:$0xff]  ;;  %vm9713_vm0 = vmmov %vm9693_vm2 }
 0x2c9   :  { %v2119_v47 = vadd.f32 %v2116_v21, %v8089_v11  ;;  %3505 = vst.msk [vmem:[#allocation3] sm:$0x1] %vm9705_vm11, %v3503_v0  ;;  %vm9714_vm11 = vmmov %vm9699_vm7 }
 0x2ca   :  { %v2120_v4 = vadd.f32 %v2118_v48, %v8099_v52  ;;  %v3508_v52 = vld [vmem:[#allocation2 + $0x20] sm:$0xff]  ;;  %v4181_v48 = vld [vmem:[%s8937_s0 + $0x378] sm:$0x3] }
 0x2cb   :  { %v2134_v14 = vsel %vm5624_vm3, %v2119_v47, %v7923_v60 }
 0x2cc   :  { %2136 = vst.msk [vmem:[%s8934_s4] sm:$0xff] %vm9706_vm6, %v2134_v14  ;;  %v2135_v40 = vsel %vm5624_vm3, %v2120_v4, %v7970_v26  ;;  %vm9708_vm3 = vmmov %vm9693_vm2  ;;  %v4182_v4 = vld [vmem:[%s8937_s0 + $0x380] sm:$0xff]  ;;  %vm9715_vm6 = vcmask 8192  }
 0x2cd   :  { %2137 = vst.msk [vmem:[%s8934_s4 + $0x8] sm:$0x3] %vm9707_vm14, %v2135_v40  ;;  %v4183_v40 = vld [vmem:[%s8937_s0 + $0x388] sm:$0x3]  ;;  %vm9716_vm14 = vmmov %vm9699_vm7 }
 0x2d0   :  { %v3732_v11 = vld [vmem:[#allocation3] ss:$0 sm:$0xff] }
 0x2d1   :  { %vm3511_vm5 = vcmp.eq.s32.totalorder %v9605_v41, %v3732_v11  ;;  %vm3512_vm12 = vcmp.eq.s32.totalorder %v9608_v61, %v3732_v11 }
 0x2d2   :  { %v3513_v60 = vsel %vm3511_vm5, %v3508_v52, 0  ;;  %v3514_v38 = vsel %vm3512_vm12, %v3509_v27, 0  ;;  %v4184_v52 = vld [vmem:[%s8937_s0 + $0x390] sm:$0xff]  ;;  %vm9717_vm5 = vmmov %vm9699_vm7 }
 0x2d3   :  { %v8192_v18 = vld [vmem:[%s8934_s4] sm:$0xff]  ;;  %v3515_v26 = vsel %vm9708_vm3, %v3513_v60, 0  ;;  %v3516_v45 = vsel %vm9699_vm7, %v3514_v38, 0  ;;  %v4185_v38 = vld [vmem:[%s8937_s0 + $0x398] sm:$0x3]  ;;  %vm9718_vm12 = vmmov %vm9715_vm6 }
 0x2d4   :  { %v8197_v22 = vld [vmem:[%s8934_s4 + $0x8] sm:$0x3]  ;;  %v2352_v55 = vrot.slane %v8192_v18, 1  ;;  %v2353_v29 = vrot.slane %v8192_v18, 2  ;;  %v3517_v31 = vadd.s32 %v3516_v45, %v3515_v26  ;;  %v2354_v62 = vrot.slane %v8192_v18, 3  ;;  %v4186_v45 = vld [vmem:[%s8937_s0 + $0x3a0] sm:$0xff]  ;;  %vm9719_vm3 = vmmov %vm9713_vm0 }
 0x2d5   :  { %v2355_v10 = vrot.slane %v8192_v18, 4  ;;  %v2356_v33 = vrot.slane %v8192_v18, 5  ;;  %v2357_v9 = vrot.slane %v8192_v18, 6  ;;  %v2358_v30 = vrot.slane %v8192_v18, 7  ;;  %vm9720_vm7 = vmmov %vm9713_vm0 }
 0x2d6   :  { %v2359_v35 = vrot.slane %v8197_v22, 1  ;;  %v2360_v56 = vperm.slane %v8192_v18, 0  ;;  %v3518_v6 = vrot.slane %v3517_v31, 4  ;;  %v2361_v36 = vperm.slane %v2352_v55, 0 }
 0x2d7   :  { %v2362_v57 = vperm.slane %v2353_v29, 0  ;;  %v2363_v63 = vperm.slane %v2354_v62, 0  ;;  %v2364_v19 = vperm.slane %v2355_v10, 0  ;;  %v2365_v25 = vperm.slane %v2356_v33, 0 }
 0x2d8   :  { %v3519_v28 = vadd.s32 %v3518_v6, %v3517_v31  ;;  %v2366_v49 = vperm.slane %v2357_v9, 0  ;;  %v2367_v58 = vperm.slane %v2358_v30, 0  ;;  %v2368_v32 = vperm.slane %v8197_v22, 0  ;;  %v4187_v31 = vld [vmem:[%s8937_s0 + $0x3a8] sm:$0x3] }
 0x2d9   :  { %v2369_v20 = vperm.slane %v2359_v35, 0  ;;  %v8214_v51 = vadd.f32 %v4170_v59, %v2360_v56  ;;  %v8219_v42 = vadd.f32 %v4171_v13, %v2360_v56  ;;  %v8224_v15 = vadd.f32 %v4172_v54, %v2361_v36  ;;  %v4188_v35 = vld [vmem:[%s8937_s0 + $0x3b0] sm:$0xff] }
 0x2da   :  { %v3520_v23 = vrot.slane %v3519_v28, 2  ;;  %v8229_v53 = vadd.f32 %v4173_v2, %v2361_v36  ;;  %v8234_v17 = vadd.f32 %v4174_v24, %v2362_v57  ;;  %v8239_v43 = vadd.f32 %v4175_v46, %v2362_v57  ;;  %v4189_v57 = vld [vmem:[%s8937_s0 + $0x3b8] sm:$0x3] }
 0x2db   :  { %v8244_v34 = vadd.f32 %v4176_v50, %v2363_v63  ;;  %v8249_v3 = vadd.f32 %v4177_v5, %v2363_v63  ;;  %v8254_v12 = vadd.f32 %v4178_v1, %v2364_v19  ;;  %v8259_v0 = vadd.f32 %v4179_v39, %v2364_v19 }
 0x2dc   :  { %v3521_v16 = vadd.s32 %v3520_v23, %v3519_v28  ;;  %v8264_v21 = vadd.f32 %v4180_v37, %v2365_v25  ;;  %v8269_v47 = vadd.f32 %v4181_v48, %v2365_v25  ;;  %v8274_v14 = vadd.f32 %v4182_v4, %v2366_v49 }
 0x2dd   :  { %v8279_v11 = vadd.f32 %v4183_v40, %v2366_v49  ;;  %v8284_v27 = vadd.f32 %v4184_v52, %v2367_v58  ;;  %v8289_v26 = vadd.f32 %v4185_v38, %v2367_v58  ;;  %v8294_v55 = vadd.f32 %v4186_v45, %v2368_v32 }
 0x2de   :  { %v3522_v60 = vrot.slane %v3521_v16, 1  ;;  %v2401_v29 = vsel %vm9709_vm15, %v8224_v15, -inf  ;;  %v8301_v62 = vadd.f32 %v4187_v31, %v2368_v32  ;;  %v2400_v10 = vsel %vm9710_vm10, %v8214_v51, -inf  ;;  %vm9721_vm15 = vmmov %vm9717_vm5 }
 0x2df   :  { %v2402_v33 = vsel %vm9711_vm9, %v8234_v17, -inf  ;;  %v2404_v9 = vsel %vm9693_vm2, %v8244_v34, -inf  ;;  %v8312_v56 = vadd.f32 %v4188_v35, %v2369_v20  ;;  %v8317_v63 = vadd.f32 %v4189_v57, %v2369_v20  ;;  %vm9722_vm10 = vmmov %vm9717_vm5 }
 0x2e0   :  { %v3523_v30 = vadd.s32 %v3522_v60, %v3521_v16  ;;  %v2403_v6 = vmax.f32 %v2400_v10, %v2402_v33  ;;  %v2405_v36 = vmax.f32 %v2401_v29, %v2404_v9  ;;  %v2406_v28 = vsel %vm9712_vm8, %v8254_v12, -inf  ;;  %vm9723_vm9 = vmmov %vm9713_vm0 }
 0x2e1   :  { %v2408_v19 = vsel %vm9713_vm0, %v8264_v21, -inf  ;;  %v2419_v25 = vsel %vm9714_vm11, %v8219_v42, -inf  ;;  %v2420_v32 = vsel %vm9716_vm14, %v8229_v53, -inf  ;;  %v2421_v20 = vsel %vm9717_vm5, %v8239_v43, -inf  ;;  %vm9724_vm2 = vmmov %vm9713_vm0 }
 0x2e2   :  { %3524 = vst.msk [vmem:[%s8938_s2 + $0x2] sm:$0x1] %vm9715_vm6, %v3523_v30  ;;  %v2407_v49 = vmax.f32 %v2403_v6, %v2406_v28  ;;  %v2409_v58 = vmax.f32 %v2405_v36, %v2408_v19  ;;  %v2410_v59 = vsel %vm9719_vm3, %v8274_v14, -inf  ;;  %v2412_v23 = vsel %vm9720_vm7, %v8284_v27, -inf  ;;  %vm9725_vm8 = vmmov %vm9717_vm5 }
 0x2e3   :  { %3525 = vst.msk [vmem:[#allocation3] sm:$0x1] %vm9718_vm12, %v3523_v30  ;;  %v2422_v13 = vmax.f32 %v2419_v25, %v2421_v20  ;;  %v2423_v54 = vsel %vm9721_vm15, %v8249_v3, -inf  ;;  %v2425_v50 = vsel %vm9722_vm10, %v8259_v0, -inf  ;;  %v2414_v5 = vsel %vm9723_vm9, %v8294_v55, -inf  ;;  %vm9726_vm0 = vmmov %vm9717_vm5 }
 0x2e4   :  { %v2411_v2 = vmax.f32 %v2407_v49, %v2410_v59  ;;  %v2413_v24 = vmax.f32 %v2409_v58, %v2412_v23  ;;  %v2424_v46 = vmax.f32 %v2420_v32, %v2423_v54  ;;  %v2416_v16 = vsel %vm9724_vm2, %v8312_v56, -inf  ;;  %vm9727_vm11 = vmmov %vm9726_vm0 }
 0x2e5   :  { %v2426_v1 = vmax.f32 %v2422_v13, %v2425_v50  ;;  %v2427_v39 = vsel %vm9725_vm8, %v8269_v47, -inf  ;;  %v2429_v40 = vsel %vm9726_vm0, %v8279_v11, -inf  ;;  %v2431_v60 = vsel %vm9727_vm11, %v8289_v26, -inf  ;;  %vm9728_vm6 = vmmov %vm9726_vm0 }
 0x2e6   :  { %v2415_v37 = vmax.f32 %v2411_v2, %v2414_v5  ;;  %v2417_v48 = vmax.f32 %v2413_v24, %v2416_v16  ;;  %v2428_v4 = vmax.f32 %v2424_v46, %v2427_v39  ;;  %v2433_v29 = vsel %vm9728_vm6, %v8301_v62, -inf  ;;  %vm9729_vm14 = vmmov %vm9726_vm0 }
 0x2e7   :  { %v2430_v52 = vmax.f32 %v2426_v1, %v2429_v40  ;;  %v2435_v10 = vsel %vm9729_vm14, %v8317_v63, -inf  ;;  %vm9730_vm5 = vmmov %vm9724_vm2 }
 0x2e8   :  { %v8352_v38 = vmax.f32 %v2415_v37, %v2417_v48  ;;  %v2432_v45 = vmax.f32 %v2428_v4, %v2431_v60  ;;  %vm9731_vm12 = vmmov %vm9724_vm2  ;;  %v3528_v48 = vld [vmem:[#allocation2 + $0x10] sm:$0xff] }
 0x2e9   :  { %v2434_v31 = vmax.f32 %v2430_v52, %v2433_v29  ;;  %vm9732_vm15 = vmmov %vm9726_vm0  ;;  %v3529_v52 = vld [vmem:[#allocation2 + $0x18] sm:$0x3] }
 0x2ea   :  { %v2436_v33 = vmax.f32 %v2432_v45, %v2435_v10  ;;  %v2438_v9 = vsub.f32 %v8214_v51, %v8352_v38  ;;  %v2440_v30 = vsub.f32 %v8224_v15, %v8352_v38  ;;  %v2442_v35 = vsub.f32 %v8234_v17, %v8352_v38  ;;  %v3733_v50 = vld [vmem:[#allocation3] ss:$0 sm:$0xff]  ;;  %vm9733_vm10 = vmmov %vm9726_vm0 }
 0x2eb   :  { %v2444_v36 = vsub.f32 %v8244_v34, %v8352_v38  ;;  %v2446_v57 = vsub.f32 %v8254_v12, %v8352_v38  ;;  %v2448_v17 = vsub.f32 %v8264_v21, %v8352_v38  ;;  %v2450_v12 = vsub.f32 %v8274_v14, %v8352_v38  ;;  %vm9734_vm9 = vmmov %vm9724_vm2 }
 0x2ec   :  { %v8364_v6 = vmax.f32 %v2434_v31, %v2436_v33  ;;  %v2458_v28 = vmul.f32 1.442695, %v2438_v9  ;;  %v2462_v19 = vmul.f32 1.442695, %v2440_v30  ;;  %v2452_v49 = vsub.f32 %v8284_v27, %v8352_v38  ;;  %vm9735_vm8 = vmmov %vm9726_vm0 }
 0x2ed   :  { %v2466_v58 = vmul.f32 1.442695, %v2442_v35  ;;  %v2454_v27 = vsub.f32 %v8294_v55, %v8352_v38  ;;  %v2470_v20 = vmul.f32 1.442695, %v2444_v36  ;;  %v2478_v13 = vmul.f32 1.442695, %v2448_v17  ;;  %vm9736_vm11 = vmmov %vm9724_vm2 }
 0x2ee   :  { %v2439_v25 = vsub.f32 %v8219_v42, %v8364_v6  ;;  %v2441_v51 = vsub.f32 %v8229_v53, %v8364_v6  ;;  %v2443_v15 = vsub.f32 %v8239_v43, %v8364_v6  ;;  %v2445_v34 = vsub.f32 %v8249_v3, %v8364_v6  ;;  %vm9737_vm6 = vmmov %vm9726_vm0 }
 0x2ef   :  { %v2447_v42 = vsub.f32 %v8259_v0, %v8364_v6  ;;  %v2449_v53 = vsub.f32 %v8269_v47, %v8364_v6  ;;  %3955 = vpow2.f32 %v2458_v28  ;;  %v2451_v21 = vsub.f32 %v8279_v11, %v8364_v6  ;;  %vm9738_vm14 = vmmov %vm9724_vm2 }
 0x2f0   :  { %v2460_v43 = vmul.f32 1.442695, %v2439_v25  ;;  %3957 = vpow2.f32 %v2462_v19  ;;  %v2464_v3 = vmul.f32 1.442695, %v2441_v51  ;;  %v2468_v32 = vmul.f32 1.442695, %v2443_v15 }
 0x2f1   :  { %v2453_v14 = vsub.f32 %v8289_v26, %v8364_v6  ;;  %v2455_v0 = vsub.f32 %v8301_v62, %v8364_v6  ;;  %v2456_v47 = vsub.f32 %v8312_v56, %v8352_v38  ;;  %v2472_v59 = vmul.f32 1.442695, %v2445_v34 }
 0x2f2   :  { %3959 = vpow2.f32 %v2460_v43  ;;  %v2474_v11 = vmul.f32 1.442695, %v2446_v57  ;;  %v2476_v23 = vmul.f32 1.442695, %v2447_v42  ;;  %v2480_v54 = vmul.f32 1.442695, %v2449_v53 }
 0x2f3   :  { %3961 = vpow2.f32 %v2464_v3  ;;  %v2482_v26 = vmul.f32 1.442695, %v2450_v12  ;;  %v2484_v2 = vmul.f32 1.442695, %v2451_v21  ;;  %v2457_v55 = vsub.f32 %v8317_v63, %v8364_v6 }
 0x2f4   :  { %3963 = vpow2.f32 %v2466_v58  ;;  %v2486_v46 = vmul.f32 1.442695, %v2452_v49  ;;  %v2488_v62 = vmul.f32 1.442695, %v2453_v14  ;;  %v2490_v56 = vmul.f32 1.442695, %v2454_v27 }
 0x2f5   :  { %3965 = vpow2.f32 %v2468_v32  ;;  %v3956_v24 = vpop.eup %3955  ;;  %v2492_v16 = vmul.f32 1.442695, %v2455_v0  ;;  %vm3531_vm3 = vcmp.eq.s32.totalorder %v9605_v41, %v3733_v50  ;;  %vm3532_vm7 = vcmp.eq.s32.totalorder %v9608_v61, %v3733_v50 }
 0x2f6   :  { %3967 = vpow2.f32 %v2470_v20  ;;  %v3958_v5 = vpop.eup %3957  ;;  %v2498_v1 = vsel %vm9730_vm5, %v3956_v24, 0.0  ;;  %v3533_v60 = vsel %vm3531_vm3, %v3528_v48, 0  ;;  %v3534_v31 = vsel %vm3532_vm7, %v3529_v52, 0  ;;  %vm9739_vm5 = vmmov %vm9726_vm0 }
 0x2f7   :  { %3969 = vpow2.f32 %v2472_v59  ;;  %v2499_v37 = vsel %vm9731_vm12, %v3958_v5, 0.0  ;;  %v3535_v10 = vsel %vm9734_vm9, %v3533_v60, 0  ;;  %v3536_v35 = vsel %vm9735_vm8, %v3534_v31, 0  ;;  %vm9740_vm12 = vmmov %vm9724_vm2 }
 0x2f8   :  { %v3960_v39 = vpop.eup %3959  ;;  %3971 = vpow2.f32 %v2474_v11  ;;  %v2500_v4 = vadd.f32 %v2499_v37, %v2498_v1  ;;  %v3537_v19 = vadd.s32 %v3536_v35, %v3535_v10  ;;  %v2494_v51 = vmul.f32 1.442695, %v2456_v47  ;;  %vm9741_vm3 = vmmov %vm9726_vm0 }
 0x2f9   :  { %v3962_v63 = vpop.eup %3961  ;;  %3973 = vpow2.f32 %v2476_v23  ;;  %v2517_v40 = vsel %vm9732_vm15, %v3960_v39, 0.0  ;;  %v2496_v53 = vmul.f32 1.442695, %v2457_v55  ;;  %vm9742_vm7 = vmmov %vm9724_vm2 }
 0x2fa   :  { %v3964_v45 = vpop.eup %3963  ;;  %3975 = vpow2.f32 %v2478_v13  ;;  %v2518_v29 = vsel %vm9733_vm10, %v3962_v63, 0.0  ;;  %v3538_v58 = vrot.slane %v3537_v19, 4  ;;  %vm9743_vm15 = vmmov %vm9726_vm0 }
 0x2fb   :  { %v3966_v33 = vpop.eup %3965  ;;  %3977 = vpow2.f32 %v2480_v54  ;;  %v2501_v9 = vsel %vm9724_vm2, %v3964_v45, 0.0  ;;  %v2519_v30 = vadd.f32 %v2518_v29, %v2517_v40  ;;  %vm9744_vm10 = vmmov %vm9724_vm2 }
 0x2fc   :  { %v3968_v36 = vpop.eup %3967  ;;  %3979 = vpow2.f32 %v2482_v26  ;;  %v2502_v57 = vadd.f32 %v2501_v9, %v2500_v4  ;;  %v2520_v28 = vsel %vm9726_vm0, %v3966_v33, 0.0  ;;  %v3539_v27 = vadd.s32 %v3538_v58, %v3537_v19  ;;  %vm9745_vm9 = vmmov %vm9726_vm0 }
 0x2fd   :  { %v3970_v25 = vpop.eup %3969  ;;  %3981 = vpow2.f32 %v2484_v2  ;;  %v2503_v15 = vsel %vm9736_vm11, %v3968_v36, 0.0  ;;  %v2521_v17 = vadd.f32 %v2520_v28, %v2519_v30  ;;  %vm9746_vm8 = vmmov %vm9726_vm0 }
 0x2fe   :  { %v3972_v34 = vpop.eup %3971  ;;  %3983 = vpow2.f32 %v2486_v46  ;;  %v2504_v12 = vadd.f32 %v2503_v15, %v2502_v57  ;;  %v2522_v49 = vsel %vm9737_vm6, %v3970_v25, 0.0  ;;  %v3540_v13 = vrot.slane %v3539_v27, 2  ;;  %vm9747_vm0 = vmmov %vm9724_vm2  ;;  %v3547_v25 = vld [vmem:[#allocation2] sm:$0xff] }
 0x2ff   :  { %v3974_v42 = vpop.eup %3973  ;;  %3985 = vpow2.f32 %v2488_v62  ;;  %v2505_v43 = vsel %vm9738_vm14, %v3972_v34, 0.0  ;;  %v2523_v21 = vadd.f32 %v2522_v49, %v2521_v17  ;;  %vm9748_vm11 = vmmov %vm9741_vm3  ;;  %vm9749_vm6 = vcmask 8192  }
 0x300   :  { %v3976_v3 = vpop.eup %3975  ;;  %3987 = vpow2.f32 %v2490_v56  ;;  %v2506_v32 = vadd.f32 %v2505_v43, %v2504_v12  ;;  %v2524_v14 = vsel %vm9739_vm5, %v3974_v42, 0.0  ;;  %v3541_v62 = vadd.s32 %v3540_v13, %v3539_v27  ;;  %vm9750_vm14 = vmmov %vm9749_vm6 }
 0x301   :  { %v3978_v20 = vpop.eup %3977  ;;  %3989 = vpow2.f32 %v2492_v16  ;;  %v2507_v0 = vsel %vm9740_vm12, %v3976_v3, 0.0  ;;  %v2525_v47 = vadd.f32 %v2524_v14, %v2523_v21 }
 0x302   :  { %v3980_v59 = vpop.eup %3979  ;;  %3991 = vpow2.f32 %v2494_v51  ;;  %v2508_v11 = vadd.f32 %v2507_v0, %v2506_v32  ;;  %v2526_v23 = vsel %vm9741_vm3, %v3978_v20, 0.0  ;;  %v3542_v37 = vrot.slane %v3541_v62, 1  ;;  %v3548_v51 = vld [vmem:[#allocation2 + $0x8] sm:$0x3]  ;;  %vm9751_vm3 = vmmov %vm9747_vm0 }
 0x303   :  { %v3982_v54 = vpop.eup %3981  ;;  %3993 = vpow2.f32 %v2496_v53  ;;  %v2509_v26 = vsel %vm9742_vm7, %v3980_v59, 0.0  ;;  %v2527_v2 = vadd.f32 %v2526_v23, %v2525_v47  ;;  %vm9752_vm7 = vmmov %vm9746_vm8 }
 0x304   :  { %v3984_v24 = vpop.eup %3983  ;;  %v2510_v55 = vadd.f32 %v2509_v26, %v2508_v11  ;;  %v2528_v46 = vsel %vm9743_vm15, %v3982_v54, 0.0  ;;  %v3543_v45 = vadd.s32 %v3542_v37, %v3541_v62  ;;  %vm9753_vm15 = vmmov %vm9747_vm0  ;;  %v4193_v37 = vld [vmem:[%s8937_s0 + $0x3f0] sm:$0xff] }
 0x305   :  { %v3986_v50 = vpop.eup %3985  ;;  %v2511_v5 = vsel %vm9744_vm10, %v3984_v24, 0.0  ;;  %v2529_v56 = vadd.f32 %v2528_v46, %v2527_v2  ;;  %vm9754_vm10 = vmmov %vm9752_vm7 }
 0x306   :  { %v3988_v16 = vpop.eup %3987  ;;  %v2512_v1 = vadd.f32 %v2511_v5, %v2510_v55  ;;  %v2530_v39 = vsel %vm9745_vm9, %v3986_v50, 0.0  ;;  %3544 = vst.msk [vmem:[%s8938_s2 + $0x1] sm:$0x1] %vm9749_vm6, %v3543_v45  ;;  %v4190_v50 = vld [vmem:[%s8937_s0 + $0x3c0] sm:$0xff] }
 0x307   :  { %v3990_v48 = vpop.eup %3989  ;;  %v2513_v63 = vsel %vm9724_vm2, %v3988_v16, 0.0  ;;  %v2531_v4 = vadd.f32 %v2530_v39, %v2529_v56  ;;  %3545 = vst.msk [vmem:[#allocation3] sm:$0x1] %vm9750_vm14, %v3543_v45  ;;  %v4191_v56 = vld [vmem:[%s8937_s0 + $0x3d0] sm:$0xff]  ;;  %vm9757_vm2 = vmmov %vm9747_vm0 }
 0x308   :  { %v3992_v40 = vpop.eup %3991  ;;  %v2514_v52 = vadd.f32 %v2513_v63, %v2512_v1  ;;  %v2532_v60 = vsel %vm9746_vm8, %v3990_v48, 0.0  ;;  %v4192_v1 = vld [vmem:[%s8937_s0 + $0x3e0] sm:$0xff]  ;;  %v4194_v63 = vld [vmem:[%s8937_s0 + $0x3c8] sm:$0x3]  ;;  %vm9758_vm8 = vmmov %vm9747_vm0 }
 0x309   :  { %v3994_v29 = vpop.eup %3993  ;;  %v2515_v31 = vsel %vm9747_vm0, %v3992_v40, 0.0  ;;  %v2533_v10 = vadd.f32 %v2532_v60, %v2531_v4  ;;  %v4195_v40 = vld [vmem:[%s8937_s0 + $0x3d8] sm:$0x3]  ;;  %v4196_v60 = vld [vmem:[%s8937_s0 + $0x3e8] sm:$0x3]  ;;  %vm9761_vm14 = vmmov %vm9747_vm0 }
 0x30a   :  { %v2516_v33 = vadd.f32 %v2515_v31, %v2514_v52  ;;  %v2534_v9 = vsel %vm9748_vm11, %v3994_v29, 0.0  ;;  %v4197_v29 = vld [vmem:[%s8937_s0 + $0x3f8] sm:$0x3]  ;;  %vm9759_vm11 = vmmov %vm9747_vm0 }
 0x30b   :  { %v2535_v30 = vadd.f32 %v2534_v9, %v2533_v10  ;;  %v4198_v10 = vld [vmem:[%s8937_s0 + $0x400] sm:$0xff]  ;;  %v4199_v9 = vld [vmem:[%s8937_s0 + $0x408] sm:$0x3] }
 0x30c   :  { %3995 = vlog2.f32 %v2516_v33 }
 0x30d   :  { %3997 = vlog2.f32 %v2535_v30 }
 0x30e   :  { %v3734_v36 = vld [vmem:[#allocation3] ss:$0 sm:$0xff] }
 0x30f   :  { %vm3550_vm5 = vcmp.eq.s32.totalorder %v9605_v41, %v3734_v36  ;;  %vm3551_vm12 = vcmp.eq.s32.totalorder %v9608_v61, %v3734_v36 }
 0x310   :  { %v3552_v17 = vsel %vm3550_vm5, %v3547_v25, 0  ;;  %v3553_v34 = vsel %vm3551_vm12, %v3548_v51, 0  ;;  %v4203_v51 = vld [vmem:[%s8937_s0 + $0x428] sm:$0x3]  ;;  %vm9762_vm5 = vmmov %vm9747_vm0 }
 0x311   :  { %v3554_v49 = vsel %vm9751_vm3, %v3552_v17, 0  ;;  %v3555_v58 = vsel %vm9752_vm7, %v3553_v34, 0  ;;  %v4204_v17 = vld [vmem:[%s8937_s0 + $0x430] sm:$0xff]  ;;  %vm9763_vm12 = vmmov %vm9752_vm7 }
 0x312   :  { %v3996_v35 = vpop.eup %3995  ;;  %v3556_v53 = vadd.s32 %v3555_v58, %v3554_v49  ;;  %vm9764_vm3 = vmmov %vm9747_vm0 }
 0x313   :  { %v3998_v57 = vpop.eup %3997  ;;  %v2537_v28 = vmul.f32 0.6931472, %v3996_v35  ;;  %v4200_v35 = vld [vmem:[%s8937_s0 + $0x410] sm:$0xff] }
 0x314   :  { %v2539_v19 = vmul.f32 0.6931472, %v3998_v57  ;;  %v3557_v61 = vrot.slane %v3556_v53, 4  ;;  %v4201_v57 = vld [vmem:[%s8937_s0 + $0x418] sm:$0x3] }
 0x315   :  { %v2540_v15 = vadd.f32 %v2537_v28, %v8352_v38 }
 0x316   :  { %v2541_v12 = vadd.f32 %v2539_v19, %v8364_v6  ;;  %v3558_v38 = vadd.s32 %v3557_v61, %v3556_v53  ;;  %v4202_v19 = vld [vmem:[%s8937_s0 + $0x420] sm:$0xff] }
 0x317   :  { %v2555_v42 = vsel %vm6548_vm1, %v2540_v15, %v8192_v18  ;;  %v4206_v61 = vld [vmem:[%s8937_s0 + $0x440] sm:$0xff] }
 0x318   :  { %2557 = vst.msk [vmem:[%s8934_s4] sm:$0xff] %vm9753_vm15, %v2555_v42  ;;  %v2556_v41 = vsel %vm6548_vm1, %v2541_v12, %v8197_v22  ;;  %v3559_v6 = vrot.slane %v3558_v38, 2  ;;  %vm9755_vm1 = vmmov %vm9749_vm6  ;;  %v4205_v12 = vld [vmem:[%s8937_s0 + $0x438] sm:$0x3] }
 0x319   :  { %2558 = vst.msk [vmem:[%s8934_s4 + $0x8] sm:$0x3] %vm9754_vm10, %v2556_v41  ;;  %vm9756_vm9 = vmmov %vm9755_vm1 }
 0x31a   :  { %v3560_v43 = vadd.s32 %v3559_v6, %v3558_v38  ;;  %v4207_v6 = vld [vmem:[%s8937_s0 + $0x448] sm:$0x3]  ;;  %vm9760_vm6 = vmmov %vm9747_vm0 }
 0x31b   :  { %vm9765_vm15 = vmmov %vm9752_vm7 }
 0x31c   :  { %v3561_v14 = vrot.slane %v3560_v43, 1  ;;  %vm9766_vm10 = vmmov %vm9752_vm7 }
 0x31e   :  { %v3562_v13 = vadd.s32 %v3561_v14, %v3560_v43  ;;  %v4209_v14 = vld [vmem:[%s8937_s0 + $0x458] sm:$0x3] }
 0x31f   :  { %v8452_v18 = vld [vmem:[%s8934_s4] sm:$0xff] }
 0x320   :  { %v8457_v21 = vld [vmem:[%s8934_s4 + $0x8] sm:$0x3]  ;;  %v2773_v8 = vrot.slane %v8452_v18, 1  ;;  %v2774_v22 = vrot.slane %v8452_v18, 2  ;;  %v2775_v3 = vrot.slane %v8452_v18, 3  ;;  %v2776_v32 = vrot.slane %v8452_v18, 4 }
 0x321   :  { %v2777_v27 = vrot.slane %v8452_v18, 5  ;;  %v2778_v20 = vrot.slane %v8452_v18, 6  ;;  %v2779_v0 = vrot.slane %v8452_v18, 7  ;;  %v2780_v47 = vrot.slane %v8457_v21, 1  ;;  %3563 = vst.msk [vmem:[%s8938_s2] sm:$0x1] %vm9755_vm1, %v3562_v13  ;;  %vm9767_vm1 = vmmov %vm9747_vm0 }
 0x322   :  { %v2781_v59 = vperm.slane %v8452_v18, 0  ;;  %v2782_v11 = vperm.slane %v2773_v8, 0  ;;  %v2783_v23 = vperm.slane %v2774_v22, 0  ;;  %v2784_v54 = vperm.slane %v2775_v3, 0  ;;  %3564 = vst.msk [vmem:[#allocation3] sm:$0x1] %vm9756_vm9, %v3562_v13  ;;  %vm9768_vm9 = vmmov %vm9747_vm0 }
 0x323   :  { %v2785_v26 = vperm.slane %v2776_v32, 0  ;;  %v2786_v2 = vperm.slane %v2777_v27, 0  ;;  %v2787_v24 = vperm.slane %v2778_v20, 0  ;;  %v2788_v55 = vperm.slane %v2779_v0, 0  ;;  %v4208_v3 = vld [vmem:[%s8937_s0 + $0x450] sm:$0xff] }
 0x324   :  { %v2789_v46 = vperm.slane %v8457_v21, 0  ;;  %v2790_v62 = vperm.slane %v2780_v47, 0  ;;  %v8477_v5 = vadd.f32 %v4190_v50, %v2781_v59  ;;  %v8482_v16 = vadd.f32 %v4191_v56, %v2782_v11 }
 0x325   :  { %v8487_v39 = vadd.f32 %v4192_v1, %v2783_v23  ;;  %v8492_v48 = vadd.f32 %v4193_v37, %v2784_v54  ;;  %v8497_v4 = vadd.f32 %v4194_v63, %v2781_v59  ;;  %v8502_v52 = vadd.f32 %v4195_v40, %v2782_v11 }
 0x326   :  { %v8507_v45 = vadd.f32 %v4196_v60, %v2783_v23  ;;  %v8512_v31 = vadd.f32 %v4197_v29, %v2784_v54  ;;  %v8517_v33 = vadd.f32 %v4198_v10, %v2785_v26  ;;  %v8522_v30 = vadd.f32 %v4199_v9, %v2785_v26 }
 0x327   :  { %v8527_v36 = vadd.f32 %v4200_v35, %v2786_v2  ;;  %v8532_v28 = vadd.f32 %v4201_v57, %v2786_v2  ;;  %v8537_v25 = vadd.f32 %v4202_v19, %v2787_v24  ;;  %v8542_v15 = vadd.f32 %v4203_v51, %v2787_v24 }
 0x328   :  { %v8547_v34 = vadd.f32 %v4204_v17, %v2788_v55  ;;  %v8552_v49 = vadd.f32 %v4205_v12, %v2788_v55  ;;  %v2821_v58 = vsel %vm9757_vm2, %v8477_v5, -inf  ;;  %v2822_v42 = vsel %vm9758_vm8, %v8482_v16, -inf  ;;  %vm9769_vm2 = vmmov %vm9752_vm7 }
 0x329   :  { %v2823_v53 = vsel %vm9747_vm0, %v8487_v39, -inf  ;;  %v2825_v41 = vsel %vm9759_vm11, %v8492_v48, -inf  ;;  %v8565_v38 = vadd.f32 %v4206_v61, %v2789_v46  ;;  %v8570_v43 = vadd.f32 %v4207_v6, %v2789_v46  ;;  %vm9770_vm8 = vmmov %vm9769_vm2 }
 0x32a   :  { %v2824_v8 = vmax.f32 %v2821_v58, %v2823_v53  ;;  %v2826_v22 = vmax.f32 %v2822_v42, %v2825_v41  ;;  %v8575_v32 = vadd.f32 %v4208_v3, %v2790_v62  ;;  %v8580_v27 = vadd.f32 %v4209_v14, %v2790_v62  ;;  %vm9771_vm0 = vmmov %vm9769_vm2 }
 0x32b   :  { %v2827_v20 = vsel %vm9760_vm6, %v8517_v33, -inf  ;;  %v2829_v0 = vsel %vm9761_vm14, %v8527_v36, -inf  ;;  %v2831_v11 = vsel %vm9762_vm5, %v8537_v25, -inf  ;;  %v2841_v23 = vsel %vm9763_vm12, %v8502_v52, -inf  ;;  %vm9772_vm11 = vmmov %vm9771_vm0 }
 0x32c   :  { %v2828_v47 = vmax.f32 %v2824_v8, %v2827_v20  ;;  %v2830_v59 = vmax.f32 %v2826_v22, %v2829_v0  ;;  %v2833_v13 = vsel %vm9764_vm3, %v8547_v34, -inf  ;;  %v2840_v54 = vsel %vm9752_vm7, %v8497_v4, -inf  ;;  %vm9773_vm6 = vmmov %vm9771_vm0 }
 0x32d   :  { %v2842_v26 = vsel %vm9765_vm15, %v8507_v45, -inf  ;;  %v2844_v2 = vsel %vm9766_vm10, %v8512_v31, -inf  ;;  %v2835_v50 = vsel %vm9767_vm1, %v8565_v38, -inf  ;;  %v2837_v56 = vsel %vm9768_vm9, %v8575_v32, -inf  ;;  %vm9774_vm14 = vmmov %vm9771_vm0 }
 0x32e   :  { %v2832_v24 = vmax.f32 %v2828_v47, %v2831_v11  ;;  %v2834_v55 = vmax.f32 %v2830_v59, %v2833_v13  ;;  %v2843_v46 = vmax.f32 %v2840_v54, %v2842_v26  ;;  %v2845_v62 = vmax.f32 %v2841_v23, %v2844_v2  ;;  %vm9775_vm5 = vmmov %vm9767_vm1 }
 0x32f   :  { %v2846_v1 = vsel %vm9769_vm2, %v8522_v30, -inf  ;;  %v2848_v37 = vsel %vm9770_vm8, %v8532_v28, -inf  ;;  %v2850_v10 = vsel %vm9771_vm0, %v8542_v15, -inf  ;;  %v2852_v9 = vsel %vm9772_vm11, %v8552_v49, -inf  ;;  %vm9776_vm12 = vmmov %vm9767_vm1 }
 0x330   :  { %v2836_v63 = vmax.f32 %v2832_v24, %v2835_v50  ;;  %v2838_v40 = vmax.f32 %v2834_v55, %v2837_v56  ;;  %v2847_v60 = vmax.f32 %v2843_v46, %v2846_v1  ;;  %v2849_v29 = vmax.f32 %v2845_v62, %v2848_v37  ;;  %vm9777_vm3 = vmmov %vm9771_vm0 }
 0x331   :  { %v2854_v51 = vsel %vm9773_vm6, %v8570_v43, -inf  ;;  %v2856_v17 = vsel %vm9774_vm14, %v8580_v27, -inf  ;;  %vm9778_vm7 = vmmov %vm9771_vm0 }
 0x332   :  { %v8610_v35 = vmax.f32 %v2836_v63, %v2838_v40  ;;  %v2851_v57 = vmax.f32 %v2847_v60, %v2850_v10  ;;  %v2853_v19 = vmax.f32 %v2849_v29, %v2852_v9  ;;  %vm9779_vm15 = vmmov %vm9767_vm1 }
 0x333   :  { %vm9780_vm10 = vmmov %vm9771_vm0 }
 0x334   :  { %v2855_v12 = vmax.f32 %v2851_v57, %v2854_v51  ;;  %v2857_v58 = vmax.f32 %v2853_v19, %v2856_v17  ;;  %v2859_v42 = vsub.f32 %v8477_v5, %v8610_v35  ;;  %v2861_v53 = vsub.f32 %v8482_v16, %v8610_v35  ;;  %vm9781_vm9 = vmmov %vm9771_vm0 }
 0x335   :  { %v2863_v61 = vsub.f32 %v8487_v39, %v8610_v35  ;;  %v2865_v5 = vsub.f32 %v8492_v48, %v8610_v35  ;;  %v2867_v39 = vsub.f32 %v8517_v33, %v8610_v35  ;;  %v2871_v33 = vsub.f32 %v8537_v25, %v8610_v35  ;;  %vm9782_vm2 = vmmov %vm9767_vm1 }
 0x336   :  { %v8620_v41 = vmax.f32 %v2855_v12, %v2857_v58  ;;  %v2879_v6 = vmul.f32 1.442695, %v2859_v42  ;;  %v2883_v8 = vmul.f32 1.442695, %v2861_v53  ;;  %v2873_v23 = vsub.f32 %v8547_v34, %v8610_v35  ;;  %vm9783_vm8 = vmmov %vm9771_vm0 }
 0x337   :  { %v2887_v0 = vmul.f32 1.442695, %v2863_v61  ;;  %v2891_v48 = vmul.f32 1.442695, %v2865_v5  ;;  %v2895_v11 = vmul.f32 1.442695, %v2867_v39  ;;  %v2875_v54 = vsub.f32 %v8565_v38, %v8610_v35  ;;  %vm9784_vm0 = vmmov %vm9767_vm1 }
 0x338   :  { %v2860_v22 = vsub.f32 %v8497_v4, %v8620_v41  ;;  %v2862_v3 = vsub.f32 %v8502_v52, %v8620_v41  ;;  %v2864_v14 = vsub.f32 %v8507_v45, %v8620_v41  ;;  %v2866_v16 = vsub.f32 %v8512_v31, %v8620_v41  ;;  %vm9785_vm11 = vmmov %vm9777_vm3 }
 0x339   :  { %3999 = vpow2.f32 %v2879_v6  ;;  %v2868_v4 = vsub.f32 %v8522_v30, %v8620_v41  ;;  %v2869_v45 = vsub.f32 %v8527_v36, %v8610_v35  ;;  %v2870_v31 = vsub.f32 %v8532_v28, %v8620_v41  ;;  %vm9786_vm6 = vmmov %vm9784_vm0 }
 0x33a   :  { %v2881_v20 = vmul.f32 1.442695, %v2860_v22  ;;  %4001 = vpow2.f32 %v2883_v8  ;;  %v2885_v52 = vmul.f32 1.442695, %v2862_v3  ;;  %v2889_v47 = vmul.f32 1.442695, %v2864_v14  ;;  %vm9787_vm14 = vmmov %vm9777_vm3 }
 0x33b   :  { %v2893_v59 = vmul.f32 1.442695, %v2866_v16  ;;  %v2872_v30 = vsub.f32 %v8542_v15, %v8620_v41  ;;  %v2897_v36 = vmul.f32 1.442695, %v2868_v4  ;;  %v2877_v28 = vsub.f32 %v8575_v32, %v8610_v35 }
 0x33c   :  { %4003 = vpow2.f32 %v2881_v20  ;;  %v2899_v26 = vmul.f32 1.442695, %v2869_v45  ;;  %v2874_v2 = vsub.f32 %v8552_v49, %v8620_v41  ;;  %v2901_v15 = vmul.f32 1.442695, %v2870_v31 }
 0x33d   :  { %4005 = vpow2.f32 %v2885_v52  ;;  %v2876_v55 = vsub.f32 %v8570_v43, %v8620_v41  ;;  %v2903_v46 = vmul.f32 1.442695, %v2871_v33  ;;  %v2905_v32 = vmul.f32 1.442695, %v2872_v30 }
 0x33e   :  { %4007 = vpow2.f32 %v2887_v0  ;;  %v2878_v49 = vsub.f32 %v8580_v27, %v8620_v41  ;;  %v2907_v37 = vmul.f32 1.442695, %v2873_v23  ;;  %v2909_v43 = vmul.f32 1.442695, %v2874_v2 }
 0x33f   :  { %4009 = vpow2.f32 %v2889_v47  ;;  %v4000_v13 = vpop.eup %3999  ;;  %v2911_v9 = vmul.f32 1.442695, %v2875_v54  ;;  %v2913_v17 = vmul.f32 1.442695, %v2876_v55  ;;  %v2915_v42 = vmul.f32 1.442695, %v2877_v28 }
 0x340   :  { %4011 = vpow2.f32 %v2891_v48  ;;  %v4002_v25 = vpop.eup %4001  ;;  %v2919_v24 = vsel %vm9775_vm5, %v4000_v13, 0.0  ;;  %v2917_v8 = vmul.f32 1.442695, %v2878_v49  ;;  %vm9788_vm5 = vmmov %vm9784_vm0 }
 0x341   :  { %4013 = vpow2.f32 %v2893_v59  ;;  %v2920_v38 = vsel %vm9776_vm12, %v4002_v25, 0.0  ;;  %vm9789_vm12 = vmmov %vm9777_vm3 }
 0x342   :  { %v4004_v34 = vpop.eup %4003  ;;  %4015 = vpow2.f32 %v2895_v11  ;;  %v2921_v50 = vadd.f32 %v2920_v38, %v2919_v24 }
 0x343   :  { %v4006_v62 = vpop.eup %4005  ;;  %4017 = vpow2.f32 %v2897_v36  ;;  %v2938_v56 = vsel %vm9777_vm3, %v4004_v34, 0.0  ;;  %vm9790_vm3 = vmmov %vm9784_vm0 }
 0x344   :  { %v4008_v1 = vpop.eup %4007  ;;  %4019 = vpow2.f32 %v2899_v26  ;;  %v2939_v63 = vsel %vm9778_vm7, %v4006_v62, 0.0 }
 0x345   :  { %v4010_v40 = vpop.eup %4009  ;;  %4021 = vpow2.f32 %v2901_v15  ;;  %v2922_v60 = vsel %vm9779_vm15, %v4008_v1, 0.0  ;;  %v2940_v29 = vadd.f32 %v2939_v63, %v2938_v56  ;;  %vm9791_vm15 = vmmov %vm9784_vm0 }
 0x346   :  { %v4012_v10 = vpop.eup %4011  ;;  %4023 = vpow2.f32 %v2903_v46  ;;  %v2923_v57 = vadd.f32 %v2922_v60, %v2921_v50  ;;  %v2941_v19 = vsel %vm9780_vm10, %v4010_v40, 0.0  ;;  %vm9792_vm10 = vmmov %vm9778_vm7 }
 0x347   :  { %v4014_v51 = vpop.eup %4013  ;;  %4025 = vpow2.f32 %v2905_v32  ;;  %v2924_v27 = vsel %vm9767_vm1, %v4012_v10, 0.0  ;;  %v2942_v12 = vadd.f32 %v2941_v19, %v2940_v29  ;;  %vm9793_vm1 = vmmov %vm9784_vm0 }
 0x348   :  { %v4016_v58 = vpop.eup %4015  ;;  %4027 = vpow2.f32 %v2907_v37  ;;  %v2925_v53 = vadd.f32 %v2924_v27, %v2923_v57  ;;  %v2943_v61 = vsel %vm9781_vm9, %v4014_v51, 0.0  ;;  %vm9794_vm9 = vmmov %vm9778_vm7 }
 0x349   :  { %v4018_v6 = vpop.eup %4017  ;;  %4029 = vpow2.f32 %v2909_v43  ;;  %v2926_v22 = vsel %vm9782_vm2, %v4016_v58, 0.0  ;;  %v2944_v3 = vadd.f32 %v2943_v61, %v2942_v12  ;;  %vm9796_vm2 = vmmov %vm9784_vm0 }
 0x34a   :  { %v4020_v14 = vpop.eup %4019  ;;  %4031 = vpow2.f32 %v2911_v9  ;;  %v2927_v5 = vadd.f32 %v2926_v22, %v2925_v53  ;;  %v2945_v16 = vsel %vm9783_vm8, %v4018_v6, 0.0  ;;  %v4210_v22 = vld [vmem:[%s8937_s0 + $0x460] sm:$0xff]  ;;  %vm9797_vm8 = vmmov %vm9784_vm0 }
 0x34b   :  { %v4022_v39 = vpop.eup %4021  ;;  %4033 = vpow2.f32 %v2913_v17  ;;  %v2928_v20 = vsel %vm9784_vm0, %v4020_v14, 0.0  ;;  %v2946_v0 = vadd.f32 %v2945_v16, %v2944_v3  ;;  %v4211_v14 = vld [vmem:[%s8937_s0 + $0x470] sm:$0xff]  ;;  %v4212_v16 = vld [vmem:[%s8937_s0 + $0x468] sm:$0x3] }
 0x34c   :  { %v4024_v4 = vpop.eup %4023  ;;  %4035 = vpow2.f32 %v2915_v42  ;;  %v2929_v52 = vadd.f32 %v2928_v20, %v2927_v5  ;;  %v2947_v47 = vsel %vm9785_vm11, %v4022_v39, 0.0  ;;  %v4213_v20 = vld [vmem:[%s8937_s0 + $0x478] sm:$0x3]  ;;  %vm9798_vm11 = vmmov %vm9784_vm0 }
 0x34d   :  { %v4026_v45 = vpop.eup %4025  ;;  %4037 = vpow2.f32 %v2917_v8  ;;  %v2930_v48 = vsel %vm9786_vm6, %v4024_v4, 0.0  ;;  %v2948_v31 = vadd.f32 %v2947_v47, %v2946_v0  ;;  %v4214_v4 = vld [vmem:[%s8937_s0 + $0x480] sm:$0xff]  ;;  %v4215_v47 = vld [vmem:[%s8937_s0 + $0x490] sm:$0xff]  ;;  %vm9799_vm6 = vmmov %vm9784_vm0 }
 0x34e   :  { %v4028_v59 = vpop.eup %4027  ;;  %v2931_v33 = vadd.f32 %v2930_v48, %v2929_v52  ;;  %v2949_v11 = vsel %vm9787_vm14, %v4026_v45, 0.0  ;;  %v4216_v48 = vld [vmem:[%s8937_s0 + $0x488] sm:$0x3]  ;;  %vm9800_vm14 = vmmov %vm9778_vm7 }
 0x34f   :  { %v4030_v30 = vpop.eup %4029  ;;  %v2932_v23 = vsel %vm9788_vm5, %v4028_v59, 0.0  ;;  %v2950_v36 = vadd.f32 %v2949_v11, %v2948_v31  ;;  %v4217_v59 = vld [vmem:[%s8937_s0 + $0x498] sm:$0x3]  ;;  %v4218_v11 = vld [vmem:[%s8937_s0 + $0x4a0] sm:$0xff]  ;;  %vm9801_vm5 = vmmov %vm9778_vm7 }
 0x350   :  { %v4032_v13 = vpop.eup %4031  ;;  %v2933_v54 = vadd.f32 %v2932_v23, %v2931_v33  ;;  %v2951_v28 = vsel %vm9789_vm12, %v4030_v30, 0.0  ;;  %v4219_v23 = vld [vmem:[%s8937_s0 + $0x4a8] sm:$0x3]  ;;  %vm9802_vm12 = vmmov %vm9801_vm5 }
 0x351   :  { %v4034_v26 = vpop.eup %4033  ;;  %v2934_v25 = vsel %vm9790_vm3, %v4032_v13, 0.0  ;;  %v2952_v2 = vadd.f32 %v2951_v28, %v2950_v36  ;;  %v4220_v13 = vld [vmem:[%s8937_s0 + $0x4b0] sm:$0xff]  ;;  %v4221_v28 = vld [vmem:[%s8937_s0 + $0x4b8] sm:$0x3]  ;;  %vm9803_vm3 = vmmov %vm9801_vm5 }
 0x352   :  { %v4036_v15 = vpop.eup %4035  ;;  %v2935_v24 = vadd.f32 %v2934_v25, %v2933_v54  ;;  %v2953_v34 = vsel %vm9778_vm7, %v4034_v26, 0.0  ;;  %v4222_v25 = vld [vmem:[%s8937_s0 + $0x4c0] sm:$0xff]  ;;  %vm9804_vm7 = vmmov %vm9784_vm0 }
 0x353   :  { %v4038_v55 = vpop.eup %4037  ;;  %v2936_v46 = vsel %vm9791_vm15, %v4036_v15, 0.0  ;;  %v2954_v38 = vadd.f32 %v2953_v34, %v2952_v2  ;;  %v4223_v15 = vld [vmem:[%s8937_s0 + $0x4c8] sm:$0x3]  ;;  %v4224_v34 = vld [vmem:[%s8937_s0 + $0x4d0] sm:$0xff]  ;;  %vm9805_vm15 = vmmov %vm9784_vm0 }
 0x354   :  { %v2937_v62 = vadd.f32 %v2936_v46, %v2935_v24  ;;  %v2955_v32 = vsel %vm9792_vm10, %v4038_v55, 0.0  ;;  %v4225_v46 = vld [vmem:[%s8937_s0 + $0x4d8] sm:$0x3]  ;;  %vm9806_vm10 = vmmov %vm9803_vm3 }
 0x355   :  { %v2956_v50 = vadd.f32 %v2955_v32, %v2954_v38 }
 0x356   :  { %4039 = vlog2.f32 %v2937_v62  ;;  %v4226_v62 = vld [vmem:[%s8937_s0 + $0x4e0] sm:$0xff] }
 0x357   :  { %4041 = vlog2.f32 %v2956_v50 }
 0x35c   :  { %v4040_v56 = vpop.eup %4039 }
 0x35d   :  { %v4042_v1 = vpop.eup %4041  ;;  %v2958_v49 = vmul.f32 0.6931472, %v4040_v56  ;;  %v4227_v56 = vld [vmem:[%s8937_s0 + $0x4e8] sm:$0x3] }
 0x35e   :  { %v2960_v37 = vmul.f32 0.6931472, %v4042_v1 }
 0x35f   :  { %v2961_v63 = vadd.f32 %v2958_v49, %v8610_v35 }
 0x360   :  { %v2962_v40 = vadd.f32 %v2960_v37, %v8620_v41 }
 0x361   :  { %v2976_v43 = vsel %vm6995_vm4, %v2961_v63, %v8452_v18 }
 0x362   :  { %2978 = vst.msk [vmem:[%s8934_s4] sm:$0xff] %vm9793_vm1, %v2976_v43  ;;  %v2977_v60 = vsel %vm6995_vm4, %v2962_v40, %v8457_v21  ;;  %vm9795_vm4 = vmmov %vm9784_vm0  ;;  %v4228_v40 = vld [vmem:[%s8937_s0 + $0x4f0] sm:$0xff] }
 0x363   :  { %2979 = vst.msk [vmem:[%s8934_s4 + $0x8] sm:$0x3] %vm9794_vm9, %v2977_v60  ;;  %v4229_v60 = vld [vmem:[%s8937_s0 + $0x4f8] sm:$0x3]  ;;  %vm9807_vm1 = vmmov %vm9803_vm3 }
 0x364   :  { %vm9808_vm9 = vmmov %vm9784_vm0 }
 0x369   :  { %v8697_v35 = vld [vmem:[%s8934_s4] sm:$0xff] }
 0x36a   :  { %v8702_v18 = vld [vmem:[%s8934_s4 + $0x8] sm:$0x3]  ;;  %v3194_v41 = vrot.slane %v8697_v35, 1  ;;  %v3195_v44 = vrot.slane %v8697_v35, 2  ;;  %v3196_v21 = vrot.slane %v8697_v35, 3  ;;  %v3197_v29 = vrot.slane %v8697_v35, 4 }
 0x36b   :  { %v3198_v10 = vrot.slane %v8697_v35, 5  ;;  %v3199_v9 = vrot.slane %v8697_v35, 6  ;;  %v3200_v57 = vrot.slane %v8697_v35, 7  ;;  %v3201_v19 = vrot.slane %v8702_v18, 1 }
 0x36c   :  { %v3202_v51 = vperm.slane %v8697_v35, 0  ;;  %v3203_v17 = vperm.slane %v3194_v41, 0  ;;  %v3204_v27 = vperm.slane %v3195_v44, 0  ;;  %v3205_v12 = vperm.slane %v3196_v21, 0 }
 0x36d   :  { %v3206_v58 = vperm.slane %v3197_v29, 0  ;;  %v3207_v42 = vperm.slane %v3198_v10, 0  ;;  %v3208_v53 = vperm.slane %v3199_v9, 0  ;;  %v3209_v61 = vperm.slane %v3200_v57, 0 }
 0x36e   :  { %v3210_v6 = vperm.slane %v8702_v18, 0  ;;  %v3211_v8 = vperm.slane %v3201_v19, 0  ;;  %v8717_v3 = vadd.f32 %v4210_v22, %v3202_v51  ;;  %v8722_v5 = vadd.f32 %v4211_v14, %v3203_v17 }
 0x36f   :  { %v8727_v39 = vadd.f32 %v4212_v16, %v3202_v51  ;;  %v8732_v0 = vadd.f32 %v4213_v20, %v3203_v17  ;;  %v8737_v52 = vadd.f32 %v4214_v4, %v3204_v27  ;;  %v8742_v45 = vadd.f32 %v4215_v47, %v3205_v12 }
 0x370   :  { %v8747_v31 = vadd.f32 %v4216_v48, %v3204_v27  ;;  %v8752_v33 = vadd.f32 %v4217_v59, %v3205_v12  ;;  %v8757_v30 = vadd.f32 %v4218_v11, %v3206_v58  ;;  %v8762_v36 = vadd.f32 %v4219_v23, %v3206_v58 }
 0x371   :  { %v8767_v54 = vadd.f32 %v4220_v13, %v3207_v42  ;;  %v8772_v26 = vadd.f32 %v4221_v28, %v3207_v42  ;;  %v8777_v2 = vadd.f32 %v4222_v25, %v3208_v53  ;;  %v8782_v24 = vadd.f32 %v4223_v15, %v3208_v53 }
 0x372   :  { %v8787_v55 = vadd.f32 %v4224_v34, %v3209_v61  ;;  %v8792_v38 = vadd.f32 %v4225_v46, %v3209_v61  ;;  %v8797_v32 = vadd.f32 %v4226_v62, %v3210_v6  ;;  %v3243_v50 = vsel %vm9795_vm4, %v8722_v5, -inf  ;;  %vm9809_vm4 = vmmov %vm9784_vm0 }
 0x373   :  { %v8804_v1 = vadd.f32 %v4227_v56, %v3210_v6  ;;  %v3242_v49 = vsel %vm9796_vm2, %v8717_v3, -inf  ;;  %v3244_v37 = vsel %vm9797_vm8, %v8737_v52, -inf  ;;  %v3246_v63 = vsel %vm9784_vm0, %v8742_v45, -inf  ;;  %vm9810_vm2 = vmmov %vm9807_vm1 }
 0x374   :  { %v8815_v43 = vadd.f32 %v4228_v40, %v3211_v8  ;;  %v8820_v41 = vadd.f32 %v4229_v60, %v3211_v8  ;;  %v3245_v44 = vmax.f32 %v3242_v49, %v3244_v37  ;;  %v3247_v21 = vmax.f32 %v3243_v50, %v3246_v63  ;;  %vm9811_vm8 = vmmov %vm9807_vm1 }
 0x375   :  { %v3248_v29 = vsel %vm9798_vm11, %v8757_v30, -inf  ;;  %v3250_v10 = vsel %vm9799_vm6, %v8767_v54, -inf  ;;  %v3261_v9 = vsel %vm9800_vm14, %v8727_v39, -inf  ;;  %v3262_v57 = vsel %vm9801_vm5, %v8732_v0, -inf  ;;  %vm9812_vm0 = vmmov %vm9807_vm1 }
 0x376   :  { %v3249_v19 = vmax.f32 %v3245_v44, %v3248_v29  ;;  %v3251_v51 = vmax.f32 %v3247_v21, %v3250_v10  ;;  %v3263_v17 = vsel %vm9802_vm12, %v8747_v31, -inf  ;;  %v3265_v27 = vsel %vm9803_vm3, %v8752_v33, -inf  ;;  %vm9813_vm11 = vmmov %vm9812_vm0 }
 0x377   :  { %v3252_v12 = vsel %vm9804_vm7, %v8777_v2, -inf  ;;  %v3254_v58 = vsel %vm9805_vm15, %v8787_v55, -inf  ;;  %v3264_v42 = vmax.f32 %v3261_v9, %v3263_v17  ;;  %v3266_v53 = vmax.f32 %v3262_v57, %v3265_v27  ;;  %vm9814_vm6 = vmmov %vm9809_vm4 }
 0x378   :  { %v3253_v61 = vmax.f32 %v3249_v19, %v3252_v12  ;;  %v3255_v6 = vmax.f32 %v3251_v51, %v3254_v58  ;;  %v3267_v8 = vsel %vm9806_vm10, %v8762_v36, -inf  ;;  %v3269_v22 = vsel %vm9807_vm1, %v8772_v26, -inf  ;;  %vm9815_vm14 = vmmov %vm9812_vm0 }
 0x379   :  { %v3256_v14 = vsel %vm9808_vm9, %v8797_v32, -inf  ;;  %v3258_v16 = vsel %vm9809_vm4, %v8815_v43, -inf  ;;  %v3268_v20 = vmax.f32 %v3264_v42, %v3267_v8  ;;  %v3270_v4 = vmax.f32 %v3266_v53, %v3269_v22  ;;  %vm9816_vm5 = vmmov %vm9809_vm4 }
 0x37a   :  { %v3257_v47 = vmax.f32 %v3253_v61, %v3256_v14  ;;  %v3259_v48 = vmax.f32 %v3255_v6, %v3258_v16  ;;  %v3271_v59 = vsel %vm9810_vm2, %v8782_v24, -inf  ;;  %v3273_v11 = vsel %vm9811_vm8, %v8792_v38, -inf  ;;  %vm9817_vm12 = vmmov %vm9812_vm0 }
 0x37b   :  { %v3272_v23 = vmax.f32 %v3268_v20, %v3271_v59  ;;  %v3274_v13 = vmax.f32 %v3270_v4, %v3273_v11  ;;  %v3275_v25 = vsel %vm9812_vm0, %v8804_v1, -inf  ;;  %v3277_v15 = vsel %vm9813_vm11, %v8820_v41, -inf  ;;  %vm9818_vm3 = vmmov %vm9809_vm4 }
 0x37c   :  { %v8850_v28 = vmax.f32 %v3257_v47, %v3259_v48  ;;  %vm9819_vm7 = vmmov %vm9812_vm0 }
 0x37d   :  { %v3276_v34 = vmax.f32 %v3272_v23, %v3275_v25  ;;  %v3278_v46 = vmax.f32 %v3274_v13, %v3277_v15  ;;  %vm9820_vm15 = vmmov %vm9818_vm3 }
 0x37e   :  { %v3280_v62 = vsub.f32 %v8717_v3, %v8850_v28  ;;  %v3282_v56 = vsub.f32 %v8722_v5, %v8850_v28  ;;  %v3284_v49 = vsub.f32 %v8737_v52, %v8850_v28  ;;  %v3286_v3 = vsub.f32 %v8742_v45, %v8850_v28  ;;  %vm9821_vm10 = vmmov %vm9812_vm0 }
 0x37f   :  { %v8858_v50 = vmax.f32 %v3276_v34, %v3278_v46  ;;  %v3288_v52 = vsub.f32 %v8757_v30, %v8850_v28  ;;  %v3292_v30 = vsub.f32 %v8777_v2, %v8850_v28  ;;  %v3294_v51 = vsub.f32 %v8787_v55, %v8850_v28  ;;  %vm9822_vm1 = vmmov %vm9818_vm3 }
 0x380   :  { %v3300_v37 = vmul.f32 1.442695, %v3280_v62  ;;  %v3304_v21 = vmul.f32 1.442695, %v3282_v56  ;;  %v3312_v45 = vmul.f32 1.442695, %v3286_v3  ;;  %v3296_v17 = vsub.f32 %v8797_v32, %v8850_v28  ;;  %vm9823_vm9 = vmmov %vm9812_vm0 }
 0x381   :  { %v3281_v63 = vsub.f32 %v8727_v39, %v8858_v50  ;;  %v3283_v40 = vsub.f32 %v8732_v0, %v8858_v50  ;;  %v3285_v60 = vsub.f32 %v8747_v31, %v8858_v50  ;;  %v3287_v44 = vsub.f32 %v8752_v33, %v8858_v50  ;;  %vm9824_vm4 = vmmov %vm9822_vm1 }
 0x382   :  { %4043 = vpow2.f32 %v3300_v37  ;;  %v3308_v39 = vmul.f32 1.442695, %v3284_v49  ;;  %v3289_v0 = vsub.f32 %v8762_v36, %v8858_v50  ;;  %v3290_v31 = vsub.f32 %v8767_v54, %v8850_v28  ;;  %vm9825_vm2 = vmmov %vm9812_vm0 }
 0x383   :  { %v3302_v5 = vmul.f32 1.442695, %v3281_v63  ;;  %v3306_v29 = vmul.f32 1.442695, %v3283_v40  ;;  %v3310_v10 = vmul.f32 1.442695, %v3285_v60  ;;  %v3291_v33 = vsub.f32 %v8772_v26, %v8858_v50  ;;  %vm9826_vm8 = vmmov %vm9822_vm1 }
 0x384   :  { %v3314_v9 = vmul.f32 1.442695, %v3287_v44  ;;  %v3316_v57 = vmul.f32 1.442695, %v3288_v52  ;;  %v3293_v36 = vsub.f32 %v8782_v24, %v8858_v50  ;;  %v3318_v54 = vmul.f32 1.442695, %v3289_v0  ;;  %vm9827_vm11 = vmmov %vm9822_vm1 }
 0x385   :  { %4045 = vpow2.f32 %v3302_v5  ;;  %v3298_v26 = vsub.f32 %v8815_v43, %v8850_v28  ;;  %v3320_v27 = vmul.f32 1.442695, %v3290_v31  ;;  %v3295_v12 = vsub.f32 %v8792_v38, %v8858_v50 }
 0x386   :  { %4047 = vpow2.f32 %v3304_v21  ;;  %v3322_v58 = vmul.f32 1.442695, %v3291_v33  ;;  %v3297_v55 = vsub.f32 %v8804_v1, %v8858_v50  ;;  %v3324_v53 = vmul.f32 1.442695, %v3292_v30 }
 0x387   :  { %4049 = vpow2.f32 %v3306_v29  ;;  %v3299_v43 = vsub.f32 %v8820_v41, %v8858_v50  ;;  %v3326_v6 = vmul.f32 1.442695, %v3293_v36  ;;  %v3328_v22 = vmul.f32 1.442695, %v3294_v51 }
 0x388   :  { %4051 = vpow2.f32 %v3308_v39  ;;  %v4044_v19 = vpop.eup %4043  ;;  %v3330_v1 = vmul.f32 1.442695, %v3295_v12  ;;  %v3332_v59 = vmul.f32 1.442695, %v3296_v17  ;;  %v3334_v13 = vmul.f32 1.442695, %v3297_v55 }
 0x389   :  { %4053 = vpow2.f32 %v3310_v10  ;;  %v3340_v24 = vsel %vm9814_vm6, %v4044_v19, 0.0  ;;  %v3336_v46 = vmul.f32 1.442695, %v3298_v26  ;;  %v3338_v37 = vmul.f32 1.442695, %v3299_v43  ;;  %vm9828_vm6 = vmmov %vm9812_vm0 }
 0x38a   :  { %4055 = vpow2.f32 %v3312_v45 }
 0x38b   :  { %v4046_v2 = vpop.eup %4045  ;;  %4057 = vpow2.f32 %v3314_v9 }
 0x38c   :  { %v4048_v42 = vpop.eup %4047  ;;  %4059 = vpow2.f32 %v3316_v57  ;;  %v3359_v32 = vsel %vm9815_vm14, %v4046_v2, 0.0  ;;  %vm9829_vm14 = vmmov %vm9822_vm1 }
 0x38d   :  { %v4050_v61 = vpop.eup %4049  ;;  %4061 = vpow2.f32 %v3318_v54  ;;  %v3341_v38 = vsel %vm9816_vm5, %v4048_v42, 0.0  ;;  %vm9830_vm5 = vmmov %vm9812_vm0 }
 0x38e   :  { %v4052_v8 = vpop.eup %4051  ;;  %4063 = vpow2.f32 %v3320_v27  ;;  %v3342_v14 = vadd.f32 %v3341_v38, %v3340_v24  ;;  %v3360_v16 = vsel %vm9817_vm12, %v4050_v61, 0.0  ;;  %vm9831_vm12 = vmmov %vm9822_vm1 }
 0x38f   :  { %v4054_v20 = vpop.eup %4053  ;;  %4065 = vpow2.f32 %v3322_v58  ;;  %v3343_v4 = vsel %vm9818_vm3, %v4052_v8, 0.0  ;;  %v3361_v47 = vadd.f32 %v3360_v16, %v3359_v32  ;;  %vm9832_vm3 = vmmov %vm9812_vm0 }
 0x390   :  { %v4056_v48 = vpop.eup %4055  ;;  %4067 = vpow2.f32 %v3324_v53  ;;  %v3344_v41 = vadd.f32 %v3343_v4, %v3342_v14  ;;  %v3362_v11 = vsel %vm9819_vm7, %v4054_v20, 0.0  ;;  %vm9833_vm7 = vmmov %vm9822_vm1 }
 0x391   :  { %v4058_v23 = vpop.eup %4057  ;;  %4069 = vpow2.f32 %v3326_v6  ;;  %v3345_v25 = vsel %vm9820_vm15, %v4056_v48, 0.0  ;;  %v3363_v15 = vadd.f32 %v3362_v11, %v3361_v47  ;;  %vm9834_vm15 = vmmov %vm9812_vm0 }
 0x392   :  { %v4060_v34 = vpop.eup %4059  ;;  %4071 = vpow2.f32 %v3328_v22  ;;  %v3346_v62 = vadd.f32 %v3345_v25, %v3344_v41  ;;  %v3364_v56 = vsel %vm9821_vm10, %v4058_v23, 0.0 }
 0x393   :  { %v4062_v49 = vpop.eup %4061  ;;  %4073 = vpow2.f32 %v3330_v1  ;;  %v3347_v63 = vsel %vm9822_vm1, %v4060_v34, 0.0  ;;  %v3365_v40 = vadd.f32 %v3364_v56, %v3363_v15 }
 0x394   :  { %v4064_v60 = vpop.eup %4063  ;;  %4075 = vpow2.f32 %v3332_v59  ;;  %v3348_v3 = vadd.f32 %v3347_v63, %v3346_v62  ;;  %v3366_v44 = vsel %vm9823_vm9, %v4062_v49, 0.0 }
 0x395   :  { %v4066_v5 = vpop.eup %4065  ;;  %4077 = vpow2.f32 %v3334_v13  ;;  %v3349_v52 = vsel %vm9824_vm4, %v4064_v60, 0.0  ;;  %v3367_v21 = vadd.f32 %v3366_v44, %v3365_v40 }
 0x396   :  { %v4068_v29 = vpop.eup %4067  ;;  %4079 = vpow2.f32 %v3336_v46  ;;  %v3350_v39 = vadd.f32 %v3349_v52, %v3348_v3  ;;  %v3368_v0 = vsel %vm9825_vm2, %v4066_v5, 0.0 }
 0x397   :  { %v4070_v10 = vpop.eup %4069  ;;  %4081 = vpow2.f32 %v3338_v37  ;;  %v3351_v31 = vsel %vm9826_vm8, %v4068_v29, 0.0  ;;  %v3369_v45 = vadd.f32 %v3368_v0, %v3367_v21 }
 0x398   :  { %v4072_v33 = vpop.eup %4071  ;;  %v3352_v9 = vadd.f32 %v3351_v31, %v3350_v39  ;;  %v3370_v30 = vsel %vm9812_vm0, %v4070_v10, 0.0 }
 0x399   :  { %v4074_v57 = vpop.eup %4073  ;;  %v3353_v19 = vsel %vm9827_vm11, %v4072_v33, 0.0  ;;  %v3371_v36 = vadd.f32 %v3370_v30, %v3369_v45 }
 0x39a   :  { %v4076_v51 = vpop.eup %4075  ;;  %v3354_v54 = vadd.f32 %v3353_v19, %v3352_v9  ;;  %v3372_v17 = vsel %vm9828_vm6, %v4074_v57, 0.0 }
 0x39b   :  { %v4078_v26 = vpop.eup %4077  ;;  %v3355_v27 = vsel %vm9829_vm14, %v4076_v51, 0.0  ;;  %v3373_v2 = vadd.f32 %v3372_v17, %v3371_v36 }
 0x39c   :  { %v4080_v12 = vpop.eup %4079  ;;  %v3356_v58 = vadd.f32 %v3355_v27, %v3354_v54  ;;  %v3374_v24 = vsel %vm9830_vm5, %v4078_v26, 0.0 }
 0x39d   :  { %v4082_v42 = vpop.eup %4081  ;;  %v3357_v55 = vsel %vm9831_vm12, %v4080_v12, 0.0  ;;  %v3375_v53 = vadd.f32 %v3374_v24, %v3373_v2 }
 0x39e   :  { %v3358_v32 = vadd.f32 %v3357_v55, %v3356_v58  ;;  %v3376_v61 = vsel %vm9832_vm3, %v4082_v42, 0.0 }
 0x39f   :  { %v3377_v43 = vadd.f32 %v3376_v61, %v3375_v53 }
 0x3a0   :  { %4083 = vlog2.f32 %v3358_v32 }
 0x3a1   :  { %4085 = vlog2.f32 %v3377_v43 }
 0x3a6   :  { %v4084_v6 = vpop.eup %4083 }
 0x3a7   :  { %v4086_v38 = vpop.eup %4085  ;;  %v3379_v8 = vmul.f32 0.6931472, %v4084_v6 }
 0x3a8   :  { %v3381_v22 = vmul.f32 0.6931472, %v4086_v38 }
 0x3a9   :  { %v3382_v14 = vadd.f32 %v3379_v8, %v8850_v28 }
 0x3aa   :  { %v3383_v16 = vadd.f32 %v3381_v22, %v8858_v50 }
 0x3ab   :  { %v3397_v20 = vsel %vm7507_vm13, %v3382_v14, %v8697_v35 }
 0x3ac   :  { %3399 = vst.msk [vmem:[%s8934_s4] sm:$0xff] %vm9833_vm7, %v3397_v20  ;;  %v3398_v1 = vsel %vm7507_vm13, %v3383_v16, %v8702_v18 }
 0x3ad   :  { %3400 = vst.msk [vmem:[%s8934_s4 + $0x8] sm:$0x3] %vm9834_vm15, %v3398_v1 }

</bundles_post_ra>
